<compile_context>
chip_gen: v5e
topology: v5e:2x2
jax: 0.10.0
libtpu: 0.0.40
codegen_flags: <defaults>
</compile_context>

<pallas_src>
import functools
import math

import jax
import jax.numpy as jnp
from jax.experimental import pallas as pl
from jax.experimental.pallas import tpu as pltpu

EPS = 1e-5
KT = 9        # temporal kernel size
PAD = 4       # temporal padding
ACT_DTYPE = jnp.bfloat16   # HBM activations / weights (f32 accumulation in-kernel)


# --------------------------------------------------------------------- Pallas kernels
def _gcn_kernel(x_ref, b_ref, w_ref, shift_ref, o_ref):
    """Fused: joint mixing (x @ kron(I_T, A)) -> 1x1 conv -> BN shift -> ReLU.

    x_ref    : (1, Cin, L)   one sample's (tile_T * V)-lane slab
    b_ref    : (L, L)        kron(I_tile_T, A) joint-mixing operator
    w_ref    : (Cout, Cin)   BN-scale-folded 1x1 conv weight
    shift_ref: (Cout, 1)     folded BN shift (f32)
    o_ref    : (1, Cout, L)
    """
    x = x_ref[0]
    xa = jnp.dot(x, b_ref[...], preferred_element_type=jnp.float32)      # A-mix
    g = jnp.dot(w_ref[...], xa.astype(w_ref.dtype),
                preferred_element_type=jnp.float32)                      # 1x1 conv
    g = jnp.maximum(g + shift_ref[...], 0.0)                             # BN + ReLU
    o_ref[0] = g.astype(o_ref.dtype)


def _tcn_kernel(*refs, stride, res_mode, relu, out_mean, v, t_out):
    """Fused temporal conv (KT taps accumulated in VMEM, no im2col) + BN shift
    + residual (none / identity / fused 1x1-conv+BN) + optional ReLU
    + optional channel-mean head (final layer)."""
    it = iter(refs)
    if stride == 1:
        slabs = (next(it)[0],)                     # (Cout, Tpad*V)
    else:
        slabs = (next(it)[0], next(it)[0])         # even / odd time phases
    wt_ref = next(it)                              # (KT, Cout, Cout)
    tshift_ref = next(it)                          # (Cout, 1) f32
    if res_mode == "conv":
        xr_ref, wr_ref, rshift_ref = next(it), next(it), next(it)
    elif res_mode == "identity":
        xr_ref = next(it)
    o_ref = next(it)

    cout = wt_ref.shape[1]
    width = t_out * v
    acc = jnp.zeros((cout, width), jnp.float32)
    for k in range(KT):                            # statically unrolled (KT = 9)
        if stride == 1:
            src, off = slabs[0], k * v
        else:
            src, off = slabs[k % 2], (k // 2) * v
        acc = acc + jnp.dot(wt_ref[k], src[:, off:off + width],
                            preferred_element_type=jnp.float32)
    out = acc + tshift_ref[...]
    if res_mode == "conv":
        out = out + jnp.dot(wr_ref[...], xr_ref[0],
                            preferred_element_type=jnp.float32) + rshift_ref[...]
    elif res_mode == "identity":
        out = out + xr_ref[0].astype(jnp.float32)
    if relu:
        out = jnp.maximum(out, 0.0)
    if out_mean:
        o_ref[0] = jnp.mean(out, axis=0, keepdims=True).astype(o_ref.dtype)
    else:
        o_ref[0] = out.astype(o_ref.dtype)


# --------------------------------------------------------------------------- wrappers
def _choose_tile_t(t, v, max_lanes=1024):
    """Largest time-tile whose lane width fits the budget; when T is split, tiles
    must be 128-lane aligned so stores stay unmasked and kron(I, A) stays small."""
    if t * v <= max_lanes:
        return t
    for tt in range(t - 1, 0, -1):
        if t % tt == 0 and tt * v <= max_lanes and (tt * v) % 128 == 0:
            return tt
    return t   # TODO(synk): large-V fallback keeps full T in one block.


def gcn_fused(x, bmat, w_s, shift, *, tile_t, v):
    """x: (N, Cin, T*V) -> (N, Cout, T*V)."""
    n, cin, L = x.shape
    t = L // v
    cout = w_s.shape[0]
    ltile = tile_t * v
    return pl.pallas_call(
        _gcn_kernel,
        out_shape=jax.ShapeDtypeStruct((n, cout, L), ACT_DTYPE),
        grid=(n, t // tile_t),
        in_specs=[
            pl.BlockSpec((1, cin, ltile), lambda i, j: (i, 0, j)),
            pl.BlockSpec((ltile, ltile), lambda i, j: (0, 0)),
            pl.BlockSpec((cout, cin), lambda i, j: (0, 0)),
            pl.BlockSpec((cout, 1), lambda i, j: (0, 0)),
        ],
        out_specs=pl.BlockSpec((1, cout, ltile), lambda i, j: (i, 0, j)),
        compiler_params=pltpu.CompilerParams(
            dimension_semantics=("parallel", "parallel")),
    )(x, bmat, w_s, shift)


def tcn_fused(g, wt_s, tshift, *, stride, v, t_in, res_mode="none", xres=None,
              wres_s=None, rshift=None, relu=True, out_mean=False):
    """g: (N, Cout, T_in*V) -> (N, Cout, T_out*V)   (or (N, 1, T_out*V) if out_mean)."""
    n, cout, _ = g.shape
    t_out = (t_in + 2 * PAD - KT) // stride + 1

    g_pad = jnp.pad(g.reshape(n, cout, t_in, v),
                    ((0, 0), (0, 0), (PAD, PAD), (0, 0)))
    t_pad = t_in + 2 * PAD

    in_arrays, in_specs = [], []
    if stride == 1:
        in_arrays.append(g_pad.reshape(n, cout, t_pad * v))
        in_specs.append(pl.BlockSpec((1, cout, t_pad * v), lambda i: (i, 0, 0)))
    else:
        assert stride == 2
        if t_pad % 2:
            g_pad = jnp.pad(g_pad, ((0, 0), (0, 0), (0, 1), (0, 0)))
            t_pad += 1
        th = t_pad // 2
        in_arrays += [g_pad[:, :, 0::2, :].reshape(n, cout, th * v),
                      g_pad[:, :, 1::2, :].reshape(n, cout, th * v)]
        in_specs += [pl.BlockSpec((1, cout, th * v), lambda i: (i, 0, 0))] * 2

    in_arrays += [wt_s, tshift]
    in_specs += [pl.BlockSpec((KT, cout, cout), lambda i: (0, 0, 0)),
                 pl.BlockSpec((cout, 1), lambda i: (0, 0))]

    if res_mode == "conv":
        cin_r = xres.shape[1]
        in_arrays += [xres, wres_s, rshift]
        in_specs += [pl.BlockSpec((1, cin_r, t_out * v), lambda i: (i, 0, 0)),
                     pl.BlockSpec((cout, cin_r), lambda i: (0, 0)),
                     pl.BlockSpec((cout, 1), lambda i: (0, 0))]
    elif res_mode == "identity":
        in_arrays.append(xres)
        in_specs.append(pl.BlockSpec((1, cout, t_out * v), lambda i: (i, 0, 0)))

    if out_mean:
        out_shape = jax.ShapeDtypeStruct((n, 1, t_out * v), jnp.float32)
        out_spec = pl.BlockSpec((1, 1, t_out * v), lambda i: (i, 0, 0))
    else:
        out_shape = jax.ShapeDtypeStruct((n, cout, t_out * v), ACT_DTYPE)
        out_spec = pl.BlockSpec((1, cout, t_out * v), lambda i: (i, 0, 0))

    kernel = functools.partial(_tcn_kernel, stride=stride, res_mode=res_mode,
                               relu=relu, out_mean=out_mean, v=v, t_out=t_out)
    return pl.pallas_call(
        kernel,
        out_shape=out_shape,
        grid=(n,),
        in_specs=in_specs,
        out_specs=out_spec,
        compiler_params=pltpu.CompilerParams(dimension_semantics=("parallel",)),
    )(*in_arrays)


# ------------------------------------------------------------------------- layer glue
def fold_bn(gamma, beta, bias):
    # eval-mode BN (running mean=0, var=1) applied after a conv with `bias`.
    scale = gamma / jnp.sqrt(1.0 + EPS)
    shift = beta + scale * bias
    return scale, shift


def gcn_tcn_unit(x, p, *, stride, residual, activate, out_mean=False):
    """x: (N, Cin, T*V) bf16 -> (N, Cout, T_out*V) bf16 (or channel-mean head)."""
    n, cin, L = x.shape
    v = p["A"].shape[0]
    t = L // v
    cout = p["W_gcn"].shape[0]

    # Host-side BN folding: fold the scale into the conv weights, keep only the shift.
    g_scale, g_shift = fold_bn(p["gamma_gcn"], p["beta_gcn"], p["b_gcn"])
    wg_s = (g_scale[:, None] * p["W_gcn"]).astype(ACT_DTYPE)
    t_scale, t_shift = fold_bn(p["gamma_tcn"], p["beta_tcn"], p["b_tcn"])
    wt_s = (t_scale[:, None, None] * p["W_tcn"]).transpose(2, 0, 1).astype(ACT_DTYPE)

    tile_t = _choose_tile_t(t, v)
    # NOTE: A is applied as x @ A (sum_j x[..., j] * A[j, w]) — same convention as
    # the reference implementation.
    bmat = jnp.kron(jnp.eye(tile_t, dtype=jnp.float32), p["A"]).astype(ACT_DTYPE)

    g = gcn_fused(x, bmat, wg_s, g_shift.reshape(cout, 1).astype(jnp.float32),
                  tile_t=tile_t, v=v)

    res_mode, xres, wr_s, rshift = "none", None, None, None
    if residual:
        if cin == cout and stride == 1:
            res_mode, xres = "identity", x
        else:
            r_scale, r_shift = fold_bn(p["gamma_res"], p["beta_res"], p["b_res"])
            wr_s = (r_scale[:, None] * p["W_res"]).astype(ACT_DTYPE)
            rshift = r_shift.reshape(cout, 1).astype(jnp.float32)
            if stride == 1:
                xres = x
            else:
                # TODO(synk): the stride-2 subsample is a small XLA copy; it could be
                # folded into the kernel with an extra phase input if it ever matters.
                xres = x.reshape(n, cin, t, v)[:, :, ::stride, :].reshape(n, cin, -1)
            res_mode = "conv"

    return tcn_fused(g, wt_s, t_shift.reshape(cout, 1).astype(jnp.float32),
                     stride=stride, v=v, t_in=t, res_mode=res_mode, xres=xres,
                     wres_s=wr_s, rshift=rshift, relu=activate, out_mean=out_mean)


def st_dis_forward(x_nctv, params):
    n, c, t, v = x_nctv.shape
    x = x_nctv.reshape(n, c, t * v).astype(ACT_DTYPE)        # lane-dense layout, once
    x = gcn_tcn_unit(x, params["l1"], stride=1, residual=False, activate=True)
    x = gcn_tcn_unit(x, params["l2"], stride=2, residual=True, activate=True)
    x = gcn_tcn_unit(x, params["l3"], stride=2, residual=True, activate=True)
    m = gcn_tcn_unit(x, params["l4"], stride=1, residual=False, activate=False,
                     out_mean=True)                          # (N, 1, T4*V) f32
    return m.reshape(n, m.shape[-1] // v, v)                 # x.mean(1) -> (N, T4, V)


# ----------------------------------------------------------------------------- params
def make_adjacency(V):
    idx = jnp.arange(V)
    ring = ((idx[:, None] == (idx[None, :] + 1) % V) |
            (idx[:, None] == (idx[None, :] - 1) % V)).astype(jnp.float32)
    A = jnp.eye(V, dtype=jnp.float32) + ring
    dinv = 1.0 / jnp.sqrt(A.sum(axis=1))
    return A * dinv[:, None] * dinv[None, :]


def init_unit_params(key, cin, cout, V, stride, residual):
    ks = jax.random.split(key, 12)

    def rn(k, shape, scale):
        return (scale * jax.random.normal(k, shape)).astype(jnp.float32)

    p = {
        "A": (make_adjacency(V) + 0.01 * rn(ks[0], (V, V), 1.0)).astype(jnp.float32),
        "W_gcn": rn(ks[1], (cout, cin), 1.0 / math.sqrt(cin)),
        "b_gcn": rn(ks[2], (cout,), 0.01),
        "gamma_gcn": 1.0 + rn(ks[3], (cout,), 0.1),
        "beta_gcn": rn(ks[4], (cout,), 0.1),
        "W_tcn": rn(ks[5], (cout, cout, KT), 1.0 / math.sqrt(cout * KT)),
        "b_tcn": rn(ks[6], (cout,), 0.01),
        "gamma_tcn": 1.0 + rn(ks[7], (cout,), 0.1),
        "beta_tcn": rn(ks[8], (cout,), 0.1),
    }
    if residual and not (cin == cout and stride == 1):
        p.update({
            "W_res": rn(ks[9], (cout, cin), 1.0 / math.sqrt(cin)),
            "b_res": rn(ks[10], (cout,), 0.01),
            "gamma_res": 1.0 + rn(ks[11], (cout,), 0.1),
            "beta_res": jnp.zeros((cout,), jnp.float32),
        })
    return p


def init_st_dis_params(key, in_channels, joint_num):
    k1, k2, k3, k4 = jax.random.split(key, 4)
    return {
        "l1": init_unit_params(k1, in_channels, 64, joint_num, stride=1, residual=False),
        "l2": init_unit_params(k2, 64, 64, joint_num, stride=2, residual=True),
        "l3": init_unit_params(k3, 64, 128, joint_num, stride=2, residual=True),
        "l4": init_unit_params(k4, 128, 128, joint_num, stride=1, residual=False),
    }


# ------------------------------------------------------------------------------- main
if __name__ == "__main__":
    key = jax.random.PRNGKey(0)
    N, C_in, T, V = 2, 3, 16, 8      # small skeleton: 3 coord channels, 16 frames, 8 joints
    x = jax.random.normal(jax.random.fold_in(key, 100), (N, C_in, T, V), dtype=jnp.float32)

    params = init_st_dis_params(key, C_in, V)
    fwd = jax.jit(st_dis_forward)
    out = jax.block_until_ready(fwd(x, params))

    assert out.shape == (N, T // 4, V), out.shape
    assert jnp.all(jnp.isfinite(out))
    print("KERNEL_OK")
</pallas_src>

<mosaic_0001>
module attributes {stable_mosaic.version = 11 : i64} {
  func.func @_gcn_kernel(%arg0: i32, %arg1: i32, %arg2: memref<1x3x128xbf16, #tpu.memory_space<vmem>>, %arg3: memref<128x128xbf16, #tpu.memory_space<vmem>>, %arg4: memref<64x3xbf16, #tpu.memory_space<vmem>>, %arg5: memref<64x1xf32, #tpu.memory_space<vmem>>, %arg6: memref<1x64x128xbf16, #tpu.memory_space<vmem>>) attributes {dimension_semantics = [#tpu.dimension_semantics<parallel>, #tpu.dimension_semantics<parallel>], iteration_bounds = array<i64: 2, 1>, scalar_prefetch = 0 : i64, scratch_operands = 0 : i64, tpu.core_type = #tpu.core_type<tc>, window_params = [{transform_indices = @transform_0, window_bounds = array<i64: 1, 3, 128>}, {pipeline_mode = #tpu.pipeline_mode<synchronous>, transform_indices = @transform_1, window_bounds = array<i64: 128, 128>}, {pipeline_mode = #tpu.pipeline_mode<synchronous>, transform_indices = @transform_2, window_bounds = array<i64: 64, 3>}, {pipeline_mode = #tpu.pipeline_mode<synchronous>, transform_indices = @transform_3, window_bounds = array<i64: 64, 1>}, {transform_indices = @transform_4, window_bounds = array<i64: 1, 64, 128>}]} {
    %c0 = arith.constant 0 : index
    %c0_0 = arith.constant 0 : index
    %c0_1 = arith.constant 0 : index
    %0 = vector.load %arg2[%c0, %c0_0, %c0_1] : memref<1x3x128xbf16, #tpu.memory_space<vmem>>, vector<1x3x128xbf16>
    %1 = vector.shape_cast %0 : vector<1x3x128xbf16> to vector<3x128xbf16>
    %c0_2 = arith.constant 0 : index
    %c0_3 = arith.constant 0 : index
    %2 = vector.load %arg3[%c0_2, %c0_3] : memref<128x128xbf16, #tpu.memory_space<vmem>>, vector<128x128xbf16>
    %cst = arith.constant dense<0.000000e+00> : vector<3x128xf32>
    %3 = tpu.matmul %1, %2, %cst {dimension_numbers = #tpu.dot_dimension_numbers<[1], [0], [0], [1], [0, 0, 1, 1], [], []>} : vector<3x128xbf16>, vector<128x128xbf16>, vector<3x128xf32> -> vector<3x128xf32>
    %c0_4 = arith.constant 0 : index
    %c0_5 = arith.constant 0 : index
    %4 = vector.load %arg4[%c0_4, %c0_5] : memref<64x3xbf16, #tpu.memory_space<vmem>>, vector<64x3xbf16>
    %5 = arith.truncf %3 : vector<3x128xf32> to vector<3x128xbf16>
    %cst_6 = arith.constant dense<0.000000e+00> : vector<64x128xf32>
    %6 = tpu.matmul %4, %5, %cst_6 {dimension_numbers = #tpu.dot_dimension_numbers<[1], [0], [0], [1], [0, 0, 1, 1], [], []>} : vector<64x3xbf16>, vector<3x128xbf16>, vector<64x128xf32> -> vector<64x128xf32>
    %c0_7 = arith.constant 0 : index
    %c0_8 = arith.constant 0 : index
    %7 = vector.load %arg5[%c0_7, %c0_8] : memref<64x1xf32, #tpu.memory_space<vmem>>, vector<64x1xf32>
    %8 = vector.broadcast %7 : vector<64x1xf32> to vector<64x128xf32>
    %9 = arith.addf %6, %8 : vector<64x128xf32>
    %cst_9 = arith.constant 0.000000e+00 : f32
    %10 = vector.broadcast %cst_9 : f32 to vector<64x128xf32>
    %11 = arith.maximumf %9, %10 : vector<64x128xf32>
    %12 = arith.truncf %11 : vector<64x128xf32> to vector<64x128xbf16>
    %c0_10 = arith.constant 0 : index
    %c0_11 = arith.constant 0 : index
    %c0_12 = arith.constant 0 : index
    %13 = vector.load %arg6[%c0_10, %c0_11, %c0_12] : memref<1x64x128xbf16, #tpu.memory_space<vmem>>, vector<1x64x128xbf16>
    %14 = vector.shape_cast %13 : vector<1x64x128xbf16> to vector<64x128xbf16>
    %15 = vector.shape_cast %12 : vector<64x128xbf16> to vector<1x64x128xbf16>
    tpu.vector_store %arg6[%c0_10, %c0_11, %c0_12], %15 {strides = array<i32>} : memref<1x64x128xbf16, #tpu.memory_space<vmem>>, vector<1x64x128xbf16>,
    return
  }
  func.func @transform_0(%arg0: i32, %arg1: i32) -> (i32, i32, i32) {
    %c0_i32 = arith.constant 0 : i32
    %c0_i32_0 = arith.constant 0 : i32
    return %arg0, %c0_i32, %arg1 : i32, i32, i32
  }
  func.func @transform_1(%arg0: i32, %arg1: i32) -> (i32, i32) {
    %c0_i32 = arith.constant 0 : i32
    %c0_i32_0 = arith.constant 0 : i32
    %c0_i32_1 = arith.constant 0 : i32
    return %c0_i32, %c0_i32_0 : i32, i32
  }
  func.func @transform_2(%arg0: i32, %arg1: i32) -> (i32, i32) {
    %c0_i32 = arith.constant 0 : i32
    %c0_i32_0 = arith.constant 0 : i32
    %c0_i32_1 = arith.constant 0 : i32
    return %c0_i32, %c0_i32_0 : i32, i32
  }
  func.func @transform_3(%arg0: i32, %arg1: i32) -> (i32, i32) {
    %c0_i32 = arith.constant 0 : i32
    %c0_i32_0 = arith.constant 0 : i32
    %c0_i32_1 = arith.constant 0 : i32
    return %c0_i32, %c0_i32_0 : i32, i32
  }
  func.func @transform_4(%arg0: i32, %arg1: i32) -> (i32, i32, i32) {
    %c0_i32 = arith.constant 0 : i32
    %c0_i32_0 = arith.constant 0 : i32
    return %arg0, %c0_i32, %arg1 : i32, i32, i32
  }
}

module attributes {stable_mosaic.version = 11 : i64} {
  func.func @_tcn_kernel(%arg0: i32, %arg1: memref<1x64x192xbf16, #tpu.memory_space<vmem>>, %arg2: memref<9x64x64xbf16, #tpu.memory_space<vmem>>, %arg3: memref<64x1xf32, #tpu.memory_space<vmem>>, %arg4: memref<1x64x128xbf16, #tpu.memory_space<vmem>>) attributes {dimension_semantics = [#tpu.dimension_semantics<parallel>], iteration_bounds = array<i64: 2>, scalar_prefetch = 0 : i64, scratch_operands = 0 : i64, tpu.core_type = #tpu.core_type<tc>, window_params = [{transform_indices = @transform_0, window_bounds = array<i64: 1, 64, 192>}, {pipeline_mode = #tpu.pipeline_mode<synchronous>, transform_indices = @transform_1, window_bounds = array<i64: 9, 64, 64>}, {pipeline_mode = #tpu.pipeline_mode<synchronous>, transform_indices = @transform_2, window_bounds = array<i64: 64, 1>}, {transform_indices = @transform_3, window_bounds = array<i64: 1, 64, 128>}]} {
    %c0 = arith.constant 0 : index
    %c0_0 = arith.constant 0 : index
    %c0_1 = arith.constant 0 : index
    %0 = vector.load %arg1[%c0, %c0_0, %c0_1] : memref<1x64x192xbf16, #tpu.memory_space<vmem>>, vector<1x64x192xbf16>
    %1 = vector.shape_cast %0 : vector<1x64x192xbf16> to vector<64x192xbf16>
    %cst = arith.constant 0.000000e+00 : f32
    %2 = vector.broadcast %cst : f32 to vector<64x128xf32>
    %c0_2 = arith.constant 0 : index
    %c0_3 = arith.constant 0 : index
    %c0_4 = arith.constant 0 : index
    %3 = vector.load %arg2[%c0_2, %c0_3, %c0_4] : memref<9x64x64xbf16, #tpu.memory_space<vmem>>, vector<1x64x64xbf16>
    %4 = vector.shape_cast %3 : vector<1x64x64xbf16> to vector<64x64xbf16>
    %5 = vector.extract_strided_slice %1 {offsets = [0, 0], sizes = [64, 128], strides = [1, 1]} : vector<64x192xbf16> to vector<64x128xbf16>
    %cst_5 = arith.constant dense<0.000000e+00> : vector<64x128xf32>
    %6 = tpu.matmul %4, %5, %cst_5 {dimension_numbers = #tpu.dot_dimension_numbers<[1], [0], [0], [1], [0, 0, 1, 1], [], []>} : vector<64x64xbf16>, vector<64x128xbf16>, vector<64x128xf32> -> vector<64x128xf32>
    %7 = arith.addf %2, %6 : vector<64x128xf32>
    %c1 = arith.constant 1 : index
    %c0_6 = arith.constant 0 : index
    %c0_7 = arith.constant 0 : index
    %8 = vector.load %arg2[%c1, %c0_6, %c0_7] : memref<9x64x64xbf16, #tpu.memory_space<vmem>>, vector<1x64x64xbf16>
    %9 = vector.shape_cast %8 : vector<1x64x64xbf16> to vector<64x64xbf16>
    %10 = vector.extract_strided_slice %1 {offsets = [0, 8], sizes = [64, 128], strides = [1, 1]} : vector<64x192xbf16> to vector<64x128xbf16>
    %cst_8 = arith.constant dense<0.000000e+00> : vector<64x128xf32>
    %11 = tpu.matmul %9, %10, %cst_8 {dimension_numbers = #tpu.dot_dimension_numbers<[1], [0], [0], [1], [0, 0, 1, 1], [], []>} : vector<64x64xbf16>, vector<64x128xbf16>, vector<64x128xf32> -> vector<64x128xf32>
    %12 = arith.addf %7, %11 : vector<64x128xf32>
    %c2 = arith.constant 2 : index
    %c0_9 = arith.constant 0 : index
    %c0_10 = arith.constant 0 : index
    %13 = vector.load %arg2[%c2, %c0_9, %c0_10] : memref<9x64x64xbf16, #tpu.memory_space<vmem>>, vector<1x64x64xbf16>
    %14 = vector.shape_cast %13 : vector<1x64x64xbf16> to vector<64x64xbf16>
    %15 = vector.extract_strided_slice %1 {offsets = [0, 16], sizes = [64, 128], strides = [1, 1]} : vector<64x192xbf16> to vector<64x128xbf16>
    %cst_11 = arith.constant dense<0.000000e+00> : vector<64x128xf32>
    %16 = tpu.matmul %14, %15, %cst_11 {dimension_numbers = #tpu.dot_dimension_numbers<[1], [0], [0], [1], [0, 0, 1, 1], [], []>} : vector<64x64xbf16>, vector<64x128xbf16>, vector<64x128xf32> -> vector<64x128xf32>
    %17 = arith.addf %12, %16 : vector<64x128xf32>
    %c3 = arith.constant 3 : index
    %c0_12 = arith.constant 0 : index
    %c0_13 = arith.constant 0 : index
    %18 = vector.load %arg2[%c3, %c0_12, %c0_13] : memref<9x64x64xbf16, #tpu.memory_space<vmem>>, vector<1x64x64xbf16>
    %19 = vector.shape_cast %18 : vector<1x64x64xbf16> to vector<64x64xbf16>
    %20 = vector.extract_strided_slice %1 {offsets = [0, 24], sizes = [64, 128], strides = [1, 1]} : vector<64x192xbf16> to vector<64x128xbf16>
    %cst_14 = arith.constant dense<0.000000e+00> : vector<64x128xf32>
    %21 = tpu.matmul %19, %20, %cst_14 {dimension_numbers = #tpu.dot_dimension_numbers<[1], [0], [0], [1], [0, 0, 1, 1], [], []>} : vector<64x64xbf16>, vector<64x128xbf16>, vector<64x128xf32> -> vector<64x128xf32>
    %22 = arith.addf %17, %21 : vector<64x128xf32>
    %c4 = arith.constant 4 : index
    %c0_15 = arith.constant 0 : index
    %c0_16 = arith.constant 0 : index
    %23 = vector.load %arg2[%c4, %c0_15, %c0_16] : memref<9x64x64xbf16, #tpu.memory_space<vmem>>, vector<1x64x64xbf16>
    %24 = vector.shape_cast %23 : vector<1x64x64xbf16> to vector<64x64xbf16>
    %25 = vector.extract_strided_slice %1 {offsets = [0, 32], sizes = [64, 128], strides = [1, 1]} : vector<64x192xbf16> to vector<64x128xbf16>
    %cst_17 = arith.constant dense<0.000000e+00> : vector<64x128xf32>
    %26 = tpu.matmul %24, %25, %cst_17 {dimension_numbers = #tpu.dot_dimension_numbers<[1], [0], [0], [1], [0, 0, 1, 1], [], []>} : vector<64x64xbf16>, vector<64x128xbf16>, vector<64x128xf32> -> vector<64x128xf32>
    %27 = arith.addf %22, %26 : vector<64x128xf32>
    %c5 = arith.constant 5 : index
    %c0_18 = arith.constant 0 : index
    %c0_19 = arith.constant 0 : index
    %28 = vector.load %arg2[%c5, %c0_18, %c0_19] : memref<9x64x64xbf16, #tpu.memory_space<vmem>>, vector<1x64x64xbf16>
    %29 = vector.shape_cast %28 : vector<1x64x64xbf16> to vector<64x64xbf16>
    %30 = vector.extract_strided_slice %1 {offsets = [0, 40], sizes = [64, 128], strides = [1, 1]} : vector<64x192xbf16> to vector<64x128xbf16>
    %cst_20 = arith.constant dense<0.000000e+00> : vector<64x128xf32>
    %31 = tpu.matmul %29, %30, %cst_20 {dimension_numbers = #tpu.dot_dimension_numbers<[1], [0], [0], [1], [0, 0, 1, 1], [], []>} : vector<64x64xbf16>, vector<64x128xbf16>, vector<64x128xf32> -> vector<64x128xf32>
    %32 = arith.addf %27, %31 : vector<64x128xf32>
    %c6 = arith.constant 6 : index
    %c0_21 = arith.constant 0 : index
    %c0_22 = arith.constant 0 : index
    %33 = vector.load %arg2[%c6, %c0_21, %c0_22] : memref<9x64x64xbf16, #tpu.memory_space<vmem>>, vector<1x64x64xbf16>
    %34 = vector.shape_cast %33 : vector<1x64x64xbf16> to vector<64x64xbf16>
    %35 = vector.extract_strided_slice %1 {offsets = [0, 48], sizes = [64, 128], strides = [1, 1]} : vector<64x192xbf16> to vector<64x128xbf16>
    %cst_23 = arith.constant dense<0.000000e+00> : vector<64x128xf32>
    %36 = tpu.matmul %34, %35, %cst_23 {dimension_numbers = #tpu.dot_dimension_numbers<[1], [0], [0], [1], [0, 0, 1, 1], [], []>} : vector<64x64xbf16>, vector<64x128xbf16>, vector<64x128xf32> -> vector<64x128xf32>
    %37 = arith.addf %32, %36 : vector<64x128xf32>
    %c7 = arith.constant 7 : index
    %c0_24 = arith.constant 0 : index
    %c0_25 = arith.constant 0 : index
    %38 = vector.load %arg2[%c7, %c0_24, %c0_25] : memref<9x64x64xbf16, #tpu.memory_space<vmem>>, vector<1x64x64xbf16>
    %39 = vector.shape_cast %38 : vector<1x64x64xbf16> to vector<64x64xbf16>
    %40 = vector.extract_strided_slice %1 {offsets = [0, 56], sizes = [64, 128], strides = [1, 1]} : vector<64x192xbf16> to vector<64x128xbf16>
    %cst_26 = arith.constant dense<0.000000e+00> : vector<64x128xf32>
    %41 = tpu.matmul %39, %40, %cst_26 {dimension_numbers = #tpu.dot_dimension_numbers<[1], [0], [0], [1], [0, 0, 1, 1], [], []>} : vector<64x64xbf16>, vector<64x128xbf16>, vector<64x128xf32> -> vector<64x128xf32>
    %42 = arith.addf %37, %41 : vector<64x128xf32>
    %c8 = arith.constant 8 : index
    %c0_27 = arith.constant 0 : index
    %c0_28 = arith.constant 0 : index
    %43 = vector.load %arg2[%c8, %c0_27, %c0_28] : memref<9x64x64xbf16, #tpu.memory_space<vmem>>, vector<1x64x64xbf16>
    %44 = vector.shape_cast %43 : vector<1x64x64xbf16> to vector<64x64xbf16>
    %45 = vector.extract_strided_slice %1 {offsets = [0, 64], sizes = [64, 128], strides = [1, 1]} : vector<64x192xbf16> to vector<64x128xbf16>
    %cst_29 = arith.constant dense<0.000000e+00> : vector<64x128xf32>
    %46 = tpu.matmul %44, %45, %cst_29 {dimension_numbers = #tpu.dot_dimension_numbers<[1], [0], [0], [1], [0, 0, 1, 1], [], []>} : vector<64x64xbf16>, vector<64x128xbf16>, vector<64x128xf32> -> vector<64x128xf32>
    %47 = arith.addf %42, %46 : vector<64x128xf32>
    %c0_30 = arith.constant 0 : index
    %c0_31 = arith.constant 0 : index
    %48 = vector.load %arg3[%c0_30, %c0_31] : memref<64x1xf32, #tpu.memory_space<vmem>>, vector<64x1xf32>
    %49 = vector.broadcast %48 : vector<64x1xf32> to vector<64x128xf32>
    %50 = arith.addf %47, %49 : vector<64x128xf32>
    %cst_32 = arith.constant 0.000000e+00 : f32
    %51 = vector.broadcast %cst_32 : f32 to vector<64x128xf32>
    %52 = arith.maximumf %50, %51 : vector<64x128xf32>
    %53 = arith.truncf %52 : vector<64x128xf32> to vector<64x128xbf16>
    %c0_33 = arith.constant 0 : index
    %c0_34 = arith.constant 0 : index
    %c0_35 = arith.constant 0 : index
    %54 = vector.load %arg4[%c0_33, %c0_34, %c0_35] : memref<1x64x128xbf16, #tpu.memory_space<vmem>>, vector<1x64x128xbf16>
    %55 = vector.shape_cast %54 : vector<1x64x128xbf16> to vector<64x128xbf16>
    %56 = vector.shape_cast %53 : vector<64x128xbf16> to vector<1x64x128xbf16>
    tpu.vector_store %arg4[%c0_33, %c0_34, %c0_35], %56 {strides = array<i32>} : memref<1x64x128xbf16, #tpu.memory_space<vmem>>, vector<1x64x128xbf16>,
    return
  }
  func.func @transform_0(%arg0: i32) -> (i32, i32, i32) {
    %c0_i32 = arith.constant 0 : i32
    %c0_i32_0 = arith.constant 0 : i32
    %c0_i32_1 = arith.constant 0 : i32
    return %arg0, %c0_i32, %c0_i32_0 : i32, i32, i32
  }
  func.func @transform_1(%arg0: i32) -> (i32, i32, i32) {
    %c0_i32 = arith.constant 0 : i32
    %c0_i32_0 = arith.constant 0 : i32
    %c0_i32_1 = arith.constant 0 : i32
    %c0_i32_2 = arith.constant 0 : i32
    return %c0_i32, %c0_i32_0, %c0_i32_1 : i32, i32, i32
  }
  func.func @transform_2(%arg0: i32) -> (i32, i32) {
    %c0_i32 = arith.constant 0 : i32
    %c0_i32_0 = arith.constant 0 : i32
    %c0_i32_1 = arith.constant 0 : i32
    return %c0_i32, %c0_i32_0 : i32, i32
  }
  func.func @transform_3(%arg0: i32) -> (i32, i32, i32) {
    %c0_i32 = arith.constant 0 : i32
    %c0_i32_0 = arith.constant 0 : i32
    %c0_i32_1 = arith.constant 0 : i32
    return %arg0, %c0_i32, %c0_i32_0 : i32, i32, i32
  }
}

module attributes {stable_mosaic.version = 11 : i64} {
  func.func @_gcn_kernel(%arg0: i32, %arg1: i32, %arg2: memref<1x64x128xbf16, #tpu.memory_space<vmem>>, %arg3: memref<128x128xbf16, #tpu.memory_space<vmem>>, %arg4: memref<64x64xbf16, #tpu.memory_space<vmem>>, %arg5: memref<64x1xf32, #tpu.memory_space<vmem>>, %arg6: memref<1x64x128xbf16, #tpu.memory_space<vmem>>) attributes {dimension_semantics = [#tpu.dimension_semantics<parallel>, #tpu.dimension_semantics<parallel>], iteration_bounds = array<i64: 2, 1>, scalar_prefetch = 0 : i64, scratch_operands = 0 : i64, tpu.core_type = #tpu.core_type<tc>, window_params = [{transform_indices = @transform_0, window_bounds = array<i64: 1, 64, 128>}, {pipeline_mode = #tpu.pipeline_mode<synchronous>, transform_indices = @transform_1, window_bounds = array<i64: 128, 128>}, {pipeline_mode = #tpu.pipeline_mode<synchronous>, transform_indices = @transform_2, window_bounds = array<i64: 64, 64>}, {pipeline_mode = #tpu.pipeline_mode<synchronous>, transform_indices = @transform_3, window_bounds = array<i64: 64, 1>}, {transform_indices = @transform_4, window_bounds = array<i64: 1, 64, 128>}]} {
    %c0 = arith.constant 0 : index
    %c0_0 = arith.constant 0 : index
    %c0_1 = arith.constant 0 : index
    %0 = vector.load %arg2[%c0, %c0_0, %c0_1] : memref<1x64x128xbf16, #tpu.memory_space<vmem>>, vector<1x64x128xbf16>
    %1 = vector.shape_cast %0 : vector<1x64x128xbf16> to vector<64x128xbf16>
    %c0_2 = arith.constant 0 : index
    %c0_3 = arith.constant 0 : index
    %2 = vector.load %arg3[%c0_2, %c0_3] : memref<128x128xbf16, #tpu.memory_space<vmem>>, vector<128x128xbf16>
    %cst = arith.constant dense<0.000000e+00> : vector<64x128xf32>
    %3 = tpu.matmul %1, %2, %cst {dimension_numbers = #tpu.dot_dimension_numbers<[1], [0], [0], [1], [0, 0, 1, 1], [], []>} : vector<64x128xbf16>, vector<128x128xbf16>, vector<64x128xf32> -> vector<64x128xf32>
    %c0_4 = arith.constant 0 : index
    %c0_5 = arith.constant 0 : index
    %4 = vector.load %arg4[%c0_4, %c0_5] : memref<64x64xbf16, #tpu.memory_space<vmem>>, vector<64x64xbf16>
    %5 = arith.truncf %3 : vector<64x128xf32> to vector<64x128xbf16>
    %cst_6 = arith.constant dense<0.000000e+00> : vector<64x128xf32>
    %6 = tpu.matmul %4, %5, %cst_6 {dimension_numbers = #tpu.dot_dimension_numbers<[1], [0], [0], [1], [0, 0, 1, 1], [], []>} : vector<64x64xbf16>, vector<64x128xbf16>, vector<64x128xf32> -> vector<64x128xf32>
    %c0_7 = arith.constant 0 : index
    %c0_8 = arith.constant 0 : index
    %7 = vector.load %arg5[%c0_7, %c0_8] : memref<64x1xf32, #tpu.memory_space<vmem>>, vector<64x1xf32>
    %8 = vector.broadcast %7 : vector<64x1xf32> to vector<64x128xf32>
    %9 = arith.addf %6, %8 : vector<64x128xf32>
    %cst_9 = arith.constant 0.000000e+00 : f32
    %10 = vector.broadcast %cst_9 : f32 to vector<64x128xf32>
    %11 = arith.maximumf %9, %10 : vector<64x128xf32>
    %12 = arith.truncf %11 : vector<64x128xf32> to vector<64x128xbf16>
    %c0_10 = arith.constant 0 : index
    %c0_11 = arith.constant 0 : index
    %c0_12 = arith.constant 0 : index
    %13 = vector.load %arg6[%c0_10, %c0_11, %c0_12] : memref<1x64x128xbf16, #tpu.memory_space<vmem>>, vector<1x64x128xbf16>
    %14 = vector.shape_cast %13 : vector<1x64x128xbf16> to vector<64x128xbf16>
    %15 = vector.shape_cast %12 : vector<64x128xbf16> to vector<1x64x128xbf16>
    tpu.vector_store %arg6[%c0_10, %c0_11, %c0_12], %15 {strides = array<i32>} : memref<1x64x128xbf16, #tpu.memory_space<vmem>>, vector<1x64x128xbf16>,
    return
  }
  func.func @transform_0(%arg0: i32, %arg1: i32) -> (i32, i32, i32) {
    %c0_i32 = arith.constant 0 : i32
    %c0_i32_0 = arith.constant 0 : i32
    return %arg0, %c0_i32, %arg1 : i32, i32, i32
  }
  func.func @transform_1(%arg0: i32, %arg1: i32) -> (i32, i32) {
    %c0_i32 = arith.constant 0 : i32
    %c0_i32_0 = arith.constant 0 : i32
    %c0_i32_1 = arith.constant 0 : i32
    return %c0_i32, %c0_i32_0 : i32, i32
  }
  func.func @transform_2(%arg0: i32, %arg1: i32) -> (i32, i32) {
    %c0_i32 = arith.constant 0 : i32
    %c0_i32_0 = arith.constant 0 : i32
    %c0_i32_1 = arith.constant 0 : i32
    return %c0_i32, %c0_i32_0 : i32, i32
  }
  func.func @transform_3(%arg0: i32, %arg1: i32) -> (i32, i32) {
    %c0_i32 = arith.constant 0 : i32
    %c0_i32_0 = arith.constant 0 : i32
    %c0_i32_1 = arith.constant 0 : i32
    return %c0_i32, %c0_i32_0 : i32, i32
  }
  func.func @transform_4(%arg0: i32, %arg1: i32) -> (i32, i32, i32) {
    %c0_i32 = arith.constant 0 : i32
    %c0_i32_0 = arith.constant 0 : i32
    return %arg0, %c0_i32, %arg1 : i32, i32, i32
  }
}

module attributes {stable_mosaic.version = 11 : i64} {
  func.func @_tcn_kernel(%arg0: i32, %arg1: memref<1x64x96xbf16, #tpu.memory_space<vmem>>, %arg2: memref<1x64x96xbf16, #tpu.memory_space<vmem>>, %arg3: memref<9x64x64xbf16, #tpu.memory_space<vmem>>, %arg4: memref<64x1xf32, #tpu.memory_space<vmem>>, %arg5: memref<1x64x64xbf16, #tpu.memory_space<vmem>>, %arg6: memref<64x64xbf16, #tpu.memory_space<vmem>>, %arg7: memref<64x1xf32, #tpu.memory_space<vmem>>, %arg8: memref<1x64x64xbf16, #tpu.memory_space<vmem>>) attributes {dimension_semantics = [#tpu.dimension_semantics<parallel>], iteration_bounds = array<i64: 2>, scalar_prefetch = 0 : i64, scratch_operands = 0 : i64, tpu.core_type = #tpu.core_type<tc>, window_params = [{transform_indices = @transform_0, window_bounds = array<i64: 1, 64, 96>}, {transform_indices = @transform_1, window_bounds = array<i64: 1, 64, 96>}, {pipeline_mode = #tpu.pipeline_mode<synchronous>, transform_indices = @transform_2, window_bounds = array<i64: 9, 64, 64>}, {pipeline_mode = #tpu.pipeline_mode<synchronous>, transform_indices = @transform_3, window_bounds = array<i64: 64, 1>}, {transform_indices = @transform_4, window_bounds = array<i64: 1, 64, 64>}, {pipeline_mode = #tpu.pipeline_mode<synchronous>, transform_indices = @transform_5, window_bounds = array<i64: 64, 64>}, {pipeline_mode = #tpu.pipeline_mode<synchronous>, transform_indices = @transform_6, window_bounds = array<i64: 64, 1>}, {transform_indices = @transform_7, window_bounds = array<i64: 1, 64, 64>}]} {
    %c0 = arith.constant 0 : index
    %c0_0 = arith.constant 0 : index
    %c0_1 = arith.constant 0 : index
    %0 = vector.load %arg1[%c0, %c0_0, %c0_1] : memref<1x64x96xbf16, #tpu.memory_space<vmem>>, vector<1x64x96xbf16>
    %1 = vector.shape_cast %0 : vector<1x64x96xbf16> to vector<64x96xbf16>
    %c0_2 = arith.constant 0 : index
    %c0_3 = arith.constant 0 : index
    %c0_4 = arith.constant 0 : index
    %2 = vector.load %arg2[%c0_2, %c0_3, %c0_4] : memref<1x64x96xbf16, #tpu.memory_space<vmem>>, vector<1x64x96xbf16>
    %3 = vector.shape_cast %2 : vector<1x64x96xbf16> to vector<64x96xbf16>
    %cst = arith.constant 0.000000e+00 : f32
    %4 = vector.broadcast %cst : f32 to vector<64x64xf32>
    %c0_5 = arith.constant 0 : index
    %c0_6 = arith.constant 0 : index
    %c0_7 = arith.constant 0 : index
    %5 = vector.load %arg3[%c0_5, %c0_6, %c0_7] : memref<9x64x64xbf16, #tpu.memory_space<vmem>>, vector<1x64x64xbf16>
    %6 = vector.shape_cast %5 : vector<1x64x64xbf16> to vector<64x64xbf16>
    %7 = vector.extract_strided_slice %1 {offsets = [0, 0], sizes = [64, 64], strides = [1, 1]} : vector<64x96xbf16> to vector<64x64xbf16>
    %cst_8 = arith.constant dense<0.000000e+00> : vector<64x64xf32>
    %8 = tpu.matmul %6, %7, %cst_8 {dimension_numbers = #tpu.dot_dimension_numbers<[1], [0], [0], [1], [0, 0, 1, 1], [], []>} : vector<64x64xbf16>, vector<64x64xbf16>, vector<64x64xf32> -> vector<64x64xf32>
    %9 = arith.addf %4, %8 : vector<64x64xf32>
    %c1 = arith.constant 1 : index
    %c0_9 = arith.constant 0 : index
    %c0_10 = arith.constant 0 : index
    %10 = vector.load %arg3[%c1, %c0_9, %c0_10] : memref<9x64x64xbf16, #tpu.memory_space<vmem>>, vector<1x64x64xbf16>
    %11 = vector.shape_cast %10 : vector<1x64x64xbf16> to vector<64x64xbf16>
    %12 = vector.extract_strided_slice %3 {offsets = [0, 0], sizes = [64, 64], strides = [1, 1]} : vector<64x96xbf16> to vector<64x64xbf16>
    %cst_11 = arith.constant dense<0.000000e+00> : vector<64x64xf32>
    %13 = tpu.matmul %11, %12, %cst_11 {dimension_numbers = #tpu.dot_dimension_numbers<[1], [0], [0], [1], [0, 0, 1, 1], [], []>} : vector<64x64xbf16>, vector<64x64xbf16>, vector<64x64xf32> -> vector<64x64xf32>
    %14 = arith.addf %9, %13 : vector<64x64xf32>
    %c2 = arith.constant 2 : index
    %c0_12 = arith.constant 0 : index
    %c0_13 = arith.constant 0 : index
    %15 = vector.load %arg3[%c2, %c0_12, %c0_13] : memref<9x64x64xbf16, #tpu.memory_space<vmem>>, vector<1x64x64xbf16>
    %16 = vector.shape_cast %15 : vector<1x64x64xbf16> to vector<64x64xbf16>
    %17 = vector.extract_strided_slice %1 {offsets = [0, 8], sizes = [64, 64], strides = [1, 1]} : vector<64x96xbf16> to vector<64x64xbf16>
    %cst_14 = arith.constant dense<0.000000e+00> : vector<64x64xf32>
    %18 = tpu.matmul %16, %17, %cst_14 {dimension_numbers = #tpu.dot_dimension_numbers<[1], [0], [0], [1], [0, 0, 1, 1], [], []>} : vector<64x64xbf16>, vector<64x64xbf16>, vector<64x64xf32> -> vector<64x64xf32>
    %19 = arith.addf %14, %18 : vector<64x64xf32>
    %c3 = arith.constant 3 : index
    %c0_15 = arith.constant 0 : index
    %c0_16 = arith.constant 0 : index
    %20 = vector.load %arg3[%c3, %c0_15, %c0_16] : memref<9x64x64xbf16, #tpu.memory_space<vmem>>, vector<1x64x64xbf16>
    %21 = vector.shape_cast %20 : vector<1x64x64xbf16> to vector<64x64xbf16>
    %22 = vector.extract_strided_slice %3 {offsets = [0, 8], sizes = [64, 64], strides = [1, 1]} : vector<64x96xbf16> to vector<64x64xbf16>
    %cst_17 = arith.constant dense<0.000000e+00> : vector<64x64xf32>
    %23 = tpu.matmul %21, %22, %cst_17 {dimension_numbers = #tpu.dot_dimension_numbers<[1], [0], [0], [1], [0, 0, 1, 1], [], []>} : vector<64x64xbf16>, vector<64x64xbf16>, vector<64x64xf32> -> vector<64x64xf32>
    %24 = arith.addf %19, %23 : vector<64x64xf32>
    %c4 = arith.constant 4 : index
    %c0_18 = arith.constant 0 : index
    %c0_19 = arith.constant 0 : index
    %25 = vector.load %arg3[%c4, %c0_18, %c0_19] : memref<9x64x64xbf16, #tpu.memory_space<vmem>>, vector<1x64x64xbf16>
    %26 = vector.shape_cast %25 : vector<1x64x64xbf16> to vector<64x64xbf16>
    %27 = vector.extract_strided_slice %1 {offsets = [0, 16], sizes = [64, 64], strides = [1, 1]} : vector<64x96xbf16> to vector<64x64xbf16>
    %cst_20 = arith.constant dense<0.000000e+00> : vector<64x64xf32>
    %28 = tpu.matmul %26, %27, %cst_20 {dimension_numbers = #tpu.dot_dimension_numbers<[1], [0], [0], [1], [0, 0, 1, 1], [], []>} : vector<64x64xbf16>, vector<64x64xbf16>, vector<64x64xf32> -> vector<64x64xf32>
    %29 = arith.addf %24, %28 : vector<64x64xf32>
    %c5 = arith.constant 5 : index
    %c0_21 = arith.constant 0 : index
    %c0_22 = arith.constant 0 : index
    %30 = vector.load %arg3[%c5, %c0_21, %c0_22] : memref<9x64x64xbf16, #tpu.memory_space<vmem>>, vector<1x64x64xbf16>
    %31 = vector.shape_cast %30 : vector<1x64x64xbf16> to vector<64x64xbf16>
    %32 = vector.extract_strided_slice %3 {offsets = [0, 16], sizes = [64, 64], strides = [1, 1]} : vector<64x96xbf16> to vector<64x64xbf16>
    %cst_23 = arith.constant dense<0.000000e+00> : vector<64x64xf32>
    %33 = tpu.matmul %31, %32, %cst_23 {dimension_numbers = #tpu.dot_dimension_numbers<[1], [0], [0], [1], [0, 0, 1, 1], [], []>} : vector<64x64xbf16>, vector<64x64xbf16>, vector<64x64xf32> -> vector<64x64xf32>
    %34 = arith.addf %29, %33 : vector<64x64xf32>
    %c6 = arith.constant 6 : index
    %c0_24 = arith.constant 0 : index
    %c0_25 = arith.constant 0 : index
    %35 = vector.load %arg3[%c6, %c0_24, %c0_25] : memref<9x64x64xbf16, #tpu.memory_space<vmem>>, vector<1x64x64xbf16>
    %36 = vector.shape_cast %35 : vector<1x64x64xbf16> to vector<64x64xbf16>
    %37 = vector.extract_strided_slice %1 {offsets = [0, 24], sizes = [64, 64], strides = [1, 1]} : vector<64x96xbf16> to vector<64x64xbf16>
    %cst_26 = arith.constant dense<0.000000e+00> : vector<64x64xf32>
    %38 = tpu.matmul %36, %37, %cst_26 {dimension_numbers = #tpu.dot_dimension_numbers<[1], [0], [0], [1], [0, 0, 1, 1], [], []>} : vector<64x64xbf16>, vector<64x64xbf16>, vector<64x64xf32> -> vector<64x64xf32>
    %39 = arith.addf %34, %38 : vector<64x64xf32>
    %c7 = arith.constant 7 : index
    %c0_27 = arith.constant 0 : index
    %c0_28 = arith.constant 0 : index
    %40 = vector.load %arg3[%c7, %c0_27, %c0_28] : memref<9x64x64xbf16, #tpu.memory_space<vmem>>, vector<1x64x64xbf16>
    %41 = vector.shape_cast %40 : vector<1x64x64xbf16> to vector<64x64xbf16>
    %42 = vector.extract_strided_slice %3 {offsets = [0, 24], sizes = [64, 64], strides = [1, 1]} : vector<64x96xbf16> to vector<64x64xbf16>
    %cst_29 = arith.constant dense<0.000000e+00> : vector<64x64xf32>
    %43 = tpu.matmul %41, %42, %cst_29 {dimension_numbers = #tpu.dot_dimension_numbers<[1], [0], [0], [1], [0, 0, 1, 1], [], []>} : vector<64x64xbf16>, vector<64x64xbf16>, vector<64x64xf32> -> vector<64x64xf32>
    %44 = arith.addf %39, %43 : vector<64x64xf32>
    %c8 = arith.constant 8 : index
    %c0_30 = arith.constant 0 : index
    %c0_31 = arith.constant 0 : index
    %45 = vector.load %arg3[%c8, %c0_30, %c0_31] : memref<9x64x64xbf16, #tpu.memory_space<vmem>>, vector<1x64x64xbf16>
    %46 = vector.shape_cast %45 : vector<1x64x64xbf16> to vector<64x64xbf16>
    %47 = vector.extract_strided_slice %1 {offsets = [0, 32], sizes = [64, 64], strides = [1, 1]} : vector<64x96xbf16> to vector<64x64xbf16>
    %cst_32 = arith.constant dense<0.000000e+00> : vector<64x64xf32>
    %48 = tpu.matmul %46, %47, %cst_32 {dimension_numbers = #tpu.dot_dimension_numbers<[1], [0], [0], [1], [0, 0, 1, 1], [], []>} : vector<64x64xbf16>, vector<64x64xbf16>, vector<64x64xf32> -> vector<64x64xf32>
    %49 = arith.addf %44, %48 : vector<64x64xf32>
    %c0_33 = arith.constant 0 : index
    %c0_34 = arith.constant 0 : index
    %50 = vector.load %arg4[%c0_33, %c0_34] : memref<64x1xf32, #tpu.memory_space<vmem>>, vector<64x1xf32>
    %51 = vector.broadcast %50 : vector<64x1xf32> to vector<64x64xf32>
    %52 = arith.addf %49, %51 : vector<64x64xf32>
    %c0_35 = arith.constant 0 : index
    %c0_36 = arith.constant 0 : index
    %53 = vector.load %arg6[%c0_35, %c0_36] : memref<64x64xbf16, #tpu.memory_space<vmem>>, vector<64x64xbf16>
    %c0_37 = arith.constant 0 : index
    %c0_38 = arith.constant 0 : index
    %c0_39 = arith.constant 0 : index
    %54 = vector.load %arg5[%c0_37, %c0_38, %c0_39] : memref<1x64x64xbf16, #tpu.memory_space<vmem>>, vector<1x64x64xbf16>
    %55 = vector.shape_cast %54 : vector<1x64x64xbf16> to vector<64x64xbf16>
    %cst_40 = arith.constant dense<0.000000e+00> : vector<64x64xf32>
    %56 = tpu.matmul %53, %55, %cst_40 {dimension_numbers = #tpu.dot_dimension_numbers<[1], [0], [0], [1], [0, 0, 1, 1], [], []>} : vector<64x64xbf16>, vector<64x64xbf16>, vector<64x64xf32> -> vector<64x64xf32>
    %57 = arith.addf %52, %56 : vector<64x64xf32>
    %c0_41 = arith.constant 0 : index
    %c0_42 = arith.constant 0 : index
    %58 = vector.load %arg7[%c0_41, %c0_42] : memref<64x1xf32, #tpu.memory_space<vmem>>, vector<64x1xf32>
    %59 = vector.broadcast %58 : vector<64x1xf32> to vector<64x64xf32>
    %60 = arith.addf %57, %59 : vector<64x64xf32>
    %cst_43 = arith.constant 0.000000e+00 : f32
    %61 = vector.broadcast %cst_43 : f32 to vector<64x64xf32>
    %62 = arith.maximumf %60, %61 : vector<64x64xf32>
    %63 = arith.truncf %62 : vector<64x64xf32> to vector<64x64xbf16>
    %c0_44 = arith.constant 0 : index
    %c0_45 = arith.constant 0 : index
    %c0_46 = arith.constant 0 : index
    %64 = vector.load %arg8[%c0_44, %c0_45, %c0_46] : memref<1x64x64xbf16, #tpu.memory_space<vmem>>, vector<1x64x64xbf16>
    %65 = vector.shape_cast %64 : vector<1x64x64xbf16> to vector<64x64xbf16>
    %66 = vector.shape_cast %63 : vector<64x64xbf16> to vector<1x64x64xbf16>
    tpu.vector_store %arg8[%c0_44, %c0_45, %c0_46], %66 {strides = array<i32>} : memref<1x64x64xbf16, #tpu.memory_space<vmem>>, vector<1x64x64xbf16>,
    return
  }
  func.func @transform_0(%arg0: i32) -> (i32, i32, i32) {
    %c0_i32 = arith.constant 0 : i32
    %c0_i32_0 = arith.constant 0 : i32
    %c0_i32_1 = arith.constant 0 : i32
    return %arg0, %c0_i32, %c0_i32_0 : i32, i32, i32
  }
  func.func @transform_1(%arg0: i32) -> (i32, i32, i32) {
    %c0_i32 = arith.constant 0 : i32
    %c0_i32_0 = arith.constant 0 : i32
    %c0_i32_1 = arith.constant 0 : i32
    return %arg0, %c0_i32, %c0_i32_0 : i32, i32, i32
  }
  func.func @transform_2(%arg0: i32) -> (i32, i32, i32) {
    %c0_i32 = arith.constant 0 : i32
    %c0_i32_0 = arith.constant 0 : i32
    %c0_i32_1 = arith.constant 0 : i32
    %c0_i32_2 = arith.constant 0 : i32
    return %c0_i32, %c0_i32_0, %c0_i32_1 : i32, i32, i32
  }
  func.func @transform_3(%arg0: i32) -> (i32, i32) {
    %c0_i32 = arith.constant 0 : i32
    %c0_i32_0 = arith.constant 0 : i32
    %c0_i32_1 = arith.constant 0 : i32
    return %c0_i32, %c0_i32_0 : i32, i32
  }
  func.func @transform_4(%arg0: i32) -> (i32, i32, i32) {
    %c0_i32 = arith.constant 0 : i32
    %c0_i32_0 = arith.constant 0 : i32
    %c0_i32_1 = arith.constant 0 : i32
    return %arg0, %c0_i32, %c0_i32_0 : i32, i32, i32
  }
  func.func @transform_5(%arg0: i32) -> (i32, i32) {
    %c0_i32 = arith.constant 0 : i32
    %c0_i32_0 = arith.constant 0 : i32
    %c0_i32_1 = arith.constant 0 : i32
    return %c0_i32, %c0_i32_0 : i32, i32
  }
  func.func @transform_6(%arg0: i32) -> (i32, i32) {
    %c0_i32 = arith.constant 0 : i32
    %c0_i32_0 = arith.constant 0 : i32
    %c0_i32_1 = arith.constant 0 : i32
    return %c0_i32, %c0_i32_0 : i32, i32
  }
  func.func @transform_7(%arg0: i32) -> (i32, i32, i32) {
    %c0_i32 = arith.constant 0 : i32
    %c0_i32_0 = arith.constant 0 : i32
    %c0_i32_1 = arith.constant 0 : i32
    return %arg0, %c0_i32, %c0_i32_0 : i32, i32, i32
  }
}

module attributes {stable_mosaic.version = 11 : i64} {
  func.func @_gcn_kernel(%arg0: i32, %arg1: i32, %arg2: memref<1x64x64xbf16, #tpu.memory_space<vmem>>, %arg3: memref<64x64xbf16, #tpu.memory_space<vmem>>, %arg4: memref<128x64xbf16, #tpu.memory_space<vmem>>, %arg5: memref<128x1xf32, #tpu.memory_space<vmem>>, %arg6: memref<1x128x64xbf16, #tpu.memory_space<vmem>>) attributes {dimension_semantics = [#tpu.dimension_semantics<parallel>, #tpu.dimension_semantics<parallel>], iteration_bounds = array<i64: 2, 1>, scalar_prefetch = 0 : i64, scratch_operands = 0 : i64, tpu.core_type = #tpu.core_type<tc>, window_params = [{transform_indices = @transform_0, window_bounds = array<i64: 1, 64, 64>}, {pipeline_mode = #tpu.pipeline_mode<synchronous>, transform_indices = @transform_1, window_bounds = array<i64: 64, 64>}, {pipeline_mode = #tpu.pipeline_mode<synchronous>, transform_indices = @transform_2, window_bounds = array<i64: 128, 64>}, {pipeline_mode = #tpu.pipeline_mode<synchronous>, transform_indices = @transform_3, window_bounds = array<i64: 128, 1>}, {transform_indices = @transform_4, window_bounds = array<i64: 1, 128, 64>}]} {
    %c0 = arith.constant 0 : index
    %c0_0 = arith.constant 0 : index
    %c0_1 = arith.constant 0 : index
    %0 = vector.load %arg2[%c0, %c0_0, %c0_1] : memref<1x64x64xbf16, #tpu.memory_space<vmem>>, vector<1x64x64xbf16>
    %1 = vector.shape_cast %0 : vector<1x64x64xbf16> to vector<64x64xbf16>
    %c0_2 = arith.constant 0 : index
    %c0_3 = arith.constant 0 : index
    %2 = vector.load %arg3[%c0_2, %c0_3] : memref<64x64xbf16, #tpu.memory_space<vmem>>, vector<64x64xbf16>
    %cst = arith.constant dense<0.000000e+00> : vector<64x64xf32>
    %3 = tpu.matmul %1, %2, %cst {dimension_numbers = #tpu.dot_dimension_numbers<[1], [0], [0], [1], [0, 0, 1, 1], [], []>} : vector<64x64xbf16>, vector<64x64xbf16>, vector<64x64xf32> -> vector<64x64xf32>
    %c0_4 = arith.constant 0 : index
    %c0_5 = arith.constant 0 : index
    %4 = vector.load %arg4[%c0_4, %c0_5] : memref<128x64xbf16, #tpu.memory_space<vmem>>, vector<128x64xbf16>
    %5 = arith.truncf %3 : vector<64x64xf32> to vector<64x64xbf16>
    %cst_6 = arith.constant dense<0.000000e+00> : vector<128x64xf32>
    %6 = tpu.matmul %4, %5, %cst_6 {dimension_numbers = #tpu.dot_dimension_numbers<[1], [0], [0], [1], [0, 0, 1, 1], [], []>} : vector<128x64xbf16>, vector<64x64xbf16>, vector<128x64xf32> -> vector<128x64xf32>
    %c0_7 = arith.constant 0 : index
    %c0_8 = arith.constant 0 : index
    %7 = vector.load %arg5[%c0_7, %c0_8] : memref<128x1xf32, #tpu.memory_space<vmem>>, vector<128x1xf32>
    %8 = vector.broadcast %7 : vector<128x1xf32> to vector<128x64xf32>
    %9 = arith.addf %6, %8 : vector<128x64xf32>
    %cst_9 = arith.constant 0.000000e+00 : f32
    %10 = vector.broadcast %cst_9 : f32 to vector<128x64xf32>
    %11 = arith.maximumf %9, %10 : vector<128x64xf32>
    %12 = arith.truncf %11 : vector<128x64xf32> to vector<128x64xbf16>
    %c0_10 = arith.constant 0 : index
    %c0_11 = arith.constant 0 : index
    %c0_12 = arith.constant 0 : index
    %13 = vector.load %arg6[%c0_10, %c0_11, %c0_12] : memref<1x128x64xbf16, #tpu.memory_space<vmem>>, vector<1x128x64xbf16>
    %14 = vector.shape_cast %13 : vector<1x128x64xbf16> to vector<128x64xbf16>
    %15 = vector.shape_cast %12 : vector<128x64xbf16> to vector<1x128x64xbf16>
    tpu.vector_store %arg6[%c0_10, %c0_11, %c0_12], %15 {strides = array<i32>} : memref<1x128x64xbf16, #tpu.memory_space<vmem>>, vector<1x128x64xbf16>,
    return
  }
  func.func @transform_0(%arg0: i32, %arg1: i32) -> (i32, i32, i32) {
    %c0_i32 = arith.constant 0 : i32
    %c0_i32_0 = arith.constant 0 : i32
    return %arg0, %c0_i32, %arg1 : i32, i32, i32
  }
  func.func @transform_1(%arg0: i32, %arg1: i32) -> (i32, i32) {
    %c0_i32 = arith.constant 0 : i32
    %c0_i32_0 = arith.constant 0 : i32
    %c0_i32_1 = arith.constant 0 : i32
    return %c0_i32, %c0_i32_0 : i32, i32
  }
  func.func @transform_2(%arg0: i32, %arg1: i32) -> (i32, i32) {
    %c0_i32 = arith.constant 0 : i32
    %c0_i32_0 = arith.constant 0 : i32
    %c0_i32_1 = arith.constant 0 : i32
    return %c0_i32, %c0_i32_0 : i32, i32
  }
  func.func @transform_3(%arg0: i32, %arg1: i32) -> (i32, i32) {
    %c0_i32 = arith.constant 0 : i32
    %c0_i32_0 = arith.constant 0 : i32
    %c0_i32_1 = arith.constant 0 : i32
    return %c0_i32, %c0_i32_0 : i32, i32
  }
  func.func @transform_4(%arg0: i32, %arg1: i32) -> (i32, i32, i32) {
    %c0_i32 = arith.constant 0 : i32
    %c0_i32_0 = arith.constant 0 : i32
    return %arg0, %c0_i32, %arg1 : i32, i32, i32
  }
}

module attributes {stable_mosaic.version = 11 : i64} {
  func.func @_tcn_kernel(%arg0: i32, %arg1: memref<1x128x64xbf16, #tpu.memory_space<vmem>>, %arg2: memref<1x128x64xbf16, #tpu.memory_space<vmem>>, %arg3: memref<9x128x128xbf16, #tpu.memory_space<vmem>>, %arg4: memref<128x1xf32, #tpu.memory_space<vmem>>, %arg5: memref<1x64x32xbf16, #tpu.memory_space<vmem>>, %arg6: memref<128x64xbf16, #tpu.memory_space<vmem>>, %arg7: memref<128x1xf32, #tpu.memory_space<vmem>>, %arg8: memref<1x128x32xbf16, #tpu.memory_space<vmem>>) attributes {dimension_semantics = [#tpu.dimension_semantics<parallel>], iteration_bounds = array<i64: 2>, scalar_prefetch = 0 : i64, scratch_operands = 0 : i64, tpu.core_type = #tpu.core_type<tc>, window_params = [{transform_indices = @transform_0, window_bounds = array<i64: 1, 128, 64>}, {transform_indices = @transform_1, window_bounds = array<i64: 1, 128, 64>}, {pipeline_mode = #tpu.pipeline_mode<synchronous>, transform_indices = @transform_2, window_bounds = array<i64: 9, 128, 128>}, {pipeline_mode = #tpu.pipeline_mode<synchronous>, transform_indices = @transform_3, window_bounds = array<i64: 128, 1>}, {transform_indices = @transform_4, window_bounds = array<i64: 1, 64, 32>}, {pipeline_mode = #tpu.pipeline_mode<synchronous>, transform_indices = @transform_5, window_bounds = array<i64: 128, 64>}, {pipeline_mode = #tpu.pipeline_mode<synchronous>, transform_indices = @transform_6, window_bounds = array<i64: 128, 1>}, {transform_indices = @transform_7, window_bounds = array<i64: 1, 128, 32>}]} {
    %c0 = arith.constant 0 : index
    %c0_0 = arith.constant 0 : index
    %c0_1 = arith.constant 0 : index
    %0 = vector.load %arg1[%c0, %c0_0, %c0_1] : memref<1x128x64xbf16, #tpu.memory_space<vmem>>, vector<1x128x64xbf16>
    %1 = vector.shape_cast %0 : vector<1x128x64xbf16> to vector<128x64xbf16>
    %c0_2 = arith.constant 0 : index
    %c0_3 = arith.constant 0 : index
    %c0_4 = arith.constant 0 : index
    %2 = vector.load %arg2[%c0_2, %c0_3, %c0_4] : memref<1x128x64xbf16, #tpu.memory_space<vmem>>, vector<1x128x64xbf16>
    %3 = vector.shape_cast %2 : vector<1x128x64xbf16> to vector<128x64xbf16>
    %cst = arith.constant 0.000000e+00 : f32
    %4 = vector.broadcast %cst : f32 to vector<128x32xf32>
    %c0_5 = arith.constant 0 : index
    %c0_6 = arith.constant 0 : index
    %c0_7 = arith.constant 0 : index
    %5 = vector.load %arg3[%c0_5, %c0_6, %c0_7] : memref<9x128x128xbf16, #tpu.memory_space<vmem>>, vector<1x128x128xbf16>
    %6 = vector.shape_cast %5 : vector<1x128x128xbf16> to vector<128x128xbf16>
    %7 = vector.extract_strided_slice %1 {offsets = [0, 0], sizes = [128, 32], strides = [1, 1]} : vector<128x64xbf16> to vector<128x32xbf16>
    %cst_8 = arith.constant dense<0.000000e+00> : vector<128x32xf32>
    %8 = tpu.matmul %6, %7, %cst_8 {dimension_numbers = #tpu.dot_dimension_numbers<[1], [0], [0], [1], [0, 0, 1, 1], [], []>} : vector<128x128xbf16>, vector<128x32xbf16>, vector<128x32xf32> -> vector<128x32xf32>
    %9 = arith.addf %4, %8 : vector<128x32xf32>
    %c1 = arith.constant 1 : index
    %c0_9 = arith.constant 0 : index
    %c0_10 = arith.constant 0 : index
    %10 = vector.load %arg3[%c1, %c0_9, %c0_10] : memref<9x128x128xbf16, #tpu.memory_space<vmem>>, vector<1x128x128xbf16>
    %11 = vector.shape_cast %10 : vector<1x128x128xbf16> to vector<128x128xbf16>
    %12 = vector.extract_strided_slice %3 {offsets = [0, 0], sizes = [128, 32], strides = [1, 1]} : vector<128x64xbf16> to vector<128x32xbf16>
    %cst_11 = arith.constant dense<0.000000e+00> : vector<128x32xf32>
    %13 = tpu.matmul %11, %12, %cst_11 {dimension_numbers = #tpu.dot_dimension_numbers<[1], [0], [0], [1], [0, 0, 1, 1], [], []>} : vector<128x128xbf16>, vector<128x32xbf16>, vector<128x32xf32> -> vector<128x32xf32>
    %14 = arith.addf %9, %13 : vector<128x32xf32>
    %c2 = arith.constant 2 : index
    %c0_12 = arith.constant 0 : index
    %c0_13 = arith.constant 0 : index
    %15 = vector.load %arg3[%c2, %c0_12, %c0_13] : memref<9x128x128xbf16, #tpu.memory_space<vmem>>, vector<1x128x128xbf16>
    %16 = vector.shape_cast %15 : vector<1x128x128xbf16> to vector<128x128xbf16>
    %17 = vector.extract_strided_slice %1 {offsets = [0, 8], sizes = [128, 32], strides = [1, 1]} : vector<128x64xbf16> to vector<128x32xbf16>
    %cst_14 = arith.constant dense<0.000000e+00> : vector<128x32xf32>
    %18 = tpu.matmul %16, %17, %cst_14 {dimension_numbers = #tpu.dot_dimension_numbers<[1], [0], [0], [1], [0, 0, 1, 1], [], []>} : vector<128x128xbf16>, vector<128x32xbf16>, vector<128x32xf32> -> vector<128x32xf32>
    %19 = arith.addf %14, %18 : vector<128x32xf32>
    %c3 = arith.constant 3 : index
    %c0_15 = arith.constant 0 : index
    %c0_16 = arith.constant 0 : index
    %20 = vector.load %arg3[%c3, %c0_15, %c0_16] : memref<9x128x128xbf16, #tpu.memory_space<vmem>>, vector<1x128x128xbf16>
    %21 = vector.shape_cast %20 : vector<1x128x128xbf16> to vector<128x128xbf16>
    %22 = vector.extract_strided_slice %3 {offsets = [0, 8], sizes = [128, 32], strides = [1, 1]} : vector<128x64xbf16> to vector<128x32xbf16>
    %cst_17 = arith.constant dense<0.000000e+00> : vector<128x32xf32>
    %23 = tpu.matmul %21, %22, %cst_17 {dimension_numbers = #tpu.dot_dimension_numbers<[1], [0], [0], [1], [0, 0, 1, 1], [], []>} : vector<128x128xbf16>, vector<128x32xbf16>, vector<128x32xf32> -> vector<128x32xf32>
    %24 = arith.addf %19, %23 : vector<128x32xf32>
    %c4 = arith.constant 4 : index
    %c0_18 = arith.constant 0 : index
    %c0_19 = arith.constant 0 : index
    %25 = vector.load %arg3[%c4, %c0_18, %c0_19] : memref<9x128x128xbf16, #tpu.memory_space<vmem>>, vector<1x128x128xbf16>
    %26 = vector.shape_cast %25 : vector<1x128x128xbf16> to vector<128x128xbf16>
    %27 = vector.extract_strided_slice %1 {offsets = [0, 16], sizes = [128, 32], strides = [1, 1]} : vector<128x64xbf16> to vector<128x32xbf16>
    %cst_20 = arith.constant dense<0.000000e+00> : vector<128x32xf32>
    %28 = tpu.matmul %26, %27, %cst_20 {dimension_numbers = #tpu.dot_dimension_numbers<[1], [0], [0], [1], [0, 0, 1, 1], [], []>} : vector<128x128xbf16>, vector<128x32xbf16>, vector<128x32xf32> -> vector<128x32xf32>
    %29 = arith.addf %24, %28 : vector<128x32xf32>
    %c5 = arith.constant 5 : index
    %c0_21 = arith.constant 0 : index
    %c0_22 = arith.constant 0 : index
    %30 = vector.load %arg3[%c5, %c0_21, %c0_22] : memref<9x128x128xbf16, #tpu.memory_space<vmem>>, vector<1x128x128xbf16>
    %31 = vector.shape_cast %30 : vector<1x128x128xbf16> to vector<128x128xbf16>
    %32 = vector.extract_strided_slice %3 {offsets = [0, 16], sizes = [128, 32], strides = [1, 1]} : vector<128x64xbf16> to vector<128x32xbf16>
    %cst_23 = arith.constant dense<0.000000e+00> : vector<128x32xf32>
    %33 = tpu.matmul %31, %32, %cst_23 {dimension_numbers = #tpu.dot_dimension_numbers<[1], [0], [0], [1], [0, 0, 1, 1], [], []>} : vector<128x128xbf16>, vector<128x32xbf16>, vector<128x32xf32> -> vector<128x32xf32>
    %34 = arith.addf %29, %33 : vector<128x32xf32>
    %c6 = arith.constant 6 : index
    %c0_24 = arith.constant 0 : index
    %c0_25 = arith.constant 0 : index
    %35 = vector.load %arg3[%c6, %c0_24, %c0_25] : memref<9x128x128xbf16, #tpu.memory_space<vmem>>, vector<1x128x128xbf16>
    %36 = vector.shape_cast %35 : vector<1x128x128xbf16> to vector<128x128xbf16>
    %37 = vector.extract_strided_slice %1 {offsets = [0, 24], sizes = [128, 32], strides = [1, 1]} : vector<128x64xbf16> to vector<128x32xbf16>
    %cst_26 = arith.constant dense<0.000000e+00> : vector<128x32xf32>
    %38 = tpu.matmul %36, %37, %cst_26 {dimension_numbers = #tpu.dot_dimension_numbers<[1], [0], [0], [1], [0, 0, 1, 1], [], []>} : vector<128x128xbf16>, vector<128x32xbf16>, vector<128x32xf32> -> vector<128x32xf32>
    %39 = arith.addf %34, %38 : vector<128x32xf32>
    %c7 = arith.constant 7 : index
    %c0_27 = arith.constant 0 : index
    %c0_28 = arith.constant 0 : index
    %40 = vector.load %arg3[%c7, %c0_27, %c0_28] : memref<9x128x128xbf16, #tpu.memory_space<vmem>>, vector<1x128x128xbf16>
    %41 = vector.shape_cast %40 : vector<1x128x128xbf16> to vector<128x128xbf16>
    %42 = vector.extract_strided_slice %3 {offsets = [0, 24], sizes = [128, 32], strides = [1, 1]} : vector<128x64xbf16> to vector<128x32xbf16>
    %cst_29 = arith.constant dense<0.000000e+00> : vector<128x32xf32>
    %43 = tpu.matmul %41, %42, %cst_29 {dimension_numbers = #tpu.dot_dimension_numbers<[1], [0], [0], [1], [0, 0, 1, 1], [], []>} : vector<128x128xbf16>, vector<128x32xbf16>, vector<128x32xf32> -> vector<128x32xf32>
    %44 = arith.addf %39, %43 : vector<128x32xf32>
    %c8 = arith.constant 8 : index
    %c0_30 = arith.constant 0 : index
    %c0_31 = arith.constant 0 : index
    %45 = vector.load %arg3[%c8, %c0_30, %c0_31] : memref<9x128x128xbf16, #tpu.memory_space<vmem>>, vector<1x128x128xbf16>
    %46 = vector.shape_cast %45 : vector<1x128x128xbf16> to vector<128x128xbf16>
    %47 = vector.extract_strided_slice %1 {offsets = [0, 32], sizes = [128, 32], strides = [1, 1]} : vector<128x64xbf16> to vector<128x32xbf16>
    %cst_32 = arith.constant dense<0.000000e+00> : vector<128x32xf32>
    %48 = tpu.matmul %46, %47, %cst_32 {dimension_numbers = #tpu.dot_dimension_numbers<[1], [0], [0], [1], [0, 0, 1, 1], [], []>} : vector<128x128xbf16>, vector<128x32xbf16>, vector<128x32xf32> -> vector<128x32xf32>
    %49 = arith.addf %44, %48 : vector<128x32xf32>
    %c0_33 = arith.constant 0 : index
    %c0_34 = arith.constant 0 : index
    %50 = vector.load %arg4[%c0_33, %c0_34] : memref<128x1xf32, #tpu.memory_space<vmem>>, vector<128x1xf32>
    %51 = vector.broadcast %50 : vector<128x1xf32> to vector<128x32xf32>
    %52 = arith.addf %49, %51 : vector<128x32xf32>
    %c0_35 = arith.constant 0 : index
    %c0_36 = arith.constant 0 : index
    %53 = vector.load %arg6[%c0_35, %c0_36] : memref<128x64xbf16, #tpu.memory_space<vmem>>, vector<128x64xbf16>
    %c0_37 = arith.constant 0 : index
    %c0_38 = arith.constant 0 : index
    %c0_39 = arith.constant 0 : index
    %54 = vector.load %arg5[%c0_37, %c0_38, %c0_39] : memref<1x64x32xbf16, #tpu.memory_space<vmem>>, vector<1x64x32xbf16>
    %55 = vector.shape_cast %54 : vector<1x64x32xbf16> to vector<64x32xbf16>
    %cst_40 = arith.constant dense<0.000000e+00> : vector<128x32xf32>
    %56 = tpu.matmul %53, %55, %cst_40 {dimension_numbers = #tpu.dot_dimension_numbers<[1], [0], [0], [1], [0, 0, 1, 1], [], []>} : vector<128x64xbf16>, vector<64x32xbf16>, vector<128x32xf32> -> vector<128x32xf32>
    %57 = arith.addf %52, %56 : vector<128x32xf32>
    %c0_41 = arith.constant 0 : index
    %c0_42 = arith.constant 0 : index
    %58 = vector.load %arg7[%c0_41, %c0_42] : memref<128x1xf32, #tpu.memory_space<vmem>>, vector<128x1xf32>
    %59 = vector.broadcast %58 : vector<128x1xf32> to vector<128x32xf32>
    %60 = arith.addf %57, %59 : vector<128x32xf32>
    %cst_43 = arith.constant 0.000000e+00 : f32
    %61 = vector.broadcast %cst_43 : f32 to vector<128x32xf32>
    %62 = arith.maximumf %60, %61 : vector<128x32xf32>
    %63 = arith.truncf %62 : vector<128x32xf32> to vector<128x32xbf16>
    %c0_44 = arith.constant 0 : index
    %c0_45 = arith.constant 0 : index
    %c0_46 = arith.constant 0 : index
    %64 = vector.load %arg8[%c0_44, %c0_45, %c0_46] : memref<1x128x32xbf16, #tpu.memory_space<vmem>>, vector<1x128x32xbf16>
    %65 = vector.shape_cast %64 : vector<1x128x32xbf16> to vector<128x32xbf16>
    %66 = vector.shape_cast %63 : vector<128x32xbf16> to vector<1x128x32xbf16>
    tpu.vector_store %arg8[%c0_44, %c0_45, %c0_46], %66 {strides = array<i32>} : memref<1x128x32xbf16, #tpu.memory_space<vmem>>, vector<1x128x32xbf16>,
    return
  }
  func.func @transform_0(%arg0: i32) -> (i32, i32, i32) {
    %c0_i32 = arith.constant 0 : i32
    %c0_i32_0 = arith.constant 0 : i32
    %c0_i32_1 = arith.constant 0 : i32
    return %arg0, %c0_i32, %c0_i32_0 : i32, i32, i32
  }
  func.func @transform_1(%arg0: i32) -> (i32, i32, i32) {
    %c0_i32 = arith.constant 0 : i32
    %c0_i32_0 = arith.constant 0 : i32
    %c0_i32_1 = arith.constant 0 : i32
    return %arg0, %c0_i32, %c0_i32_0 : i32, i32, i32
  }
  func.func @transform_2(%arg0: i32) -> (i32, i32, i32) {
    %c0_i32 = arith.constant 0 : i32
    %c0_i32_0 = arith.constant 0 : i32
    %c0_i32_1 = arith.constant 0 : i32
    %c0_i32_2 = arith.constant 0 : i32
    return %c0_i32, %c0_i32_0, %c0_i32_1 : i32, i32, i32
  }
  func.func @transform_3(%arg0: i32) -> (i32, i32) {
    %c0_i32 = arith.constant 0 : i32
    %c0_i32_0 = arith.constant 0 : i32
    %c0_i32_1 = arith.constant 0 : i32
    return %c0_i32, %c0_i32_0 : i32, i32
  }
  func.func @transform_4(%arg0: i32) -> (i32, i32, i32) {
    %c0_i32 = arith.constant 0 : i32
    %c0_i32_0 = arith.constant 0 : i32
    %c0_i32_1 = arith.constant 0 : i32
    return %arg0, %c0_i32, %c0_i32_0 : i32, i32, i32
  }
  func.func @transform_5(%arg0: i32) -> (i32, i32) {
    %c0_i32 = arith.constant 0 : i32
    %c0_i32_0 = arith.constant 0 : i32
    %c0_i32_1 = arith.constant 0 : i32
    return %c0_i32, %c0_i32_0 : i32, i32
  }
  func.func @transform_6(%arg0: i32) -> (i32, i32) {
    %c0_i32 = arith.constant 0 : i32
    %c0_i32_0 = arith.constant 0 : i32
    %c0_i32_1 = arith.constant 0 : i32
    return %c0_i32, %c0_i32_0 : i32, i32
  }
  func.func @transform_7(%arg0: i32) -> (i32, i32, i32) {
    %c0_i32 = arith.constant 0 : i32
    %c0_i32_0 = arith.constant 0 : i32
    %c0_i32_1 = arith.constant 0 : i32
    return %arg0, %c0_i32, %c0_i32_0 : i32, i32, i32
  }
}

module attributes {stable_mosaic.version = 11 : i64} {
  func.func @_gcn_kernel(%arg0: i32, %arg1: i32, %arg2: memref<1x128x32xbf16, #tpu.memory_space<vmem>>, %arg3: memref<32x32xbf16, #tpu.memory_space<vmem>>, %arg4: memref<128x128xbf16, #tpu.memory_space<vmem>>, %arg5: memref<128x1xf32, #tpu.memory_space<vmem>>, %arg6: memref<1x128x32xbf16, #tpu.memory_space<vmem>>) attributes {dimension_semantics = [#tpu.dimension_semantics<parallel>, #tpu.dimension_semantics<parallel>], iteration_bounds = array<i64: 2, 1>, scalar_prefetch = 0 : i64, scratch_operands = 0 : i64, tpu.core_type = #tpu.core_type<tc>, window_params = [{transform_indices = @transform_0, window_bounds = array<i64: 1, 128, 32>}, {pipeline_mode = #tpu.pipeline_mode<synchronous>, transform_indices = @transform_1, window_bounds = array<i64: 32, 32>}, {pipeline_mode = #tpu.pipeline_mode<synchronous>, transform_indices = @transform_2, window_bounds = array<i64: 128, 128>}, {pipeline_mode = #tpu.pipeline_mode<synchronous>, transform_indices = @transform_3, window_bounds = array<i64: 128, 1>}, {transform_indices = @transform_4, window_bounds = array<i64: 1, 128, 32>}]} {
    %c0 = arith.constant 0 : index
    %c0_0 = arith.constant 0 : index
    %c0_1 = arith.constant 0 : index
    %0 = vector.load %arg2[%c0, %c0_0, %c0_1] : memref<1x128x32xbf16, #tpu.memory_space<vmem>>, vector<1x128x32xbf16>
    %1 = vector.shape_cast %0 : vector<1x128x32xbf16> to vector<128x32xbf16>
    %c0_2 = arith.constant 0 : index
    %c0_3 = arith.constant 0 : index
    %2 = vector.load %arg3[%c0_2, %c0_3] : memref<32x32xbf16, #tpu.memory_space<vmem>>, vector<32x32xbf16>
    %cst = arith.constant dense<0.000000e+00> : vector<128x32xf32>
    %3 = tpu.matmul %1, %2, %cst {dimension_numbers = #tpu.dot_dimension_numbers<[1], [0], [0], [1], [0, 0, 1, 1], [], []>} : vector<128x32xbf16>, vector<32x32xbf16>, vector<128x32xf32> -> vector<128x32xf32>
    %c0_4 = arith.constant 0 : index
    %c0_5 = arith.constant 0 : index
    %4 = vector.load %arg4[%c0_4, %c0_5] : memref<128x128xbf16, #tpu.memory_space<vmem>>, vector<128x128xbf16>
    %5 = arith.truncf %3 : vector<128x32xf32> to vector<128x32xbf16>
    %cst_6 = arith.constant dense<0.000000e+00> : vector<128x32xf32>
    %6 = tpu.matmul %4, %5, %cst_6 {dimension_numbers = #tpu.dot_dimension_numbers<[1], [0], [0], [1], [0, 0, 1, 1], [], []>} : vector<128x128xbf16>, vector<128x32xbf16>, vector<128x32xf32> -> vector<128x32xf32>
    %c0_7 = arith.constant 0 : index
    %c0_8 = arith.constant 0 : index
    %7 = vector.load %arg5[%c0_7, %c0_8] : memref<128x1xf32, #tpu.memory_space<vmem>>, vector<128x1xf32>
    %8 = vector.broadcast %7 : vector<128x1xf32> to vector<128x32xf32>
    %9 = arith.addf %6, %8 : vector<128x32xf32>
    %cst_9 = arith.constant 0.000000e+00 : f32
    %10 = vector.broadcast %cst_9 : f32 to vector<128x32xf32>
    %11 = arith.maximumf %9, %10 : vector<128x32xf32>
    %12 = arith.truncf %11 : vector<128x32xf32> to vector<128x32xbf16>
    %c0_10 = arith.constant 0 : index
    %c0_11 = arith.constant 0 : index
    %c0_12 = arith.constant 0 : index
    %13 = vector.load %arg6[%c0_10, %c0_11, %c0_12] : memref<1x128x32xbf16, #tpu.memory_space<vmem>>, vector<1x128x32xbf16>
    %14 = vector.shape_cast %13 : vector<1x128x32xbf16> to vector<128x32xbf16>
    %15 = vector.shape_cast %12 : vector<128x32xbf16> to vector<1x128x32xbf16>
    tpu.vector_store %arg6[%c0_10, %c0_11, %c0_12], %15 {strides = array<i32>} : memref<1x128x32xbf16, #tpu.memory_space<vmem>>, vector<1x128x32xbf16>,
    return
  }
  func.func @transform_0(%arg0: i32, %arg1: i32) -> (i32, i32, i32) {
    %c0_i32 = arith.constant 0 : i32
    %c0_i32_0 = arith.constant 0 : i32
    return %arg0, %c0_i32, %arg1 : i32, i32, i32
  }
  func.func @transform_1(%arg0: i32, %arg1: i32) -> (i32, i32) {
    %c0_i32 = arith.constant 0 : i32
    %c0_i32_0 = arith.constant 0 : i32
    %c0_i32_1 = arith.constant 0 : i32
    return %c0_i32, %c0_i32_0 : i32, i32
  }
  func.func @transform_2(%arg0: i32, %arg1: i32) -> (i32, i32) {
    %c0_i32 = arith.constant 0 : i32
    %c0_i32_0 = arith.constant 0 : i32
    %c0_i32_1 = arith.constant 0 : i32
    return %c0_i32, %c0_i32_0 : i32, i32
  }
  func.func @transform_3(%arg0: i32, %arg1: i32) -> (i32, i32) {
    %c0_i32 = arith.constant 0 : i32
    %c0_i32_0 = arith.constant 0 : i32
    %c0_i32_1 = arith.constant 0 : i32
    return %c0_i32, %c0_i32_0 : i32, i32
  }
  func.func @transform_4(%arg0: i32, %arg1: i32) -> (i32, i32, i32) {
    %c0_i32 = arith.constant 0 : i32
    %c0_i32_0 = arith.constant 0 : i32
    return %arg0, %c0_i32, %arg1 : i32, i32, i32
  }
}

module attributes {stable_mosaic.version = 11 : i64} {
  func.func @_tcn_kernel(%arg0: i32, %arg1: memref<1x128x96xbf16, #tpu.memory_space<vmem>>, %arg2: memref<9x128x128xbf16, #tpu.memory_space<vmem>>, %arg3: memref<128x1xf32, #tpu.memory_space<vmem>>, %arg4: memref<1x1x32xf32, #tpu.memory_space<vmem>>) attributes {dimension_semantics = [#tpu.dimension_semantics<parallel>], iteration_bounds = array<i64: 2>, scalar_prefetch = 0 : i64, scratch_operands = 0 : i64, tpu.core_type = #tpu.core_type<tc>, window_params = [{transform_indices = @transform_0, window_bounds = array<i64: 1, 128, 96>}, {pipeline_mode = #tpu.pipeline_mode<synchronous>, transform_indices = @transform_1, window_bounds = array<i64: 9, 128, 128>}, {pipeline_mode = #tpu.pipeline_mode<synchronous>, transform_indices = @transform_2, window_bounds = array<i64: 128, 1>}, {transform_indices = @transform_3, window_bounds = array<i64: 1, 1, 32>}]} {
    %c0 = arith.constant 0 : index
    %c0_0 = arith.constant 0 : index
    %c0_1 = arith.constant 0 : index
    %0 = vector.load %arg1[%c0, %c0_0, %c0_1] : memref<1x128x96xbf16, #tpu.memory_space<vmem>>, vector<1x128x96xbf16>
    %1 = vector.shape_cast %0 : vector<1x128x96xbf16> to vector<128x96xbf16>
    %cst = arith.constant 0.000000e+00 : f32
    %2 = vector.broadcast %cst : f32 to vector<128x32xf32>
    %c0_2 = arith.constant 0 : index
    %c0_3 = arith.constant 0 : index
    %c0_4 = arith.constant 0 : index
    %3 = vector.load %arg2[%c0_2, %c0_3, %c0_4] : memref<9x128x128xbf16, #tpu.memory_space<vmem>>, vector<1x128x128xbf16>
    %4 = vector.shape_cast %3 : vector<1x128x128xbf16> to vector<128x128xbf16>
    %5 = vector.extract_strided_slice %1 {offsets = [0, 0], sizes = [128, 32], strides = [1, 1]} : vector<128x96xbf16> to vector<128x32xbf16>
    %cst_5 = arith.constant dense<0.000000e+00> : vector<128x32xf32>
    %6 = tpu.matmul %4, %5, %cst_5 {dimension_numbers = #tpu.dot_dimension_numbers<[1], [0], [0], [1], [0, 0, 1, 1], [], []>} : vector<128x128xbf16>, vector<128x32xbf16>, vector<128x32xf32> -> vector<128x32xf32>
    %7 = arith.addf %2, %6 : vector<128x32xf32>
    %c1 = arith.constant 1 : index
    %c0_6 = arith.constant 0 : index
    %c0_7 = arith.constant 0 : index
    %8 = vector.load %arg2[%c1, %c0_6, %c0_7] : memref<9x128x128xbf16, #tpu.memory_space<vmem>>, vector<1x128x128xbf16>
    %9 = vector.shape_cast %8 : vector<1x128x128xbf16> to vector<128x128xbf16>
    %10 = vector.extract_strided_slice %1 {offsets = [0, 8], sizes = [128, 32], strides = [1, 1]} : vector<128x96xbf16> to vector<128x32xbf16>
    %cst_8 = arith.constant dense<0.000000e+00> : vector<128x32xf32>
    %11 = tpu.matmul %9, %10, %cst_8 {dimension_numbers = #tpu.dot_dimension_numbers<[1], [0], [0], [1], [0, 0, 1, 1], [], []>} : vector<128x128xbf16>, vector<128x32xbf16>, vector<128x32xf32> -> vector<128x32xf32>
    %12 = arith.addf %7, %11 : vector<128x32xf32>
    %c2 = arith.constant 2 : index
    %c0_9 = arith.constant 0 : index
    %c0_10 = arith.constant 0 : index
    %13 = vector.load %arg2[%c2, %c0_9, %c0_10] : memref<9x128x128xbf16, #tpu.memory_space<vmem>>, vector<1x128x128xbf16>
    %14 = vector.shape_cast %13 : vector<1x128x128xbf16> to vector<128x128xbf16>
    %15 = vector.extract_strided_slice %1 {offsets = [0, 16], sizes = [128, 32], strides = [1, 1]} : vector<128x96xbf16> to vector<128x32xbf16>
    %cst_11 = arith.constant dense<0.000000e+00> : vector<128x32xf32>
    %16 = tpu.matmul %14, %15, %cst_11 {dimension_numbers = #tpu.dot_dimension_numbers<[1], [0], [0], [1], [0, 0, 1, 1], [], []>} : vector<128x128xbf16>, vector<128x32xbf16>, vector<128x32xf32> -> vector<128x32xf32>
    %17 = arith.addf %12, %16 : vector<128x32xf32>
    %c3 = arith.constant 3 : index
    %c0_12 = arith.constant 0 : index
    %c0_13 = arith.constant 0 : index
    %18 = vector.load %arg2[%c3, %c0_12, %c0_13] : memref<9x128x128xbf16, #tpu.memory_space<vmem>>, vector<1x128x128xbf16>
    %19 = vector.shape_cast %18 : vector<1x128x128xbf16> to vector<128x128xbf16>
    %20 = vector.extract_strided_slice %1 {offsets = [0, 24], sizes = [128, 32], strides = [1, 1]} : vector<128x96xbf16> to vector<128x32xbf16>
    %cst_14 = arith.constant dense<0.000000e+00> : vector<128x32xf32>
    %21 = tpu.matmul %19, %20, %cst_14 {dimension_numbers = #tpu.dot_dimension_numbers<[1], [0], [0], [1], [0, 0, 1, 1], [], []>} : vector<128x128xbf16>, vector<128x32xbf16>, vector<128x32xf32> -> vector<128x32xf32>
    %22 = arith.addf %17, %21 : vector<128x32xf32>
    %c4 = arith.constant 4 : index
    %c0_15 = arith.constant 0 : index
    %c0_16 = arith.constant 0 : index
    %23 = vector.load %arg2[%c4, %c0_15, %c0_16] : memref<9x128x128xbf16, #tpu.memory_space<vmem>>, vector<1x128x128xbf16>
    %24 = vector.shape_cast %23 : vector<1x128x128xbf16> to vector<128x128xbf16>
    %25 = vector.extract_strided_slice %1 {offsets = [0, 32], sizes = [128, 32], strides = [1, 1]} : vector<128x96xbf16> to vector<128x32xbf16>
    %cst_17 = arith.constant dense<0.000000e+00> : vector<128x32xf32>
    %26 = tpu.matmul %24, %25, %cst_17 {dimension_numbers = #tpu.dot_dimension_numbers<[1], [0], [0], [1], [0, 0, 1, 1], [], []>} : vector<128x128xbf16>, vector<128x32xbf16>, vector<128x32xf32> -> vector<128x32xf32>
    %27 = arith.addf %22, %26 : vector<128x32xf32>
    %c5 = arith.constant 5 : index
    %c0_18 = arith.constant 0 : index
    %c0_19 = arith.constant 0 : index
    %28 = vector.load %arg2[%c5, %c0_18, %c0_19] : memref<9x128x128xbf16, #tpu.memory_space<vmem>>, vector<1x128x128xbf16>
    %29 = vector.shape_cast %28 : vector<1x128x128xbf16> to vector<128x128xbf16>
    %30 = vector.extract_strided_slice %1 {offsets = [0, 40], sizes = [128, 32], strides = [1, 1]} : vector<128x96xbf16> to vector<128x32xbf16>
    %cst_20 = arith.constant dense<0.000000e+00> : vector<128x32xf32>
    %31 = tpu.matmul %29, %30, %cst_20 {dimension_numbers = #tpu.dot_dimension_numbers<[1], [0], [0], [1], [0, 0, 1, 1], [], []>} : vector<128x128xbf16>, vector<128x32xbf16>, vector<128x32xf32> -> vector<128x32xf32>
    %32 = arith.addf %27, %31 : vector<128x32xf32>
    %c6 = arith.constant 6 : index
    %c0_21 = arith.constant 0 : index
    %c0_22 = arith.constant 0 : index
    %33 = vector.load %arg2[%c6, %c0_21, %c0_22] : memref<9x128x128xbf16, #tpu.memory_space<vmem>>, vector<1x128x128xbf16>
    %34 = vector.shape_cast %33 : vector<1x128x128xbf16> to vector<128x128xbf16>
    %35 = vector.extract_strided_slice %1 {offsets = [0, 48], sizes = [128, 32], strides = [1, 1]} : vector<128x96xbf16> to vector<128x32xbf16>
    %cst_23 = arith.constant dense<0.000000e+00> : vector<128x32xf32>
    %36 = tpu.matmul %34, %35, %cst_23 {dimension_numbers = #tpu.dot_dimension_numbers<[1], [0], [0], [1], [0, 0, 1, 1], [], []>} : vector<128x128xbf16>, vector<128x32xbf16>, vector<128x32xf32> -> vector<128x32xf32>
    %37 = arith.addf %32, %36 : vector<128x32xf32>
    %c7 = arith.constant 7 : index
    %c0_24 = arith.constant 0 : index
    %c0_25 = arith.constant 0 : index
    %38 = vector.load %arg2[%c7, %c0_24, %c0_25] : memref<9x128x128xbf16, #tpu.memory_space<vmem>>, vector<1x128x128xbf16>
    %39 = vector.shape_cast %38 : vector<1x128x128xbf16> to vector<128x128xbf16>
    %40 = vector.extract_strided_slice %1 {offsets = [0, 56], sizes = [128, 32], strides = [1, 1]} : vector<128x96xbf16> to vector<128x32xbf16>
    %cst_26 = arith.constant dense<0.000000e+00> : vector<128x32xf32>
    %41 = tpu.matmul %39, %40, %cst_26 {dimension_numbers = #tpu.dot_dimension_numbers<[1], [0], [0], [1], [0, 0, 1, 1], [], []>} : vector<128x128xbf16>, vector<128x32xbf16>, vector<128x32xf32> -> vector<128x32xf32>
    %42 = arith.addf %37, %41 : vector<128x32xf32>
    %c8 = arith.constant 8 : index
    %c0_27 = arith.constant 0 : index
    %c0_28 = arith.constant 0 : index
    %43 = vector.load %arg2[%c8, %c0_27, %c0_28] : memref<9x128x128xbf16, #tpu.memory_space<vmem>>, vector<1x128x128xbf16>
    %44 = vector.shape_cast %43 : vector<1x128x128xbf16> to vector<128x128xbf16>
    %45 = vector.extract_strided_slice %1 {offsets = [0, 64], sizes = [128, 32], strides = [1, 1]} : vector<128x96xbf16> to vector<128x32xbf16>
    %cst_29 = arith.constant dense<0.000000e+00> : vector<128x32xf32>
    %46 = tpu.matmul %44, %45, %cst_29 {dimension_numbers = #tpu.dot_dimension_numbers<[1], [0], [0], [1], [0, 0, 1, 1], [], []>} : vector<128x128xbf16>, vector<128x32xbf16>, vector<128x32xf32> -> vector<128x32xf32>
    %47 = arith.addf %42, %46 : vector<128x32xf32>
    %c0_30 = arith.constant 0 : index
    %c0_31 = arith.constant 0 : index
    %48 = vector.load %arg3[%c0_30, %c0_31] : memref<128x1xf32, #tpu.memory_space<vmem>>, vector<128x1xf32>
    %49 = vector.broadcast %48 : vector<128x1xf32> to vector<128x32xf32>
    %50 = arith.addf %47, %49 : vector<128x32xf32>
    %cst_32 = arith.constant dense<0.000000e+00> : vector<32xf32>
    %51 = vector.multi_reduction <add>, %50, %cst_32 [0] : vector<128x32xf32> to vector<32xf32>
    %52 = vector.shape_cast %51 : vector<32xf32> to vector<1x32xf32>
    %cst_33 = arith.constant 1.280000e+02 : f32
    %53 = vector.broadcast %cst_33 : f32 to vector<1x32xf32>
    %54 = arith.divf %52, %53 : vector<1x32xf32>
    %c0_34 = arith.constant 0 : index
    %c0_35 = arith.constant 0 : index
    %c0_36 = arith.constant 0 : index
    %55 = vector.load %arg4[%c0_34, %c0_35, %c0_36] : memref<1x1x32xf32, #tpu.memory_space<vmem>>, vector<1x1x32xf32>
    %56 = vector.shape_cast %55 : vector<1x1x32xf32> to vector<1x32xf32>
    %57 = vector.shape_cast %54 : vector<1x32xf32> to vector<1x1x32xf32>
    tpu.vector_store %arg4[%c0_34, %c0_35, %c0_36], %57 {strides = array<i32>} : memref<1x1x32xf32, #tpu.memory_space<vmem>>, vector<1x1x32xf32>,
    return
  }
  func.func @transform_0(%arg0: i32) -> (i32, i32, i32) {
    %c0_i32 = arith.constant 0 : i32
    %c0_i32_0 = arith.constant 0 : i32
    %c0_i32_1 = arith.constant 0 : i32
    return %arg0, %c0_i32, %c0_i32_0 : i32, i32, i32
  }
  func.func @transform_1(%arg0: i32) -> (i32, i32, i32) {
    %c0_i32 = arith.constant 0 : i32
    %c0_i32_0 = arith.constant 0 : i32
    %c0_i32_1 = arith.constant 0 : i32
    %c0_i32_2 = arith.constant 0 : i32
    return %c0_i32, %c0_i32_0, %c0_i32_1 : i32, i32, i32
  }
  func.func @transform_2(%arg0: i32) -> (i32, i32) {
    %c0_i32 = arith.constant 0 : i32
    %c0_i32_0 = arith.constant 0 : i32
    %c0_i32_1 = arith.constant 0 : i32
    return %c0_i32, %c0_i32_0 : i32, i32
  }
  func.func @transform_3(%arg0: i32) -> (i32, i32, i32) {
    %c0_i32 = arith.constant 0 : i32
    %c0_i32_0 = arith.constant 0 : i32
    %c0_i32_1 = arith.constant 0 : i32
    return %arg0, %c0_i32, %c0_i32_0 : i32, i32, i32
  }
}

</mosaic_0001>

<bundles_post_ra>
// kernel: st_dis_forward.8
= control target key start
LH: loop header
LB: loop body
LE: loop exit
PB: predicated region body
PF: predicated region fallthrough
CT: control target
= control target key end

     0   :  { %s714_s15 = smov 0   ;;  %s716_s16 = smov 0   ;;  %s811_s0 = inlined_call_operand.vmem [shape: bf16[2,3,128], index: 0, kind: input, shape index: {}]   ;;  %s812_s1 = inlined_call_operand.vmem [shape: bf16[128,128], index: 1, kind: input, shape index: {}]   ;;  %s813_s2 = inlined_call_operand.vmem [shape: bf16[64,3], index: 2, kind: input, shape index: {}]   ;;  %s814_s3 = inlined_call_operand.vmem [shape: f32[64,1], index: 3, kind: input, shape index: {}]   ;;  %s815_s4 = inlined_call_operand.vmem [shape: bf16[2,64,128], index: 4, kind: output, shape index: {}]  }
   0x1   :  { %s718_s17 = smov 0  }
   0x2 LB: > { %s26_s18 = sadd.s32 1, %s681_s16  ;;  %p539_p0 = scmp.ge.s32.totalorder %s685_s17, 1  ;;  %s685_s17 = sphi %s718_s17, %s14_s17   ;;  %s681_s16 = sphi %s716_s16, %s817_s16   ;;  %s677_s15 = sphi %s714_s15, %s816_s15  }
   0x3   : > { %p28_p1 = scmp.ge.s32.totalorder %s26_s18, 2  ;;  %p180_p2 = scmp.lt.s32.totalorder %s685_s17, 3 }
   0x5   : > { %s819_s18 = smov (%p28_p1, %s26_s18), 0  ;;  %p181_p3 = pnand %p539_p0, %p180_p2 }
   0x6   : > { %p211_p4 = scmp.lt.s32.totalorder (!%p181_p3), %s677_s15, 1 }
   0x7   : > { %184 = sbr.rel (%p181_p3) target bundleno = 340 (0x154), region = 36 }
   0xc   : > { %v605_v0 = vld [vmem:[%s812_s1 + $0x38] sm:$0xff]  ;;  %v604_v1 = vld [vmem:[%s812_s1 + $0x30] sm:$0xff]  ;;  %v603_v2 = vld [vmem:[%s812_s1 + $0x28] sm:$0xff]  ;;  %s821_s15 = smov (!%p211_p4, %s677_s15), 1  ;;  %v687_v11 = vmov 0   ;;  %vm395_vm0 = vcmask 1040384  }
   0xd   : > { %292 = vmatpush.bf16.msra.mxu0 %v605_v0  ;;  %v602_v3 = vld [vmem:[%s812_s1 + $0x20] sm:$0xff]  ;;  %v601_v4 = vld [vmem:[%s812_s1 + $0x18] sm:$0xff]  ;;  %v600_v5 = vld [vmem:[%s812_s1 + $0x10] sm:$0xff]  ;;  %s540_s7 = sshll.u32 %s821_s15, 1  ;;  %661 = vset.pattern.permute.xlu1 %v687_v11  ;;  %vm396_vm1 = vcmask 1041408   ;;  %v688_v15 = vmov 65535  }
   0xe   : > { %v599_v6 = vld [vmem:[%s812_s1 + $0x8] sm:$0xff]  ;;  %v598_v7 = vld [vmem:[%s812_s1] sm:$0xff]  ;;  %s217_s12 = scalar_lea.vmem %s811_s0, %s540_s7  ;;  %v316_v9 = vld [vmem:[%s814_s3 + $0x10] sm:$0xff]  ;;  %660 = vset.pattern.permute.xlu0 %v687_v11  ;;  %662 = vset.pattern.permute.xlu2 %v687_v11  ;;  %v397_v16 = vsel %vm395_vm0, 4294967295, %v688_v15  ;;  %vm382_vm2 = vcmask 23552   ;;  %s597_s19 = sshll.u32 %s821_s15, 5 }
   0xf   : > { %v227_v8 = vld [vmem:[%s217_s12] sm:$0x3]  ;;  %334 = vperm.xlu1 %661, %v316_v9   ;;  %v317_v12 = vld [vmem:[%s814_s3 + $0x18] sm:$0xff]  ;;  %v315_v13 = vld [vmem:[%s814_s3 + $0x8] sm:$0xff]  ;;  %v398_v21 = vsel %vm396_vm1, %v397_v16, 0  ;;  %s225_s22 = scalar_lea.vmem %s815_s4, %s597_s19 }
  0x10   : > { %v314_v10 = vld [vmem:[%s814_s3] sm:$0xff]  ;;  %v321_v17 = vld [vmem:[%s814_s3 + $0x38] sm:$0xff]  ;;  %v320_v18 = vld [vmem:[%s814_s3 + $0x30] sm:$0xff] }
  0x11   : > { %293 = vmatpush.bf16.msra.mxu0 %v604_v1  ;;  %324 = vperm.xlu0 %660, %v314_v10   ;;  %v318_v14 = vld [vmem:[%s814_s3 + $0x20] sm:$0xff]  ;;  %v319_v19 = vld [vmem:[%s814_s3 + $0x28] sm:$0xff]  ;;  %v608_v25 = vld [vmem:[%s813_s2 + $0x10] sm:$0xff] }
  0x12   : > { %344 = vperm.xlu2 %662, %v318_v14   ;;  %v606_v24 = vld [vmem:[%s813_s2] sm:$0xff]  ;;  %v607_v27 = vld [vmem:[%s813_s2 + $0x8] sm:$0xff]  ;;  %v609_v28 = vld [vmem:[%s813_s2 + $0x18] sm:$0xff] }
  0x15   : > { %294 = vmatpush.bf16.msra.mxu0 %v603_v2 }
  0x17   : > { %339 = vperm.xlu1 %661, %v317_v12  }
  0x19   : > { %295 = vmatpush.bf16.msra.mxu0 %v602_v3  ;;  %329 = vperm.xlu0 %660, %v315_v13  }
  0x1a   : > { %349 = vperm.xlu2 %662, %v319_v19  }
  0x1d   : > { %296 = vmatpush.bf16.msra.mxu0 %v601_v4 }
  0x1f   : > { %359 = vperm.xlu1 %661, %v321_v17  }
  0x21   : > { %297 = vmatpush.bf16.msra.mxu0 %v600_v5  ;;  %354 = vperm.xlu0 %660, %v320_v18  }
  0x25   : > { %298 = vmatpush.bf16.msra.mxu0 %v599_v6 }
  0x29   : > { %299 = vmatpush.bf16.msra.mxu0 %v598_v7 }
  0x2c   : > { %300 = vmatmul.bf16.vlgmr.msra.gmra.mxu0 %v227_v8 }
  0x6c   : > { %v345_v31 = vpop.permute.xlu2 %344 }
  0x74   : > { %v350_v40 = vpop.permute.xlu2 %349 }
  0x81   : > { %v335_v37 = vpop.permute.xlu1 %334 }
  0x83   : > { %v325_v29 = vpop.permute.xlu0 %324 }
  0x89   : > { %v340_v49 = vpop.permute.xlu1 %339 }
  0x8b   : > { %v330_v34 = vpop.permute.xlu0 %329 }
  0x91   : > { %v360_v59 = vpop.permute.xlu1 %359 }
  0x93   : > { %v355_v56 = vpop.permute.xlu0 %354 }
  0xa9   : > { %v301_v20 = vpop.f32.mrf.mxu0 }
  0xaa   : > { %v313_v22 = vpack.c.bf16 %v301_v20, %v301_v20 }
  0xac   : > { %v400_v23 = vand.u32 %v398_v21, %v313_v22 }
  0xae   : > { %409 = vmatpush.bf16.msra.mxu1 %v400_v23  ;;  %633 = vmatpush.bf16.msra.mxu2 %v400_v23 }
  0xb1   : > { %v303_v26 = vpop.f32.mrf.mxu0  ;;  %591 = vmatmul.msk.bf16.vlgmr.msra.gmra.mxu1 %vm382_vm2, %v606_v24  ;;  %593 = vmatmul.msk.bf16.vlgmr.msra.gmra.mxu2 %vm382_vm2, %v608_v25 }
  0xc1   : > { %592 = vmatmul.msk.bf16.gmra.mxu1 %vm382_vm2, %v607_v27  ;;  %594 = vmatmul.msk.bf16.gmra.mxu2 %vm382_vm2, %v609_v28 }
 0x12e   : > { %v411_v30 = vpop.f32.mrf.mxu1 }
 0x12f   : > { %v412_v33 = vadd.f32 %v411_v30, %v325_v29 }
 0x131   : > { %v431_v38 = vmax.f32 %v412_v33, 0.0 }
 0x134   : > { %v421_v32 = vpop.f32.mrf.mxu2 }
 0x135   : > { %v422_v41 = vadd.f32 %v421_v32, %v345_v31 }
 0x136   : > { %v413_v35 = vpop.f32.mrf.mxu1 }
 0x137   : > { %v414_v36 = vadd.f32 %v413_v35, %v330_v34  ;;  %v435_v46 = vmax.f32 %v422_v41, 0.0 }
 0x139   : > { %v432_v39 = vmax.f32 %v414_v36, 0.0 }
 0x13b   : > { %v613_v42 = vpack.c.bf16 %v432_v39, %v431_v38 }
 0x13c   : > { %v423_v43 = vpop.f32.mrf.mxu2 }
 0x13d   : > { %614 = vst [vmem:[%s225_s22] sm:$0xff] %v613_v42   ;;  %v424_v44 = vadd.f32 %v423_v43, %v350_v40 }
 0x13e   : > { %v416_v45 = vpop.f32.mrf.mxu1 }
 0x13f   : > { %v436_v47 = vmax.f32 %v424_v44, 0.0  ;;  %v417_v51 = vadd.f32 %v416_v45, %v335_v37 }
 0x141   : > { %v623_v48 = vpack.c.bf16 %v436_v47, %v435_v46  ;;  %v433_v54 = vmax.f32 %v417_v51, 0.0 }
 0x143   : > { %631 = vst [vmem:[%s225_s22 + $0x10] sm:$0xff] %v623_v48  }
 0x144   : > { %v426_v50 = vpop.f32.mrf.mxu2 }
 0x145   : > { %v427_v57 = vadd.f32 %v426_v50, %v355_v56 }
 0x146   : > { %v418_v52 = vpop.f32.mrf.mxu1 }
 0x147   : > { %v419_v53 = vadd.f32 %v418_v52, %v340_v49  ;;  %v437_v62 = vmax.f32 %v427_v57, 0.0 }
 0x149   : > { %v434_v55 = vmax.f32 %v419_v53, 0.0 }
 0x14b   : > { %v618_v58 = vpack.c.bf16 %v434_v55, %v433_v54 }
 0x14c   : > { %v428_v60 = vpop.f32.mrf.mxu2 }
 0x14d   : > { %630 = vst [vmem:[%s225_s22 + $0x8] sm:$0xff] %v618_v58   ;;  %v429_v61 = vadd.f32 %v428_v60, %v360_v59 }
 0x14f   : > { %v438_v63 = vmax.f32 %v429_v61, 0.0 }
 0x151   : > { %v628_v0 = vpack.c.bf16 %v438_v63, %v437_v62 }
 0x153   : > { %632 = vst [vmem:[%s225_s22 + $0x18] sm:$0xff] %v628_v0  }
 0x154 PF: > { %s14_s17 = sadd.s32 1, %s685_s17   ;;  %s816_s15 = smov %s681_s16 }
 0x155   : > { %p11_p5 = scmp.ge.s32.totalorder %s14_s17, 4   ;;  %s817_s16 = smov %s819_s18 }
 0x157   :  { %13 = sbr.rel (!%p11_p5) target bundleno = 2 (0x2), region = 66 }

// kernel: st_dis_forward.10
= control target key start
LH: loop header
LB: loop body
LE: loop exit
PB: predicated region body
PF: predicated region fallthrough
CT: control target
= control target key end

     0   :  { %s794_s15 = smov 0   ;;  %s796_s16 = smov 0   ;;  %s898_s0 = inlined_call_operand.vmem [shape: bf16[2,64,128], index: 0, kind: input, shape index: {}]   ;;  %s899_s1 = inlined_call_operand.vmem [shape: bf16[128,128], index: 1, kind: input, shape index: {}]   ;;  %s900_s2 = inlined_call_operand.vmem [shape: bf16[64,64], index: 2, kind: input, shape index: {}]   ;;  %s901_s3 = inlined_call_operand.vmem [shape: f32[64,1], index: 3, kind: input, shape index: {}]   ;;  %s902_s4 = inlined_call_operand.vmem [shape: bf16[2,64,128], index: 4, kind: output, shape index: {}]  }
   0x1   :  { %s798_s17 = smov 0  }
   0x2 LB: > { %s26_s18 = sadd.s32 1, %s762_s16  ;;  %p588_p0 = scmp.ge.s32.totalorder %s766_s17, 1  ;;  %s766_s17 = sphi %s798_s17, %s14_s17   ;;  %s762_s16 = sphi %s796_s16, %s904_s16   ;;  %s758_s15 = sphi %s794_s15, %s903_s15  }
   0x3   : > { %p28_p1 = scmp.ge.s32.totalorder %s26_s18, 2  ;;  %p181_p2 = scmp.lt.s32.totalorder %s766_s17, 3 }
   0x5   : > { %s906_s18 = smov (%p28_p1, %s26_s18), 0  ;;  %p182_p3 = pnand %p588_p0, %p181_p2 }
   0x6   : > { %p213_p4 = scmp.lt.s32.totalorder (!%p182_p3), %s758_s15, 1 }
   0x7   : > { %185 = sbr.rel (%p182_p3) target bundleno = 396 (0x18c), region = 36 }
   0xc   : > { %v676_v0 = vld [vmem:[%s899_s1 + $0x38] sm:$0xff]  ;;  %v675_v1 = vld [vmem:[%s899_s1 + $0x30] sm:$0xff]  ;;  %v674_v2 = vld [vmem:[%s899_s1 + $0x28] sm:$0xff]  ;;  %s908_s15 = smov (!%p213_p4, %s758_s15), 1  ;;  %v768_v16 = vmov 0   ;;  %vm435_vm0 = vcmask 523264  }
   0xd   : > { %704 = vmatpush.bf16.msra.mxu2 %v676_v0  ;;  %326 = vmatpush.bf16.msra.mxu0 %v676_v0  ;;  %v673_v3 = vld [vmem:[%s899_s1 + $0x20] sm:$0xff]  ;;  %v672_v4 = vld [vmem:[%s899_s1 + $0x18] sm:$0xff]  ;;  %v671_v5 = vld [vmem:[%s899_s1 + $0x10] sm:$0xff]  ;;  %s663_s7 = sshll.u32 %s908_s15, 5 }
   0xe   : > { %v670_v6 = vld [vmem:[%s899_s1 + $0x8] sm:$0xff]  ;;  %v669_v7 = vld [vmem:[%s899_s1] sm:$0xff]  ;;  %s220_s12 = scalar_lea.vmem %s898_s0, %s663_s7  ;;  %742 = vset.pattern.permute.xlu1 %v768_v16  ;;  %741 = vset.pattern.permute.xlu0 %v768_v16  ;;  %v369_v21 = vld [vmem:[%s901_s3 + $0x10] sm:$0xff]  ;;  %s228_s22 = scalar_lea.vmem %s902_s4, %s663_s7 }
   0xf   : > { %v667_v8 = vld [vmem:[%s220_s12 + $0x10] sm:$0xff]  ;;  %v665_v9 = vld [vmem:[%s220_s12] sm:$0xff]  ;;  %v668_v10 = vld [vmem:[%s220_s12 + $0x18] sm:$0xff]  ;;  %743 = vset.pattern.permute.xlu2 %v768_v16  ;;  %387 = vperm.xlu1 %742, %v369_v21  }
  0x10   : > { %v666_v11 = vld [vmem:[%s220_s12 + $0x8] sm:$0xff]  ;;  %v367_v22 = vld [vmem:[%s901_s3] sm:$0xff]  ;;  %v370_v26 = vld [vmem:[%s901_s3 + $0x18] sm:$0xff] }
  0x11   : > { %705 = vmatpush.bf16.msra.mxu2 %v675_v1  ;;  %327 = vmatpush.bf16.msra.mxu0 %v675_v1  ;;  %v678_v28 = vld [vmem:[%s900_s2 + $0x8] sm:$0xff]  ;;  %v677_v29 = vld [vmem:[%s900_s2] sm:$0xff]  ;;  %v374_v31 = vld [vmem:[%s901_s3 + $0x38] sm:$0xff] }
  0x12   : > { %377 = vperm.xlu0 %741, %v367_v22   ;;  %v368_v30 = vld [vmem:[%s901_s3 + $0x8] sm:$0xff]  ;;  %v371_v32 = vld [vmem:[%s901_s3 + $0x20] sm:$0xff]  ;;  %v373_v33 = vld [vmem:[%s901_s3 + $0x30] sm:$0xff] }
  0x13   : > { %397 = vperm.xlu2 %743, %v371_v32   ;;  %v372_v34 = vld [vmem:[%s901_s3 + $0x28] sm:$0xff]  ;;  %v679_v35 = vld [vmem:[%s900_s2 + $0x10] sm:$0xff]  ;;  %v680_v36 = vld [vmem:[%s900_s2 + $0x18] sm:$0xff] }
  0x15   : > { %706 = vmatpush.bf16.msra.mxu2 %v674_v2  ;;  %328 = vmatpush.bf16.msra.mxu0 %v674_v2 }
  0x17   : > { %392 = vperm.xlu1 %742, %v370_v26  }
  0x19   : > { %707 = vmatpush.bf16.msra.mxu2 %v673_v3  ;;  %329 = vmatpush.bf16.msra.mxu0 %v673_v3 }
  0x1a   : > { %382 = vperm.xlu0 %741, %v368_v30  }
  0x1b   : > { %402 = vperm.xlu2 %743, %v372_v34  }
  0x1d   : > { %708 = vmatpush.bf16.msra.mxu2 %v672_v4  ;;  %330 = vmatpush.bf16.msra.mxu0 %v672_v4 }
  0x1f   : > { %412 = vperm.xlu1 %742, %v374_v31  }
  0x21   : > { %709 = vmatpush.bf16.msra.mxu2 %v671_v5  ;;  %331 = vmatpush.bf16.msra.mxu0 %v671_v5 }
  0x22   : > { %407 = vperm.xlu0 %741, %v373_v33  }
  0x25   : > { %710 = vmatpush.bf16.msra.mxu2 %v670_v6  ;;  %332 = vmatpush.bf16.msra.mxu0 %v670_v6 }
  0x29   : > { %711 = vmatpush.bf16.msra.mxu2 %v669_v7  ;;  %333 = vmatpush.bf16.msra.mxu0 %v669_v7 }
  0x2c   : > { %344 = vmatmul.bf16.vlgmr.msra.gmra.mxu2 %v667_v8  ;;  %334 = vmatmul.bf16.vlgmr.msra.gmra.mxu0 %v665_v9 }
  0x3c   : > { %349 = vmatmul.bf16.gmra.mxu2 %v668_v10  ;;  %339 = vmatmul.bf16.gmra.mxu0 %v666_v11 }
  0x6d   : > { %v398_v54 = vpop.permute.xlu2 %397 }
  0x75   : > { %v403_v57 = vpop.permute.xlu2 %402 }
  0x81   : > { %v388_v39 = vpop.permute.xlu1 %387 }
  0x84   : > { %v378_v37 = vpop.permute.xlu0 %377 }
  0x89   : > { %v393_v47 = vpop.permute.xlu1 %392 }
  0x8c   : > { %v383_v42 = vpop.permute.xlu0 %382 }
  0x91   : > { %v413_v3 = vpop.permute.xlu1 %412 }
  0x94   : > { %v408_v1 = vpop.permute.xlu0 %407 }
  0xa9   : > { %v335_v12 = vpop.f32.mrf.mxu0 }
  0xaf   : > { %v345_v13 = vpop.f32.mrf.mxu2 }
  0xb1   : > { %v337_v15 = vpop.f32.mrf.mxu0 }
  0xb2   : > { %v363_v27 = vpack.c.bf16 %v337_v15, %v335_v12 }
  0xb7   : > { %v347_v14 = vpop.f32.mrf.mxu2 }
  0xb8   : > { %v365_v23 = vpack.c.bf16 %v347_v14, %v345_v13 }
  0xb9   : > { %v340_v18 = vpop.f32.mrf.mxu0 }
  0xbf   : > { %v350_v17 = vpop.f32.mrf.mxu2 }
  0xc1   : > { %v342_v24 = vpop.f32.mrf.mxu0 }
  0xc2   : > { %v364_v25 = vpack.c.bf16 %v342_v24, %v340_v18 }
  0xc7   : > { %v352_v19 = vpop.f32.mrf.mxu2 }
  0xc8   : > { %v366_v20 = vpack.c.bf16 %v352_v19, %v350_v17 }
  0xca   : > { %452 = vmatpush.bf16.msra.mxu1 %v366_v20  ;;  %712 = vmatpush.bf16.msra.mxu3 %v366_v20 }
  0xce   : > { %453 = vmatpush.bf16.msra.mxu1 %v365_v23  ;;  %713 = vmatpush.bf16.msra.mxu3 %v365_v23 }
  0xd2   : > { %454 = vmatpush.bf16.msra.mxu1 %v364_v25  ;;  %714 = vmatpush.bf16.msra.mxu3 %v364_v25 }
  0xd6   : > { %455 = vmatpush.bf16.msra.mxu1 %v363_v27  ;;  %715 = vmatpush.bf16.msra.mxu3 %v363_v27 }
  0xd9   : > { %658 = vmatmul.msk.bf16.vlgmr.msra.gmra.mxu3 %vm435_vm0, %v678_v28  ;;  %657 = vmatmul.msk.bf16.vlgmr.msra.gmra.mxu1 %vm435_vm0, %v677_v29 }
  0xe9   : > { %659 = vmatmul.msk.bf16.gmra.mxu3 %vm435_vm0, %v679_v35 }
  0xf9   : > { %660 = vmatmul.msk.bf16.gmra.mxu3 %vm435_vm0, %v680_v36 }
 0x156   : > { %v457_v38 = vpop.f32.mrf.mxu1 }
 0x157   : > { %v458_v40 = vadd.f32 %v457_v38, %v378_v37 }
 0x159   : > { %v477_v44 = vmax.f32 %v458_v40, 0.0 }
 0x15c   : > { %v462_v41 = vpop.f32.mrf.mxu3 }
 0x15d   : > { %v463_v48 = vadd.f32 %v462_v41, %v388_v39 }
 0x15e   : > { %v459_v43 = vpop.f32.mrf.mxu1 }
 0x15f   : > { %v460_v45 = vadd.f32 %v459_v43, %v383_v42  ;;  %v479_v52 = vmax.f32 %v463_v48, 0.0 }
 0x161   : > { %v478_v46 = vmax.f32 %v460_v45, 0.0 }
 0x163   : > { %v684_v49 = vpack.c.bf16 %v478_v46, %v477_v44 }
 0x164   : > { %v464_v50 = vpop.f32.mrf.mxu3 }
 0x165   : > { %v465_v51 = vadd.f32 %v464_v50, %v393_v47  ;;  %685 = vst [vmem:[%s228_s22] sm:$0xff] %v684_v49  }
 0x167   : > { %v480_v53 = vmax.f32 %v465_v51, 0.0 }
 0x169   : > { %v689_v55 = vpack.c.bf16 %v480_v53, %v479_v52 }
 0x16b   : > { %701 = vst [vmem:[%s228_s22 + $0x8] sm:$0xff] %v689_v55  }
 0x16c   : > { %v467_v56 = vpop.f32.mrf.mxu3 }
 0x16d   : > { %v468_v58 = vadd.f32 %v467_v56, %v398_v54 }
 0x16f   : > { %v481_v61 = vmax.f32 %v468_v58, 0.0 }
 0x174   : > { %v469_v59 = vpop.f32.mrf.mxu3 }
 0x175   : > { %v470_v60 = vadd.f32 %v469_v59, %v403_v57 }
 0x177   : > { %v482_v62 = vmax.f32 %v470_v60, 0.0 }
 0x179   : > { %v694_v63 = vpack.c.bf16 %v482_v62, %v481_v61 }
 0x17b   : > { %702 = vst [vmem:[%s228_s22 + $0x10] sm:$0xff] %v694_v63  }
 0x17c   : > { %v472_v0 = vpop.f32.mrf.mxu3 }
 0x17d   : > { %v473_v2 = vadd.f32 %v472_v0, %v408_v1 }
 0x17f   : > { %v483_v6 = vmax.f32 %v473_v2, 0.0 }
 0x184   : > { %v474_v4 = vpop.f32.mrf.mxu3 }
 0x185   : > { %v475_v5 = vadd.f32 %v474_v4, %v413_v3 }
 0x187   : > { %v484_v7 = vmax.f32 %v475_v5, 0.0 }
 0x189   : > { %v699_v8 = vpack.c.bf16 %v484_v7, %v483_v6 }
 0x18b   : > { %703 = vst [vmem:[%s228_s22 + $0x18] sm:$0xff] %v699_v8  }
 0x18c PF: > { %s14_s17 = sadd.s32 1, %s766_s17   ;;  %s903_s15 = smov %s762_s16 }
 0x18d   : > { %p11_p5 = scmp.ge.s32.totalorder %s14_s17, 4   ;;  %s904_s16 = smov %s906_s18 }
 0x18f   :  { %13 = sbr.rel (!%p11_p5) target bundleno = 2 (0x2), region = 66 }

// kernel: st_dis_forward.9
= control target key start
LH: loop header
LB: loop body
LE: loop exit
PB: predicated region body
PF: predicated region fallthrough
CT: control target
= control target key end

     0   :  { %s1662_s12 = smov 0   ;;  %s2050_s0 = inlined_call_operand.vmem [shape: bf16[2,64,192], index: 0, kind: input, shape index: {}]   ;;  %s2051_s1 = inlined_call_operand.vmem [shape: bf16[9,64,64], index: 1, kind: input, shape index: {}]   ;;  %s2052_s2 = inlined_call_operand.vmem [shape: f32[64,1], index: 2, kind: input, shape index: {}]   ;;  %s2053_s3 = inlined_call_operand.vmem [shape: bf16[2,64,128], index: 3, kind: output, shape index: {}]  }
   0x1 LB: > { %s1237_s13 = sadd.s32 4294967295, %s1631_s12   ;;  %p1241_p0 = scmp.ge.s32.totalorder %s1631_s12, 1  ;;  %s1631_s12 = sphi %s1662_s12, %s13_s12  }
   0x2   : > { %p137_p1 = scmp.lt.s32.totalorder %s1631_s12, 3 }
   0x4   : > { %p138_p2 = pnand %p1241_p0, %p137_p1 }
   0x5   : > { %p161_p3 = scmp.lt.s32.totalorder (!%p138_p2), %s1237_s13, 1  ;;  %s1633_s18 = smov (!%p138_p2), 120  }
   0x6   : > { %141 = sbr.rel (%p138_p2) target bundleno = 497 (0x1f1), region = 32  ;;  %s1634_s19 = smov (!%p138_p2), 112  }
   0x7   : > { %s1635_s20 = smov (!%p138_p2), 104   ;;  %s1636_s21 = smov (!%p138_p2), 96  }
   0x8   : > { %s1637_s22 = smov (!%p138_p2), 80   ;;  %s1638_s23 = smov (!%p138_p2), 72  }
   0x9   : > { %s1639_s24 = smov (!%p138_p2), 88   ;;  %s1640_s25 = smov (!%p138_p2), 64  }
   0xb   : > { %s2055_s13 = smov (!%p161_p3, %s1237_s13), 1  ;;  %vm265_vm0 = vcmask 982016   ;;  %v1539_v40 = vld [vmem:[%s2051_s1 + $0x28] sm:$0xff]  ;;  %vm426_vm1 = vcmask 916480   ;;  %vm274_vm2 = vcmask 523264   ;;  %vm529_vm3 = vcmask 850944  }
   0xc   : > { %s1524_s14 = sshll.u32 %s2055_s13, 6  ;;  %v1540_v41 = vld [vmem:[%s2051_s1 + $0x30] sm:$0xff]  ;;  %v1541_v43 = vld [vmem:[%s2051_s1 + $0x38] sm:$0xff]  ;;  %v1538_v51 = vld [vmem:[%s2051_s1 + $0x20] sm:$0xff]  ;;  %vm632_vm4 = vcmask 785408   ;;  %vm838_vm5 = vcmask 654336  }
   0xd   : > { %s165_s17 = scalar_lea.vmem %s2050_s0, %s1524_s14  ;;  %v1534_v53 = vld [vmem:[%s2051_s1] sm:$0xff]  ;;  %v1535_v63 = vld [vmem:[%s2051_s1 + $0x8] sm:$0xff]  ;;  %vm941_vm6 = vcmask 588800   ;;  %vm735_vm7 = vcmask 719872   ;;  %s1525_s14 = sshll.u32 %s2055_s13, 5 }
   0xe   : > { %v1296_v0 = vld [vmem:[%s165_s17 + $0x30] sm:$0xf]  ;;  %v1533_v1 = vld [vmem:[%s165_s17 + $0x34] sm:$0xf0]  ;;  %v1288_v2 = vld [vmem:[%s165_s17 + $0x20] sm:$0xf] }
   0xf   : > { %v1676_v3 = vor.u32 %v1533_v1, %v1296_v0  ;;  %v1531_v4 = vld [vmem:[%s165_s17 + $0x24] sm:$0xf0]  ;;  %v1532_v6 = vld [vmem:[%s165_s17 + $0x34] sm:$0xf]  ;;  %v1298_v7 = vld [vmem:[%s165_s17 + $0x38] sm:$0xf0] }
  0x10   : > { %v1678_v5 = vor.u32 %v1531_v4, %v1288_v2  ;;  %v1280_v8 = vld [vmem:[%s165_s17 + $0x10] sm:$0xf]  ;;  %v1529_v9 = vld [vmem:[%s165_s17 + $0x14] sm:$0xf0]  ;;  %v1530_v10 = vld [vmem:[%s165_s17 + $0x24] sm:$0xf]  ;;  %v1684_v13 = vor.u32 %v1532_v6, %v1298_v7 }
  0x11   : > { %261 = vrot.lane.b32.xlu0 %v1676_v3, %s1633_s18  ;;  %v1290_v11 = vld [vmem:[%s165_s17 + $0x28] sm:$0xf0]  ;;  %v1682_v12 = vor.u32 %v1529_v9, %v1280_v8  ;;  %v1528_v15 = vld [vmem:[%s165_s17 + $0x14] sm:$0xf]  ;;  %v1282_v16 = vld [vmem:[%s165_s17 + $0x18] sm:$0xf0] }
  0x12   : > { %257 = vrot.lane.b32.xlu1 %v1678_v5, %s1633_s18  ;;  %v1687_v14 = vor.u32 %v1530_v10, %v1290_v11  ;;  %v1690_v17 = vor.u32 %v1528_v15, %v1282_v16  ;;  %v1272_v18 = vld [vmem:[%s165_s17] sm:$0xf]  ;;  %v1527_v19 = vld [vmem:[%s165_s17 + $0x4] sm:$0xf0]  ;;  %v1526_v20 = vld [vmem:[%s165_s17 + $0x4] sm:$0xf] }
  0x13   : > { %253 = vrot.lane.b32.xlu2 %v1682_v12, %s1633_s18  ;;  %v1274_v21 = vld [vmem:[%s165_s17 + $0x8] sm:$0xf0]  ;;  %v1693_v22 = vor.u32 %v1527_v19, %v1272_v18  ;;  %v1542_v4 = vld [vmem:[%s2051_s1 + $0x40] sm:$0xff]  ;;  %v1536_v10 = vld [vmem:[%s2051_s1 + $0x10] sm:$0xff]  ;;  %s2029_s17 = scalar_lea.vmem %s2053_s3, %s1525_s14 }
  0x14   : > { %v1696_v23 = vor.u32 %v1526_v20, %v1274_v21  ;;  %v1546_v9 = vld [vmem:[%s2051_s1 + $0x60] sm:$0xff]  ;;  %v1543_v15 = vld [vmem:[%s2051_s1 + $0x48] sm:$0xff] }
  0x15   : > { %v1547_v20 = vld [vmem:[%s2051_s1 + $0x68] sm:$0xff]  ;;  %v1550_v21 = vld [vmem:[%s2051_s1 + $0x80] sm:$0xff] }
  0x19   : > { %263 = vrot.lane.b32.xlu0 %v1684_v13, %s1633_s18 }
  0x1a   : > { %259 = vrot.lane.b32.xlu1 %v1687_v14, %s1633_s18 }
  0x1b   : > { %255 = vrot.lane.b32.xlu2 %v1690_v17, %s1633_s18 }
  0x21   : > { %249 = vrot.lane.b32.xlu0 %v1693_v22, %s1633_s18 }
  0x22   : > { %251 = vrot.lane.b32.xlu1 %v1696_v23, %s1633_s18 }
  0x23   : > { %422 = vrot.lane.b32.xlu2 %v1676_v3, %s1634_s19 }
  0x29   : > { %424 = vrot.lane.b32.xlu0 %v1684_v13, %s1634_s19 }
  0x2a   : > { %525 = vrot.lane.b32.xlu1 %v1676_v3, %s1635_s20 }
  0x2b   : > { %527 = vrot.lane.b32.xlu2 %v1684_v13, %s1635_s20 }
  0x31   : > { %418 = vrot.lane.b32.xlu0 %v1678_v5, %s1634_s19 }
  0x32   : > { %420 = vrot.lane.b32.xlu1 %v1687_v14, %s1634_s19 }
  0x33   : > { %521 = vrot.lane.b32.xlu2 %v1678_v5, %s1635_s20 }
  0x39   : > { %523 = vrot.lane.b32.xlu0 %v1687_v14, %s1635_s20 }
  0x3a   : > { %414 = vrot.lane.b32.xlu1 %v1682_v12, %s1634_s19 }
  0x3b   : > { %416 = vrot.lane.b32.xlu2 %v1690_v17, %s1634_s19 }
  0x41   : > { %517 = vrot.lane.b32.xlu0 %v1682_v12, %s1635_s20 }
  0x42   : > { %519 = vrot.lane.b32.xlu1 %v1690_v17, %s1635_s20 }
  0x43   : > { %628 = vrot.lane.b32.xlu2 %v1676_v3, %s1636_s21 }
  0x49   : > { %630 = vrot.lane.b32.xlu0 %v1684_v13, %s1636_s21 }
  0x4a   : > { %410 = vrot.lane.b32.xlu1 %v1693_v22, %s1634_s19 }
  0x4b   : > { %412 = vrot.lane.b32.xlu2 %v1696_v23, %s1634_s19 }
  0x51   : > { %513 = vrot.lane.b32.xlu0 %v1693_v22, %s1635_s20 }
  0x52   : > { %515 = vrot.lane.b32.xlu1 %v1696_v23, %s1635_s20 }
  0x53   : > { %624 = vrot.lane.b32.xlu2 %v1678_v5, %s1636_s21 }
  0x59   : > { %626 = vrot.lane.b32.xlu0 %v1687_v14, %s1636_s21 }
  0x5a   : > { %620 = vrot.lane.b32.xlu1 %v1682_v12, %s1636_s21 }
  0x5b   : > { %622 = vrot.lane.b32.xlu2 %v1690_v17, %s1636_s21 }
  0x61   : > { %616 = vrot.lane.b32.xlu0 %v1693_v22, %s1636_s21 }
  0x62   : > { %618 = vrot.lane.b32.xlu1 %v1696_v23, %s1636_s21 }
  0x63   : > { %834 = vrot.lane.b32.xlu2 %v1676_v3, %s1637_s22 }
  0x69   : > { %836 = vrot.lane.b32.xlu0 %v1684_v13, %s1637_s22 }
  0x6a   : > { %937 = vrot.lane.b32.xlu1 %v1676_v3, %s1638_s23 }
  0x6b   : > { %939 = vrot.lane.b32.xlu2 %v1684_v13, %s1638_s23 }
  0x6d   : > { %v254_v24 = vpop.permute.xlu2 %253 }
  0x71   : > { %731 = vrot.lane.b32.xlu0 %v1676_v3, %s1639_s24 }
  0x72   : > { %733 = vrot.lane.b32.xlu1 %v1684_v13, %s1639_s24 }
  0x73   : > { %830 = vrot.lane.b32.xlu2 %v1678_v5, %s1637_s22 }
  0x75   : > { %v256_v25 = vpop.permute.xlu2 %255 }
  0x76   : > { %v267_v36 = vsel %vm265_vm0, %v254_v24, %v256_v25 }
  0x79   : > { %832 = vrot.lane.b32.xlu0 %v1687_v14, %s1637_s22 }
  0x7a   : > { %933 = vrot.lane.b32.xlu1 %v1678_v5, %s1638_s23 }
  0x7b   : > { %935 = vrot.lane.b32.xlu2 %v1687_v14, %s1638_s23 }
  0x7d   : > { %v423_v26 = vpop.permute.xlu2 %422 }
  0x81   : > { %727 = vrot.lane.b32.xlu0 %v1678_v5, %s1639_s24 }
  0x82   : > { %729 = vrot.lane.b32.xlu1 %v1687_v14, %s1639_s24 }
  0x83   : > { %v262_v27 = vpop.permute.xlu0 %261  ;;  %826 = vrot.lane.b32.xlu2 %v1682_v12, %s1637_s22 }
  0x84   : > { %v258_v28 = vpop.permute.xlu1 %257 }
  0x85   : > { %v528_v29 = vpop.permute.xlu2 %527 }
  0x89   : > { %828 = vrot.lane.b32.xlu0 %v1690_v17, %s1637_s22 }
  0x8a   : > { %929 = vrot.lane.b32.xlu1 %v1682_v12, %s1638_s23 }
  0x8b   : > { %v264_v30 = vpop.permute.xlu0 %263  ;;  %931 = vrot.lane.b32.xlu2 %v1690_v17, %s1638_s23 }
  0x8c   : > { %v269_v31 = vsel %vm265_vm0, %v262_v27, %v264_v30  ;;  %v260_v32 = vpop.permute.xlu1 %259 }
  0x8d   : > { %291 = vmatpush.bf16.msra.mxu0 %v269_v31  ;;  %1593 = vmatpush.bf16.msra.mxu1 %v269_v31  ;;  %v522_v33 = vpop.permute.xlu2 %521  ;;  %v268_v34 = vsel %vm265_vm0, %v258_v28, %v260_v32  ;;  %v1544_v28 = vld [vmem:[%s2051_s1 + $0x50] sm:$0xff] }
  0x8e   : > { %1594 = vmatpush.bf16.msra.mxu2 %v269_v31  ;;  %1595 = vmatpush.bf16.msra.mxu3 %v269_v31 }
  0x91   : > { %292 = vmatpush.bf16.msra.mxu0 %v268_v34  ;;  %1596 = vmatpush.bf16.msra.mxu1 %v268_v34 }
  0x92   : > { %1597 = vmatpush.bf16.msra.mxu2 %v268_v34  ;;  %1598 = vmatpush.bf16.msra.mxu3 %v268_v34  ;;  %v1551_v34 = vld [vmem:[%s2051_s1 + $0x88] sm:$0xff] }
  0x93   : > { %1040 = vrot.lane.b32.xlu0 %v1676_v3, %s1640_s25  ;;  %1042 = vrot.lane.b32.xlu1 %v1684_v13, %s1640_s25  ;;  %v250_v35 = vpop.permute.xlu0 %249 }
  0x94   : > { %v252_v37 = vpop.permute.xlu1 %251  ;;  %723 = vrot.lane.b32.xlu2 %v1682_v12, %s1639_s24 }
  0x95   : > { %293 = vmatpush.bf16.msra.mxu0 %v267_v36  ;;  %1599 = vmatpush.bf16.msra.mxu1 %v267_v36  ;;  %v417_v38 = vpop.permute.xlu2 %416  ;;  %v266_v39 = vsel %vm265_vm0, %v250_v35, %v252_v37 }
  0x96   : > { %1600 = vmatpush.bf16.msra.mxu2 %v267_v36  ;;  %1601 = vmatpush.bf16.msra.mxu3 %v267_v36 }
  0x99   : > { %294 = vmatpush.bf16.msra.mxu0 %v266_v39  ;;  %1602 = vmatpush.bf16.msra.mxu1 %v266_v39 }
  0x9a   : > { %1603 = vmatpush.bf16.msra.mxu2 %v266_v39  ;;  %1604 = vmatpush.bf16.msra.mxu3 %v266_v39  ;;  %v1545_v39 = vld [vmem:[%s2051_s1 + $0x58] sm:$0xff] }
  0x9b   : > { %725 = vrot.lane.b32.xlu0 %v1690_v17, %s1639_s24  ;;  %822 = vrot.lane.b32.xlu1 %v1693_v22, %s1637_s22  ;;  %v425_v42 = vpop.permute.xlu0 %424 }
  0x9c   : > { %v526_v44 = vpop.permute.xlu1 %525  ;;  %v430_v45 = vsel %vm426_vm1, %v423_v26, %v425_v42  ;;  %1303 = vmatmul.msk.bf16.vlgmr.msra.gmra.mxu1 %vm274_vm2, %v1539_v40  ;;  %824 = vrot.lane.b32.xlu2 %v1696_v23, %s1637_s22 }
  0x9d   : > { %v533_v46 = vsel %vm529_vm3, %v526_v44, %v528_v29  ;;  %356 = vmatpush.bf16.msrb.mxu1 %v1676_v3  ;;  %1304 = vmatmul.msk.bf16.vlgmr.msra.gmra.mxu2 %vm274_vm2, %v1540_v41  ;;  %v629_v47 = vpop.permute.xlu2 %628 }
  0x9e   : > { %451 = vmatpush.bf16.msrb.mxu2 %v430_v45  ;;  %554 = vmatpush.bf16.msrb.mxu3 %v533_v46  ;;  %v1549_v45 = vld [vmem:[%s2051_s1 + $0x78] sm:$0xff]  ;;  %v1552_v46 = vld [vmem:[%s2051_s1 + $0x90] sm:$0xff] }
  0x9f   : > { %1305 = vmatmul.msk.bf16.vlgmr.msra.gmra.mxu3 %vm274_vm2, %v1541_v43  ;;  %1302 = vmatmul.msk.bf16.vlgmr.msra.gmra.mxu0 %vm274_vm2, %v1538_v51 }
  0xa1   : > { %357 = vmatpush.bf16.msrb.mxu1 %v1678_v5 }
  0xa3   : > { %925 = vrot.lane.b32.xlu0 %v1693_v22, %s1638_s23  ;;  %927 = vrot.lane.b32.xlu1 %v1696_v23, %s1638_s23  ;;  %v419_v48 = vpop.permute.xlu0 %418 }
  0xa4   : > { %v421_v49 = vpop.permute.xlu1 %420  ;;  %1036 = vrot.lane.b32.xlu2 %v1678_v5, %s1640_s25 }
  0xa5   : > { %v429_v50 = vsel %vm426_vm1, %v419_v48, %v421_v49  ;;  %358 = vmatpush.bf16.msrb.mxu1 %v1682_v12  ;;  %v413_v52 = vpop.permute.xlu2 %412 }
  0xa6   : > { %452 = vmatpush.bf16.msrb.mxu2 %v429_v50 }
  0xa9   : > { %359 = vmatpush.bf16.msrb.mxu1 %v1693_v22 }
  0xab   : > { %1038 = vrot.lane.b32.xlu0 %v1687_v14, %s1640_s25  ;;  %719 = vrot.lane.b32.xlu1 %v1693_v22, %s1639_s24  ;;  %v524_v54 = vpop.permute.xlu0 %523 }
  0xac   : > { %v415_v55 = vpop.permute.xlu1 %414  ;;  %v532_v56 = vsel %vm529_vm3, %v522_v33, %v524_v54  ;;  %1322 = vmatmul.msk.bf16.vlgmr.msrb.gmra.mxu1 %vm274_vm2, %v1534_v53  ;;  %721 = vrot.lane.b32.xlu2 %v1696_v23, %s1639_s24  ;;  %v1548_v33 = vld [vmem:[%s2051_s1 + $0x70] sm:$0xff]  ;;  %v1553_v54 = vld [vmem:[%s2051_s1 + $0x98] sm:$0xff] }
  0xad   : > { %555 = vmatpush.bf16.msrb.mxu3 %v532_v56  ;;  %v428_v57 = vsel %vm426_vm1, %v415_v55, %v417_v38  ;;  %v625_v58 = vpop.permute.xlu2 %624 }
  0xae   : > { %453 = vmatpush.bf16.msrb.mxu2 %v428_v57 }
  0xb3   : > { %1032 = vrot.lane.b32.xlu0 %v1682_v12, %s1640_s25  ;;  %v518_v59 = vpop.permute.xlu0 %517  ;;  %1034 = vrot.lane.b32.xlu1 %v1690_v17, %s1640_s25 }
  0xb4   : > { %v520_v60 = vpop.permute.xlu1 %519  ;;  %1028 = vrot.lane.b32.xlu2 %v1693_v22, %s1640_s25 }
  0xb5   : > { %v531_v61 = vsel %vm529_vm3, %v518_v59, %v520_v60  ;;  %v623_v62 = vpop.permute.xlu2 %622 }
  0xb6   : > { %556 = vmatpush.bf16.msrb.mxu3 %v531_v61  ;;  %v1558_v61 = vld [vmem:[%s2051_s1 + $0xc0] sm:$0xff] }
  0xbb   : > { %1030 = vrot.lane.b32.xlu0 %v1696_v23, %s1640_s25  ;;  %v631_v0 = vpop.permute.xlu0 %630  ;;  %v1537_v23 = vld [vmem:[%s2051_s1 + $0x18] sm:$0xff] }
  0xbc   : > { %v411_v1 = vpop.permute.xlu1 %410  ;;  %v636_v2 = vsel %vm632_vm4, %v629_v47, %v631_v0  ;;  %1323 = vmatmul.msk.bf16.gmra.mxu1 %vm274_vm2, %v1535_v63  ;;  %v1641_v63 = vmov 0   ;;  %v1102_v0 = vld [vmem:[%s2052_s2] sm:$0xff] }
  0xbd   : > { %v427_v3 = vsel %vm426_vm1, %v411_v1, %v413_v52  ;;  %657 = vmatpush.bf16.msrb.mxu0 %v636_v2  ;;  %v835_v5 = vpop.permute.xlu2 %834  ;;  %1622 = vset.pattern.permute.xlu1 %v1641_v63 }
  0xbe   : > { %454 = vmatpush.bf16.msrb.mxu2 %v427_v3  ;;  %1624 = vset.pattern.permute.xlu0 %v1641_v63 }
  0xbf   : > { %1112 = vperm.xlu1 %1622, %v1102_v0   ;;  %1623 = vset.pattern.permute.xlu2 %v1641_v63 }
  0xc1   : > { %1350 = vmatmul.msk.bf16.vlgmr.msrb.gmra.mxu2 %vm274_vm2, %v1542_v4  ;;  %v1562_v4 = vld [vmem:[%s2051_s1 + $0xe0] sm:$0xff] }
  0xc3   : > { %v514_v6 = vpop.permute.xlu0 %513 }
  0xc4   : > { %v516_v7 = vpop.permute.xlu1 %515 }
  0xc5   : > { %v530_v8 = vsel %vm529_vm3, %v514_v6, %v516_v7  ;;  %v940_v12 = vpop.permute.xlu2 %939 }
  0xc6   : > { %557 = vmatpush.bf16.msrb.mxu3 %v530_v8 }
  0xc9   : > { %1378 = vmatmul.msk.bf16.vlgmr.msrb.gmra.mxu3 %vm274_vm2, %v1546_v9 }
  0xcb   : > { %v627_v11 = vpop.permute.xlu0 %626 }
  0xcc   : > { %v621_v13 = vpop.permute.xlu1 %620  ;;  %v635_v14 = vsel %vm632_vm4, %v625_v58, %v627_v11  ;;  %1324 = vmatmul.msk.bf16.gmra.mxu1 %vm274_vm2, %v1536_v10  ;;  %v1554_v11 = vld [vmem:[%s2051_s1 + $0xa0] sm:$0xff] }
  0xcd   : > { %658 = vmatpush.bf16.msrb.mxu0 %v635_v14  ;;  %v634_v16 = vsel %vm632_vm4, %v621_v13, %v623_v62  ;;  %v831_v22 = vpop.permute.xlu2 %830 }
  0xd1   : > { %1351 = vmatmul.msk.bf16.gmra.mxu2 %vm274_vm2, %v1543_v15  ;;  %659 = vmatpush.bf16.msrb.mxu0 %v634_v16 }
  0xd3   : > { %v617_v17 = vpop.permute.xlu0 %616 }
  0xd4   : > { %v619_v18 = vpop.permute.xlu1 %618 }
  0xd5   : > { %v633_v19 = vsel %vm632_vm4, %v617_v17, %v619_v18  ;;  %v936_v29 = vpop.permute.xlu2 %935  ;;  %v1563_v17 = vld [vmem:[%s2051_s1 + $0xe8] sm:$0xff] }
  0xd6   : > { %660 = vmatpush.bf16.msrb.mxu0 %v633_v19 }
  0xd9   : > { %1379 = vmatmul.msk.bf16.gmra.mxu3 %vm274_vm2, %v1547_v20  ;;  %1406 = vmatmul.msk.bf16.vlgmr.msrb.gmra.mxu0 %vm274_vm2, %v1550_v21 }
  0xdb   : > { %v837_v24 = vpop.permute.xlu0 %836 }
  0xdc   : > { %v842_v25 = vsel %vm838_vm5, %v835_v5, %v837_v24  ;;  %v938_v26 = vpop.permute.xlu1 %937  ;;  %1325 = vmatmul.msk.bf16.gmra.mxu1 %vm274_vm2, %v1537_v23  ;;  %v1104_v23 = vld [vmem:[%s2052_s2 + $0x10] sm:$0xff] }
  0xdd   : > { %v945_v27 = vsel %vm941_vm6, %v938_v26, %v940_v12  ;;  %863 = vmatpush.bf16.msra.mxu2 %v842_v25  ;;  %v827_v35 = vpop.permute.xlu2 %826  ;;  %v1559_v12 = vld [vmem:[%s2051_s1 + $0xc8] sm:$0xff]  ;;  %v1566_v26 = vld [vmem:[%s2051_s1 + $0x100] sm:$0xff]  ;;  %1122 = vperm.xlu0 %1624, %v1104_v23  }
  0xde   : > { %966 = vmatpush.bf16.msra.mxu3 %v945_v27  ;;  %v1555_v25 = vld [vmem:[%s2051_s1 + $0xa8] sm:$0xff]  ;;  %v1560_v27 = vld [vmem:[%s2051_s1 + $0xd0] sm:$0xff] }
  0xe1   : > { %1352 = vmatmul.msk.bf16.gmra.mxu2 %vm274_vm2, %v1544_v28 }
  0xe3   : > { %v732_v30 = vpop.permute.xlu0 %731 }
  0xe4   : > { %v734_v31 = vpop.permute.xlu1 %733 }
  0xe5   : > { %v739_v32 = vsel %vm735_vm7, %v732_v30, %v734_v31  ;;  %v932_v42 = vpop.permute.xlu2 %931  ;;  %v1105_v30 = vld [vmem:[%s2052_s2 + $0x18] sm:$0xff]  ;;  %v1564_v31 = vld [vmem:[%s2051_s1 + $0xf0] sm:$0xff] }
  0xe6   : > { %760 = vmatpush.bf16.msra.mxu1 %v739_v32  ;;  %1127 = vperm.xlu1 %1622, %v1105_v30  }
  0xe9   : > { %1380 = vmatmul.msk.bf16.gmra.mxu3 %vm274_vm2, %v1548_v33  ;;  %1407 = vmatmul.msk.bf16.gmra.mxu0 %vm274_vm2, %v1551_v34 }
  0xeb   : > { %v833_v36 = vpop.permute.xlu0 %832 }
  0xec   : > { %v934_v37 = vpop.permute.xlu1 %933  ;;  %v841_v38 = vsel %vm838_vm5, %v831_v22, %v833_v36  ;;  %v1103_v36 = vld [vmem:[%s2052_s2 + $0x8] sm:$0xff] }
  0xed   : > { %864 = vmatpush.bf16.msra.mxu2 %v841_v38  ;;  %v944_v40 = vsel %vm941_vm6, %v934_v37, %v936_v29  ;;  %v1556_v37 = vld [vmem:[%s2051_s1 + $0xb0] sm:$0xff]  ;;  %v1567_v38 = vld [vmem:[%s2051_s1 + $0x108] sm:$0xff]  ;;  %1117 = vperm.xlu2 %1623, %v1103_v36  }
  0xee   : > { %967 = vmatpush.bf16.msra.mxu3 %v944_v40  ;;  %v724_v50 = vpop.permute.xlu2 %723 }
  0xf1   : > { %1353 = vmatmul.msk.bf16.gmra.mxu2 %vm274_vm2, %v1545_v39  ;;  %v1561_v39 = vld [vmem:[%s2051_s1 + $0xd8] sm:$0xff] }
  0xf3   : > { %v728_v41 = vpop.permute.xlu0 %727 }
  0xf4   : > { %v730_v43 = vpop.permute.xlu1 %729 }
  0xf5   : > { %v738_v44 = vsel %vm735_vm7, %v728_v41, %v730_v43 }
  0xf6   : > { %761 = vmatpush.bf16.msra.mxu1 %v738_v44  ;;  %v825_v56 = vpop.permute.xlu2 %824  ;;  %v1107_v44 = vld [vmem:[%s2052_s2 + $0x28] sm:$0xff] }
  0xf7   : > { %1137 = vperm.xlu1 %1622, %v1107_v44  }
  0xf9   : > { %1381 = vmatmul.msk.bf16.gmra.mxu3 %vm274_vm2, %v1549_v45  ;;  %1408 = vmatmul.msk.bf16.gmra.mxu0 %vm274_vm2, %v1552_v46  ;;  %v1565_v45 = vld [vmem:[%s2051_s1 + $0xf8] sm:$0xff] }
  0xfb   : > { %v829_v47 = vpop.permute.xlu0 %828 }
  0xfc   : > { %v930_v48 = vpop.permute.xlu1 %929  ;;  %v840_v49 = vsel %vm838_vm5, %v827_v35, %v829_v47 }
  0xfd   : > { %865 = vmatpush.bf16.msra.mxu2 %v840_v49  ;;  %v943_v51 = vsel %vm941_vm6, %v930_v48, %v932_v42 }
  0xfe   : > { %968 = vmatpush.bf16.msra.mxu3 %v943_v51  ;;  %v1037_v62 = vpop.permute.xlu2 %1036 }
 0x105   : > { %v1041_v52 = vpop.permute.xlu0 %1040  ;;  %v1043_v53 = vpop.permute.xlu1 %1042 }
 0x106   : > { %v1048_v55 = vsel %vm274_vm2, %v1041_v52, %v1043_v53  ;;  %v722_v6 = vpop.permute.xlu2 %721  ;;  %v1557_v52 = vld [vmem:[%s2051_s1 + $0xb8] sm:$0xff]  ;;  %v1568_v53 = vld [vmem:[%s2051_s1 + $0x110] sm:$0xff] }
 0x107   : > { %1069 = vmatpush.bf16.msra.mxu0 %v1048_v55 }
 0x109   : > { %1409 = vmatmul.msk.bf16.gmra.mxu0 %vm274_vm2, %v1553_v54  ;;  %v1109_v54 = vld [vmem:[%s2052_s2 + $0x38] sm:$0xff] }
 0x10a   : > { %1147 = vperm.xlu0 %1624, %v1109_v54  }
 0x10d   : > { %v726_v57 = vpop.permute.xlu0 %725  ;;  %v823_v58 = vpop.permute.xlu1 %822 }
 0x10e   : > { %v737_v59 = vsel %vm735_vm7, %v724_v50, %v726_v57  ;;  %v839_v60 = vsel %vm838_vm5, %v823_v58, %v825_v56  ;;  %v1029_v21 = vpop.permute.xlu2 %1028 }
 0x10f   : > { %762 = vmatpush.bf16.msra.mxu1 %v737_v59  ;;  %866 = vmatpush.bf16.msra.mxu2 %v839_v60  ;;  %v1106_v59 = vld [vmem:[%s2052_s2 + $0x20] sm:$0xff] }
 0x110   : > { %1132 = vperm.xlu2 %1623, %v1106_v59  }
 0x112   : > { %1462 = vmatmul.msk.bf16.vlgmr.msra.gmra.mxu2 %vm274_vm2, %v1558_v61 }
 0x115   : > { %v926_v1 = vpop.permute.xlu0 %925  ;;  %v928_v2 = vpop.permute.xlu1 %927 }
 0x116   : > { %v942_v3 = vsel %vm941_vm6, %v926_v1, %v928_v2 }
 0x117   : > { %969 = vmatpush.bf16.msra.mxu3 %v942_v3 }
 0x119   : > { %v301_v5 = vpop.f32.mrf.mxu1 }
 0x11a   : > { %1490 = vmatmul.msk.bf16.vlgmr.msra.gmra.mxu3 %vm274_vm2, %v1562_v4  ;;  %v1569_v4 = vld [vmem:[%s2051_s1 + $0x118] sm:$0xff] }
 0x11c   : > { %v296_v19 = vpop.f32.mrf.mxu0 }
 0x11d   : > { %v1039_v7 = vpop.permute.xlu0 %1038  ;;  %v720_v8 = vpop.permute.xlu1 %719 }
 0x11e   : > { %v736_v9 = vsel %vm735_vm7, %v720_v8, %v722_v6  ;;  %v1047_v10 = vsel %vm274_vm2, %v1037_v62, %v1039_v7 }
 0x11f   : > { %763 = vmatpush.bf16.msra.mxu1 %v736_v9  ;;  %1070 = vmatpush.bf16.msra.mxu0 %v1047_v10 }
 0x120   : > { %v306_v28 = vpop.f32.mrf.mxu2 }
 0x121   : > { %v1919_v13 = vpop.f32.mrf.mxu1 }
 0x122   : > { %1434 = vmatmul.msk.bf16.vlgmr.msra.gmra.mxu1 %vm274_vm2, %v1554_v11  ;;  %1463 = vmatmul.msk.bf16.gmra.mxu2 %vm274_vm2, %v1559_v12  ;;  %v311_v32 = vpop.f32.mrf.mxu3 }
 0x124   : > { %v298_v48 = vpop.f32.mrf.mxu0 }
 0x125   : > { %v1033_v14 = vpop.permute.xlu0 %1032  ;;  %v1035_v15 = vpop.permute.xlu1 %1034 }
 0x126   : > { %v1046_v16 = vsel %vm274_vm2, %v1033_v14, %v1035_v15 }
 0x127   : > { %1071 = vmatpush.bf16.msra.mxu0 %v1046_v16 }
 0x128   : > { %v1952_v34 = vpop.f32.mrf.mxu2 }
 0x129   : > { %v361_v18 = vpop.f32.mrf.mxu1 }
 0x12a   : > { %1491 = vmatmul.msk.bf16.gmra.mxu3 %vm274_vm2, %v1563_v17  ;;  %v362_v20 = vadd.f32 %v361_v18, %v296_v19  ;;  %v1971_v41 = vpop.f32.mrf.mxu3 }
 0x12d   : > { %v1031_v22 = vpop.permute.xlu0 %1030 }
 0x12e   : > { %v1045_v24 = vsel %vm274_vm2, %v1029_v21, %v1031_v22 }
 0x12f   : > { %1072 = vmatpush.bf16.msra.mxu0 %v1045_v24 }
 0x131   : > { %v1941_v29 = vpop.f32.mrf.mxu1 }
 0x132   : > { %1435 = vmatmul.msk.bf16.gmra.mxu1 %vm274_vm2, %v1555_v25  ;;  %1518 = vmatmul.msk.bf16.vlgmr.msra.gmra.mxu0 %vm274_vm2, %v1566_v26 }
 0x133   : > { %1464 = vmatmul.msk.bf16.gmra.mxu2 %vm274_vm2, %v1560_v27 }
 0x139   : > { %v366_v33 = vpop.f32.mrf.mxu1 }
 0x13a   : > { %1492 = vmatmul.msk.bf16.gmra.mxu3 %vm274_vm2, %v1564_v31  ;;  %v367_v35 = vadd.f32 %v366_v33, %v301_v5  ;;  %v1108_v5 = vld [vmem:[%s2052_s2 + $0x30] sm:$0xff]  ;;  %v364_v33 = vadd.f32 %v1941_v29, %v298_v48  ;;  %v1113_v29 = vpop.permute.xlu1 %1112 }
 0x13b   : > { %1142 = vperm.xlu2 %1623, %v1108_v5  }
 0x141   : > { %v1967_v40 = vpop.f32.mrf.mxu1 }
 0x142   : > { %1436 = vmatmul.msk.bf16.gmra.mxu1 %vm274_vm2, %v1556_v37  ;;  %1519 = vmatmul.msk.bf16.gmra.mxu0 %vm274_vm2, %v1567_v38  ;;  %v369_v48 = vadd.f32 %v1967_v40, %v1919_v13 }
 0x143   : > { %1465 = vmatmul.msk.bf16.gmra.mxu2 %vm274_vm2, %v1561_v39 }
 0x144   : > { %v456_v42 = vpop.f32.mrf.mxu2 }
 0x145   : > { %v476_v43 = vadd.f32 %v456_v42, %v362_v20 }
 0x149   : > { %v371_v46 = vpop.f32.mrf.mxu1 }
 0x14a   : > { %1493 = vmatmul.msk.bf16.gmra.mxu3 %vm274_vm2, %v1565_v45  ;;  %v372_v47 = vadd.f32 %v371_v46, %v306_v28 }
 0x14c   : > { %v458_v49 = vpop.f32.mrf.mxu2  ;;  %v559_v50 = vpop.f32.mrf.mxu3 }
 0x14d   : > { %v579_v51 = vadd.f32 %v559_v50, %v476_v43  ;;  %v477_v36 = vadd.f32 %v458_v49, %v364_v33 }
 0x151   : > { %v1990_v55 = vpop.f32.mrf.mxu1 }
 0x152   : > { %1437 = vmatmul.msk.bf16.gmra.mxu1 %vm274_vm2, %v1557_v52  ;;  %1520 = vmatmul.msk.bf16.gmra.mxu0 %vm274_vm2, %v1568_v53 }
 0x154   : > { %v461_v56 = vpop.f32.mrf.mxu2  ;;  %v561_v57 = vpop.f32.mrf.mxu3 }
 0x155   : > { %v478_v58 = vadd.f32 %v461_v56, %v367_v35  ;;  %v580_v42 = vadd.f32 %v561_v57, %v477_v36 }
 0x156   : > { %v662_v60 = vpop.f32.mrf.mxu0 }
 0x157   : > { %v682_v61 = vadd.f32 %v662_v60, %v579_v51 }
 0x159   : > { %v376_v62 = vpop.f32.mrf.mxu1 }
 0x15a   : > { %v377_v63 = vadd.f32 %v376_v62, %v311_v32 }
 0x15c   : > { %v463_v0 = vpop.f32.mrf.mxu2  ;;  %v564_v1 = vpop.f32.mrf.mxu3 }
 0x15d   : > { %v581_v2 = vadd.f32 %v564_v1, %v478_v58  ;;  %v1118_v58 = vpop.permute.xlu2 %1117 }
 0x15e   : > { %v664_v3 = vpop.f32.mrf.mxu0 }
 0x15f   : > { %v683_v44 = vadd.f32 %v664_v3, %v580_v42 }
 0x161   : > { %v2018_v28 = vpop.f32.mrf.mxu1 }
 0x162   : > { %1521 = vmatmul.msk.bf16.gmra.mxu0 %vm274_vm2, %v1569_v4 }
 0x164   : > { %v466_v6 = vpop.f32.mrf.mxu2  ;;  %v566_v7 = vpop.f32.mrf.mxu3 }
 0x165   : > { %v480_v8 = vadd.f32 %v466_v6, %v372_v47 }
 0x166   : > { %v667_v9 = vpop.f32.mrf.mxu0 }
 0x167   : > { %v684_v10 = vadd.f32 %v667_v9, %v581_v2 }
 0x16c   : > { %v2004_v11 = vpop.f32.mrf.mxu2  ;;  %v569_v12 = vpop.f32.mrf.mxu3 }
 0x16d   : > { %v583_v14 = vadd.f32 %v569_v12, %v480_v8 }
 0x16e   : > { %v669_v15 = vpop.f32.mrf.mxu0 }
 0x174   : > { %v471_v16 = vpop.f32.mrf.mxu2  ;;  %v2006_v17 = vpop.f32.mrf.mxu3 }
 0x175   : > { %v482_v18 = vadd.f32 %v471_v16, %v377_v63 }
 0x176   : > { %v672_v19 = vpop.f32.mrf.mxu0 }
 0x177   : > { %v2008_v20 = vadd.f32 %v672_v19, %v583_v14  ;;  %v374_v19 = vadd.f32 %v1990_v55, %v1952_v34 }
 0x17c   : > { %v574_v21 = vpop.f32.mrf.mxu3  ;;  %v2014_v26 = vpop.f32.mrf.mxu2 }
 0x17d   : > { %v585_v22 = vadd.f32 %v574_v21, %v482_v18  ;;  %v1123_v18 = vpop.permute.xlu0 %1122 }
 0x17e   : > { %v2010_v23 = vpop.f32.mrf.mxu0 }
 0x184   : > { %v2016_v27 = vpop.f32.mrf.mxu3 }
 0x186   : > { %v677_v24 = vpop.f32.mrf.mxu0 }
 0x187   : > { %v2012_v25 = vadd.f32 %v677_v24, %v585_v22  ;;  %v1128_v22 = vpop.permute.xlu1 %1127 }
 0x18e   : > { %v2021_v37 = vpop.f32.mrf.mxu0 }
 0x195   : > { %v868_v30 = vpop.f32.mrf.mxu2 }
 0x19d   : > { %v971_v31 = vpop.f32.mrf.mxu3  ;;  %v870_v35 = vpop.f32.mrf.mxu2 }
 0x19f   : > { %v765_v32 = vpop.f32.mrf.mxu1 }
 0x1a0   : > { %v785_v43 = vadd.f32 %v765_v32, %v682_v61  ;;  %v479_v61 = vadd.f32 %v463_v0, %v369_v48 }
 0x1a2   : > { %v888_v46 = vadd.f32 %v868_v30, %v785_v43  ;;  %v582_v1 = vadd.f32 %v566_v7, %v479_v61 }
 0x1a4   : > { %v991_v53 = vadd.f32 %v971_v31, %v888_v46  ;;  %v685_v5 = vadd.f32 %v669_v15, %v582_v1  ;;  %v481_v31 = vadd.f32 %v2004_v11, %v374_v19 }
 0x1a5   : > { %v973_v39 = vpop.f32.mrf.mxu3  ;;  %v873_v45 = vpop.f32.mrf.mxu2 }
 0x1a7   : > { %v767_v38 = vpop.f32.mrf.mxu1 }
 0x1a8   : > { %v786_v47 = vadd.f32 %v767_v38, %v683_v44 }
 0x1aa   : > { %v889_v54 = vadd.f32 %v870_v35, %v786_v47  ;;  %v584_v35 = vadd.f32 %v2006_v17, %v481_v31 }
 0x1ac   : > { %v992_v49 = vadd.f32 %v973_v39, %v889_v54  ;;  %v687_v42 = vadd.f32 %v2010_v23, %v584_v35  ;;  %v1138_v23 = vpop.permute.xlu1 %1137 }
 0x1ad   : > { %v976_v52 = vpop.f32.mrf.mxu3  ;;  %v875_v59 = vpop.f32.mrf.mxu2 }
 0x1af   : > { %v770_v50 = vpop.f32.mrf.mxu1  ;;  %v1074_v51 = vpop.f32.mrf.mxu0 }
 0x1b0   : > { %v1094_v56 = vadd.f32 %v1074_v51, %v991_v53  ;;  %v787_v2 = vadd.f32 %v770_v50, %v684_v10  ;;  %v1133_v53 = vpop.permute.xlu2 %1132 }
 0x1b2   : > { %v1150_v62 = vadd.f32 %v1113_v29, %v1094_v56  ;;  %v890_v13 = vadd.f32 %v873_v45, %v787_v2 }
 0x1b4   : > { %v1158_v6 = vmax.f32 %v1150_v62, 0.0  ;;  %v993_v10 = vadd.f32 %v976_v52, %v890_v13 }
 0x1b5   : > { %v978_v4 = vpop.f32.mrf.mxu3 }
 0x1b6   : > { %v878_v7 = vpop.f32.mrf.mxu2 }
 0x1b7   : > { %v772_v57 = vpop.f32.mrf.mxu1  ;;  %v1076_v60 = vpop.f32.mrf.mxu0 }
 0x1b8   : > { %v1095_v63 = vadd.f32 %v1076_v60, %v992_v49  ;;  %v788_v40 = vadd.f32 %v772_v57, %v685_v5  ;;  %v1143_v13 = vpop.permute.xlu2 %1142 }
 0x1ba   : > { %v1151_v3 = vadd.f32 %v1118_v58, %v1095_v63  ;;  %v891_v14 = vadd.f32 %v875_v59, %v788_v40 }
 0x1bc   : > { %v1159_v8 = vmax.f32 %v1151_v3, 0.0  ;;  %v994_v21 = vadd.f32 %v978_v4, %v891_v14 }
 0x1bd   : > { %v981_v15 = vpop.f32.mrf.mxu3 }
 0x1be   : > { %v1573_v9 = vpack.c.bf16 %v1159_v8, %v1158_v6  ;;  %v880_v39 = vpop.f32.mrf.mxu2 }
 0x1bf   : > { %v775_v0 = vpop.f32.mrf.mxu1  ;;  %v1079_v12 = vpop.f32.mrf.mxu0 }
 0x1c0   : > { %1574 = vst [vmem:[%s2029_s17] sm:$0xff] %v1573_v9   ;;  %v1096_v16 = vadd.f32 %v1079_v12, %v993_v10  ;;  %v789_v36 = vadd.f32 %v775_v0, %v2008_v20  ;;  %v379_v20 = vadd.f32 %v2018_v28, %v1971_v41  ;;  %v1148_v0 = vpop.permute.xlu0 %1147 }
 0x1c2   : > { %v1152_v32 = vadd.f32 %v1123_v18, %v1096_v16  ;;  %v892_v34 = vadd.f32 %v878_v7, %v789_v36  ;;  %v483_v29 = vadd.f32 %v2014_v26, %v379_v20 }
 0x1c4   : > { %v1160_v43 = vmax.f32 %v1152_v32, 0.0  ;;  %v995_v11 = vadd.f32 %v981_v15, %v892_v34  ;;  %v586_v59 = vadd.f32 %v2016_v27, %v483_v29 }
 0x1c5   : > { %v983_v46 = vpop.f32.mrf.mxu3 }
 0x1c6   : > { %v883_v17 = vpop.f32.mrf.mxu2  ;;  %v689_v62 = vadd.f32 %v2021_v37, %v586_v59 }
 0x1c7   : > { %v777_v24 = vpop.f32.mrf.mxu1  ;;  %v1081_v30 = vpop.f32.mrf.mxu0 }
 0x1c8   : > { %v1097_v33 = vadd.f32 %v1081_v30, %v994_v21  ;;  %v790_v55 = vadd.f32 %v777_v24, %v687_v42 }
 0x1ca   : > { %v1153_v38 = vadd.f32 %v1128_v22, %v1097_v33  ;;  %v893_v51 = vadd.f32 %v880_v39, %v790_v55 }
 0x1cc   : > { %v1161_v44 = vmax.f32 %v1153_v38, 0.0  ;;  %v996_v54 = vadd.f32 %v983_v46, %v893_v51 }
 0x1cd   : > { %v986_v58 = vpop.f32.mrf.mxu3 }
 0x1ce   : > { %v1578_v45 = vpack.c.bf16 %v1161_v44, %v1160_v43  ;;  %v885_v3 = vpop.f32.mrf.mxu2 }
 0x1cf   : > { %v1084_v47 = vpop.f32.mrf.mxu0  ;;  %v780_v50 = vpop.f32.mrf.mxu1 }
 0x1d0   : > { %1590 = vst [vmem:[%s2029_s17 + $0x8] sm:$0xff] %v1578_v45   ;;  %v1098_v52 = vadd.f32 %v1084_v47, %v995_v11  ;;  %v791_v57 = vadd.f32 %v780_v50, %v2012_v25 }
 0x1d2   : > { %v1154_v48 = vadd.f32 %v1133_v53, %v1098_v52  ;;  %v894_v41 = vadd.f32 %v883_v17, %v791_v57 }
 0x1d4   : > { %v1162_v63 = vmax.f32 %v1154_v48, 0.0  ;;  %v997_v26 = vadd.f32 %v986_v58, %v894_v41 }
 0x1d5   : > { %v988_v6 = vpop.f32.mrf.mxu3 }
 0x1d7   : > { %v1086_v56 = vpop.f32.mrf.mxu0  ;;  %v782_v61 = vpop.f32.mrf.mxu1 }
 0x1d8   : > { %v1099_v49 = vadd.f32 %v1086_v56, %v996_v54  ;;  %v792_v28 = vadd.f32 %v782_v61, %v689_v62 }
 0x1da   : > { %v1155_v60 = vadd.f32 %v1138_v23, %v1099_v49  ;;  %v895_v5 = vadd.f32 %v885_v3, %v792_v28 }
 0x1dc   : > { %v1163_v1 = vmax.f32 %v1155_v60, 0.0  ;;  %v998_v27 = vadd.f32 %v988_v6, %v895_v5 }
 0x1de   : > { %v1583_v2 = vpack.c.bf16 %v1163_v1, %v1162_v63 }
 0x1df   : > { %v1089_v4 = vpop.f32.mrf.mxu0 }
 0x1e0   : > { %1591 = vst [vmem:[%s2029_s17 + $0x10] sm:$0xff] %v1583_v2   ;;  %v1100_v8 = vadd.f32 %v1089_v4, %v997_v26 }
 0x1e2   : > { %v1156_v40 = vadd.f32 %v1143_v13, %v1100_v8 }
 0x1e4   : > { %v1164_v12 = vmax.f32 %v1156_v40, 0.0 }
 0x1e7   : > { %v1091_v25 = vpop.f32.mrf.mxu0 }
 0x1e8   : > { %v1101_v9 = vadd.f32 %v1091_v25, %v998_v27 }
 0x1ea   : > { %v1157_v37 = vadd.f32 %v1148_v0, %v1101_v9 }
 0x1ec   : > { %v1165_v7 = vmax.f32 %v1157_v37, 0.0 }
 0x1ee   : > { %v1588_v10 = vpack.c.bf16 %v1165_v7, %v1164_v12 }
 0x1f0   : > { %1592 = vst [vmem:[%s2029_s17 + $0x18] sm:$0xff] %v1588_v10  }
 0x1f1 PF: > { %s13_s12 = sadd.s32 1, %s1631_s12  }
 0x1f2   : > { %p10_p4 = scmp.ge.s32.totalorder %s13_s12, 4  }
 0x1f4   :  { %12 = sbr.rel (!%p10_p4) target bundleno = 1 (0x1), region = 70 }

// kernel: st_dis_forward.11
= control target key start
LH: loop header
LB: loop body
LE: loop exit
PB: predicated region body
PF: predicated region fallthrough
CT: control target
= control target key end

     0   :  { %s1939_s24 = smov 0   ;;  %s2299_s0 = inlined_call_operand.vmem [shape: bf16[2,64,96], index: 0, kind: input, shape index: {}]   ;;  %s2300_s1 = inlined_call_operand.vmem [shape: bf16[2,64,96], index: 1, kind: input, shape index: {}]   ;;  %s2301_s2 = inlined_call_operand.vmem [shape: bf16[9,64,64], index: 2, kind: input, shape index: {}]   ;;  %s2302_s3 = inlined_call_operand.vmem [shape: f32[64,1], index: 3, kind: input, shape index: {}]   ;;  %s2303_s4 = inlined_call_operand.vmem [shape: bf16[2,64,64], index: 4, kind: input, shape index: {}]   ;;  %s2304_s5 = inlined_call_operand.vmem [shape: bf16[64,64], index: 5, kind: input, shape index: {}]   ;;  %s2305_s6 = inlined_call_operand.vmem [shape: f32[64,1], index: 6, kind: input, shape index: {}]   ;;  %s2306_s7 = inlined_call_operand.vmem [shape: bf16[2,64,64], index: 7, kind: output, shape index: {}]  }
   0x1 LB: > { %s1479_s25 = sadd.s32 4294967295, %s1892_s24   ;;  %p1483_p0 = scmp.ge.s32.totalorder %s1892_s24, 1  ;;  %s1892_s24 = sphi %s1939_s24, %s17_s24  }
   0x2   : > { %p257_p1 = scmp.lt.s32.totalorder %s1892_s24, 3 }
   0x4   : > { %p258_p2 = pnand %p1483_p0, %p257_p1 }
   0x5   : > { %p299_p3 = scmp.lt.s32.totalorder (!%p258_p2), %s1479_s25, 1  ;;  %s1894_s10 = smov (!%p258_p2), 120  }
   0x6   : > { %261 = sbr.rel (%p258_p2) target bundleno = 428 (0x1ac), region = 48  ;;  %s1895_s11 = smov (!%p258_p2), 112  }
   0x7   : > { %s1896_s12 = smov (!%p258_p2), 104   ;;  %s1897_s17 = smov (!%p258_p2), 96  }
   0xb   : > { %s2308_s25 = smov (!%p299_p3, %s1479_s25), 1  ;;  %v1824_v8 = vld [vmem:[%s2301_s2 + $0x30] sm:$0xff]  ;;  %vm397_vm0 = vcmask 523264   ;;  %v1822_v10 = vld [vmem:[%s2301_s2 + $0x20] sm:$0xff]  ;;  %v1825_v12 = vld [vmem:[%s2301_s2 + $0x38] sm:$0xff]  ;;  %v1898_v54 = vmov 0  }
   0xc   : > { %s1947_s26 = sshll.u32 %s2308_s25, 5  ;;  %v1820_v9 = vld [vmem:[%s2301_s2 + $0x10] sm:$0xff]  ;;  %v1818_v11 = vld [vmem:[%s2301_s2] sm:$0xff]  ;;  %v1821_v13 = vld [vmem:[%s2301_s2 + $0x18] sm:$0xff]  ;;  %1883 = vset.pattern.permute.xlu1 %v1898_v54  ;;  %1885 = vset.pattern.permute.xlu0 %v1898_v54  ;;  %vm1391_vm1 = vcmask 519168  }
   0xd   : > { %s303_s29 = scalar_lea.vmem %s2299_s0, %s1947_s26  ;;  %s308_s9 = scalar_lea.vmem %s2300_s1, %s1947_s26  ;;  %v1823_v15 = vld [vmem:[%s2301_s2 + $0x28] sm:$0xff]  ;;  %v1826_v27 = vld [vmem:[%s2301_s2 + $0x40] sm:$0xff]  ;;  %v1828_v44 = vld [vmem:[%s2301_s2 + $0x50] sm:$0xff]  ;;  %1884 = vset.pattern.permute.xlu2 %v1898_v54 }
   0xe   : > { %v1813_v0 = vld [vmem:[%s303_s29 + $0x18] sm:$0xff]  ;;  %v1812_v1 = vld [vmem:[%s303_s29 + $0x10] sm:$0xff]  ;;  %v1811_v3 = vld [vmem:[%s303_s29 + $0x8] sm:$0xff]  ;;  %s2007_s19 = scalar_lea.vmem %s2303_s4, %s1947_s26 }
   0xf   : > { %v1817_v2 = vld [vmem:[%s308_s9 + $0x18] sm:$0xff]  ;;  %559 = vrot.lane.b32.xlu0 %v1813_v0, %s1894_s10  ;;  %557 = vrot.lane.b32.xlu1 %v1812_v1, %s1894_s10  ;;  %v1816_v4 = vld [vmem:[%s308_s9 + $0x10] sm:$0xff] }
  0x10   : > { %555 = vrot.lane.b32.xlu2 %v1811_v3, %s1894_s10  ;;  %1862 = vmatpush.bf16.msra.mxu2 %v1817_v2  ;;  %v1815_v5 = vld [vmem:[%s308_s9 + $0x8] sm:$0xff]  ;;  %v1814_v6 = vld [vmem:[%s308_s9] sm:$0xff]  ;;  %v1861_v37 = vld [vmem:[%s2007_s19 + $0x18] sm:$0xff] }
  0x11   : > { %1866 = vmatpush.bf16.msra.mxu3 %v1813_v0  ;;  %414 = vmatpush.bf16.msra.mxu0 %v1817_v2  ;;  %v1810_v7 = vld [vmem:[%s303_s29] sm:$0xff]  ;;  %v1819_v16 = vld [vmem:[%s2301_s2 + $0x8] sm:$0xff]  ;;  %v1860_v42 = vld [vmem:[%s2007_s19 + $0x10] sm:$0xff]  ;;  %s2248_s29 = scalar_lea.vmem %s2306_s7, %s1947_s26 }
  0x12   : > { %499 = vmatpush.bf16.msra.mxu1 %v1813_v0  ;;  %v1830_v28 = vld [vmem:[%s2301_s2 + $0x60] sm:$0xff]  ;;  %v1827_v34 = vld [vmem:[%s2301_s2 + $0x48] sm:$0xff]  ;;  %v1832_v47 = vld [vmem:[%s2301_s2 + $0x70] sm:$0xff] }
  0x13   : > { %v1834_v35 = vld [vmem:[%s2301_s2 + $0x80] sm:$0xff]  ;;  %v1831_v36 = vld [vmem:[%s2301_s2 + $0x68] sm:$0xff]  ;;  %v1829_v55 = vld [vmem:[%s2301_s2 + $0x58] sm:$0xff] }
  0x14   : > { %1863 = vmatpush.bf16.msra.mxu2 %v1816_v4  ;;  %v1838_v40 = vld [vmem:[%s2301_s2 + $0xa0] sm:$0xff]  ;;  %v1835_v45 = vld [vmem:[%s2301_s2 + $0x88] sm:$0xff]  ;;  %v1836_v56 = vld [vmem:[%s2301_s2 + $0x90] sm:$0xff] }
  0x15   : > { %1867 = vmatpush.bf16.msra.mxu3 %v1812_v1  ;;  %415 = vmatpush.bf16.msra.mxu0 %v1816_v4  ;;  %v1839_v50 = vld [vmem:[%s2301_s2 + $0xa8] sm:$0xff]  ;;  %v1154_v53 = vld [vmem:[%s2302_s3] sm:$0xff]  ;;  %v1833_v60 = vld [vmem:[%s2301_s2 + $0x78] sm:$0xff] }
  0x16   : > { %500 = vmatpush.bf16.msra.mxu1 %v1812_v1  ;;  %v1859_v52 = vld [vmem:[%s2007_s19 + $0x8] sm:$0xff]  ;;  %v1840_v61 = vld [vmem:[%s2301_s2 + $0xb0] sm:$0xff]  ;;  %v1157_v63 = vld [vmem:[%s2302_s3 + $0x18] sm:$0xff] }
  0x17   : > { %649 = vrot.lane.b32.xlu0 %v1817_v2, %s1894_s10  ;;  %647 = vrot.lane.b32.xlu1 %v1816_v4, %s1894_s10  ;;  %v1856_v54 = vld [vmem:[%s2304_s5 + $0x10] sm:$0xff] }
  0x18   : > { %645 = vrot.lane.b32.xlu2 %v1815_v5, %s1894_s10  ;;  %1864 = vmatpush.bf16.msra.mxu2 %v1815_v5 }
  0x19   : > { %1868 = vmatpush.bf16.msra.mxu3 %v1811_v3  ;;  %416 = vmatpush.bf16.msra.mxu0 %v1815_v5 }
  0x1a   : > { %501 = vmatpush.bf16.msra.mxu1 %v1811_v3 }
  0x1c   : > { %1865 = vmatpush.bf16.msra.mxu2 %v1814_v6 }
  0x1d   : > { %1869 = vmatpush.bf16.msra.mxu3 %v1810_v7  ;;  %417 = vmatpush.bf16.msra.mxu0 %v1814_v6 }
  0x1e   : > { %502 = vmatpush.bf16.msra.mxu1 %v1810_v7 }
  0x1f   : > { %739 = vrot.lane.b32.xlu0 %v1813_v0, %s1895_s11  ;;  %553 = vrot.lane.b32.xlu1 %v1810_v7, %s1894_s10 }
  0x20   : > { %643 = vrot.lane.b32.xlu2 %v1814_v6, %s1894_s10  ;;  %1534 = vmatmul.msk.bf16.vlgmr.msra.gmra.mxu2 %vm397_vm0, %v1824_v8  ;;  %v1319_v8 = vld [vmem:[%s2305_s6] sm:$0xff] }
  0x21   : > { %1570 = vmatmul.msk.bf16.vlgmr.msra.gmra.mxu3 %vm397_vm0, %v1820_v9  ;;  %1532 = vmatmul.msk.bf16.vlgmr.msra.gmra.mxu0 %vm397_vm0, %v1822_v10 }
  0x22   : > { %1568 = vmatmul.msk.bf16.vlgmr.msra.gmra.mxu1 %vm397_vm0, %v1818_v11  ;;  %v1155_v11 = vld [vmem:[%s2302_s3 + $0x8] sm:$0xff] }
  0x27   : > { %737 = vrot.lane.b32.xlu0 %v1812_v1, %s1895_s11  ;;  %829 = vrot.lane.b32.xlu1 %v1817_v2, %s1895_s11 }
  0x28   : > { %735 = vrot.lane.b32.xlu2 %v1811_v3, %s1895_s11 }
  0x2f   : > { %827 = vrot.lane.b32.xlu0 %v1816_v4, %s1895_s11  ;;  %733 = vrot.lane.b32.xlu1 %v1810_v7, %s1895_s11 }
  0x30   : > { %825 = vrot.lane.b32.xlu2 %v1815_v5, %s1895_s11  ;;  %1535 = vmatmul.msk.bf16.gmra.mxu2 %vm397_vm0, %v1825_v12 }
  0x31   : > { %1571 = vmatmul.msk.bf16.gmra.mxu3 %vm397_vm0, %v1821_v13  ;;  %1533 = vmatmul.msk.bf16.gmra.mxu0 %vm397_vm0, %v1823_v15 }
  0x32   : > { %1569 = vmatmul.msk.bf16.gmra.mxu1 %vm397_vm0, %v1819_v16  ;;  %v1843_v16 = vld [vmem:[%s2301_s2 + $0xc8] sm:$0xff] }
  0x37   : > { %823 = vrot.lane.b32.xlu0 %v1814_v6, %s1895_s11  ;;  %919 = vrot.lane.b32.xlu1 %v1813_v0, %s1896_s12 }
  0x38   : > { %1009 = vrot.lane.b32.xlu2 %v1817_v2, %s1896_s12  ;;  %v1837_v2 = vld [vmem:[%s2301_s2 + $0x98] sm:$0xff] }
  0x3f   : > { %1007 = vrot.lane.b32.xlu1 %v1816_v4, %s1896_s12  ;;  %917 = vrot.lane.b32.xlu0 %v1812_v1, %s1896_s12  ;;  %v1846_v4 = vld [vmem:[%s2301_s2 + $0xe0] sm:$0xff] }
  0x40   : > { %915 = vrot.lane.b32.xlu2 %v1811_v3, %s1896_s12 }
  0x47   : > { %1099 = vrot.lane.b32.xlu1 %v1813_v0, %s1897_s17  ;;  %1005 = vrot.lane.b32.xlu0 %v1815_v5, %s1896_s12  ;;  %v1858_v0 = vld [vmem:[%s2007_s19] sm:$0xff] }
  0x48   : > { %913 = vrot.lane.b32.xlu2 %v1810_v7, %s1896_s12 }
  0x4f   : > { %1097 = vrot.lane.b32.xlu1 %v1812_v1, %s1897_s17  ;;  %1003 = vrot.lane.b32.xlu0 %v1814_v6, %s1896_s12  ;;  %v1159_v1 = vld [vmem:[%s2302_s3 + $0x28] sm:$0xff]  ;;  %v1841_v6 = vld [vmem:[%s2301_s2 + $0xb8] sm:$0xff] }
  0x50   : > { %1095 = vrot.lane.b32.xlu2 %v1811_v3, %s1897_s17  ;;  %v1842_v3 = vld [vmem:[%s2301_s2 + $0xc0] sm:$0xff] }
  0x57   : > { %1093 = vrot.lane.b32.xlu0 %v1810_v7, %s1897_s17  ;;  %1164 = vperm.xlu1 %1883, %v1154_v53   ;;  %v1156_v7 = vld [vmem:[%s2302_s3 + $0x10] sm:$0xff]  ;;  %v1849_v53 = vld [vmem:[%s2301_s2 + $0xf8] sm:$0xff] }
  0x58   : > { %1169 = vperm.xlu2 %1884, %v1155_v11  }
  0x5f   : > { %1179 = vperm.xlu1 %1883, %v1157_v63   ;;  %1174 = vperm.xlu0 %1885, %v1156_v7  }
  0x67   : > { %1189 = vperm.xlu1 %1883, %v1159_v1  }
  0x6a   : > { %v556_v14 = vpop.permute.xlu2 %555 }
  0x6f   : > { %1329 = vperm.xlu1 %1883, %v1319_v8  }
  0x72   : > { %v646_v17 = vpop.permute.xlu2 %645 }
  0x7a   : > { %v644_v18 = vpop.permute.xlu2 %643 }
  0x81   : > { %v560_v19 = vpop.permute.xlu0 %559  ;;  %v558_v20 = vpop.permute.xlu1 %557 }
  0x82   : > { %581 = vmatpush.bf16.msrb.mxu2 %v560_v19  ;;  %v736_v21 = vpop.permute.xlu2 %735 }
  0x86   : > { %582 = vmatpush.bf16.msrb.mxu2 %v558_v20  ;;  %v1158_v20 = vld [vmem:[%s2302_s3 + $0x20] sm:$0xff] }
  0x87   : > { %1184 = vperm.xlu2 %1884, %v1158_v20  }
  0x89   : > { %v650_v22 = vpop.permute.xlu0 %649  ;;  %v648_v23 = vpop.permute.xlu1 %647 }
  0x8a   : > { %583 = vmatpush.bf16.msrb.mxu2 %v556_v14  ;;  %671 = vmatpush.bf16.msrb.mxu3 %v650_v22  ;;  %v826_v24 = vpop.permute.xlu2 %825  ;;  %v1161_v14 = vld [vmem:[%s2302_s3 + $0x38] sm:$0xff]  ;;  %v1847_v22 = vld [vmem:[%s2301_s2 + $0xe8] sm:$0xff] }
  0x8b   : > { %1199 = vperm.xlu0 %1885, %v1161_v14  }
  0x8e   : > { %672 = vmatpush.bf16.msrb.mxu3 %v648_v23 }
  0x91   : > { %v740_v25 = vpop.permute.xlu0 %739  ;;  %v554_v26 = vpop.permute.xlu1 %553 }
  0x92   : > { %584 = vmatpush.bf16.msrb.mxu2 %v554_v26  ;;  %673 = vmatpush.bf16.msrb.mxu3 %v646_v17  ;;  %v1010_v29 = vpop.permute.xlu2 %1009  ;;  %v1850_v17 = vld [vmem:[%s2301_s2 + $0x100] sm:$0xff] }
  0x93   : > { %761 = vmatpush.bf16.msrb.mxu0 %v740_v25 }
  0x95   : > { %1596 = vmatmul.msk.bf16.vlgmr.msrb.gmra.mxu2 %vm397_vm0, %v1826_v27  ;;  %v1854_v27 = vld [vmem:[%s2304_s5] sm:$0xff] }
  0x96   : > { %674 = vmatpush.bf16.msrb.mxu3 %v644_v18 }
  0x99   : > { %v738_v30 = vpop.permute.xlu0 %737  ;;  %v830_v31 = vpop.permute.xlu1 %829  ;;  %1624 = vmatmul.msk.bf16.vlgmr.msrb.gmra.mxu3 %vm397_vm0, %v1830_v28  ;;  %v1321_v28 = vld [vmem:[%s2305_s6 + $0x10] sm:$0xff] }
  0x9a   : > { %1031 = vmatpush.bf16.msra.mxu3 %v1010_v29  ;;  %762 = vmatpush.bf16.msrb.mxu0 %v738_v30  ;;  %v916_v41 = vpop.permute.xlu2 %915 }
  0x9b   : > { %851 = vmatpush.bf16.msrb.mxu1 %v830_v31  ;;  %1339 = vperm.xlu0 %1885, %v1321_v28   ;;  %v1160_v31 = vld [vmem:[%s2302_s3 + $0x30] sm:$0xff] }
  0x9c   : > { %1194 = vperm.xlu2 %1884, %v1160_v31  }
  0x9e   : > { %763 = vmatpush.bf16.msrb.mxu0 %v736_v21  ;;  %v419_v13 = vpop.f32.mrf.mxu0  ;;  %v1322_v21 = vld [vmem:[%s2305_s6 + $0x18] sm:$0xff] }
  0x9f   : > { %v504_v15 = vpop.f32.mrf.mxu1  ;;  %1344 = vperm.xlu1 %1883, %v1322_v21  }
  0xa0   : > { %v2113_v25 = vadd.f32 %v504_v15, %v419_v13 }
  0xa1   : > { %v828_v32 = vpop.permute.xlu0 %827  ;;  %v734_v33 = vpop.permute.xlu1 %733 }
  0xa2   : > { %764 = vmatpush.bf16.msrb.mxu0 %v734_v33  ;;  %852 = vmatpush.bf16.msrb.mxu1 %v828_v32  ;;  %v914_v48 = vpop.permute.xlu2 %913  ;;  %v1325_v32 = vld [vmem:[%s2305_s6 + $0x30] sm:$0xff] }
  0xa3   : > { %v429_v5 = vpop.f32.mrf.mxu2 }
  0xa4   : > { %v514_v9 = vpop.f32.mrf.mxu3 }
  0xa5   : > { %1597 = vmatmul.msk.bf16.gmra.mxu2 %vm397_vm0, %v1827_v34  ;;  %1652 = vmatmul.msk.bf16.vlgmr.msrb.gmra.mxu0 %vm397_vm0, %v1834_v35  ;;  %v2085_v10 = vadd.f32 %v514_v9, %v429_v5 }
  0xa6   : > { %853 = vmatpush.bf16.msrb.mxu1 %v826_v24  ;;  %v421_v23 = vpop.f32.mrf.mxu0 }
  0xa7   : > { %v506_v26 = vpop.f32.mrf.mxu1  ;;  %1359 = vperm.xlu1 %1883, %v1325_v32  }
  0xa8   : > { %v2122_v29 = vadd.f32 %v506_v26, %v421_v23 }
  0xa9   : > { %v824_v38 = vpop.permute.xlu0 %823  ;;  %v920_v39 = vpop.permute.xlu1 %919  ;;  %1625 = vmatmul.msk.bf16.gmra.mxu3 %vm397_vm0, %v1831_v36  ;;  %v1844_v36 = vld [vmem:[%s2301_s2 + $0xd0] sm:$0xff] }
  0xaa   : > { %854 = vmatpush.bf16.msrb.mxu1 %v824_v38  ;;  %941 = vmatpush.bf16.msra.mxu2 %v920_v39  ;;  %v1096_v59 = vpop.permute.xlu2 %1095 }
  0xab   : > { %v431_v12 = vpop.f32.mrf.mxu2 }
  0xac   : > { %v516_v18 = vpop.f32.mrf.mxu3 }
  0xad   : > { %1680 = vmatmul.msk.bf16.vlgmr.msrb.gmra.mxu1 %vm397_vm0, %v1838_v40  ;;  %v2100_v19 = vadd.f32 %v516_v18, %v431_v12  ;;  %v1320_v40 = vld [vmem:[%s2305_s6 + $0x8] sm:$0xff] }
  0xae   : > { %1286 = vmatpush.bf16.msra.mxu1 %v1861_v37  ;;  %v424_v34 = vpop.f32.mrf.mxu0  ;;  %v1851_v37 = vld [vmem:[%s2301_s2 + $0x108] sm:$0xff]  ;;  %1334 = vperm.xlu2 %1884, %v1320_v40  }
  0xaf   : > { %v509_v35 = vpop.f32.mrf.mxu1 }
  0xb1   : > { %v1008_v43 = vpop.permute.xlu1 %1007  ;;  %v918_v46 = vpop.permute.xlu0 %917 }
  0xb2   : > { %1287 = vmatpush.bf16.msra.mxu1 %v1860_v42  ;;  %1032 = vmatpush.bf16.msra.mxu3 %v1008_v43  ;;  %v1848_v42 = vld [vmem:[%s2301_s2 + $0xf0] sm:$0xff]  ;;  %v1170_v26 = vpop.permute.xlu2 %1169 }
  0xb3   : > { %942 = vmatpush.bf16.msra.mxu2 %v918_v46  ;;  %v434_v24 = vpop.f32.mrf.mxu2  ;;  %v1855_v46 = vld [vmem:[%s2304_s5 + $0x8] sm:$0xff] }
  0xb4   : > { %v519_v30 = vpop.f32.mrf.mxu3 }
  0xb5   : > { %1598 = vmatmul.msk.bf16.gmra.mxu2 %vm397_vm0, %v1828_v44  ;;  %1653 = vmatmul.msk.bf16.gmra.mxu0 %vm397_vm0, %v1835_v45  ;;  %v2130_v33 = vadd.f32 %v519_v30, %v434_v24  ;;  %v2149_v44 = vadd.f32 %v509_v35, %v424_v34 }
  0xb6   : > { %1288 = vmatpush.bf16.msra.mxu1 %v1859_v52  ;;  %v426_v43 = vpop.f32.mrf.mxu0  ;;  %v1326_v52 = vld [vmem:[%s2305_s6 + $0x38] sm:$0xff] }
  0xb7   : > { %943 = vmatpush.bf16.msra.mxu2 %v916_v41  ;;  %v511_v45 = vpop.f32.mrf.mxu1 }
  0xb9   : > { %v1100_v49 = vpop.permute.xlu1 %1099  ;;  %1626 = vmatmul.msk.bf16.gmra.mxu3 %vm397_vm0, %v1832_v47  ;;  %v1006_v51 = vpop.permute.xlu0 %1005  ;;  %v2155_v47 = vadd.f32 %v511_v45, %v426_v43 }
  0xba   : > { %1121 = vmatpush.bf16.msra.mxu0 %v1100_v49  ;;  %1033 = vmatpush.bf16.msra.mxu3 %v1006_v51  ;;  %v1323_v49 = vld [vmem:[%s2305_s6 + $0x20] sm:$0xff]  ;;  %v1852_v51 = vld [vmem:[%s2301_s2 + $0x110] sm:$0xff] }
  0xbb   : > { %944 = vmatpush.bf16.msra.mxu2 %v914_v48  ;;  %1289 = vmatpush.bf16.msra.mxu1 %v1858_v0  ;;  %v436_v38 = vpop.f32.mrf.mxu2  ;;  %v1324_v48 = vld [vmem:[%s2305_s6 + $0x28] sm:$0xff] }
  0xbc   : > { %v521_v39 = vpop.f32.mrf.mxu3  ;;  %1354 = vperm.xlu0 %1885, %v1324_v48   ;;  %1349 = vperm.xlu2 %1884, %v1323_v49  }
  0xbd   : > { %1681 = vmatmul.msk.bf16.gmra.mxu1 %vm397_vm0, %v1839_v50  ;;  %v2142_v41 = vadd.f32 %v521_v39, %v436_v38  ;;  %v1845_v50 = vld [vmem:[%s2301_s2 + $0xd8] sm:$0xff] }
  0xc1   : > { %v1098_v57 = vpop.permute.xlu1 %1097  ;;  %v1004_v58 = vpop.permute.xlu0 %1003 }
  0xc2   : > { %1122 = vmatpush.bf16.msra.mxu0 %v1098_v57  ;;  %1034 = vmatpush.bf16.msra.mxu3 %v1004_v58  ;;  %v1857_v57 = vld [vmem:[%s2304_s5 + $0x18] sm:$0xff] }
  0xc4   : > { %1364 = vperm.xlu2 %1884, %v1326_v52  }
  0xc5   : > { %1599 = vmatmul.msk.bf16.gmra.mxu2 %vm397_vm0, %v1829_v55  ;;  %1654 = vmatmul.msk.bf16.gmra.mxu0 %vm397_vm0, %v1836_v56  ;;  %v1853_v55 = vld [vmem:[%s2301_s2 + $0x118] sm:$0xff] }
  0xc6   : > { %1123 = vmatpush.bf16.msra.mxu0 %v1096_v59 }
  0xc9   : > { %1627 = vmatmul.msk.bf16.gmra.mxu3 %vm397_vm0, %v1833_v60  ;;  %v1094_v62 = vpop.permute.xlu0 %1093  ;;  %v1165_v18 = vpop.permute.xlu1 %1164 }
  0xca   : > { %1124 = vmatpush.bf16.msra.mxu0 %v1094_v62 }
  0xcd   : > { %1682 = vmatmul.msk.bf16.gmra.mxu1 %vm397_vm0, %v1840_v61 }
  0xd1   : > { %v1175_v52 = vpop.permute.xlu0 %1174 }
  0xd5   : > { %1655 = vmatmul.msk.bf16.gmra.mxu0 %vm397_vm0, %v1837_v2  ;;  %1708 = vmatmul.msk.bf16.vlgmr.msra.gmra.mxu2 %vm397_vm0, %v1842_v3 }
  0xd9   : > { %1736 = vmatmul.msk.bf16.vlgmr.msra.gmra.mxu3 %vm397_vm0, %v1846_v4 }
  0xdd   : > { %1683 = vmatmul.msk.bf16.gmra.mxu1 %vm397_vm0, %v1841_v6 }
  0xe1   : > { %v2232_v38 = vpop.permute.xlu2 %1184 }
  0xe5   : > { %1709 = vmatmul.msk.bf16.gmra.mxu2 %vm397_vm0, %v1843_v16  ;;  %1764 = vmatmul.msk.bf16.vlgmr.msra.gmra.mxu0 %vm397_vm0, %v1850_v17 }
  0xe9   : > { %1737 = vmatmul.msk.bf16.gmra.mxu3 %vm397_vm0, %v1847_v22 }
  0xed   : > { %1800 = vmatmul.msk.bf16.vlgmr.msra.gmra.mxu1 %vm397_vm0, %v1854_v27  ;;  %v2225_v27 = vpop.permute.xlu1 %1179 }
  0xf5   : > { %1710 = vmatmul.msk.bf16.gmra.mxu2 %vm397_vm0, %v1844_v36  ;;  %1765 = vmatmul.msk.bf16.gmra.mxu0 %vm397_vm0, %v1851_v37  ;;  %v2234_v39 = vpop.permute.xlu1 %1189 }
  0xf9   : > { %1738 = vmatmul.msk.bf16.gmra.mxu3 %vm397_vm0, %v1848_v42 }
  0xfd   : > { %1801 = vmatmul.msk.bf16.gmra.mxu1 %vm397_vm0, %v1855_v46 }
 0x105   : > { %1711 = vmatmul.msk.bf16.gmra.mxu2 %vm397_vm0, %v1845_v50  ;;  %1766 = vmatmul.msk.bf16.gmra.mxu0 %vm397_vm0, %v1852_v51 }
 0x109   : > { %1739 = vmatmul.msk.bf16.gmra.mxu3 %vm397_vm0, %v1849_v53 }
 0x10d   : > { %1802 = vmatmul.msk.bf16.gmra.mxu1 %vm397_vm0, %v1856_v54 }
 0x115   : > { %1767 = vmatmul.msk.bf16.gmra.mxu0 %vm397_vm0, %v1853_v55 }
 0x118   : > { %v586_v56 = vpop.f32.mrf.mxu2 }
 0x119   : > { %v606_v30 = vadd.f32 %v586_v56, %v2113_v25 }
 0x11c   : > { %v676_v58 = vpop.f32.mrf.mxu3 }
 0x11d   : > { %1803 = vmatmul.msk.bf16.gmra.mxu1 %vm397_vm0, %v1857_v57  ;;  %v696_v34 = vadd.f32 %v676_v58, %v606_v30  ;;  %v2240_v58 = vpop.permute.xlu2 %1194 }
 0x120   : > { %v588_v59 = vpop.f32.mrf.mxu2 }
 0x121   : > { %v607_v42 = vadd.f32 %v588_v59, %v2122_v29  ;;  %v1330_v29 = vpop.permute.xlu1 %1329 }
 0x122   : > { %v766_v60 = vpop.f32.mrf.mxu0 }
 0x123   : > { %v786_v36 = vadd.f32 %v766_v60, %v696_v34 }
 0x124   : > { %v678_v61 = vpop.f32.mrf.mxu3 }
 0x125   : > { %v697_v25 = vadd.f32 %v678_v61, %v607_v42 }
 0x128   : > { %v591_v62 = vpop.f32.mrf.mxu2 }
 0x129   : > { %v608_v55 = vadd.f32 %v591_v62, %v2149_v44 }
 0x12a   : > { %v768_v63 = vpop.f32.mrf.mxu0  ;;  %v856_v0 = vpop.f32.mrf.mxu1 }
 0x12b   : > { %v876_v37 = vadd.f32 %v856_v0, %v786_v36  ;;  %v787_v50 = vadd.f32 %v768_v63, %v697_v25  ;;  %v1335_v25 = vpop.permute.xlu2 %1334 }
 0x12c   : > { %v681_v1 = vpop.f32.mrf.mxu3 }
 0x12d   : > { %v698_v0 = vadd.f32 %v681_v1, %v608_v55 }
 0x130   : > { %v2191_v2 = vpop.f32.mrf.mxu2 }
 0x131   : > { %v609_v62 = vadd.f32 %v2191_v2, %v2155_v47 }
 0x132   : > { %v771_v3 = vpop.f32.mrf.mxu0  ;;  %v858_v4 = vpop.f32.mrf.mxu1 }
 0x133   : > { %v877_v53 = vadd.f32 %v858_v4, %v787_v50  ;;  %v788_v34 = vadd.f32 %v771_v3, %v698_v0 }
 0x134   : > { %v2193_v5 = vpop.f32.mrf.mxu3 }
 0x138   : > { %v2195_v6 = vpop.f32.mrf.mxu2 }
 0x13a   : > { %v2197_v7 = vpop.f32.mrf.mxu0  ;;  %v861_v8 = vpop.f32.mrf.mxu1 }
 0x13b   : > { %v878_v36 = vadd.f32 %v861_v8, %v788_v34  ;;  %v699_v8 = vadd.f32 %v2193_v5, %v609_v62  ;;  %v1345_v62 = vpop.permute.xlu1 %1344 }
 0x13c   : > { %v2199_v9 = vpop.f32.mrf.mxu3 }
 0x140   : > { %v2201_v11 = vpop.f32.mrf.mxu2 }
 0x142   : > { %v2203_v12 = vpop.f32.mrf.mxu0  ;;  %v2205_v13 = vpop.f32.mrf.mxu1 }
 0x144   : > { %v2207_v14 = vpop.f32.mrf.mxu3 }
 0x148   : > { %v2209_v15 = vpop.f32.mrf.mxu2 }
 0x14a   : > { %v2211_v16 = vpop.f32.mrf.mxu0  ;;  %v2213_v17 = vpop.f32.mrf.mxu1 }
 0x14c   : > { %v2215_v20 = vpop.f32.mrf.mxu3 }
 0x150   : > { %v2217_v21 = vpop.f32.mrf.mxu2 }
 0x152   : > { %v2219_v22 = vpop.f32.mrf.mxu0  ;;  %v2221_v23 = vpop.f32.mrf.mxu1 }
 0x154   : > { %v2223_v24 = vpop.f32.mrf.mxu3 }
 0x158   : > { %v946_v28 = vpop.f32.mrf.mxu2 }
 0x159   : > { %v966_v43 = vadd.f32 %v946_v28, %v876_v37  ;;  %v2242_v37 = vpop.permute.xlu0 %1199 }
 0x15a   : > { %v2228_v31 = vpop.f32.mrf.mxu0  ;;  %v2230_v32 = vpop.f32.mrf.mxu1 }
 0x15c   : > { %v1036_v35 = vpop.f32.mrf.mxu3 }
 0x15d   : > { %v1056_v48 = vadd.f32 %v1036_v35, %v966_v43 }
 0x160   : > { %v948_v40 = vpop.f32.mrf.mxu2 }
 0x161   : > { %v967_v56 = vadd.f32 %v948_v40, %v877_v53 }
 0x162   : > { %v2237_v45 = vpop.f32.mrf.mxu1  ;;  %v1126_v46 = vpop.f32.mrf.mxu0 }
 0x163   : > { %v1146_v51 = vadd.f32 %v1126_v46, %v1056_v48 }
 0x164   : > { %v1038_v49 = vpop.f32.mrf.mxu3 }
 0x165   : > { %v1202_v57 = vadd.f32 %v1165_v18, %v1146_v51  ;;  %v1057_v28 = vadd.f32 %v1038_v49, %v967_v56  ;;  %v789_v49 = vadd.f32 %v2197_v7, %v699_v8  ;;  %v1340_v56 = vpop.permute.xlu0 %1339 }
 0x167   : > { %v879_v47 = vadd.f32 %v2205_v13, %v789_v49 }
 0x168   : > { %v951_v54 = vpop.f32.mrf.mxu2 }
 0x169   : > { %v968_v1 = vadd.f32 %v951_v54, %v878_v36 }
 0x16a   : > { %v1128_v59 = vpop.f32.mrf.mxu0  ;;  %v1291_v60 = vpop.f32.mrf.mxu1 }
 0x16b   : > { %v1311_v61 = vadd.f32 %v1291_v60, %v1202_v57  ;;  %v1147_v63 = vadd.f32 %v1128_v59, %v1057_v28 }
 0x16c   : > { %v1041_v30 = vpop.f32.mrf.mxu3 }
 0x16d   : > { %v1367_v35 = vadd.f32 %v1330_v29, %v1311_v61  ;;  %v1203_v3 = vadd.f32 %v1170_v26, %v1147_v63  ;;  %v1058_v43 = vadd.f32 %v1041_v30, %v968_v1  ;;  %v610_v26 = vadd.f32 %v2195_v6, %v2085_v10 }
 0x16f   : > { %v1375_v4 = vmax.f32 %v1367_v35, 0.0  ;;  %v700_v59 = vadd.f32 %v2199_v9, %v610_v26 }
 0x170   : > { %v953_v44 = vpop.f32.mrf.mxu2 }
 0x171   : > { %v1383_v18 = vpack.c.bf16 %v1375_v4, %v1375_v4  ;;  %v969_v54 = vadd.f32 %v953_v44, %v879_v47  ;;  %v790_v13 = vadd.f32 %v2203_v12, %v700_v59 }
 0x172   : > { %v1131_v40 = vpop.f32.mrf.mxu0  ;;  %v1293_v42 = vpop.f32.mrf.mxu1 }
 0x173   : > { %1392 = vst.msk [vmem:[%s2248_s29] sm:$0xf] %vm1391_vm1, %v1383_v18  ;;  %v1312_v46 = vadd.f32 %v1293_v42, %v1203_v3  ;;  %v1148_v50 = vadd.f32 %v1131_v40, %v1058_v43  ;;  %v880_v10 = vadd.f32 %v2213_v17, %v790_v13 }
 0x174   : > { %v1043_v48 = vpop.f32.mrf.mxu3 }
 0x175   : > { %v1368_v51 = vadd.f32 %v1335_v25, %v1312_v46  ;;  %v1204_v55 = vadd.f32 %v1175_v52, %v1148_v50  ;;  %v1059_v7 = vadd.f32 %v1043_v48, %v969_v54  ;;  %v611_v52 = vadd.f32 %v2201_v11, %v2100_v19  ;;  %v1350_v48 = vpop.permute.xlu2 %1349 }
 0x177   : > { %v1376_v2 = vmax.f32 %v1368_v51, 0.0  ;;  %v701_v4 = vadd.f32 %v2207_v14, %v611_v52 }
 0x178   : > { %v956_v53 = vpop.f32.mrf.mxu2 }
 0x179   : > { %v1384_v5 = vpack.c.bf16 %v1376_v2, %v1376_v2  ;;  %v970_v30 = vadd.f32 %v956_v53, %v880_v10  ;;  %v791_v1 = vadd.f32 %v2211_v16, %v701_v4 }
 0x17a   : > { %v1133_v57 = vpop.f32.mrf.mxu0  ;;  %v1296_v29 = vpop.f32.mrf.mxu1 }
 0x17b   : > { %1393 = vst.msk [vmem:[%s2248_s29 + $0x4] sm:$0xf] %vm1391_vm1, %v1384_v5  ;;  %v1313_v60 = vadd.f32 %v1296_v29, %v1204_v55  ;;  %v1149_v28 = vadd.f32 %v1133_v57, %v1059_v7  ;;  %v881_v11 = vadd.f32 %v2221_v23, %v791_v1 }
 0x17c   : > { %v1046_v0 = vpop.f32.mrf.mxu3 }
 0x17d   : > { %v1369_v61 = vadd.f32 %v1340_v56, %v1313_v60  ;;  %v1205_v9 = vadd.f32 %v2225_v27, %v1149_v28  ;;  %v1060_v12 = vadd.f32 %v1046_v0, %v970_v30  ;;  %v612_v27 = vadd.f32 %v2209_v15, %v2130_v33  ;;  %v1355_v56 = vpop.permute.xlu0 %1354 }
 0x17f   : > { %v1377_v6 = vmax.f32 %v1369_v61, 0.0  ;;  %v702_v46 = vadd.f32 %v2215_v20, %v612_v27 }
 0x180   : > { %v958_v63 = vpop.f32.mrf.mxu2 }
 0x181   : > { %v1385_v34 = vpack.c.bf16 %v1377_v6, %v1377_v6  ;;  %v971_v40 = vadd.f32 %v958_v63, %v881_v11  ;;  %v792_v23 = vadd.f32 %v2219_v22, %v702_v46 }
 0x182   : > { %v1136_v35 = vpop.f32.mrf.mxu0  ;;  %v1298_v36 = vpop.f32.mrf.mxu1 }
 0x183   : > { %1394 = vst.msk [vmem:[%s2248_s29 + $0x8] sm:$0xf] %vm1391_vm1, %v1385_v34  ;;  %v1314_v44 = vadd.f32 %v1298_v36, %v1205_v9  ;;  %v1150_v18 = vadd.f32 %v1136_v35, %v1060_v12  ;;  %v882_v15 = vadd.f32 %v2230_v32, %v792_v23  ;;  %v1365_v9 = vpop.permute.xlu2 %1364 }
 0x184   : > { %v1048_v17 = vpop.f32.mrf.mxu3 }
 0x185   : > { %v1370_v19 = vadd.f32 %v1345_v62, %v1314_v44  ;;  %v1206_v14 = vadd.f32 %v2232_v38, %v1150_v18  ;;  %v1061_v25 = vadd.f32 %v1048_v17, %v971_v40  ;;  %v613_v38 = vadd.f32 %v2217_v21, %v2142_v41 }
 0x187   : > { %v1378_v3 = vmax.f32 %v1370_v19, 0.0  ;;  %v703_v5 = vadd.f32 %v2223_v24, %v613_v38 }
 0x188   : > { %v961_v49 = vpop.f32.mrf.mxu2 }
 0x189   : > { %v1386_v42 = vpack.c.bf16 %v1378_v3, %v1378_v3  ;;  %v972_v2 = vadd.f32 %v961_v49, %v882_v15  ;;  %v793_v32 = vadd.f32 %v2228_v31, %v703_v5  ;;  %v1360_v31 = vpop.permute.xlu1 %1359 }
 0x18a   : > { %v1138_v8 = vpop.f32.mrf.mxu0  ;;  %v1301_v43 = vpop.f32.mrf.mxu1 }
 0x18b   : > { %1395 = vst.msk [vmem:[%s2248_s29 + $0xc] sm:$0xf] %vm1391_vm1, %v1386_v42  ;;  %v1315_v16 = vadd.f32 %v1301_v43, %v1206_v14  ;;  %v1151_v50 = vadd.f32 %v1138_v8, %v1061_v25  ;;  %v883_v41 = vadd.f32 %v2237_v45, %v793_v32 }
 0x18c   : > { %v1051_v33 = vpop.f32.mrf.mxu3 }
 0x18d   : > { %v1371_v51 = vadd.f32 %v1350_v48, %v1315_v16  ;;  %v1207_v53 = vadd.f32 %v2234_v39, %v1151_v50  ;;  %v1062_v22 = vadd.f32 %v1051_v33, %v972_v2 }
 0x18f   : > { %v1379_v47 = vmax.f32 %v1371_v51, 0.0 }
 0x190   : > { %v963_v59 = vpop.f32.mrf.mxu2 }
 0x191   : > { %v1387_v20 = vpack.c.bf16 %v1379_v47, %v1379_v47  ;;  %v973_v39 = vadd.f32 %v963_v59, %v883_v41 }
 0x192   : > { %v1141_v26 = vpop.f32.mrf.mxu0  ;;  %v1303_v54 = vpop.f32.mrf.mxu1 }
 0x193   : > { %1396 = vst.msk [vmem:[%s2248_s29 + $0x10] sm:$0xf] %vm1391_vm1, %v1387_v20  ;;  %v1316_v55 = vadd.f32 %v1303_v54, %v1207_v53  ;;  %v1152_v57 = vadd.f32 %v1141_v26, %v1062_v22 }
 0x194   : > { %v1053_v7 = vpop.f32.mrf.mxu3 }
 0x195   : > { %v1372_v29 = vadd.f32 %v1355_v56, %v1316_v55  ;;  %v1208_v24 = vadd.f32 %v2240_v58, %v1152_v57  ;;  %v1063_v28 = vadd.f32 %v1053_v7, %v973_v39 }
 0x197   : > { %v1380_v21 = vmax.f32 %v1372_v29, 0.0 }
 0x199   : > { %v1388_v60 = vpack.c.bf16 %v1380_v21, %v1380_v21 }
 0x19a   : > { %v1143_v0 = vpop.f32.mrf.mxu0  ;;  %v1306_v13 = vpop.f32.mrf.mxu1 }
 0x19b   : > { %1397 = vst.msk [vmem:[%s2248_s29 + $0x14] sm:$0xf] %vm1391_vm1, %v1388_v60  ;;  %v1317_v61 = vadd.f32 %v1306_v13, %v1208_v24  ;;  %v1153_v10 = vadd.f32 %v1143_v0, %v1063_v28 }
 0x19d   : > { %v1373_v6 = vadd.f32 %v1360_v31, %v1317_v61  ;;  %v1209_v45 = vadd.f32 %v2242_v37, %v1153_v10 }
 0x19f   : > { %v1381_v52 = vmax.f32 %v1373_v6, 0.0 }
 0x1a1   : > { %v1389_v30 = vpack.c.bf16 %v1381_v52, %v1381_v52 }
 0x1a2   : > { %v1308_v34 = vpop.f32.mrf.mxu1 }
 0x1a3   : > { %1398 = vst.msk [vmem:[%s2248_s29 + $0x18] sm:$0xf] %vm1391_vm1, %v1389_v30  ;;  %v1318_v63 = vadd.f32 %v1308_v34, %v1209_v45 }
 0x1a5   : > { %v1374_v58 = vadd.f32 %v1365_v9, %v1318_v63 }
 0x1a7   : > { %v1382_v35 = vmax.f32 %v1374_v58, 0.0 }
 0x1a9   : > { %v1390_v36 = vpack.c.bf16 %v1382_v35, %v1382_v35 }
 0x1ab   : > { %1399 = vst.msk [vmem:[%s2248_s29 + $0x1c] sm:$0xf] %vm1391_vm1, %v1390_v36 }
 0x1ac PF: > { %s17_s24 = sadd.s32 1, %s1892_s24  }
 0x1ad   : > { %p14_p4 = scmp.ge.s32.totalorder %s17_s24, 4  }
 0x1af   :  { %16 = sbr.rel (!%p14_p4) target bundleno = 1 (0x1), region = 92 }

// kernel: st_dis_forward.12
= control target key start
LH: loop header
LB: loop body
LE: loop exit
PB: predicated region body
PF: predicated region fallthrough
CT: control target
= control target key end

     0   :  { %s888_s15 = smov 0   ;;  %s890_s16 = smov 0   ;;  %s1067_s0 = inlined_call_operand.vmem [shape: bf16[2,64,64], index: 0, kind: input, shape index: {}]   ;;  %s1068_s1 = inlined_call_operand.vmem [shape: bf16[64,64], index: 1, kind: input, shape index: {}]   ;;  %s1069_s2 = inlined_call_operand.vmem [shape: bf16[128,64], index: 2, kind: input, shape index: {}]   ;;  %s1070_s3 = inlined_call_operand.vmem [shape: f32[128,1], index: 3, kind: input, shape index: {}]   ;;  %s1071_s4 = inlined_call_operand.vmem [shape: bf16[2,128,64], index: 4, kind: output, shape index: {}]  }
   0x1   :  { %s892_s17 = smov 0  }
   0x2 LB: > { %s26_s18 = sadd.s32 1, %s856_s16  ;;  %p697_p0 = scmp.ge.s32.totalorder %s860_s17, 1  ;;  %s860_s17 = sphi %s892_s17, %s14_s17   ;;  %s856_s16 = sphi %s890_s16, %s1073_s16   ;;  %s852_s15 = sphi %s888_s15, %s1072_s15  }
   0x3   : > { %p28_p1 = scmp.ge.s32.totalorder %s26_s18, 2  ;;  %p181_p2 = scmp.lt.s32.totalorder %s860_s17, 3 }
   0x5   : > { %s1075_s18 = smov (%p28_p1, %s26_s18), 0  ;;  %p182_p3 = pnand %p697_p0, %p181_p2 }
   0x6   : > { %p213_p4 = scmp.lt.s32.totalorder (!%p182_p3), %s852_s15, 1 }
   0x7   : > { %185 = sbr.rel (%p182_p3) target bundleno = 386 (0x182), region = 36 }
   0xc   : > { %v789_v0 = vld [vmem:[%s1068_s1 + $0x18] sm:$0xff]  ;;  %v788_v1 = vld [vmem:[%s1068_s1 + $0x10] sm:$0xff]  ;;  %s1077_s15 = smov (!%p213_p4, %s852_s15), 1  ;;  %v787_v2 = vld [vmem:[%s1068_s1 + $0x8] sm:$0xff]  ;;  %vm290_vm0 = vcmask 523264   ;;  %v862_v9 = vmov 0  }
   0xd   : > { %307 = vmatpush.bf16.msra.mxu0 %v789_v0  ;;  %798 = vmatpush.bf16.msra.mxu3 %v789_v0  ;;  %s780_s25 = sshll.u32 %s1077_s15, 5  ;;  %v786_v3 = vld [vmem:[%s1068_s1] sm:$0xff]  ;;  %v353_v11 = vld [vmem:[%s1070_s3 + $0x8] sm:$0xff]  ;;  %v354_v14 = vld [vmem:[%s1070_s3 + $0x10] sm:$0xff]  ;;  %s781_s9 = sshll.u32 %s1077_s15, 6  ;;  %vm593_vm1 = vcmask 519168  }
   0xe   : > { %s220_s30 = scalar_lea.vmem %s1067_s0, %s780_s25  ;;  %v352_v8 = vld [vmem:[%s1070_s3] sm:$0xff]  ;;  %835 = vset.pattern.permute.xlu0 %v862_v9  ;;  %836 = vset.pattern.permute.xlu1 %v862_v9  ;;  %v358_v15 = vld [vmem:[%s1070_s3 + $0x30] sm:$0xff]  ;;  %v355_v19 = vld [vmem:[%s1070_s3 + $0x18] sm:$0xff]  ;;  %s1018_s12 = scalar_lea.vmem %s1071_s4, %s781_s9 }
   0xf   : > { %v782_v4 = vld [vmem:[%s220_s30] sm:$0xff]  ;;  %v785_v5 = vld [vmem:[%s220_s30 + $0x18] sm:$0xff]  ;;  %v783_v6 = vld [vmem:[%s220_s30 + $0x8] sm:$0xff]  ;;  %370 = vperm.xlu0 %835, %v352_v8   ;;  %837 = vset.pattern.permute.xlu2 %v862_v9 }
  0x10   : > { %v784_v7 = vld [vmem:[%s220_s30 + $0x10] sm:$0xff]  ;;  %380 = vperm.xlu1 %836, %v354_v14   ;;  %v361_v20 = vld [vmem:[%s1070_s3 + $0x48] sm:$0xff]  ;;  %v359_v22 = vld [vmem:[%s1070_s3 + $0x38] sm:$0xff] }
  0x11   : > { %308 = vmatpush.bf16.msra.mxu0 %v788_v1  ;;  %799 = vmatpush.bf16.msra.mxu3 %v788_v1  ;;  %v364_v23 = vld [vmem:[%s1070_s3 + $0x60] sm:$0xff]  ;;  %v362_v26 = vld [vmem:[%s1070_s3 + $0x50] sm:$0xff]  ;;  %v367_v27 = vld [vmem:[%s1070_s3 + $0x78] sm:$0xff] }
  0x12   : > { %v356_v25 = vld [vmem:[%s1070_s3 + $0x20] sm:$0xff]  ;;  %v357_v31 = vld [vmem:[%s1070_s3 + $0x28] sm:$0xff]  ;;  %v793_v35 = vld [vmem:[%s1069_s2 + $0x18] sm:$0xff] }
  0x13   : > { %390 = vperm.xlu2 %837, %v356_v25   ;;  %v365_v32 = vld [vmem:[%s1070_s3 + $0x68] sm:$0xff]  ;;  %v790_v34 = vld [vmem:[%s1069_s2] sm:$0xff]  ;;  %v796_v36 = vld [vmem:[%s1069_s2 + $0x30] sm:$0xff] }
  0x14   : > { %v360_v37 = vld [vmem:[%s1070_s3 + $0x40] sm:$0xff]  ;;  %v363_v38 = vld [vmem:[%s1070_s3 + $0x58] sm:$0xff]  ;;  %v791_v39 = vld [vmem:[%s1069_s2 + $0x8] sm:$0xff] }
  0x15   : > { %309 = vmatpush.bf16.msra.mxu0 %v787_v2  ;;  %800 = vmatpush.bf16.msra.mxu3 %v787_v2  ;;  %v794_v40 = vld [vmem:[%s1069_s2 + $0x20] sm:$0xff]  ;;  %v797_v41 = vld [vmem:[%s1069_s2 + $0x38] sm:$0xff]  ;;  %v366_v42 = vld [vmem:[%s1070_s3 + $0x70] sm:$0xff] }
  0x16   : > { %v792_v43 = vld [vmem:[%s1069_s2 + $0x10] sm:$0xff]  ;;  %v795_v44 = vld [vmem:[%s1069_s2 + $0x28] sm:$0xff] }
  0x17   : > { %375 = vperm.xlu0 %835, %v353_v11  }
  0x18   : > { %385 = vperm.xlu1 %836, %v355_v19  }
  0x19   : > { %310 = vmatpush.bf16.msra.mxu0 %v786_v3  ;;  %801 = vmatpush.bf16.msra.mxu3 %v786_v3 }
  0x1b   : > { %395 = vperm.xlu2 %837, %v357_v31  }
  0x1c   : > { %734 = vmatmul.msk.bf16.vlgmr.msra.gmra.mxu0 %vm290_vm0, %v782_v4  ;;  %737 = vmatmul.msk.bf16.vlgmr.msra.gmra.mxu3 %vm290_vm0, %v785_v5 }
  0x1f   : > { %400 = vperm.xlu0 %835, %v358_v15  }
  0x20   : > { %405 = vperm.xlu1 %836, %v359_v22  }
  0x23   : > { %410 = vperm.xlu2 %837, %v360_v37  }
  0x27   : > { %415 = vperm.xlu0 %835, %v361_v20  }
  0x28   : > { %420 = vperm.xlu1 %836, %v362_v26  }
  0x2b   : > { %425 = vperm.xlu2 %837, %v363_v38  }
  0x2c   : > { %735 = vmatmul.msk.bf16.gmra.mxu0 %vm290_vm0, %v783_v6 }
  0x2f   : > { %430 = vperm.xlu0 %835, %v364_v23  }
  0x30   : > { %435 = vperm.xlu1 %836, %v365_v32  }
  0x33   : > { %440 = vperm.xlu2 %837, %v366_v42  }
  0x37   : > { %445 = vperm.xlu0 %835, %v367_v27  }
  0x3c   : > { %736 = vmatmul.msk.bf16.gmra.mxu0 %vm290_vm0, %v784_v7 }
  0x6d   : > { %v1008_v48 = vpop.permute.xlu2 %390 }
  0x75   : > { %v1010_v51 = vpop.permute.xlu2 %395 }
  0x7d   : > { %v411_v56 = vpop.permute.xlu2 %410 }
  0x81   : > { %v371_v45 = vpop.permute.xlu0 %370 }
  0x82   : > { %v381_v46 = vpop.permute.xlu1 %380 }
  0x85   : > { %v1022_v8 = vpop.permute.xlu2 %425 }
  0x89   : > { %v376_v47 = vpop.permute.xlu0 %375 }
  0x8a   : > { %v386_v49 = vpop.permute.xlu1 %385 }
  0x91   : > { %v401_v50 = vpop.permute.xlu0 %400 }
  0x92   : > { %v406_v52 = vpop.permute.xlu1 %405 }
  0x99   : > { %v312_v10 = vpop.f32.mrf.mxu0  ;;  %v416_v53 = vpop.permute.xlu0 %415 }
  0x9a   : > { %v1013_v58 = vpop.permute.xlu1 %420 }
  0x9f   : > { %v327_v12 = vpop.f32.mrf.mxu3 }
  0xa1   : > { %v314_v13 = vpop.f32.mrf.mxu0  ;;  %v431_v61 = vpop.permute.xlu0 %430 }
  0xa2   : > { %v348_v33 = vpack.c.bf16 %v314_v13, %v312_v10  ;;  %v436_v10 = vpop.permute.xlu1 %435 }
  0xa7   : > { %v329_v16 = vpop.f32.mrf.mxu3 }
  0xa8   : > { %v351_v17 = vpack.c.bf16 %v329_v16, %v327_v12 }
  0xa9   : > { %v317_v18 = vpop.f32.mrf.mxu0  ;;  %v446_v37 = vpop.permute.xlu0 %445 }
  0xaa   : > { %516 = vmatpush.bf16.msra.mxu1 %v351_v17  ;;  %802 = vmatpush.bf16.msra.mxu2 %v351_v17 }
  0xab   : > { %803 = vmatpush.bf16.msrb.mxu3 %v351_v17 }
  0xb1   : > { %v319_v21 = vpop.f32.mrf.mxu0 }
  0xb2   : > { %v349_v30 = vpack.c.bf16 %v319_v21, %v317_v18 }
  0xb9   : > { %v322_v24 = vpop.f32.mrf.mxu0 }
  0xc1   : > { %v324_v28 = vpop.f32.mrf.mxu0 }
  0xc2   : > { %v350_v29 = vpack.c.bf16 %v324_v28, %v322_v24  ;;  %v441_v24 = vpop.permute.xlu2 %440 }
  0xc4   : > { %517 = vmatpush.bf16.msra.mxu1 %v350_v29  ;;  %804 = vmatpush.bf16.msra.mxu2 %v350_v29 }
  0xc5   : > { %805 = vmatpush.bf16.msrb.mxu3 %v350_v29 }
  0xc8   : > { %518 = vmatpush.bf16.msra.mxu1 %v349_v30  ;;  %806 = vmatpush.bf16.msra.mxu2 %v349_v30 }
  0xc9   : > { %807 = vmatpush.bf16.msrb.mxu3 %v349_v30 }
  0xcc   : > { %519 = vmatpush.bf16.msra.mxu1 %v348_v33  ;;  %808 = vmatpush.bf16.msra.mxu2 %v348_v33 }
  0xcd   : > { %809 = vmatpush.bf16.msrb.mxu3 %v348_v33 }
  0xcf   : > { %770 = vmatmul.msk.bf16.vlgmr.msra.gmra.mxu1 %vm290_vm0, %v790_v34  ;;  %773 = vmatmul.msk.bf16.vlgmr.msra.gmra.mxu2 %vm290_vm0, %v793_v35 }
  0xd0   : > { %776 = vmatmul.msk.bf16.vlgmr.msrb.gmra.mxu3 %vm290_vm0, %v796_v36 }
  0xdf   : > { %771 = vmatmul.msk.bf16.gmra.mxu1 %vm290_vm0, %v791_v39  ;;  %774 = vmatmul.msk.bf16.gmra.mxu2 %vm290_vm0, %v794_v40 }
  0xe0   : > { %777 = vmatmul.msk.bf16.gmra.mxu3 %vm290_vm0, %v797_v41 }
  0xef   : > { %772 = vmatmul.msk.bf16.gmra.mxu1 %vm290_vm0, %v792_v43  ;;  %775 = vmatmul.msk.bf16.gmra.mxu2 %vm290_vm0, %v795_v44 }
 0x14c   : > { %v521_v54 = vpop.f32.mrf.mxu1 }
 0x14d   : > { %v522_v55 = vadd.f32 %v521_v54, %v371_v45 }
 0x14f   : > { %v561_v57 = vmax.f32 %v522_v55, 0.0 }
 0x151   : > { %v577_v59 = vpack.c.bf16 %v561_v57, %v561_v57 }
 0x152   : > { %v536_v60 = vpop.f32.mrf.mxu2 }
 0x153   : > { %594 = vst.msk [vmem:[%s1018_s12] sm:$0xf] %vm593_vm1, %v577_v59  ;;  %v537_v62 = vadd.f32 %v536_v60, %v401_v50  ;;  %v551_v63 = vpop.f32.mrf.mxu3 }
 0x154   : > { %v552_v0 = vadd.f32 %v551_v63, %v431_v61  ;;  %v523_v1 = vpop.f32.mrf.mxu1 }
 0x155   : > { %v567_v2 = vmax.f32 %v537_v62, 0.0  ;;  %v524_v3 = vadd.f32 %v523_v1, %v376_v47 }
 0x156   : > { %v573_v4 = vmax.f32 %v552_v0, 0.0 }
 0x157   : > { %v583_v5 = vpack.c.bf16 %v567_v2, %v567_v2  ;;  %v562_v6 = vmax.f32 %v524_v3, 0.0 }
 0x158   : > { %v589_v7 = vpack.c.bf16 %v573_v4, %v573_v4 }
 0x159   : > { %600 = vst.msk [vmem:[%s1018_s12 + $0x18] sm:$0xf] %vm593_vm1, %v583_v5  ;;  %v578_v9 = vpack.c.bf16 %v562_v6, %v562_v6 }
 0x15a   : > { %606 = vst.msk [vmem:[%s1018_s12 + $0x30] sm:$0xf] %vm593_vm1, %v589_v7  ;;  %v538_v11 = vpop.f32.mrf.mxu2 }
 0x15b   : > { %595 = vst.msk [vmem:[%s1018_s12 + $0x4] sm:$0xf] %vm593_vm1, %v578_v9  ;;  %v539_v12 = vadd.f32 %v538_v11, %v406_v52  ;;  %v553_v13 = vpop.f32.mrf.mxu3 }
 0x15c   : > { %v554_v14 = vadd.f32 %v553_v13, %v436_v10  ;;  %v526_v15 = vpop.f32.mrf.mxu1 }
 0x15d   : > { %v568_v16 = vmax.f32 %v539_v12, 0.0  ;;  %v527_v17 = vadd.f32 %v526_v15, %v381_v46 }
 0x15e   : > { %v574_v18 = vmax.f32 %v554_v14, 0.0 }
 0x15f   : > { %v584_v19 = vpack.c.bf16 %v568_v16, %v568_v16  ;;  %v563_v20 = vmax.f32 %v527_v17, 0.0 }
 0x160   : > { %v590_v21 = vpack.c.bf16 %v574_v18, %v574_v18 }
 0x161   : > { %601 = vst.msk [vmem:[%s1018_s12 + $0x1c] sm:$0xf] %vm593_vm1, %v584_v19  ;;  %v579_v22 = vpack.c.bf16 %v563_v20, %v563_v20 }
 0x162   : > { %607 = vst.msk [vmem:[%s1018_s12 + $0x34] sm:$0xf] %vm593_vm1, %v590_v21  ;;  %v541_v23 = vpop.f32.mrf.mxu2 }
 0x163   : > { %596 = vst.msk [vmem:[%s1018_s12 + $0x8] sm:$0xf] %vm593_vm1, %v579_v22  ;;  %v542_v25 = vadd.f32 %v541_v23, %v411_v56  ;;  %v556_v26 = vpop.f32.mrf.mxu3 }
 0x164   : > { %v557_v27 = vadd.f32 %v556_v26, %v441_v24  ;;  %v528_v28 = vpop.f32.mrf.mxu1 }
 0x165   : > { %v569_v29 = vmax.f32 %v542_v25, 0.0  ;;  %v529_v30 = vadd.f32 %v528_v28, %v386_v49 }
 0x166   : > { %v575_v31 = vmax.f32 %v557_v27, 0.0 }
 0x167   : > { %v585_v32 = vpack.c.bf16 %v569_v29, %v569_v29  ;;  %v564_v33 = vmax.f32 %v529_v30, 0.0 }
 0x168   : > { %v591_v34 = vpack.c.bf16 %v575_v31, %v575_v31 }
 0x169   : > { %602 = vst.msk [vmem:[%s1018_s12 + $0x20] sm:$0xf] %vm593_vm1, %v585_v32  ;;  %v580_v35 = vpack.c.bf16 %v564_v33, %v564_v33 }
 0x16a   : > { %608 = vst.msk [vmem:[%s1018_s12 + $0x38] sm:$0xf] %vm593_vm1, %v591_v34  ;;  %v543_v36 = vpop.f32.mrf.mxu2 }
 0x16b   : > { %597 = vst.msk [vmem:[%s1018_s12 + $0xc] sm:$0xf] %vm593_vm1, %v580_v35  ;;  %v544_v38 = vadd.f32 %v543_v36, %v416_v53  ;;  %v558_v39 = vpop.f32.mrf.mxu3 }
 0x16c   : > { %v559_v40 = vadd.f32 %v558_v39, %v446_v37  ;;  %v531_v41 = vpop.f32.mrf.mxu1 }
 0x16d   : > { %v570_v42 = vmax.f32 %v544_v38, 0.0  ;;  %v532_v43 = vadd.f32 %v531_v41, %v1008_v48 }
 0x16e   : > { %v576_v44 = vmax.f32 %v559_v40, 0.0 }
 0x16f   : > { %v586_v45 = vpack.c.bf16 %v570_v42, %v570_v42  ;;  %v565_v46 = vmax.f32 %v532_v43, 0.0 }
 0x170   : > { %v592_v47 = vpack.c.bf16 %v576_v44, %v576_v44 }
 0x171   : > { %603 = vst.msk [vmem:[%s1018_s12 + $0x24] sm:$0xf] %vm593_vm1, %v586_v45  ;;  %v581_v49 = vpack.c.bf16 %v565_v46, %v565_v46 }
 0x172   : > { %609 = vst.msk [vmem:[%s1018_s12 + $0x3c] sm:$0xf] %vm593_vm1, %v592_v47  ;;  %v546_v50 = vpop.f32.mrf.mxu2 }
 0x173   : > { %598 = vst.msk [vmem:[%s1018_s12 + $0x10] sm:$0xf] %vm593_vm1, %v581_v49  ;;  %v547_v52 = vadd.f32 %v546_v50, %v1013_v58 }
 0x174   : > { %v533_v53 = vpop.f32.mrf.mxu1 }
 0x175   : > { %v571_v54 = vmax.f32 %v547_v52, 0.0  ;;  %v534_v48 = vadd.f32 %v533_v53, %v1010_v51 }
 0x177   : > { %v587_v55 = vpack.c.bf16 %v571_v54, %v571_v54  ;;  %v566_v56 = vmax.f32 %v534_v48, 0.0 }
 0x179   : > { %604 = vst.msk [vmem:[%s1018_s12 + $0x28] sm:$0xf] %vm593_vm1, %v587_v55  ;;  %v582_v57 = vpack.c.bf16 %v566_v56, %v566_v56 }
 0x17a   : > { %v548_v59 = vpop.f32.mrf.mxu2 }
 0x17b   : > { %599 = vst.msk [vmem:[%s1018_s12 + $0x14] sm:$0xf] %vm593_vm1, %v582_v57  ;;  %v549_v60 = vadd.f32 %v548_v59, %v1022_v8 }
 0x17d   : > { %v572_v61 = vmax.f32 %v549_v60, 0.0 }
 0x17f   : > { %v588_v62 = vpack.c.bf16 %v572_v61, %v572_v61 }
 0x181   : > { %605 = vst.msk [vmem:[%s1018_s12 + $0x2c] sm:$0xf] %vm593_vm1, %v588_v62 }
 0x182 PF: > { %s14_s17 = sadd.s32 1, %s860_s17   ;;  %s1072_s15 = smov %s856_s16 }
 0x183   : > { %p11_p5 = scmp.ge.s32.totalorder %s14_s17, 4   ;;  %s1073_s16 = smov %s1075_s18 }
 0x185   :  { %13 = sbr.rel (!%p11_p5) target bundleno = 2 (0x2), region = 66 }

// kernel: st_dis_forward.14
= control target key start
LH: loop header
LB: loop body
LE: loop exit
PB: predicated region body
PF: predicated region fallthrough
CT: control target
= control target key end

     0   :  { %s924_s15 = smov 0   ;;  %s926_s16 = smov 0   ;;  %s1082_s0 = inlined_call_operand.vmem [shape: bf16[2,128,32], index: 0, kind: input, shape index: {}]   ;;  %s1083_s1 = inlined_call_operand.vmem [shape: bf16[32,32], index: 1, kind: input, shape index: {}]   ;;  %s1084_s2 = inlined_call_operand.vmem [shape: bf16[128,128], index: 2, kind: input, shape index: {}]   ;;  %s1085_s3 = inlined_call_operand.vmem [shape: f32[128,1], index: 3, kind: input, shape index: {}]   ;;  %s1086_s4 = inlined_call_operand.vmem [shape: bf16[2,128,32], index: 4, kind: output, shape index: {}]  }
   0x1   :  { %s928_s17 = smov 0  }
   0x2 LB: > { %s26_s18 = sadd.s32 1, %s892_s16  ;;  %p729_p0 = scmp.ge.s32.totalorder %s896_s17, 1  ;;  %s896_s17 = sphi %s928_s17, %s14_s17   ;;  %s892_s16 = sphi %s926_s16, %s1088_s16   ;;  %s888_s15 = sphi %s924_s15, %s1087_s15  }
   0x3   : > { %p28_p1 = scmp.ge.s32.totalorder %s26_s18, 2  ;;  %p181_p2 = scmp.lt.s32.totalorder %s896_s17, 3 }
   0x5   : > { %s1090_s18 = smov (%p28_p1, %s26_s18), 0  ;;  %p182_p3 = pnand %p729_p0, %p181_p2 }
   0x6   : > { %p213_p4 = scmp.lt.s32.totalorder (!%p182_p3), %s888_s15, 1 }
   0x7   : > { %185 = sbr.rel (%p182_p3) target bundleno = 434 (0x1b2), region = 36 }
   0xc   : > { %v827_v0 = vld [vmem:[%s1083_s1 + $0x8] sm:$0xff]  ;;  %v826_v1 = vld [vmem:[%s1083_s1] sm:$0xff]  ;;  %s1092_s15 = smov (!%p213_p4, %s888_s15), 1  ;;  %vm302_vm0 = vcmask 261120   ;;  %v898_v27 = vmov 0   ;;  %v402_v31 = vld [vmem:[%s1085_s3 + $0x10] sm:$0xff] }
   0xd   : > { %333 = vmatpush.bf16.msra.mxu0 %v827_v0  ;;  %836 = vmatpush.bf16.msra.mxu3 %v827_v0  ;;  %s816_s23 = sshll.u32 %s1092_s15, 6  ;;  %v400_v26 = vld [vmem:[%s1085_s3] sm:$0xff]  ;;  %v401_v30 = vld [vmem:[%s1085_s3 + $0x8] sm:$0xff]  ;;  %v406_v33 = vld [vmem:[%s1085_s3 + $0x30] sm:$0xff]  ;;  %vm625_vm1 = vcmask 257024  }
   0xe   : > { %s220_s26 = scalar_lea.vmem %s1082_s0, %s816_s23  ;;  %871 = vset.pattern.permute.xlu0 %v898_v27  ;;  %872 = vset.pattern.permute.xlu1 %v898_v27  ;;  %v403_v37 = vld [vmem:[%s1085_s3 + $0x18] sm:$0xff]  ;;  %v409_v38 = vld [vmem:[%s1085_s3 + $0x48] sm:$0xff]  ;;  %v404_v39 = vld [vmem:[%s1085_s3 + $0x20] sm:$0xff]  ;;  %s1035_s9 = scalar_lea.vmem %s1086_s4, %s816_s23 }
   0xf   : > { %v818_v2 = vld [vmem:[%s220_s26] sm:$0xff]  ;;  %v823_v3 = vld [vmem:[%s220_s26 + $0x28] sm:$0xff]  ;;  %v824_v5 = vld [vmem:[%s220_s26 + $0x30] sm:$0xff]  ;;  %418 = vperm.xlu0 %871, %v400_v26   ;;  %873 = vset.pattern.permute.xlu2 %v898_v27 }
  0x10   : > { %v819_v4 = vld [vmem:[%s220_s26 + $0x8] sm:$0xff]  ;;  %v820_v6 = vld [vmem:[%s220_s26 + $0x10] sm:$0xff]  ;;  %v825_v7 = vld [vmem:[%s220_s26 + $0x38] sm:$0xff]  ;;  %428 = vperm.xlu1 %872, %v402_v31   ;;  %438 = vperm.xlu2 %873, %v404_v39  }
  0x11   : > { %334 = vmatpush.bf16.msra.mxu0 %v826_v1  ;;  %837 = vmatpush.bf16.msra.mxu3 %v826_v1  ;;  %v821_v8 = vld [vmem:[%s220_s26 + $0x18] sm:$0xff]  ;;  %v822_v9 = vld [vmem:[%s220_s26 + $0x20] sm:$0xff]  ;;  %v405_v46 = vld [vmem:[%s1085_s3 + $0x28] sm:$0xff] }
  0x12   : > { %v407_v42 = vld [vmem:[%s1085_s3 + $0x38] sm:$0xff]  ;;  %v412_v43 = vld [vmem:[%s1085_s3 + $0x60] sm:$0xff]  ;;  %v410_v47 = vld [vmem:[%s1085_s3 + $0x50] sm:$0xff] }
  0x13   : > { %v828_v44 = vld [vmem:[%s1084_s2] sm:$0xff]  ;;  %v415_v48 = vld [vmem:[%s1085_s3 + $0x78] sm:$0xff]  ;;  %v413_v50 = vld [vmem:[%s1085_s3 + $0x68] sm:$0xff] }
  0x14   : > { %774 = vmatmul.msk.bf16.vlgmr.msra.gmra.mxu0 %vm302_vm0, %v818_v2  ;;  %779 = vmatmul.msk.bf16.vlgmr.msra.gmra.mxu3 %vm302_vm0, %v823_v3  ;;  %v832_v45 = vld [vmem:[%s1084_s2 + $0x20] sm:$0xff]  ;;  %v829_v51 = vld [vmem:[%s1084_s2 + $0x8] sm:$0xff]  ;;  %v411_v53 = vld [vmem:[%s1085_s3 + $0x58] sm:$0xff] }
  0x15   : > { %v408_v49 = vld [vmem:[%s1085_s3 + $0x40] sm:$0xff]  ;;  %v833_v52 = vld [vmem:[%s1084_s2 + $0x28] sm:$0xff]  ;;  %v414_v54 = vld [vmem:[%s1085_s3 + $0x70] sm:$0xff] }
  0x16   : > { %v830_v55 = vld [vmem:[%s1084_s2 + $0x10] sm:$0xff]  ;;  %v831_v57 = vld [vmem:[%s1084_s2 + $0x18] sm:$0xff] }
  0x17   : > { %423 = vperm.xlu0 %871, %v401_v30   ;;  %v834_v56 = vld [vmem:[%s1084_s2 + $0x30] sm:$0xff]  ;;  %v835_v58 = vld [vmem:[%s1084_s2 + $0x38] sm:$0xff] }
  0x18   : > { %433 = vperm.xlu1 %872, %v403_v37   ;;  %443 = vperm.xlu2 %873, %v405_v46  }
  0x1f   : > { %448 = vperm.xlu0 %871, %v406_v33  }
  0x20   : > { %453 = vperm.xlu1 %872, %v407_v42   ;;  %458 = vperm.xlu2 %873, %v408_v49  }
  0x24   : > { %775 = vmatmul.msk.bf16.gmra.mxu0 %vm302_vm0, %v819_v4  ;;  %780 = vmatmul.msk.bf16.gmra.mxu3 %vm302_vm0, %v824_v5 }
  0x27   : > { %463 = vperm.xlu0 %871, %v409_v38  }
  0x28   : > { %468 = vperm.xlu1 %872, %v410_v47   ;;  %473 = vperm.xlu2 %873, %v411_v53  }
  0x2f   : > { %478 = vperm.xlu0 %871, %v412_v43  }
  0x30   : > { %483 = vperm.xlu1 %872, %v413_v50   ;;  %488 = vperm.xlu2 %873, %v414_v54  }
  0x34   : > { %776 = vmatmul.msk.bf16.gmra.mxu0 %vm302_vm0, %v820_v6  ;;  %781 = vmatmul.msk.bf16.gmra.mxu3 %vm302_vm0, %v825_v7 }
  0x37   : > { %493 = vperm.xlu0 %871, %v415_v48  }
  0x44   : > { %777 = vmatmul.msk.bf16.gmra.mxu0 %vm302_vm0, %v821_v8 }
  0x54   : > { %778 = vmatmul.msk.bf16.gmra.mxu0 %vm302_vm0, %v822_v9 }
  0x6a   : > { %v439_v60 = vpop.permute.xlu2 %438 }
  0x72   : > { %v444_v63 = vpop.permute.xlu2 %443 }
  0x7a   : > { %v459_v5 = vpop.permute.xlu2 %458 }
  0x81   : > { %v419_v59 = vpop.permute.xlu0 %418 }
  0x82   : > { %v429_v61 = vpop.permute.xlu1 %428 }
  0x89   : > { %v424_v62 = vpop.permute.xlu0 %423 }
  0x8a   : > { %v434_v1 = vpop.permute.xlu1 %433 }
  0x91   : > { %v336_v10 = vpop.f32.mrf.mxu0  ;;  %v1028_v4 = vpop.permute.xlu0 %448 }
  0x97   : > { %v361_v11 = vpop.f32.mrf.mxu3 }
  0x99   : > { %v338_v12 = vpop.f32.mrf.mxu0 }
  0x9a   : > { %v392_v13 = vpack.c.bf16 %v338_v12, %v336_v10  ;;  %v1039_v12 = vpop.permute.xlu1 %453 }
  0x9f   : > { %v363_v14 = vpop.f32.mrf.mxu3 }
  0xa0   : > { %v397_v28 = vpack.c.bf16 %v363_v14, %v361_v11 }
  0xa1   : > { %v341_v15 = vpop.f32.mrf.mxu0 }
  0xa7   : > { %v366_v16 = vpop.f32.mrf.mxu3 }
  0xa9   : > { %v343_v17 = vpop.f32.mrf.mxu0 }
  0xaa   : > { %v393_v41 = vpack.c.bf16 %v343_v17, %v341_v15 }
  0xaf   : > { %v368_v18 = vpop.f32.mrf.mxu3 }
  0xb0   : > { %v398_v25 = vpack.c.bf16 %v368_v18, %v366_v16  ;;  %v464_v16 = vpop.permute.xlu0 %463 }
  0xb1   : > { %v346_v19 = vpop.f32.mrf.mxu0 }
  0xb7   : > { %v371_v20 = vpop.f32.mrf.mxu3 }
  0xb8   : > { %v479_v43 = vpop.permute.xlu0 %478 }
  0xb9   : > { %v348_v21 = vpop.f32.mrf.mxu0 }
  0xba   : > { %v394_v40 = vpack.c.bf16 %v348_v21, %v346_v19 }
  0xbf   : > { %v373_v22 = vpop.f32.mrf.mxu3 }
  0xc0   : > { %v399_v23 = vpack.c.bf16 %v373_v22, %v371_v20 }
  0xc1   : > { %v351_v24 = vpop.f32.mrf.mxu0 }
  0xc2   : > { %544 = vmatpush.bf16.msra.mxu1 %v399_v23  ;;  %838 = vmatpush.bf16.msra.mxu2 %v399_v23 }
  0xc6   : > { %545 = vmatpush.bf16.msra.mxu1 %v398_v25  ;;  %839 = vmatpush.bf16.msra.mxu2 %v398_v25 }
  0xc9   : > { %v353_v29 = vpop.f32.mrf.mxu0 }
  0xca   : > { %546 = vmatpush.bf16.msra.mxu1 %v397_v28  ;;  %840 = vmatpush.bf16.msra.mxu2 %v397_v28  ;;  %v395_v36 = vpack.c.bf16 %v353_v29, %v351_v24  ;;  %v469_v24 = vpop.permute.xlu1 %468 }
  0xd1   : > { %v356_v32 = vpop.f32.mrf.mxu0 }
  0xd9   : > { %v358_v34 = vpop.f32.mrf.mxu0 }
  0xda   : > { %v396_v35 = vpack.c.bf16 %v358_v34, %v356_v32  ;;  %v474_v34 = vpop.permute.xlu2 %473 }
  0xdc   : > { %547 = vmatpush.bf16.msra.mxu1 %v396_v35  ;;  %841 = vmatpush.bf16.msra.mxu2 %v396_v35 }
  0xe0   : > { %548 = vmatpush.bf16.msra.mxu1 %v395_v36  ;;  %842 = vmatpush.bf16.msra.mxu2 %v395_v36 }
  0xe4   : > { %549 = vmatpush.bf16.msra.mxu1 %v394_v40  ;;  %843 = vmatpush.bf16.msra.mxu2 %v394_v40 }
  0xe8   : > { %550 = vmatpush.bf16.msra.mxu1 %v393_v41  ;;  %844 = vmatpush.bf16.msra.mxu2 %v393_v41 }
  0xec   : > { %551 = vmatpush.bf16.msra.mxu1 %v392_v13  ;;  %845 = vmatpush.bf16.msra.mxu2 %v392_v13 }
  0xef   : > { %552 = vmatmul.bf16.vlgmr.msra.gmra.mxu1 %v828_v44  ;;  %572 = vmatmul.bf16.vlgmr.msra.gmra.mxu2 %v832_v45 }
  0xff   : > { %557 = vmatmul.bf16.gmra.mxu1 %v829_v51  ;;  %577 = vmatmul.bf16.gmra.mxu2 %v833_v52  ;;  %v484_v52 = vpop.permute.xlu1 %483 }
 0x10f   : > { %562 = vmatmul.bf16.gmra.mxu1 %v830_v55  ;;  %582 = vmatmul.bf16.gmra.mxu2 %v834_v56 }
 0x11f   : > { %567 = vmatmul.bf16.gmra.mxu1 %v831_v57  ;;  %587 = vmatmul.bf16.gmra.mxu2 %v835_v58 }
 0x16c   : > { %v553_v0 = vpop.f32.mrf.mxu1 }
 0x16d   : > { %v554_v2 = vadd.f32 %v553_v0, %v419_v59 }
 0x16f   : > { %v593_v3 = vmax.f32 %v554_v2, 0.0 }
 0x171   : > { %v609_v6 = vpack.c.bf16 %v593_v3, %v593_v3 }
 0x172   : > { %v573_v7 = vpop.f32.mrf.mxu2 }
 0x173   : > { %626 = vst.msk [vmem:[%s1035_s9] sm:$0xf] %vm625_vm1, %v609_v6  ;;  %v574_v8 = vadd.f32 %v573_v7, %v459_v5  ;;  %v494_v6 = vpop.permute.xlu0 %493 }
 0x174   : > { %v555_v9 = vpop.f32.mrf.mxu1 }
 0x175   : > { %v601_v10 = vmax.f32 %v574_v8, 0.0  ;;  %v556_v11 = vadd.f32 %v555_v9, %v424_v62 }
 0x177   : > { %v617_v13 = vpack.c.bf16 %v601_v10, %v601_v10  ;;  %v594_v14 = vmax.f32 %v556_v11, 0.0 }
 0x179   : > { %634 = vst.msk [vmem:[%s1035_s9 + $0x20] sm:$0xf] %vm625_vm1, %v617_v13  ;;  %v610_v15 = vpack.c.bf16 %v594_v14, %v594_v14 }
 0x17a   : > { %v575_v17 = vpop.f32.mrf.mxu2 }
 0x17b   : > { %627 = vst.msk [vmem:[%s1035_s9 + $0x4] sm:$0xf] %vm625_vm1, %v610_v15  ;;  %v576_v18 = vadd.f32 %v575_v17, %v464_v16 }
 0x17c   : > { %v558_v19 = vpop.f32.mrf.mxu1 }
 0x17d   : > { %v602_v20 = vmax.f32 %v576_v18, 0.0  ;;  %v559_v21 = vadd.f32 %v558_v19, %v429_v61  ;;  %v489_v61 = vpop.permute.xlu2 %488 }
 0x17f   : > { %v618_v22 = vpack.c.bf16 %v602_v20, %v602_v20  ;;  %v595_v23 = vmax.f32 %v559_v21, 0.0 }
 0x181   : > { %635 = vst.msk [vmem:[%s1035_s9 + $0x24] sm:$0xf] %vm625_vm1, %v618_v22  ;;  %v611_v25 = vpack.c.bf16 %v595_v23, %v595_v23 }
 0x182   : > { %v578_v26 = vpop.f32.mrf.mxu2 }
 0x183   : > { %628 = vst.msk [vmem:[%s1035_s9 + $0x8] sm:$0xf] %vm625_vm1, %v611_v25  ;;  %v579_v27 = vadd.f32 %v578_v26, %v469_v24 }
 0x184   : > { %v560_v28 = vpop.f32.mrf.mxu1 }
 0x185   : > { %v603_v29 = vmax.f32 %v579_v27, 0.0  ;;  %v561_v30 = vadd.f32 %v560_v28, %v434_v1 }
 0x187   : > { %v619_v31 = vpack.c.bf16 %v603_v29, %v603_v29  ;;  %v596_v32 = vmax.f32 %v561_v30, 0.0 }
 0x189   : > { %636 = vst.msk [vmem:[%s1035_s9 + $0x28] sm:$0xf] %vm625_vm1, %v619_v31  ;;  %v612_v33 = vpack.c.bf16 %v596_v32, %v596_v32 }
 0x18a   : > { %v580_v35 = vpop.f32.mrf.mxu2 }
 0x18b   : > { %629 = vst.msk [vmem:[%s1035_s9 + $0xc] sm:$0xf] %vm625_vm1, %v612_v33  ;;  %v581_v36 = vadd.f32 %v580_v35, %v474_v34 }
 0x18c   : > { %v563_v37 = vpop.f32.mrf.mxu1 }
 0x18d   : > { %v604_v38 = vmax.f32 %v581_v36, 0.0  ;;  %v564_v39 = vadd.f32 %v563_v37, %v439_v60 }
 0x18f   : > { %v620_v40 = vpack.c.bf16 %v604_v38, %v604_v38  ;;  %v597_v41 = vmax.f32 %v564_v39, 0.0 }
 0x191   : > { %637 = vst.msk [vmem:[%s1035_s9 + $0x2c] sm:$0xf] %vm625_vm1, %v620_v40  ;;  %v613_v42 = vpack.c.bf16 %v597_v41, %v597_v41 }
 0x192   : > { %v583_v44 = vpop.f32.mrf.mxu2 }
 0x193   : > { %630 = vst.msk [vmem:[%s1035_s9 + $0x10] sm:$0xf] %vm625_vm1, %v613_v42  ;;  %v584_v45 = vadd.f32 %v583_v44, %v479_v43 }
 0x194   : > { %v565_v46 = vpop.f32.mrf.mxu1 }
 0x195   : > { %v605_v47 = vmax.f32 %v584_v45, 0.0  ;;  %v566_v48 = vadd.f32 %v565_v46, %v444_v63 }
 0x197   : > { %v621_v49 = vpack.c.bf16 %v605_v47, %v605_v47  ;;  %v598_v50 = vmax.f32 %v566_v48, 0.0 }
 0x199   : > { %638 = vst.msk [vmem:[%s1035_s9 + $0x30] sm:$0xf] %vm625_vm1, %v621_v49  ;;  %v614_v51 = vpack.c.bf16 %v598_v50, %v598_v50 }
 0x19a   : > { %v585_v53 = vpop.f32.mrf.mxu2 }
 0x19b   : > { %631 = vst.msk [vmem:[%s1035_s9 + $0x14] sm:$0xf] %vm625_vm1, %v614_v51  ;;  %v586_v54 = vadd.f32 %v585_v53, %v484_v52 }
 0x19c   : > { %v568_v55 = vpop.f32.mrf.mxu1 }
 0x19d   : > { %v606_v56 = vmax.f32 %v586_v54, 0.0  ;;  %v569_v57 = vadd.f32 %v568_v55, %v1028_v4 }
 0x19f   : > { %v622_v58 = vpack.c.bf16 %v606_v56, %v606_v56  ;;  %v599_v59 = vmax.f32 %v569_v57, 0.0 }
 0x1a1   : > { %639 = vst.msk [vmem:[%s1035_s9 + $0x34] sm:$0xf] %vm625_vm1, %v622_v58  ;;  %v615_v60 = vpack.c.bf16 %v599_v59, %v599_v59 }
 0x1a2   : > { %v588_v62 = vpop.f32.mrf.mxu2 }
 0x1a3   : > { %632 = vst.msk [vmem:[%s1035_s9 + $0x18] sm:$0xf] %vm625_vm1, %v615_v60  ;;  %v589_v63 = vadd.f32 %v588_v62, %v489_v61 }
 0x1a4   : > { %v570_v0 = vpop.f32.mrf.mxu1 }
 0x1a5   : > { %v607_v1 = vmax.f32 %v589_v63, 0.0  ;;  %v571_v2 = vadd.f32 %v570_v0, %v1039_v12 }
 0x1a7   : > { %v623_v3 = vpack.c.bf16 %v607_v1, %v607_v1  ;;  %v600_v5 = vmax.f32 %v571_v2, 0.0 }
 0x1a9   : > { %640 = vst.msk [vmem:[%s1035_s9 + $0x38] sm:$0xf] %vm625_vm1, %v623_v3  ;;  %v616_v4 = vpack.c.bf16 %v600_v5, %v600_v5 }
 0x1aa   : > { %v590_v7 = vpop.f32.mrf.mxu2 }
 0x1ab   : > { %633 = vst.msk [vmem:[%s1035_s9 + $0x1c] sm:$0xf] %vm625_vm1, %v616_v4  ;;  %v591_v8 = vadd.f32 %v590_v7, %v494_v6 }
 0x1ad   : > { %v608_v9 = vmax.f32 %v591_v8, 0.0 }
 0x1af   : > { %v624_v10 = vpack.c.bf16 %v608_v9, %v608_v9 }
 0x1b1   : > { %641 = vst.msk [vmem:[%s1035_s9 + $0x3c] sm:$0xf] %vm625_vm1, %v624_v10 }
 0x1b2 PF: > { %s14_s17 = sadd.s32 1, %s896_s17   ;;  %s1087_s15 = smov %s892_s16 }
 0x1b3   : > { %p11_p5 = scmp.ge.s32.totalorder %s14_s17, 4   ;;  %s1088_s16 = smov %s1090_s18 }
 0x1b5   :  { %13 = sbr.rel (!%p11_p5) target bundleno = 2 (0x2), region = 66 }

// kernel: st_dis_forward.13
= control target key start
LH: loop header
LB: loop body
LE: loop exit
PB: predicated region body
PF: predicated region fallthrough
CT: control target
= control target key end

     0   :  { %s3023_s24 = smov 0   ;;  %s3803_s0 = inlined_call_operand.vmem [shape: bf16[2,128,64], index: 0, kind: input, shape index: {}]   ;;  %s3804_s1 = inlined_call_operand.vmem [shape: bf16[2,128,64], index: 1, kind: input, shape index: {}]   ;;  %s3805_s2 = inlined_call_operand.vmem [shape: bf16[9,128,128], index: 2, kind: input, shape index: {}]   ;;  %s3806_s3 = inlined_call_operand.vmem [shape: f32[128,1], index: 3, kind: input, shape index: {}]   ;;  %s3807_s4 = inlined_call_operand.vmem [shape: bf16[2,64,32], index: 4, kind: input, shape index: {}]   ;;  %s3808_s5 = inlined_call_operand.vmem [shape: bf16[128,64], index: 5, kind: input, shape index: {}]   ;;  %s3809_s6 = inlined_call_operand.vmem [shape: f32[128,1], index: 6, kind: input, shape index: {}]   ;;  %s3810_s7 = inlined_call_operand.vmem [shape: bf16[2,128,32], index: 7, kind: output, shape index: {}]  }
   0x1 LB: > { %s2283_s25 = sadd.s32 4294967295, %s2976_s24   ;;  %p2287_p0 = scmp.ge.s32.totalorder %s2976_s24, 1  ;;  %s2976_s24 = sphi %s3023_s24, %s17_s24  }
   0x2   : > { %p257_p1 = scmp.lt.s32.totalorder %s2976_s24, 3 }
   0x4   : > { %p258_p2 = pnand %p2287_p0, %p257_p1 }
   0x5   : > { %p299_p3 = scmp.lt.s32.totalorder (!%p258_p2), %s2283_s25, 1  ;;  %s2978_s10 = smov (!%p258_p2), 120  }
   0x6   : > { %261 = sbr.rel (%p258_p2) target bundleno = 600 (0x258), region = 48  ;;  %s2979_s11 = smov (!%p258_p2), 112  }
   0x7   : > { %s2980_s14 = smov (!%p258_p2), 104   ;;  %s2981_s23 = smov (!%p258_p2), 96  }
   0xb   : > { %s3812_s25 = smov (!%p299_p3, %s2283_s25), 1  ;;  %v2866_v16 = vld [vmem:[%s3805_s2 + $0x60] sm:$0xff]  ;;  %v2867_v18 = vld [vmem:[%s3805_s2 + $0x68] sm:$0xff]  ;;  %v2868_v24 = vld [vmem:[%s3805_s2 + $0x70] sm:$0xff]  ;;  %vm1953_vm0 = vcmask 523264   ;;  %vm2187_vm1 = vcmask 257024  }
   0xc   : > { %s3034_s26 = sshll.u32 %s3812_s25, 6  ;;  %v2858_v17 = vld [vmem:[%s3805_s2 + $0x20] sm:$0xff]  ;;  %v2859_v22 = vld [vmem:[%s3805_s2 + $0x28] sm:$0xff]  ;;  %v2860_v30 = vld [vmem:[%s3805_s2 + $0x30] sm:$0xff]  ;;  %s2836_s15 = sshll.u32 %s3812_s25, 5 }
   0xd   : > { %s3040_s29 = scalar_lea.vmem %s3803_s0, %s3034_s26  ;;  %s3046_s9 = scalar_lea.vmem %s3804_s1, %s3034_s26  ;;  %v2862_v20 = vld [vmem:[%s3805_s2 + $0x40] sm:$0xff]  ;;  %v2863_v26 = vld [vmem:[%s3805_s2 + $0x48] sm:$0xff]  ;;  %v2869_v32 = vld [vmem:[%s3805_s2 + $0x78] sm:$0xff] }
   0xe   : > { %v3049_v0 = vld [vmem:[%s3040_s29 + $0x38] sm:$0xff]  ;;  %v3052_v1 = vld [vmem:[%s3040_s29 + $0x30] sm:$0xff]  ;;  %v3058_v3 = vld [vmem:[%s3040_s29 + $0x28] sm:$0xff]  ;;  %s3304_s18 = scalar_lea.vmem %s3807_s4, %s2836_s15  ;;  %s3737_s17 = scalar_lea.vmem %s3810_s7, %s3034_s26 }
   0xf   : > { %v3055_v2 = vld [vmem:[%s3046_s9 + $0x38] sm:$0xff]  ;;  %754 = vrot.lane.b32.xlu0 %v3049_v0, %s2978_s10  ;;  %752 = vrot.lane.b32.xlu1 %v3052_v1, %s2978_s10  ;;  %v3070_v4 = vld [vmem:[%s3046_s9 + $0x30] sm:$0xff] }
  0x10   : > { %750 = vrot.lane.b32.xlu2 %v3058_v3, %s2978_s10  ;;  %2938 = vmatpush.bf16.msra.mxu2 %v3055_v2  ;;  %v3074_v5 = vld [vmem:[%s3046_s9 + $0x28] sm:$0xff]  ;;  %v3090_v6 = vld [vmem:[%s3046_s9 + $0x20] sm:$0xff]  ;;  %v3100_v8 = vld [vmem:[%s3046_s9 + $0x18] sm:$0xff] }
  0x11   : > { %2946 = vmatpush.bf16.msra.mxu3 %v3049_v0  ;;  %481 = vmatpush.bf16.msra.mxu0 %v3055_v2  ;;  %v3094_v7 = vld [vmem:[%s3040_s29 + $0x20] sm:$0xff]  ;;  %v3108_v9 = vld [vmem:[%s3040_s29 + $0x18] sm:$0xff]  ;;  %v3116_v10 = vld [vmem:[%s3046_s9 + $0x10] sm:$0xff] }
  0x12   : > { %626 = vmatpush.bf16.msra.mxu1 %v3049_v0  ;;  %v3120_v11 = vld [vmem:[%s3040_s29 + $0x10] sm:$0xff]  ;;  %v3131_v12 = vld [vmem:[%s3040_s29 + $0x8] sm:$0xff]  ;;  %v3149_v14 = vld [vmem:[%s3046_s9] sm:$0xff] }
  0x13   : > { %v3142_v13 = vld [vmem:[%s3046_s9 + $0x8] sm:$0xff]  ;;  %v3158_v15 = vld [vmem:[%s3040_s29] sm:$0xff]  ;;  %v2864_v36 = vld [vmem:[%s3805_s2 + $0x50] sm:$0xff] }
  0x14   : > { %2939 = vmatpush.bf16.msra.mxu2 %v3070_v4  ;;  %v2854_v21 = vld [vmem:[%s3805_s2] sm:$0xff]  ;;  %v2855_v27 = vld [vmem:[%s3805_s2 + $0x8] sm:$0xff]  ;;  %v2856_v37 = vld [vmem:[%s3805_s2 + $0x10] sm:$0xff] }
  0x15   : > { %2947 = vmatpush.bf16.msra.mxu3 %v3052_v1  ;;  %482 = vmatpush.bf16.msra.mxu0 %v3070_v4  ;;  %v2861_v40 = vld [vmem:[%s3805_s2 + $0x38] sm:$0xff]  ;;  %v2870_v56 = vld [vmem:[%s3805_s2 + $0x80] sm:$0xff] }
  0x16   : > { %627 = vmatpush.bf16.msra.mxu1 %v3052_v1  ;;  %v2865_v45 = vld [vmem:[%s3805_s2 + $0x58] sm:$0xff]  ;;  %v2878_v62 = vld [vmem:[%s3805_s2 + $0xc0] sm:$0xff] }
  0x17   : > { %908 = vrot.lane.b32.xlu0 %v3055_v2, %s2978_s10  ;;  %906 = vrot.lane.b32.xlu1 %v3070_v4, %s2978_s10  ;;  %v2857_v46 = vld [vmem:[%s3805_s2 + $0x18] sm:$0xff] }
  0x18   : > { %904 = vrot.lane.b32.xlu2 %v3074_v5, %s2978_s10  ;;  %2940 = vmatpush.bf16.msra.mxu2 %v3074_v5 }
  0x19   : > { %2948 = vmatpush.bf16.msra.mxu3 %v3058_v3  ;;  %483 = vmatpush.bf16.msra.mxu0 %v3074_v5 }
  0x1a   : > { %628 = vmatpush.bf16.msra.mxu1 %v3058_v3 }
  0x1c   : > { %2941 = vmatpush.bf16.msra.mxu2 %v3090_v6 }
  0x1d   : > { %2949 = vmatpush.bf16.msra.mxu3 %v3094_v7  ;;  %484 = vmatpush.bf16.msra.mxu0 %v3090_v6 }
  0x1e   : > { %629 = vmatpush.bf16.msra.mxu1 %v3094_v7 }
  0x1f   : > { %1062 = vrot.lane.b32.xlu0 %v3049_v0, %s2979_s11  ;;  %748 = vrot.lane.b32.xlu1 %v3094_v7, %s2978_s10 }
  0x20   : > { %902 = vrot.lane.b32.xlu2 %v3090_v6, %s2978_s10  ;;  %2942 = vmatpush.bf16.msra.mxu2 %v3100_v8 }
  0x21   : > { %2950 = vmatpush.bf16.msra.mxu3 %v3108_v9  ;;  %485 = vmatpush.bf16.msra.mxu0 %v3100_v8 }
  0x22   : > { %630 = vmatpush.bf16.msra.mxu1 %v3108_v9 }
  0x24   : > { %2943 = vmatpush.bf16.msra.mxu2 %v3116_v10 }
  0x25   : > { %2951 = vmatpush.bf16.msra.mxu3 %v3120_v11  ;;  %486 = vmatpush.bf16.msra.mxu0 %v3116_v10 }
  0x26   : > { %631 = vmatpush.bf16.msra.mxu1 %v3120_v11 }
  0x27   : > { %1060 = vrot.lane.b32.xlu0 %v3052_v1, %s2979_s11  ;;  %1216 = vrot.lane.b32.xlu1 %v3055_v2, %s2979_s11 }
  0x28   : > { %746 = vrot.lane.b32.xlu2 %v3108_v9, %s2978_s10  ;;  %2944 = vmatpush.bf16.msra.mxu2 %v3142_v13 }
  0x29   : > { %2952 = vmatpush.bf16.msra.mxu3 %v3131_v12  ;;  %487 = vmatpush.bf16.msra.mxu0 %v3142_v13 }
  0x2a   : > { %632 = vmatpush.bf16.msra.mxu1 %v3131_v12 }
  0x2c   : > { %2945 = vmatpush.bf16.msra.mxu2 %v3149_v14 }
  0x2d   : > { %488 = vmatpush.bf16.msra.mxu0 %v3149_v14  ;;  %2953 = vmatpush.bf16.msra.mxu3 %v3158_v15 }
  0x2e   : > { %633 = vmatpush.bf16.msra.mxu1 %v3158_v15 }
  0x2f   : > { %900 = vrot.lane.b32.xlu0 %v3100_v8, %s2978_s10  ;;  %1058 = vrot.lane.b32.xlu1 %v3058_v3, %s2979_s11 }
  0x30   : > { %1214 = vrot.lane.b32.xlu2 %v3070_v4, %s2979_s11  ;;  %509 = vmatmul.bf16.vlgmr.msra.gmra.mxu2 %v2866_v16  ;;  %v2880_v16 = vld [vmem:[%s3805_s2 + $0xd0] sm:$0xff] }
  0x31   : > { %654 = vmatmul.bf16.vlgmr.msra.gmra.mxu3 %v2858_v17  ;;  %489 = vmatmul.bf16.vlgmr.msra.gmra.mxu0 %v2862_v20 }
  0x32   : > { %634 = vmatmul.bf16.vlgmr.msra.gmra.mxu1 %v2854_v21  ;;  %v2873_v21 = vld [vmem:[%s3805_s2 + $0x98] sm:$0xff] }
  0x37   : > { %898 = vrot.lane.b32.xlu1 %v3116_v10, %s2978_s10  ;;  %744 = vrot.lane.b32.xlu0 %v3120_v11, %s2978_s10 }
  0x38   : > { %1056 = vrot.lane.b32.xlu2 %v3094_v7, %s2979_s11 }
  0x3f   : > { %1212 = vrot.lane.b32.xlu0 %v3074_v5, %s2979_s11  ;;  %742 = vrot.lane.b32.xlu1 %v3131_v12, %s2978_s10 }
  0x40   : > { %896 = vrot.lane.b32.xlu2 %v3142_v13, %s2978_s10  ;;  %514 = vmatmul.bf16.gmra.mxu2 %v2867_v18 }
  0x41   : > { %659 = vmatmul.bf16.gmra.mxu3 %v2859_v22  ;;  %494 = vmatmul.bf16.gmra.mxu0 %v2863_v26  ;;  %v2895_v22 = vld [vmem:[%s3805_s2 + $0x148] sm:$0xff] }
  0x42   : > { %639 = vmatmul.bf16.gmra.mxu1 %v2855_v27 }
  0x47   : > { %1054 = vrot.lane.b32.xlu0 %v3108_v9, %s2979_s11  ;;  %1210 = vrot.lane.b32.xlu1 %v3090_v6, %s2979_s11 }
  0x48   : > { %740 = vrot.lane.b32.xlu2 %v3158_v15, %s2978_s10 }
  0x4f   : > { %894 = vrot.lane.b32.xlu0 %v3149_v14, %s2978_s10  ;;  %1052 = vrot.lane.b32.xlu1 %v3120_v11, %s2979_s11 }
  0x50   : > { %1208 = vrot.lane.b32.xlu2 %v3100_v8, %s2979_s11  ;;  %519 = vmatmul.bf16.gmra.mxu2 %v2868_v24 }
  0x51   : > { %664 = vmatmul.bf16.gmra.mxu3 %v2860_v30  ;;  %499 = vmatmul.bf16.gmra.mxu0 %v2864_v36  ;;  %v2888_v30 = vld [vmem:[%s3805_s2 + $0x110] sm:$0xff] }
  0x52   : > { %644 = vmatmul.bf16.gmra.mxu1 %v2856_v37 }
  0x57   : > { %1050 = vrot.lane.b32.xlu0 %v3131_v12, %s2979_s11  ;;  %1206 = vrot.lane.b32.xlu1 %v3116_v10, %s2979_s11 }
  0x58   : > { %1048 = vrot.lane.b32.xlu2 %v3158_v15, %s2979_s11 }
  0x5f   : > { %1204 = vrot.lane.b32.xlu0 %v3142_v13, %s2979_s11  ;;  %1202 = vrot.lane.b32.xlu1 %v3149_v14, %s2979_s11 }
  0x60   : > { %1370 = vrot.lane.b32.xlu2 %v3049_v0, %s2980_s14  ;;  %524 = vmatmul.bf16.gmra.mxu2 %v2869_v32 }
  0x61   : > { %669 = vmatmul.bf16.gmra.mxu3 %v2861_v40  ;;  %504 = vmatmul.bf16.gmra.mxu0 %v2865_v45 }
  0x62   : > { %649 = vmatmul.bf16.gmra.mxu1 %v2857_v46 }
  0x67   : > { %1524 = vrot.lane.b32.xlu0 %v3055_v2, %s2980_s14  ;;  %1368 = vrot.lane.b32.xlu1 %v3052_v1, %s2980_s14 }
  0x68   : > { %1522 = vrot.lane.b32.xlu2 %v3070_v4, %s2980_s14  ;;  %v2886_v4 = vld [vmem:[%s3805_s2 + $0x100] sm:$0xff] }
  0x6a   : > { %v751_v19 = vpop.permute.xlu2 %750 }
  0x6f   : > { %1366 = vrot.lane.b32.xlu0 %v3058_v3, %s2980_s14  ;;  %1520 = vrot.lane.b32.xlu1 %v3074_v5, %s2980_s14 }
  0x70   : > { %1678 = vrot.lane.b32.xlu2 %v3049_v0, %s2981_s23  ;;  %v2871_v0 = vld [vmem:[%s3805_s2 + $0x88] sm:$0xff] }
  0x72   : > { %v905_v23 = vpop.permute.xlu2 %904 }
  0x77   : > { %1364 = vrot.lane.b32.xlu0 %v3094_v7, %s2980_s14  ;;  %1518 = vrot.lane.b32.xlu1 %v3090_v6, %s2980_s14 }
  0x78   : > { %1676 = vrot.lane.b32.xlu2 %v3052_v1, %s2981_s23 }
  0x7a   : > { %v903_v25 = vpop.permute.xlu2 %902 }
  0x7f   : > { %1362 = vrot.lane.b32.xlu0 %v3108_v9, %s2980_s14  ;;  %1516 = vrot.lane.b32.xlu1 %v3100_v8, %s2980_s14 }
  0x80   : > { %1674 = vrot.lane.b32.xlu2 %v3058_v3, %s2981_s23 }
  0x81   : > { %v755_v28 = vpop.permute.xlu0 %754  ;;  %v753_v29 = vpop.permute.xlu1 %752 }
  0x82   : > { %764 = vmatpush.bf16.msrb.mxu2 %v755_v28  ;;  %v747_v31 = vpop.permute.xlu2 %746 }
  0x86   : > { %765 = vmatpush.bf16.msrb.mxu2 %v753_v29 }
  0x87   : > { %1360 = vrot.lane.b32.xlu0 %v3120_v11, %s2980_s14  ;;  %1514 = vrot.lane.b32.xlu1 %v3116_v10, %s2980_s14  ;;  %v2872_v10 = vld [vmem:[%s3805_s2 + $0x90] sm:$0xff] }
  0x88   : > { %1672 = vrot.lane.b32.xlu2 %v3094_v7, %s2981_s23  ;;  %v2879_v7 = vld [vmem:[%s3805_s2 + $0xc8] sm:$0xff] }
  0x89   : > { %v909_v33 = vpop.permute.xlu0 %908  ;;  %v907_v34 = vpop.permute.xlu1 %906 }
  0x8a   : > { %766 = vmatpush.bf16.msrb.mxu2 %v751_v19  ;;  %918 = vmatpush.bf16.msrb.mxu3 %v909_v33  ;;  %v1215_v35 = vpop.permute.xlu2 %1214  ;;  %v2881_v33 = vld [vmem:[%s3805_s2 + $0xd8] sm:$0xff] }
  0x8e   : > { %919 = vmatpush.bf16.msrb.mxu3 %v907_v34 }
  0x8f   : > { %1358 = vrot.lane.b32.xlu0 %v3131_v12, %s2980_s14  ;;  %1512 = vrot.lane.b32.xlu1 %v3142_v13, %s2980_s14 }
  0x90   : > { %1670 = vrot.lane.b32.xlu2 %v3108_v9, %s2981_s23  ;;  %v2937_v9 = vld [vmem:[%s3304_s18 + $0x18] sm:$0xff] }
  0x91   : > { %v1063_v38 = vpop.permute.xlu0 %1062  ;;  %v749_v39 = vpop.permute.xlu1 %748 }
  0x92   : > { %920 = vmatpush.bf16.msrb.mxu3 %v905_v23  ;;  %1072 = vmatpush.bf16.msrb.mxu0 %v1063_v38  ;;  %v1057_v41 = vpop.permute.xlu2 %1056  ;;  %v2936_v23 = vld [vmem:[%s3304_s18 + $0x10] sm:$0xff]  ;;  %v2874_v38 = vld [vmem:[%s3805_s2 + $0xa0] sm:$0xff] }
  0x93   : > { %767 = vmatpush.bf16.msrb.mxu2 %v749_v39  ;;  %v2896_v39 = vld [vmem:[%s3805_s2 + $0x150] sm:$0xff] }
  0x96   : > { %921 = vmatpush.bf16.msrb.mxu3 %v903_v25 }
  0x97   : > { %768 = vmatpush.bf16.msrb.mxu2 %v747_v31  ;;  %1356 = vrot.lane.b32.xlu0 %v3158_v15, %s2980_s14 }
  0x98   : > { %1510 = vrot.lane.b32.xlu1 %v3149_v14, %s2980_s14  ;;  %1668 = vrot.lane.b32.xlu2 %v3120_v11, %s2981_s23  ;;  %v2894_v11 = vld [vmem:[%s3805_s2 + $0x140] sm:$0xff] }
  0x99   : > { %v1061_v42 = vpop.permute.xlu0 %1060  ;;  %v1217_v43 = vpop.permute.xlu1 %1216 }
  0x9a   : > { %1073 = vmatpush.bf16.msrb.mxu0 %v1061_v42  ;;  %1226 = vmatpush.bf16.msrb.mxu1 %v1217_v43  ;;  %v897_v44 = vpop.permute.xlu2 %896 }
  0x9e   : > { %1227 = vmatpush.bf16.msrb.mxu1 %v1215_v35 }
  0x9f   : > { %1666 = vrot.lane.b32.xlu0 %v3131_v12, %s2981_s23 }
  0xa0   : > { %1664 = vrot.lane.b32.xlu1 %v3158_v15, %s2981_s23  ;;  %v2887_v15 = vld [vmem:[%s3805_s2 + $0x108] sm:$0xff] }
  0xa1   : > { %v901_v47 = vpop.permute.xlu0 %900  ;;  %v1059_v48 = vpop.permute.xlu1 %1058 }
  0xa2   : > { %922 = vmatpush.bf16.msrb.mxu3 %v901_v47  ;;  %1074 = vmatpush.bf16.msrb.mxu0 %v1059_v48  ;;  %v741_v49 = vpop.permute.xlu2 %740  ;;  %v2889_v47 = vld [vmem:[%s3805_s2 + $0x118] sm:$0xff] }
  0xa6   : > { %1075 = vmatpush.bf16.msrb.mxu0 %v1057_v41 }
  0xa9   : > { %v899_v50 = vpop.permute.xlu1 %898  ;;  %v745_v51 = vpop.permute.xlu0 %744 }
  0xaa   : > { %769 = vmatpush.bf16.msrb.mxu2 %v745_v51  ;;  %923 = vmatpush.bf16.msrb.mxu3 %v899_v50  ;;  %v1209_v52 = vpop.permute.xlu2 %1208 }
  0xae   : > { %924 = vmatpush.bf16.msrb.mxu3 %v897_v44  ;;  %v490_v28 = vpop.f32.mrf.mxu0 }
  0xaf   : > { %v635_v29 = vpop.f32.mrf.mxu1 }
  0xb0   : > { %v3345_v37 = vadd.f32 %v635_v29, %v490_v28  ;;  %v2899_v28 = vld [vmem:[%s3805_s2 + $0x168] sm:$0xff]  ;;  %v1757_v29 = vld [vmem:[%s3806_s3 + $0x20] sm:$0xff] }
  0xb1   : > { %v1213_v53 = vpop.permute.xlu0 %1212  ;;  %v743_v54 = vpop.permute.xlu1 %742 }
  0xb2   : > { %770 = vmatpush.bf16.msrb.mxu2 %v743_v54  ;;  %1228 = vmatpush.bf16.msrb.mxu1 %v1213_v53  ;;  %v1049_v55 = vpop.permute.xlu2 %1048 }
  0xb3   : > { %v510_v14 = vpop.f32.mrf.mxu2 }
  0xb4   : > { %v655_v24 = vpop.f32.mrf.mxu3 }
  0xb5   : > { %v3331_v25 = vadd.f32 %v655_v24, %v510_v14 }
  0xb6   : > { %771 = vmatpush.bf16.msrb.mxu2 %v741_v49  ;;  %v3341_v35 = vpop.f32.mrf.mxu0  ;;  %v2882_v49 = vld [vmem:[%s3805_s2 + $0xe0] sm:$0xff] }
  0xb7   : > { %v3343_v36 = vpop.f32.mrf.mxu1 }
  0xb9   : > { %v1055_v57 = vpop.permute.xlu0 %1054  ;;  %772 = vmatmul.bf16.vlgmr.msrb.gmra.mxu2 %v2870_v56  ;;  %v1211_v58 = vpop.permute.xlu1 %1210  ;;  %v2875_v56 = vld [vmem:[%s3805_s2 + $0xa8] sm:$0xff] }
  0xba   : > { %1076 = vmatpush.bf16.msrb.mxu0 %v1055_v57  ;;  %1229 = vmatpush.bf16.msrb.mxu1 %v1211_v58  ;;  %v1371_v59 = vpop.permute.xlu2 %1370  ;;  %v2897_v57 = vld [vmem:[%s3805_s2 + $0x158] sm:$0xff]  ;;  %v2935_v58 = vld [vmem:[%s3304_s18 + $0x8] sm:$0xff] }
  0xbb   : > { %1380 = vmatpush.bf16.msra.mxu2 %v1371_v59  ;;  %v3322_v20 = vpop.f32.mrf.mxu2 }
  0xbc   : > { %v3336_v32 = vpop.f32.mrf.mxu3 }
  0xbe   : > { %1230 = vmatpush.bf16.msrb.mxu1 %v1209_v52  ;;  %v495_v45 = vpop.f32.mrf.mxu0 }
  0xbf   : > { %v640_v46 = vpop.f32.mrf.mxu1 }
  0xc0   : > { %v3367_v54 = vadd.f32 %v640_v46, %v495_v45  ;;  %v1763_v45 = vld [vmem:[%s3806_s3 + $0x50] sm:$0xff] }
  0xc1   : > { %v895_v60 = vpop.permute.xlu0 %894  ;;  %v1053_v61 = vpop.permute.xlu1 %1052  ;;  %v1759_v46 = vld [vmem:[%s3806_s3 + $0x30] sm:$0xff] }
  0xc2   : > { %925 = vmatpush.bf16.msrb.mxu3 %v895_v60  ;;  %1077 = vmatpush.bf16.msrb.mxu0 %v1053_v61  ;;  %v1523_v63 = vpop.permute.xlu2 %1522 }
  0xc3   : > { %v515_v31 = vpop.f32.mrf.mxu2 }
  0xc4   : > { %v660_v42 = vpop.f32.mrf.mxu3 }
  0xc5   : > { %926 = vmatmul.bf16.vlgmr.msrb.gmra.mxu3 %v2878_v62  ;;  %v3353_v43 = vadd.f32 %v660_v42, %v515_v31  ;;  %v2892_v31 = vld [vmem:[%s3805_s2 + $0x130] sm:$0xff]  ;;  %v2902_v42 = vld [vmem:[%s3805_s2 + $0x180] sm:$0xff] }
  0xc6   : > { %v3365_v53 = vpop.f32.mrf.mxu0 }
  0xc9   : > { %v1051_v1 = vpop.permute.xlu0 %1050  ;;  %777 = vmatmul.bf16.gmra.mxu2 %v2871_v0  ;;  %v1207_v2 = vpop.permute.xlu1 %1206  ;;  %v2890_v0 = vld [vmem:[%s3805_s2 + $0x120] sm:$0xff] }
  0xca   : > { %1078 = vmatpush.bf16.msrb.mxu0 %v1051_v1  ;;  %1231 = vmatpush.bf16.msrb.mxu1 %v1207_v2  ;;  %v1679_v3 = vpop.permute.xlu2 %1678 }
  0xcb   : > { %v3355_v44 = vpop.f32.mrf.mxu2 }
  0xcc   : > { %v3360_v48 = vpop.f32.mrf.mxu3 }
  0xce   : > { %1079 = vmatpush.bf16.msrb.mxu0 %v1049_v55  ;;  %v3369_v55 = vpop.f32.mrf.mxu1  ;;  %v500_v1 = vpop.f32.mrf.mxu0 }
  0xd1   : > { %v1205_v5 = vpop.permute.xlu0 %1204  ;;  %1080 = vmatmul.bf16.vlgmr.msrb.gmra.mxu0 %v2886_v4  ;;  %v1203_v6 = vpop.permute.xlu1 %1202  ;;  %v2883_v4 = vld [vmem:[%s3805_s2 + $0xe8] sm:$0xff] }
  0xd2   : > { %1688 = vmatpush.bf16.msra.mxu0 %v1679_v3  ;;  %1232 = vmatpush.bf16.msrb.mxu1 %v1205_v5  ;;  %v1677_v8 = vpop.permute.xlu2 %1676 }
  0xd3   : > { %v520_v52 = vpop.f32.mrf.mxu2 }
  0xd4   : > { %v665_v60 = vpop.f32.mrf.mxu3 }
  0xd5   : > { %931 = vmatmul.bf16.gmra.mxu3 %v2879_v7  ;;  %v3378_v61 = vadd.f32 %v665_v60, %v520_v52  ;;  %v1766_v52 = vld [vmem:[%s3806_s3 + $0x68] sm:$0xff]  ;;  %v2901_v60 = vld [vmem:[%s3805_s2 + $0x178] sm:$0xff] }
  0xd6   : > { %1689 = vmatpush.bf16.msra.mxu0 %v1677_v8  ;;  %1233 = vmatpush.bf16.msrb.mxu1 %v1203_v6  ;;  %v645_v3 = vpop.f32.mrf.mxu1  ;;  %v2876_v8 = vld [vmem:[%s3805_s2 + $0xb0] sm:$0xff]  ;;  %v3400_v14 = vpop.f32.mrf.mxu0 }
  0xd7   : > { %v3390_v7 = vadd.f32 %v645_v3, %v500_v1  ;;  %v1765_v1 = vld [vmem:[%s3806_s3 + $0x60] sm:$0xff]  ;;  %v1758_v3 = vld [vmem:[%s3806_s3 + $0x28] sm:$0xff] }
  0xd9   : > { %v1525_v12 = vpop.permute.xlu0 %1524  ;;  %782 = vmatmul.bf16.gmra.mxu2 %v2872_v10  ;;  %1234 = vmatmul.bf16.vlgmr.msrb.gmra.mxu1 %v2894_v11  ;;  %v1369_v13 = vpop.permute.xlu1 %1368 }
  0xda   : > { %1982 = vmatpush.bf16.msra.mxu1 %v2937_v9  ;;  %1534 = vmatpush.bf16.msra.mxu3 %v1525_v12  ;;  %v1675_v19 = vpop.permute.xlu2 %1674  ;;  %v2898_v9 = vld [vmem:[%s3805_s2 + $0x160] sm:$0xff] }
  0xdb   : > { %1381 = vmatpush.bf16.msra.mxu2 %v1369_v13  ;;  %1690 = vmatpush.bf16.msra.mxu0 %v1675_v19 }
  0xdc   : > { %v3385_v2 = vpop.f32.mrf.mxu3 }
  0xde   : > { %1535 = vmatpush.bf16.msra.mxu3 %v1523_v63  ;;  %1983 = vmatpush.bf16.msra.mxu1 %v2936_v23  ;;  %v3380_v63 = vpop.f32.mrf.mxu2  ;;  %v505_v23 = vpop.f32.mrf.mxu0 }
  0xe1   : > { %1085 = vmatmul.bf16.gmra.mxu0 %v2887_v15  ;;  %v1367_v17 = vpop.permute.xlu0 %1366  ;;  %v1521_v18 = vpop.permute.xlu1 %1520 }
  0xe2   : > { %1382 = vmatpush.bf16.msra.mxu2 %v1367_v17  ;;  %1536 = vmatpush.bf16.msra.mxu3 %v1521_v18  ;;  %v1673_v34 = vpop.permute.xlu2 %1672  ;;  %v3402_v15 = vpop.f32.mrf.mxu1  ;;  %v2982_v17 = vmov 0   ;;  %v1755_v18 = vld [vmem:[%s3806_s3 + $0x10] sm:$0xff] }
  0xe3   : > { %1691 = vmatpush.bf16.msra.mxu0 %v1673_v34  ;;  %1984 = vmatpush.bf16.msra.mxu1 %v2935_v58  ;;  %v1760_v34 = vld [vmem:[%s3806_s3 + $0x38] sm:$0xff] }
  0xe4   : > { %v670_v12 = vpop.f32.mrf.mxu3  ;;  %2969 = vset.pattern.permute.xlu1 %v2982_v17  ;;  %2968 = vset.pattern.permute.xlu0 %v2982_v17 }
  0xe5   : > { %936 = vmatmul.bf16.gmra.mxu3 %v2880_v16  ;;  %v2891_v16 = vld [vmem:[%s3805_s2 + $0x128] sm:$0xff]  ;;  %1781 = vperm.xlu1 %2969, %v1755_v18  }
  0xe6   : > { %v525_v11 = vpop.f32.mrf.mxu2  ;;  %2967 = vset.pattern.permute.xlu2 %v2982_v17  ;;  %v2046_v17 = vld [vmem:[%s3809_s6 + $0x18] sm:$0xff] }
  0xe7   : > { %v3398_v13 = vadd.f32 %v670_v12, %v525_v11  ;;  %v1768_v12 = vld [vmem:[%s3806_s3 + $0x78] sm:$0xff] }
  0xe9   : > { %787 = vmatmul.bf16.gmra.mxu2 %v2873_v21  ;;  %1239 = vmatmul.bf16.gmra.mxu1 %v2895_v22  ;;  %v1365_v26 = vpop.permute.xlu0 %1364  ;;  %v1519_v27 = vpop.permute.xlu1 %1518  ;;  %v2884_v22 = vld [vmem:[%s3805_s2 + $0xf0] sm:$0xff] }
  0xea   : > { %1383 = vmatpush.bf16.msra.mxu2 %v1365_v26  ;;  %1537 = vmatpush.bf16.msra.mxu3 %v1519_v27  ;;  %v1671_v50 = vpop.permute.xlu2 %1670  ;;  %v650_v24 = vpop.f32.mrf.mxu1  ;;  %v2877_v27 = vld [vmem:[%s3805_s2 + $0xb8] sm:$0xff] }
  0xeb   : > { %1692 = vmatpush.bf16.msra.mxu0 %v1671_v50  ;;  %v3413_v26 = vadd.f32 %v650_v24, %v505_v23  ;;  %v2893_v50 = vld [vmem:[%s3805_s2 + $0x138] sm:$0xff]  ;;  %v2904_v24 = vld [vmem:[%s3805_s2 + $0x190] sm:$0xff] }
  0xec   : > { %v3467_v58 = vpop.f32.mrf.mxu3 }
  0xed   : > { %1791 = vperm.xlu1 %2969, %v1757_v29   ;;  %v1764_v29 = vld [vmem:[%s3806_s3 + $0x58] sm:$0xff] }
  0xf1   : > { %1090 = vmatmul.bf16.gmra.mxu0 %v2888_v30  ;;  %v1363_v40 = vpop.permute.xlu0 %1362  ;;  %v1517_v41 = vpop.permute.xlu1 %1516  ;;  %v2934_v30 = vld [vmem:[%s3304_s18] sm:$0xff] }
  0xf2   : > { %1384 = vmatpush.bf16.msra.mxu2 %v1363_v40  ;;  %1538 = vmatpush.bf16.msra.mxu3 %v1517_v41  ;;  %v1669_v5 = vpop.permute.xlu2 %1668  ;;  %v3437_v40 = vpop.f32.mrf.mxu2  ;;  %v2900_v41 = vld [vmem:[%s3805_s2 + $0x170] sm:$0xff] }
  0xf3   : > { %1693 = vmatpush.bf16.msra.mxu0 %v1669_v5  ;;  %1985 = vmatpush.bf16.msra.mxu1 %v2934_v30  ;;  %v3504_v18 = vpop.f32.mrf.mxu1  ;;  %v2049_v30 = vld [vmem:[%s3809_s6 + $0x30] sm:$0xff] }
  0xf5   : > { %941 = vmatmul.bf16.gmra.mxu3 %v2881_v33  ;;  %1806 = vperm.xlu1 %2969, %v1760_v34  }
  0xf9   : > { %792 = vmatmul.bf16.gmra.mxu2 %v2874_v38  ;;  %1244 = vmatmul.bf16.gmra.mxu1 %v2896_v39  ;;  %v1361_v51 = vpop.permute.xlu0 %1360  ;;  %v1515_v59 = vpop.permute.xlu1 %1514  ;;  %v1754_v38 = vld [vmem:[%s3806_s3 + $0x8] sm:$0xff]  ;;  %v2885_v39 = vld [vmem:[%s3805_s2 + $0xf8] sm:$0xff] }
  0xfa   : > { %1385 = vmatpush.bf16.msra.mxu2 %v1361_v51  ;;  %1539 = vmatpush.bf16.msra.mxu3 %v1515_v59 }
  0xfb   : > { %1776 = vperm.xlu0 %2968, %v1754_v38  }
  0xfd   : > { %1821 = vperm.xlu1 %2969, %v1763_v45   ;;  %v2919_v45 = vld [vmem:[%s3805_s2 + $0x208] sm:$0xff] }
 0x101   : > { %1095 = vmatmul.bf16.gmra.mxu0 %v2889_v47  ;;  %v1359_v62 = vpop.permute.xlu0 %1358  ;;  %v1513_v10 = vpop.permute.xlu1 %1512  ;;  %v1753_v47 = vld [vmem:[%s3806_s3] sm:$0xff] }
 0x102   : > { %1386 = vmatpush.bf16.msra.mxu2 %v1359_v62  ;;  %1540 = vmatpush.bf16.msra.mxu3 %v1513_v10  ;;  %v2903_v62 = vld [vmem:[%s3805_s2 + $0x188] sm:$0xff]  ;;  %v638_v10 = vadd.f32 %v3343_v36, %v3341_v35 }
 0x103   : > { %1801 = vperm.xlu0 %2968, %v1759_v46   ;;  %1771 = vperm.xlu2 %2967, %v1753_v47   ;;  %v643_v46 = vadd.f32 %v3369_v55, %v3365_v53 }
 0x105   : > { %946 = vmatmul.bf16.gmra.mxu3 %v2882_v49  ;;  %1836 = vperm.xlu1 %2969, %v1766_v52  }
 0x109   : > { %797 = vmatmul.bf16.gmra.mxu2 %v2875_v56  ;;  %1249 = vmatmul.bf16.gmra.mxu1 %v2897_v57  ;;  %v1357_v6 = vpop.permute.xlu0 %1356  ;;  %v1762_v56 = vld [vmem:[%s3806_s3 + $0x48] sm:$0xff]  ;;  %v1756_v57 = vld [vmem:[%s3806_s3 + $0x18] sm:$0xff] }
 0x10a   : > { %1387 = vmatpush.bf16.msra.mxu2 %v1357_v6  ;;  %v1511_v19 = vpop.permute.xlu1 %1510 }
 0x10b   : > { %1541 = vmatpush.bf16.msra.mxu3 %v1511_v19  ;;  %1816 = vperm.xlu0 %2968, %v1762_v56  }
 0x10c   : > { %1786 = vperm.xlu2 %2967, %v1756_v57  }
 0x111   : > { %1100 = vmatmul.bf16.gmra.mxu0 %v2890_v0  ;;  %v1667_v21 = vpop.permute.xlu0 %1666  ;;  %v2043_v0 = vld [vmem:[%s3809_s6] sm:$0xff] }
 0x112   : > { %1694 = vmatpush.bf16.msra.mxu0 %v1667_v21  ;;  %v1665_v33 = vpop.permute.xlu1 %1664  ;;  %2061 = vperm.xlu1 %2969, %v2043_v0   ;;  %v2927_v0 = vld [vmem:[%s3808_s5 + $0x8] sm:$0xff] }
 0x113   : > { %1831 = vperm.xlu0 %2968, %v1765_v1   ;;  %v2044_v1 = vld [vmem:[%s3809_s6 + $0x8] sm:$0xff] }
 0x114   : > { %1796 = vperm.xlu2 %2967, %v1758_v3   ;;  %v2055_v3 = vld [vmem:[%s3809_s6 + $0x60] sm:$0xff] }
 0x115   : > { %951 = vmatmul.bf16.gmra.mxu3 %v2883_v4  ;;  %v3487_v4 = vpop.f32.mrf.mxu0 }
 0x116   : > { %1695 = vmatpush.bf16.msra.mxu0 %v1665_v33 }
 0x119   : > { %802 = vmatmul.bf16.gmra.mxu2 %v2876_v8  ;;  %1254 = vmatmul.bf16.gmra.mxu1 %v2898_v9  ;;  %v2918_v9 = vld [vmem:[%s3805_s2 + $0x200] sm:$0xff] }
 0x11a   : > { %2076 = vperm.xlu1 %2969, %v2046_v17   ;;  %v2920_v17 = vld [vmem:[%s3805_s2 + $0x210] sm:$0xff] }
 0x11b   : > { %1846 = vperm.xlu0 %2968, %v1768_v12  }
 0x121   : > { %1105 = vmatmul.bf16.gmra.mxu0 %v2891_v16  ;;  %v1761_v16 = vld [vmem:[%s3806_s3 + $0x40] sm:$0xff] }
 0x122   : > { %1811 = vperm.xlu2 %2967, %v1761_v16   ;;  %2091 = vperm.xlu1 %2969, %v2049_v30   ;;  %v2906_v30 = vld [vmem:[%s3805_s2 + $0x1a0] sm:$0xff] }
 0x125   : > { %956 = vmatmul.bf16.gmra.mxu3 %v2884_v22  ;;  %v2911_v22 = vld [vmem:[%s3805_s2 + $0x1c8] sm:$0xff] }
 0x129   : > { %807 = vmatmul.bf16.gmra.mxu2 %v2877_v27  ;;  %1259 = vmatmul.bf16.gmra.mxu1 %v2899_v28  ;;  %v2926_v27 = vld [vmem:[%s3808_s5] sm:$0xff]  ;;  %v2045_v28 = vld [vmem:[%s3809_s6 + $0x10] sm:$0xff] }
 0x12a   : > { %2071 = vperm.xlu0 %2968, %v2045_v28   ;;  %1826 = vperm.xlu2 %2967, %v1764_v29   ;;  %v2913_v28 = vld [vmem:[%s3805_s2 + $0x1d8] sm:$0xff] }
 0x131   : > { %1110 = vmatmul.bf16.gmra.mxu0 %v2892_v31 }
 0x135   : > { %961 = vmatmul.bf16.gmra.mxu3 %v2885_v39 }
 0x139   : > { %1264 = vmatmul.bf16.gmra.mxu1 %v2900_v41  ;;  %1388 = vmatmul.bf16.vlgmr.msra.gmra.mxu2 %v2902_v42 }
 0x13c   : > { %v773_v49 = vpop.f32.mrf.mxu2 }
 0x13d   : > { %v813_v51 = vadd.f32 %v773_v49, %v3345_v37  ;;  %v2910_v37 = vld [vmem:[%s3805_s2 + $0x1c0] sm:$0xff]  ;;  %v1767_v49 = vld [vmem:[%s3806_s3 + $0x70] sm:$0xff] }
 0x13e   : > { %1841 = vperm.xlu2 %2967, %v1767_v49  }
 0x141   : > { %1115 = vmatmul.bf16.gmra.mxu0 %v2893_v50  ;;  %v2052_v50 = vld [vmem:[%s3809_s6 + $0x48] sm:$0xff] }
 0x142   : > { %2106 = vperm.xlu1 %2969, %v2052_v50   ;;  %v653_v50 = vadd.f32 %v3504_v18, %v3487_v4  ;;  %v2907_v18 = vld [vmem:[%s3805_s2 + $0x1a8] sm:$0xff] }
 0x144   : > { %v775_v59 = vpop.f32.mrf.mxu2 }
 0x145   : > { %1542 = vmatmul.bf16.vlgmr.msra.gmra.mxu3 %v2910_v37  ;;  %v814_v35 = vadd.f32 %v775_v59, %v638_v10  ;;  %v2912_v59 = vld [vmem:[%s3805_s2 + $0x1d0] sm:$0xff] }
 0x146   : > { %2066 = vperm.xlu2 %2967, %v2044_v1   ;;  %v2056_v1 = vld [vmem:[%s3809_s6 + $0x68] sm:$0xff] }
 0x148   : > { %v927_v5 = vpop.f32.mrf.mxu3 }
 0x149   : > { %v967_v6 = vadd.f32 %v927_v5, %v813_v51  ;;  %1269 = vmatmul.bf16.gmra.mxu1 %v2901_v60  ;;  %1393 = vmatmul.bf16.gmra.mxu2 %v2903_v62  ;;  %v2048_v51 = vld [vmem:[%s3809_s6 + $0x28] sm:$0xff]  ;;  %v2905_v62 = vld [vmem:[%s3805_s2 + $0x198] sm:$0xff]  ;;  %v2051_v5 = vld [vmem:[%s3809_s6 + $0x40] sm:$0xff] }
 0x14a   : > { %2086 = vperm.xlu0 %2968, %v2048_v51   ;;  %2121 = vperm.xlu1 %2969, %v2055_v3  }
 0x14c   : > { %v778_v8 = vpop.f32.mrf.mxu2 }
 0x14d   : > { %v815_v11 = vadd.f32 %v778_v8, %v3367_v54 }
 0x14e   : > { %v1081_v19 = vpop.f32.mrf.mxu0 }
 0x14f   : > { %v1121_v36 = vadd.f32 %v1081_v19, %v967_v6  ;;  %v648_v19 = vadd.f32 %v3402_v15, %v3400_v14 }
 0x150   : > { %v929_v54 = vpop.f32.mrf.mxu3 }
 0x151   : > { %v968_v21 = vadd.f32 %v929_v54, %v814_v35  ;;  %1696 = vmatmul.bf16.vlgmr.msra.gmra.mxu0 %v2918_v9  ;;  %v2054_v54 = vld [vmem:[%s3809_s6 + $0x58] sm:$0xff] }
 0x152   : > { %2101 = vperm.xlu0 %2968, %v2051_v5  }
 0x154   : > { %v780_v23 = vpop.f32.mrf.mxu2 }
 0x155   : > { %1547 = vmatmul.bf16.gmra.mxu3 %v2911_v22  ;;  %v816_v57 = vadd.f32 %v780_v23, %v643_v46 }
 0x156   : > { %v1083_v31 = vpop.f32.mrf.mxu0  ;;  %v1235_v33 = vpop.f32.mrf.mxu1 }
 0x157   : > { %v1122_v34 = vadd.f32 %v1083_v31, %v968_v21  ;;  %v3524_v38 = vadd.f32 %v1235_v33, %v1121_v36  ;;  %v2058_v36 = vld [vmem:[%s3809_s6 + $0x78] sm:$0xff]  ;;  %v2047_v21 = vld [vmem:[%s3809_s6 + $0x20] sm:$0xff]  ;;  %v2928_v31 = vld [vmem:[%s3808_s5 + $0x10] sm:$0xff] }
 0x158   : > { %v932_v39 = vpop.f32.mrf.mxu3  ;;  %2136 = vperm.xlu1 %2969, %v2058_v36   ;;  %2081 = vperm.xlu2 %2967, %v2047_v21   ;;  %v2057_v33 = vld [vmem:[%s3809_s6 + $0x70] sm:$0xff] }
 0x159   : > { %v969_v41 = vadd.f32 %v932_v39, %v815_v11  ;;  %1398 = vmatmul.bf16.gmra.mxu2 %v2904_v24  ;;  %2824 = vmatmul.msk.bf16.vlgmr.msra.gmra.mxu1 %vm1953_vm0, %v2926_v27 }
 0x15a   : > { %2116 = vperm.xlu0 %2968, %v2054_v54  }
 0x15c   : > { %v783_v42 = vpop.f32.mrf.mxu2 }
 0x15d   : > { %v817_v47 = vadd.f32 %v783_v42, %v3390_v7 }
 0x15e   : > { %v1086_v52 = vpop.f32.mrf.mxu0  ;;  %v1237_v56 = vpop.f32.mrf.mxu1 }
 0x15f   : > { %v1123_v53 = vadd.f32 %v1086_v52, %v969_v41  ;;  %v3542_v55 = vadd.f32 %v1237_v56, %v1122_v34  ;;  %v2050_v34 = vld [vmem:[%s3809_s6 + $0x38] sm:$0xff]  ;;  %v2053_v56 = vld [vmem:[%s3809_s6 + $0x50] sm:$0xff] }
 0x160   : > { %v934_v7 = vpop.f32.mrf.mxu3  ;;  %2096 = vperm.xlu2 %2967, %v2050_v34   ;;  %v2921_v52 = vld [vmem:[%s3805_s2 + $0x218] sm:$0xff]  ;;  %v663_v34 = vadd.f32 %v3360_v48, %v3355_v44  ;;  %v3657_v44 = vpop.permute.xlu2 %1771 }
 0x161   : > { %v970_v37 = vadd.f32 %v934_v7, %v816_v57  ;;  %1701 = vmatmul.bf16.gmra.mxu0 %v2919_v45  ;;  %v3659_v48 = vpop.permute.xlu1 %1781 }
 0x162   : > { %2131 = vperm.xlu0 %2968, %v2057_v33  }
 0x164   : > { %v785_v60 = vpop.f32.mrf.mxu2 }
 0x165   : > { %1552 = vmatmul.bf16.gmra.mxu3 %v2912_v59  ;;  %v818_v24 = vadd.f32 %v785_v60, %v648_v19  ;;  %v2922_v19 = vld [vmem:[%s3805_s2 + $0x220] sm:$0xff] }
 0x166   : > { %v1088_v6 = vpop.f32.mrf.mxu0  ;;  %v1240_v8 = vpop.f32.mrf.mxu1 }
 0x167   : > { %v1124_v9 = vadd.f32 %v1088_v6, %v970_v37  ;;  %v3562_v10 = vadd.f32 %v1240_v8, %v1123_v53 }
 0x168   : > { %v937_v11 = vpop.f32.mrf.mxu3  ;;  %2111 = vperm.xlu2 %2967, %v2053_v56   ;;  %v2916_v56 = vld [vmem:[%s3805_s2 + $0x1f0] sm:$0xff] }
 0x169   : > { %v971_v12 = vadd.f32 %v937_v11, %v817_v47  ;;  %1403 = vmatmul.bf16.gmra.mxu2 %v2905_v62  ;;  %2825 = vmatmul.msk.bf16.gmra.mxu1 %vm1953_vm0, %v2927_v0  ;;  %v2929_v0 = vld [vmem:[%s3808_s5 + $0x18] sm:$0xff] }
 0x16c   : > { %v788_v16 = vpop.f32.mrf.mxu2 }
 0x16d   : > { %v819_v35 = vadd.f32 %v788_v16, %v3413_v26  ;;  %v658_v16 = vadd.f32 %v3336_v32, %v3322_v20  ;;  %v2908_v32 = vld [vmem:[%s3805_s2 + $0x1b0] sm:$0xff] }
 0x16e   : > { %v1091_v22 = vpop.f32.mrf.mxu0  ;;  %v1242_v23 = vpop.f32.mrf.mxu1 }
 0x16f   : > { %v1125_v14 = vadd.f32 %v1091_v22, %v971_v12  ;;  %v3580_v15 = vadd.f32 %v1242_v23, %v1124_v9 }
 0x170   : > { %v939_v26 = vpop.f32.mrf.mxu3  ;;  %2126 = vperm.xlu2 %2967, %v2056_v1   ;;  %v668_v1 = vadd.f32 %v3385_v2, %v3380_v63  ;;  %v2917_v63 = vld [vmem:[%s3805_s2 + $0x1f8] sm:$0xff]  ;;  %v3685_v2 = vpop.permute.xlu0 %1776 }
 0x171   : > { %v972_v27 = vadd.f32 %v939_v26, %v818_v24  ;;  %1706 = vmatmul.bf16.gmra.mxu0 %v2920_v17 }
 0x174   : > { %v790_v29 = vpop.f32.mrf.mxu2 }
 0x175   : > { %1557 = vmatmul.bf16.gmra.mxu3 %v2913_v28  ;;  %v820_v7 = vadd.f32 %v790_v29, %v653_v50 }
 0x176   : > { %v1093_v39 = vpop.f32.mrf.mxu0  ;;  %v1245_v41 = vpop.f32.mrf.mxu1 }
 0x177   : > { %v1126_v42 = vadd.f32 %v1093_v39, %v972_v27  ;;  %v3597_v45 = vadd.f32 %v1245_v41, %v1125_v14  ;;  %v2915_v14 = vld [vmem:[%s3805_s2 + $0x1e8] sm:$0xff] }
 0x178   : > { %v942_v46 = vpop.f32.mrf.mxu3  ;;  %v2923_v41 = vld [vmem:[%s3805_s2 + $0x228] sm:$0xff] }
 0x179   : > { %v973_v47 = vadd.f32 %v942_v46, %v819_v35  ;;  %1408 = vmatmul.bf16.gmra.mxu2 %v2906_v30  ;;  %2826 = vmatmul.msk.bf16.gmra.mxu1 %vm1953_vm0, %v2928_v31 }
 0x17c   : > { %v793_v49 = vpop.f32.mrf.mxu2 }
 0x17d   : > { %v821_v51 = vadd.f32 %v793_v49, %v3331_v25  ;;  %v2914_v25 = vld [vmem:[%s3805_s2 + $0x1e0] sm:$0xff] }
 0x17e   : > { %v1096_v57 = vpop.f32.mrf.mxu0  ;;  %v1247_v53 = vpop.f32.mrf.mxu1 }
 0x17f   : > { %v1127_v37 = vadd.f32 %v1096_v57, %v973_v47  ;;  %v3609_v59 = vadd.f32 %v1247_v53, %v1126_v42  ;;  %v2909_v57 = vld [vmem:[%s3805_s2 + $0x1b8] sm:$0xff]  ;;  %v2931_v53 = vld [vmem:[%s3808_s5 + $0x28] sm:$0xff] }
 0x180   : > { %v944_v60 = vpop.f32.mrf.mxu3 }
 0x181   : > { %v974_v62 = vadd.f32 %v944_v60, %v820_v7  ;;  %1711 = vmatmul.bf16.gmra.mxu0 %v2921_v52 }
 0x184   : > { %v795_v4 = vpop.f32.mrf.mxu2 }
 0x185   : > { %1562 = vmatmul.bf16.gmra.mxu3 %v2914_v25  ;;  %v822_v54 = vadd.f32 %v795_v4, %v658_v16 }
 0x186   : > { %v1098_v3 = vpop.f32.mrf.mxu0  ;;  %v1250_v5 = vpop.f32.mrf.mxu1 }
 0x187   : > { %v1128_v6 = vadd.f32 %v1098_v3, %v974_v62  ;;  %v3623_v8 = vadd.f32 %v1250_v5, %v1127_v37  ;;  %v2924_v5 = vld [vmem:[%s3805_s2 + $0x230] sm:$0xff] }
 0x188   : > { %v947_v9 = vpop.f32.mrf.mxu3 }
 0x189   : > { %v975_v11 = vadd.f32 %v947_v9, %v821_v51  ;;  %1413 = vmatmul.bf16.gmra.mxu2 %v2907_v18  ;;  %2827 = vmatmul.msk.bf16.gmra.mxu1 %vm1953_vm0, %v2929_v0  ;;  %v3670_v18 = vpop.permute.xlu2 %1786 }
 0x18c   : > { %v798_v12 = vpop.f32.mrf.mxu2 }
 0x18d   : > { %v823_v17 = vadd.f32 %v798_v12, %v3353_v43  ;;  %v2930_v43 = vld [vmem:[%s3808_s5 + $0x20] sm:$0xff] }
 0x18e   : > { %v1101_v35 = vpop.f32.mrf.mxu0  ;;  %v1252_v36 = vpop.f32.mrf.mxu1 }
 0x18f   : > { %v1129_v21 = vadd.f32 %v1101_v35, %v975_v11  ;;  %v3632_v22 = vadd.f32 %v1252_v36, %v1128_v6  ;;  %v3678_v6 = vpop.permute.xlu1 %1791  ;;  %v2932_v36 = vld [vmem:[%s3808_s5 + $0x30] sm:$0xff] }
 0x190   : > { %v949_v23 = vpop.f32.mrf.mxu3 }
 0x191   : > { %v976_v24 = vadd.f32 %v949_v23, %v822_v54  ;;  %1716 = vmatmul.bf16.gmra.mxu0 %v2922_v19  ;;  %v3690_v54 = vpop.permute.xlu2 %1796 }
 0x194   : > { %v800_v20 = vpop.f32.mrf.mxu2 }
 0x195   : > { %1567 = vmatmul.bf16.gmra.mxu3 %v2915_v14  ;;  %v824_v47 = vadd.f32 %v800_v20, %v663_v34 }
 0x196   : > { %v1103_v26 = vpop.f32.mrf.mxu0  ;;  %v1255_v27 = vpop.f32.mrf.mxu1 }
 0x197   : > { %v1130_v28 = vadd.f32 %v1103_v26, %v976_v24  ;;  %v3643_v29 = vadd.f32 %v1255_v27, %v1129_v21  ;;  %v3694_v20 = vpop.permute.xlu1 %1806  ;;  %v673_v27 = vadd.f32 %v3467_v58, %v3437_v40  ;;  %v2933_v58 = vld [vmem:[%s3808_s5 + $0x38] sm:$0xff] }
 0x198   : > { %v952_v30 = vpop.f32.mrf.mxu3 }
 0x199   : > { %v977_v31 = vadd.f32 %v952_v30, %v823_v17  ;;  %1418 = vmatmul.bf16.gmra.mxu2 %v2908_v32  ;;  %2828 = vmatmul.msk.bf16.gmra.mxu1 %vm1953_vm0, %v2930_v43  ;;  %v3702_v30 = vpop.permute.xlu0 %1801 }
 0x19c   : > { %v803_v33 = vpop.f32.mrf.mxu2 }
 0x19d   : > { %v825_v39 = vadd.f32 %v803_v33, %v3378_v61 }
 0x19e   : > { %v1106_v42 = vpop.f32.mrf.mxu0  ;;  %v1257_v46 = vpop.f32.mrf.mxu1 }
 0x19f   : > { %v1131_v49 = vadd.f32 %v1106_v42, %v977_v31  ;;  %v3652_v50 = vadd.f32 %v1257_v46, %v1130_v28  ;;  %v2925_v28 = vld [vmem:[%s3805_s2 + $0x238] sm:$0xff]  ;;  %v3706_v42 = vpop.permute.xlu2 %1811 }
 0x1a0   : > { %v954_v51 = vpop.f32.mrf.mxu3 }
 0x1a1   : > { %v978_v52 = vadd.f32 %v954_v51, %v824_v47  ;;  %1721 = vmatmul.bf16.gmra.mxu0 %v2923_v41 }
 0x1a4   : > { %v805_v61 = vpop.f32.mrf.mxu2 }
 0x1a5   : > { %1572 = vmatmul.bf16.gmra.mxu3 %v2916_v56  ;;  %v826_v12 = vadd.f32 %v805_v61, %v668_v1 }
 0x1a6   : > { %v1108_v7 = vpop.f32.mrf.mxu0  ;;  %v1260_v37 = vpop.f32.mrf.mxu1 }
 0x1a7   : > { %v1132_v60 = vadd.f32 %v1108_v7, %v978_v52  ;;  %v3667_v62 = vadd.f32 %v1260_v37, %v1131_v49  ;;  %v3708_v49 = vpop.permute.xlu1 %1821  ;;  %v3718_v7 = vpop.permute.xlu2 %1826 }
 0x1a8   : > { %v957_v25 = vpop.f32.mrf.mxu3 }
 0x1a9   : > { %v979_v4 = vadd.f32 %v957_v25, %v825_v39  ;;  %1423 = vmatmul.bf16.gmra.mxu2 %v2909_v57  ;;  %2829 = vmatmul.msk.bf16.gmra.mxu1 %vm1953_vm0, %v2931_v53  ;;  %v3715_v57 = vpop.permute.xlu0 %1816 }
 0x1ac   : > { %v808_v0 = vpop.f32.mrf.mxu2 }
 0x1ad   : > { %v827_v3 = vadd.f32 %v808_v0, %v3398_v13 }
 0x1ae   : > { %v1111_v9 = vpop.f32.mrf.mxu0  ;;  %v1262_v11 = vpop.f32.mrf.mxu1 }
 0x1af   : > { %v1133_v16 = vadd.f32 %v1111_v9, %v979_v4  ;;  %v3680_v17 = vadd.f32 %v1262_v11, %v1132_v60  ;;  %v3720_v37 = vpop.permute.xlu1 %1836 }
 0x1b0   : > { %v959_v19 = vpop.f32.mrf.mxu3 }
 0x1b1   : > { %v980_v35 = vadd.f32 %v959_v19, %v826_v12  ;;  %1726 = vmatmul.bf16.gmra.mxu0 %v2924_v5  ;;  %v3725_v11 = vpop.permute.xlu0 %1831  ;;  %v3727_v12 = vpop.permute.xlu2 %1841 }
 0x1b4   : > { %v810_v13 = vpop.f32.mrf.mxu2 }
 0x1b5   : > { %1577 = vmatmul.bf16.gmra.mxu3 %v2917_v63  ;;  %v828_v34 = vadd.f32 %v810_v13, %v673_v27 }
 0x1b6   : > { %v1113_v21 = vpop.f32.mrf.mxu0  ;;  %v1265_v23 = vpop.f32.mrf.mxu1 }
 0x1b7   : > { %v1134_v24 = vadd.f32 %v1113_v21, %v980_v35  ;;  %v3692_v14 = vadd.f32 %v1265_v23, %v1133_v16  ;;  %v2062_v63 = vpop.permute.xlu1 %2061 }
 0x1b8   : > { %v962_v32 = vpop.f32.mrf.mxu3 }
 0x1b9   : > { %v981_v43 = vadd.f32 %v962_v32, %v827_v3  ;;  %2830 = vmatmul.msk.bf16.gmra.mxu1 %vm1953_vm0, %v2932_v36 }
 0x1bc   : > { %v1389_v26 = vpop.f32.mrf.mxu2 }
 0x1bd   : > { %v1429_v25 = vadd.f32 %v1389_v26, %v3524_v38  ;;  %v3731_v26 = vpop.permute.xlu0 %1846 }
 0x1be   : > { %v1116_v31 = vpop.f32.mrf.mxu0  ;;  %v1267_v33 = vpop.f32.mrf.mxu1 }
 0x1bf   : > { %v1135_v39 = vadd.f32 %v1116_v31, %v981_v43  ;;  %v3704_v41 = vadd.f32 %v1267_v33, %v1134_v24  ;;  %v2067_v31 = vpop.permute.xlu2 %2066 }
 0x1c0   : > { %v964_v46 = vpop.f32.mrf.mxu3 }
 0x1c1   : > { %v982_v47 = vadd.f32 %v964_v46, %v828_v34  ;;  %1731 = vmatmul.bf16.gmra.mxu0 %v2925_v28 }
 0x1c4   : > { %v1391_v40 = vpop.f32.mrf.mxu2 }
 0x1c5   : > { %v1430_v19 = vadd.f32 %v1391_v40, %v3542_v55 }
 0x1c6   : > { %v1118_v51 = vpop.f32.mrf.mxu0  ;;  %v1270_v52 = vpop.f32.mrf.mxu1 }
 0x1c7   : > { %v1136_v56 = vadd.f32 %v1118_v51, %v982_v47  ;;  %v3713_v61 = vadd.f32 %v1270_v52, %v1135_v39 }
 0x1c8   : > { %v1543_v53 = vpop.f32.mrf.mxu3 }
 0x1c9   : > { %2831 = vmatmul.msk.bf16.gmra.mxu1 %vm1953_vm0, %v2933_v58  ;;  %v1583_v1 = vadd.f32 %v1543_v53, %v1429_v25 }
 0x1cc   : > { %v1394_v60 = vpop.f32.mrf.mxu2 }
 0x1ce   : > { %v1272_v4 = vpop.f32.mrf.mxu1  ;;  %v1697_v0 = vpop.f32.mrf.mxu0 }
 0x1cf   : > { %v3723_v3 = vadd.f32 %v1272_v4, %v1136_v56  ;;  %v1737_v9 = vadd.f32 %v1697_v0, %v1583_v1 }
 0x1d0   : > { %v1545_v5 = vpop.f32.mrf.mxu3 }
 0x1d1   : > { %v1849_v35 = vadd.f32 %v3657_v44, %v1737_v9  ;;  %v1584_v36 = vadd.f32 %v1545_v5, %v1430_v19  ;;  %v1431_v44 = vadd.f32 %v1394_v60, %v3562_v10  ;;  %v2072_v60 = vpop.permute.xlu0 %2071 }
 0x1d4   : > { %v1396_v16 = vpop.f32.mrf.mxu2 }
 0x1d5   : > { %v1432_v56 = vadd.f32 %v1396_v16, %v3580_v15 }
 0x1d6   : > { %v1699_v13 = vpop.f32.mrf.mxu0  ;;  %v1987_v38 = vpop.f32.mrf.mxu1 }
 0x1d7   : > { %v2027_v21 = vadd.f32 %v1987_v38, %v1849_v35  ;;  %v1738_v24 = vadd.f32 %v1699_v13, %v1584_v36 }
 0x1d8   : > { %v1548_v23 = vpop.f32.mrf.mxu3 }
 0x1d9   : > { %v2139_v32 = vadd.f32 %v2062_v63, %v2027_v21  ;;  %v1850_v28 = vadd.f32 %v3685_v2, %v1738_v24  ;;  %v1585_v39 = vadd.f32 %v1548_v23, %v1431_v44  ;;  %v2077_v21 = vpop.permute.xlu1 %2076 }
 0x1db   : > { %v2155_v43 = vmax.f32 %v2139_v32, 0.0 }
 0x1dc   : > { %v1399_v55 = vpop.f32.mrf.mxu2 }
 0x1dd   : > { %v2171_v27 = vpack.c.bf16 %v2155_v43, %v2155_v43  ;;  %v1433_v63 = vadd.f32 %v1399_v55, %v3597_v45 }
 0x1de   : > { %v1702_v33 = vpop.f32.mrf.mxu0  ;;  %v1989_v34 = vpop.f32.mrf.mxu1 }
 0x1df   : > { %2188 = vst.msk [vmem:[%s3737_s17] sm:$0xf] %vm2187_vm1, %v2171_v27  ;;  %v2028_v46 = vadd.f32 %v1989_v34, %v1850_v28  ;;  %v1739_v40 = vadd.f32 %v1702_v33, %v1585_v39  ;;  %v2082_v34 = vpop.permute.xlu2 %2081 }
 0x1e0   : > { %v1550_v47 = vpop.f32.mrf.mxu3 }
 0x1e1   : > { %v2140_v58 = vadd.f32 %v2067_v31, %v2028_v46  ;;  %v1851_v10 = vadd.f32 %v3659_v48, %v1739_v40  ;;  %v1586_v4 = vadd.f32 %v1550_v47, %v1432_v56 }
 0x1e3   : > { %v2156_v51 = vmax.f32 %v2140_v58, 0.0 }
 0x1e4   : > { %v1401_v52 = vpop.f32.mrf.mxu2 }
 0x1e5   : > { %v2172_v53 = vpack.c.bf16 %v2156_v51, %v2156_v51  ;;  %v1434_v27 = vadd.f32 %v1401_v52, %v3609_v59 }
 0x1e6   : > { %v1704_v2 = vpop.f32.mrf.mxu0  ;;  %v1992_v25 = vpop.f32.mrf.mxu1 }
 0x1e7   : > { %2189 = vst.msk [vmem:[%s3737_s17 + $0x4] sm:$0xf] %vm2187_vm1, %v2172_v53  ;;  %v2029_v0 = vadd.f32 %v1992_v25, %v1851_v10  ;;  %v1740_v5 = vadd.f32 %v1704_v2, %v1586_v4 }
 0x1e8   : > { %v1553_v1 = vpop.f32.mrf.mxu3 }
 0x1e9   : > { %v2141_v9 = vadd.f32 %v2072_v60, %v2029_v0  ;;  %v1852_v15 = vadd.f32 %v3670_v18, %v1740_v5  ;;  %v1587_v38 = vadd.f32 %v1553_v1, %v1433_v63  ;;  %v2087_v60 = vpop.permute.xlu0 %2086 }
 0x1eb   : > { %v2157_v19 = vmax.f32 %v2141_v9, 0.0 }
 0x1ec   : > { %v1404_v35 = vpop.f32.mrf.mxu2 }
 0x1ed   : > { %v2173_v13 = vpack.c.bf16 %v2157_v19, %v2157_v19  ;;  %v1435_v51 = vadd.f32 %v1404_v35, %v3623_v8 }
 0x1ee   : > { %v1707_v16 = vpop.f32.mrf.mxu0  ;;  %v1994_v48 = vpop.f32.mrf.mxu1 }
 0x1ef   : > { %2190 = vst.msk [vmem:[%s3737_s17 + $0x8] sm:$0xf] %vm2187_vm1, %v2173_v13  ;;  %v2030_v36 = vadd.f32 %v1994_v48, %v1852_v15  ;;  %v1741_v24 = vadd.f32 %v1707_v16, %v1587_v38  ;;  %v2092_v13 = vpop.permute.xlu1 %2091 }
 0x1f0   : > { %v1555_v23 = vpop.f32.mrf.mxu3 }
 0x1f1   : > { %v2142_v32 = vadd.f32 %v2077_v21, %v2030_v36  ;;  %v1853_v45 = vadd.f32 %v3678_v6, %v1741_v24  ;;  %v1588_v31 = vadd.f32 %v1555_v23, %v1434_v27 }
 0x1f3   : > { %v2158_v43 = vmax.f32 %v2142_v32, 0.0 }
 0x1f4   : > { %v1406_v44 = vpop.f32.mrf.mxu2 }
 0x1f5   : > { %v2174_v28 = vpack.c.bf16 %v2158_v43, %v2158_v43  ;;  %v1436_v1 = vadd.f32 %v1406_v44, %v3632_v22  ;;  %v2097_v44 = vpop.permute.xlu2 %2096 }
 0x1f6   : > { %v1709_v55 = vpop.f32.mrf.mxu0  ;;  %v1997_v18 = vpop.f32.mrf.mxu1 }
 0x1f7   : > { %2191 = vst.msk [vmem:[%s3737_s17 + $0xc] sm:$0xf] %vm2187_vm1, %v2174_v28  ;;  %v2031_v33 = vadd.f32 %v1997_v18, %v1853_v45  ;;  %v1742_v46 = vadd.f32 %v1709_v55, %v1588_v31 }
 0x1f8   : > { %v1558_v39 = vpop.f32.mrf.mxu3 }
 0x1f9   : > { %v2143_v47 = vadd.f32 %v2082_v34, %v2031_v33  ;;  %v1854_v59 = vadd.f32 %v3690_v54, %v1742_v46  ;;  %v1589_v53 = vadd.f32 %v1558_v39, %v1435_v51  ;;  %v2102_v46 = vpop.permute.xlu0 %2101 }
 0x1fb   : > { %v2159_v40 = vmax.f32 %v2143_v47, 0.0 }
 0x1fc   : > { %v1409_v58 = vpop.f32.mrf.mxu2 }
 0x1fd   : > { %v2175_v56 = vpack.c.bf16 %v2159_v40, %v2159_v40  ;;  %v1437_v36 = vadd.f32 %v1409_v58, %v3643_v29 }
 0x1fe   : > { %v1712_v52 = vpop.f32.mrf.mxu0  ;;  %v1999_v6 = vpop.f32.mrf.mxu1 }
 0x1ff   : > { %2192 = vst.msk [vmem:[%s3737_s17 + $0x10] sm:$0xf] %vm2187_vm1, %v2175_v56  ;;  %v2032_v10 = vadd.f32 %v1999_v6, %v1854_v59  ;;  %v1743_v25 = vadd.f32 %v1712_v52, %v1589_v53 }
 0x200   : > { %v1560_v2 = vpop.f32.mrf.mxu3 }
 0x201   : > { %v2144_v4 = vadd.f32 %v2087_v60, %v2032_v10  ;;  %v1855_v8 = vadd.f32 %v3702_v30, %v1743_v25  ;;  %v1590_v35 = vadd.f32 %v1560_v2, %v1436_v1  ;;  %v2107_v60 = vpop.permute.xlu1 %2106 }
 0x203   : > { %v2160_v0 = vmax.f32 %v2144_v4, 0.0 }
 0x204   : > { %v1411_v9 = vpop.f32.mrf.mxu2 }
 0x205   : > { %v2176_v5 = vpack.c.bf16 %v2160_v0, %v2160_v0  ;;  %v1438_v18 = vadd.f32 %v1411_v9, %v3652_v50 }
 0x206   : > { %v1714_v54 = vpop.f32.mrf.mxu0  ;;  %v2002_v19 = vpop.f32.mrf.mxu1 }
 0x207   : > { %2193 = vst.msk [vmem:[%s3737_s17 + $0x14] sm:$0xf] %vm2187_vm1, %v2176_v5  ;;  %v2033_v63 = vadd.f32 %v2002_v19, %v1855_v8  ;;  %v1744_v16 = vadd.f32 %v1714_v54, %v1590_v35  ;;  %v2112_v35 = vpop.permute.xlu2 %2111 }
 0x208   : > { %v1563_v15 = vpop.f32.mrf.mxu3 }
 0x209   : > { %v2145_v48 = vadd.f32 %v2092_v13, %v2033_v63  ;;  %v1856_v22 = vadd.f32 %v3694_v20, %v1744_v16  ;;  %v1591_v24 = vadd.f32 %v1563_v15, %v1437_v36 }
 0x20b   : > { %v2161_v38 = vmax.f32 %v2145_v48, 0.0 }
 0x20c   : > { %v1414_v32 = vpop.f32.mrf.mxu2 }
 0x20d   : > { %v2177_v21 = vpack.c.bf16 %v2161_v38, %v2161_v38  ;;  %v1439_v59 = vadd.f32 %v1414_v32, %v3667_v62 }
 0x20e   : > { %v1717_v23 = vpop.f32.mrf.mxu0  ;;  %v2004_v30 = vpop.f32.mrf.mxu1 }
 0x20f   : > { %2194 = vst.msk [vmem:[%s3737_s17 + $0x18] sm:$0xf] %vm2187_vm1, %v2177_v21  ;;  %v2034_v43 = vadd.f32 %v2004_v30, %v1856_v22  ;;  %v1745_v28 = vadd.f32 %v1717_v23, %v1591_v24  ;;  %v2117_v30 = vpop.permute.xlu0 %2116 }
 0x210   : > { %v1565_v27 = vpop.f32.mrf.mxu3 }
 0x211   : > { %v2146_v45 = vadd.f32 %v2097_v44, %v2034_v43  ;;  %v1857_v29 = vadd.f32 %v3706_v42, %v1745_v28  ;;  %v1592_v34 = vadd.f32 %v1565_v27, %v1438_v18 }
 0x213   : > { %v2162_v55 = vmax.f32 %v2146_v45, 0.0 }
 0x214   : > { %v1416_v40 = vpop.f32.mrf.mxu2 }
 0x215   : > { %v2178_v31 = vpack.c.bf16 %v2162_v55, %v2162_v55  ;;  %v1440_v5 = vadd.f32 %v1416_v40, %v3680_v17 }
 0x216   : > { %v1719_v33 = vpop.f32.mrf.mxu0  ;;  %v2007_v20 = vpop.f32.mrf.mxu1 }
 0x217   : > { %2195 = vst.msk [vmem:[%s3737_s17 + $0x1c] sm:$0xf] %vm2187_vm1, %v2178_v31  ;;  %v2035_v39 = vadd.f32 %v2007_v20, %v1857_v29  ;;  %v1746_v58 = vadd.f32 %v1719_v33, %v1592_v34  ;;  %v2122_v31 = vpop.permute.xlu1 %2121 }
 0x218   : > { %v1568_v47 = vpop.f32.mrf.mxu3 }
 0x219   : > { %v2147_v51 = vadd.f32 %v2102_v46, %v2035_v39  ;;  %v1858_v50 = vadd.f32 %v3715_v57, %v1746_v58  ;;  %v1593_v53 = vadd.f32 %v1568_v47, %v1439_v59 }
 0x21b   : > { %v2163_v56 = vmax.f32 %v2147_v51, 0.0 }
 0x21c   : > { %v1419_v0 = vpop.f32.mrf.mxu2 }
 0x21d   : > { %v2179_v52 = vpack.c.bf16 %v2163_v56, %v2163_v56  ;;  %v1441_v48 = vadd.f32 %v1419_v0, %v3692_v14  ;;  %v2127_v56 = vpop.permute.xlu2 %2126 }
 0x21e   : > { %v1722_v6 = vpop.f32.mrf.mxu0  ;;  %v2009_v42 = vpop.f32.mrf.mxu1 }
 0x21f   : > { %2196 = vst.msk [vmem:[%s3737_s17 + $0x20] sm:$0xf] %vm2187_vm1, %v2179_v52  ;;  %v2036_v10 = vadd.f32 %v2009_v42, %v1858_v50  ;;  %v1747_v25 = vadd.f32 %v1722_v6, %v1593_v53 }
 0x220   : > { %v1570_v2 = vpop.f32.mrf.mxu3 }
 0x221   : > { %v2148_v4 = vadd.f32 %v2107_v60, %v2036_v10  ;;  %v1859_v62 = vadd.f32 %v3708_v49, %v1747_v25  ;;  %v1594_v54 = vadd.f32 %v1570_v2, %v1440_v5 }
 0x223   : > { %v2164_v1 = vmax.f32 %v2148_v4, 0.0  ;;  %v2132_v4 = vpop.permute.xlu0 %2131 }
 0x224   : > { %v1421_v38 = vpop.f32.mrf.mxu2 }
 0x225   : > { %v2180_v9 = vpack.c.bf16 %v2164_v1, %v2164_v1  ;;  %v1442_v27 = vadd.f32 %v1421_v38, %v3704_v41 }
 0x226   : > { %v1724_v8 = vpop.f32.mrf.mxu0  ;;  %v2012_v57 = vpop.f32.mrf.mxu1 }
 0x227   : > { %2197 = vst.msk [vmem:[%s3737_s17 + $0x24] sm:$0xf] %vm2187_vm1, %v2180_v9  ;;  %v2037_v19 = vadd.f32 %v2012_v57, %v1859_v62  ;;  %v1748_v13 = vadd.f32 %v1724_v8, %v1594_v54  ;;  %v2137_v57 = vpop.permute.xlu1 %2136 }
 0x228   : > { %v1573_v63 = vpop.f32.mrf.mxu3 }
 0x229   : > { %v2149_v15 = vadd.f32 %v2112_v35, %v2037_v19  ;;  %v1860_v17 = vadd.f32 %v3718_v7, %v1748_v13  ;;  %v1595_v22 = vadd.f32 %v1573_v63, %v1441_v48 }
 0x22b   : > { %v2165_v16 = vmax.f32 %v2149_v15, 0.0 }
 0x22c   : > { %v1424_v29 = vpop.f32.mrf.mxu2 }
 0x22d   : > { %v2181_v36 = vpack.c.bf16 %v2165_v16, %v2165_v16  ;;  %v1443_v46 = vadd.f32 %v1424_v29, %v3713_v61 }
 0x22e   : > { %v1727_v49 = vpop.f32.mrf.mxu0  ;;  %v2014_v21 = vpop.f32.mrf.mxu1 }
 0x22f   : > { %2198 = vst.msk [vmem:[%s3737_s17 + $0x28] sm:$0xf] %vm2187_vm1, %v2181_v36  ;;  %v2038_v23 = vadd.f32 %v2014_v21, %v1860_v17  ;;  %v1749_v32 = vadd.f32 %v1727_v49, %v1595_v22 }
 0x230   : > { %v1575_v24 = vpop.f32.mrf.mxu3 }
 0x231   : > { %v2150_v43 = vadd.f32 %v2117_v30, %v2038_v23  ;;  %v1861_v14 = vadd.f32 %v3725_v11, %v1749_v32  ;;  %v1596_v55 = vadd.f32 %v1575_v24, %v1442_v27 }
 0x233   : > { %v2166_v44 = vmax.f32 %v2150_v43, 0.0 }
 0x234   : > { %v1426_v50 = vpop.f32.mrf.mxu2 }
 0x235   : > { %v2182_v28 = vpack.c.bf16 %v2166_v44, %v2166_v44  ;;  %v1444_v53 = vadd.f32 %v1426_v50, %v3723_v3 }
 0x236   : > { %v1729_v45 = vpop.f32.mrf.mxu0  ;;  %v2017_v7 = vpop.f32.mrf.mxu1 }
 0x237   : > { %2199 = vst.msk [vmem:[%s3737_s17 + $0x2c] sm:$0xf] %vm2187_vm1, %v2182_v28  ;;  %v2039_v18 = vadd.f32 %v2017_v7, %v1861_v14  ;;  %v1750_v33 = vadd.f32 %v1729_v45, %v1596_v55 }
 0x238   : > { %v1578_v34 = vpop.f32.mrf.mxu3 }
 0x239   : > { %v2151_v20 = vadd.f32 %v2122_v31, %v2039_v18  ;;  %v1862_v41 = vadd.f32 %v3720_v37, %v1750_v33  ;;  %v1597_v58 = vadd.f32 %v1578_v34, %v1443_v46 }
 0x23b   : > { %v2167_v39 = vmax.f32 %v2151_v20, 0.0 }
 0x23d   : > { %v2183_v47 = vpack.c.bf16 %v2167_v39, %v2167_v39 }
 0x23e   : > { %v1732_v40 = vpop.f32.mrf.mxu0  ;;  %v2019_v11 = vpop.f32.mrf.mxu1 }
 0x23f   : > { %2200 = vst.msk [vmem:[%s3737_s17 + $0x30] sm:$0xf] %vm2187_vm1, %v2183_v47  ;;  %v2040_v51 = vadd.f32 %v2019_v11, %v1862_v41  ;;  %v1751_v59 = vadd.f32 %v1732_v40, %v1597_v58 }
 0x240   : > { %v1580_v42 = vpop.f32.mrf.mxu3 }
 0x241   : > { %v2152_v52 = vadd.f32 %v2127_v56, %v2040_v51  ;;  %v1863_v10 = vadd.f32 %v3727_v12, %v1751_v59  ;;  %v1598_v2 = vadd.f32 %v1580_v42, %v1444_v53 }
 0x243   : > { %v2168_v6 = vmax.f32 %v2152_v52, 0.0 }
 0x245   : > { %v2184_v61 = vpack.c.bf16 %v2168_v6, %v2168_v6 }
 0x246   : > { %v1734_v37 = vpop.f32.mrf.mxu0  ;;  %v2022_v60 = vpop.f32.mrf.mxu1 }
 0x247   : > { %2201 = vst.msk [vmem:[%s3737_s17 + $0x34] sm:$0xf] %vm2187_vm1, %v2184_v61  ;;  %v2041_v25 = vadd.f32 %v2022_v60, %v1863_v10  ;;  %v1752_v0 = vadd.f32 %v1734_v37, %v1598_v2 }
 0x249   : > { %v2153_v1 = vadd.f32 %v2132_v4, %v2041_v25  ;;  %v1864_v62 = vadd.f32 %v3731_v26, %v1752_v0 }
 0x24b   : > { %v2169_v5 = vmax.f32 %v2153_v1, 0.0 }
 0x24d   : > { %v2185_v9 = vpack.c.bf16 %v2169_v5, %v2169_v5 }
 0x24e   : > { %v2024_v8 = vpop.f32.mrf.mxu1 }
 0x24f   : > { %2202 = vst.msk [vmem:[%s3737_s17 + $0x38] sm:$0xf] %vm2187_vm1, %v2185_v9  ;;  %v2042_v3 = vadd.f32 %v2024_v8, %v1864_v62 }
 0x251   : > { %v2154_v12 = vadd.f32 %v2137_v57, %v2042_v3 }
 0x253   : > { %v2170_v54 = vmax.f32 %v2154_v12, 0.0 }
 0x255   : > { %v2186_v19 = vpack.c.bf16 %v2170_v54, %v2170_v54 }
 0x257   : > { %2203 = vst.msk [vmem:[%s3737_s17 + $0x3c] sm:$0xf] %vm2187_vm1, %v2186_v19 }
 0x258 PF: > { %s17_s24 = sadd.s32 1, %s2976_s24  }
 0x259   : > { %p14_p4 = scmp.ge.s32.totalorder %s17_s24, 4  }
 0x25b   :  { %16 = sbr.rel (!%p14_p4) target bundleno = 1 (0x1), region = 92 }

// kernel: st_dis_forward.15
= control target key start
LH: loop header
LB: loop body
LE: loop exit
PB: predicated region body
PF: predicated region fallthrough
CT: control target
= control target key end

     0   :  { %s2390_s12 = smov 0   ;;  %s2901_s0 = inlined_call_operand.vmem [shape: bf16[2,128,96], index: 0, kind: input, shape index: {}]   ;;  %s2902_s1 = inlined_call_operand.vmem [shape: bf16[9,128,128], index: 1, kind: input, shape index: {}]   ;;  %s2903_s2 = inlined_call_operand.vmem [shape: f32[128,1], index: 2, kind: input, shape index: {}]   ;;  %s2904_s3 = inlined_call_operand.vmem [shape: f32[2,1,32], index: 3, kind: output, shape index: {}]  }
   0x1 LB: > { %s1767_s13 = sadd.s32 4294967295, %s2358_s12   ;;  %p1771_p0 = scmp.ge.s32.totalorder %s2358_s12, 1  ;;  %s2358_s12 = sphi %s2390_s12, %s13_s12  }
   0x2   : > { %p137_p1 = scmp.lt.s32.totalorder %s2358_s12, 3 }
   0x4   : > { %p138_p2 = pnand %p1771_p0, %p137_p1 }
   0x5   : > { %p159_p3 = scmp.lt.s32.totalorder (!%p138_p2), %s1767_s13, 1  ;;  %s2360_s18 = smov (!%p138_p2), 120  }
   0x6   : > { %141 = sbr.rel (%p138_p2) target bundleno = 613 (0x265), region = 32  ;;  %s2361_s19 = smov (!%p138_p2), 112  }
   0x7   : > { %s2362_s20 = smov (!%p138_p2), 104   ;;  %s2363_s21 = smov (!%p138_p2), 96  }
   0x8   : > { %s2364_s22 = smov (!%p138_p2), 80   ;;  %s2365_s23 = smov (!%p138_p2), 88  }
   0x9   : > { %s2366_s24 = smov (!%p138_p2), 72   ;;  %s2367_s25 = smov (!%p138_p2), 64  }
   0xb   : > { %s2906_s13 = smov (!%p159_p3, %s1767_s13), 1  ;;  %v2243_v25 = vld [vmem:[%s2902_s1 + $0x50] sm:$0xff]  ;;  %v2245_v26 = vld [vmem:[%s2902_s1 + $0x60] sm:$0xff]  ;;  %v2244_v35 = vld [vmem:[%s2902_s1 + $0x58] sm:$0xff]  ;;  %vm1672_vm0 = vcmask 261120   ;;  %vm1718_vm2 = vcmask 253952  }
   0xc   : > { %s2224_s14 = sshll.u32 %s2906_s13, 6  ;;  %v2247_v27 = vld [vmem:[%s2902_s1 + $0x70] sm:$0xff]  ;;  %v2241_v28 = vld [vmem:[%s2902_s1 + $0x40] sm:$0xff]  ;;  %v2246_v36 = vld [vmem:[%s2902_s1 + $0x68] sm:$0xff]  ;;  %s166_s29 = scalar_lea.vmem %s2904_s3, %s2906_s13 }
   0xd   : > { %s163_s17 = scalar_lea.vmem %s2901_s0, %s2224_s14  ;;  %v2248_v37 = vld [vmem:[%s2902_s1 + $0x78] sm:$0xff]  ;;  %v2242_v38 = vld [vmem:[%s2902_s1 + $0x48] sm:$0xff]  ;;  %v2233_v45 = vld [vmem:[%s2902_s1] sm:$0xff] }
   0xe   : > { %v2404_v0 = vld [vmem:[%s163_s17 + $0x38] sm:$0xff]  ;;  %v2406_v1 = vld [vmem:[%s163_s17 + $0x28] sm:$0xff]  ;;  %v2413_v3 = vld [vmem:[%s163_s17 + $0x30] sm:$0xff] }
   0xf   : > { %318 = vrot.lane.b32.xlu0 %v2404_v0, %s2360_s18  ;;  %314 = vrot.lane.b32.xlu1 %v2406_v1, %s2360_s18  ;;  %v2410_v2 = vld [vmem:[%s163_s17 + $0x18] sm:$0xff]  ;;  %v2415_v4 = vld [vmem:[%s163_s17 + $0x20] sm:$0xff] }
  0x10   : > { %310 = vrot.lane.b32.xlu2 %v2410_v2, %s2360_s18  ;;  %v2417_v5 = vld [vmem:[%s163_s17 + $0x10] sm:$0xff]  ;;  %v2422_v6 = vld [vmem:[%s163_s17 + $0x8] sm:$0xff]  ;;  %v2424_v7 = vld [vmem:[%s163_s17] sm:$0xff] }
  0x11   : > { %v2249_v49 = vld [vmem:[%s2902_s1 + $0x80] sm:$0xff]  ;;  %v2234_v54 = vld [vmem:[%s2902_s1 + $0x8] sm:$0xff]  ;;  %v2235_v62 = vld [vmem:[%s2902_s1 + $0x10] sm:$0xff] }
  0x12   : > { %v2257_v50 = vld [vmem:[%s2902_s1 + $0xc0] sm:$0xff]  ;;  %v2250_v58 = vld [vmem:[%s2902_s1 + $0x88] sm:$0xff] }
  0x13   : > { %v2265_v55 = vld [vmem:[%s2902_s1 + $0x100] sm:$0xff]  ;;  %v2258_v59 = vld [vmem:[%s2902_s1 + $0xc8] sm:$0xff] }
  0x17   : > { %316 = vrot.lane.b32.xlu0 %v2413_v3, %s2360_s18  ;;  %312 = vrot.lane.b32.xlu1 %v2415_v4, %s2360_s18 }
  0x18   : > { %308 = vrot.lane.b32.xlu2 %v2417_v5, %s2360_s18 }
  0x1f   : > { %306 = vrot.lane.b32.xlu0 %v2422_v6, %s2360_s18  ;;  %304 = vrot.lane.b32.xlu1 %v2424_v7, %s2360_s18 }
  0x20   : > { %561 = vrot.lane.b32.xlu2 %v2404_v0, %s2361_s19 }
  0x27   : > { %715 = vrot.lane.b32.xlu0 %v2404_v0, %s2362_s20  ;;  %559 = vrot.lane.b32.xlu1 %v2413_v3, %s2361_s19 }
  0x28   : > { %713 = vrot.lane.b32.xlu2 %v2413_v3, %s2362_s20 }
  0x2f   : > { %557 = vrot.lane.b32.xlu0 %v2406_v1, %s2361_s19  ;;  %711 = vrot.lane.b32.xlu1 %v2406_v1, %s2362_s20 }
  0x30   : > { %869 = vrot.lane.b32.xlu2 %v2404_v0, %s2363_s21 }
  0x37   : > { %555 = vrot.lane.b32.xlu0 %v2415_v4, %s2361_s19  ;;  %709 = vrot.lane.b32.xlu1 %v2415_v4, %s2362_s20 }
  0x38   : > { %867 = vrot.lane.b32.xlu2 %v2413_v3, %s2363_s21 }
  0x3f   : > { %553 = vrot.lane.b32.xlu0 %v2410_v2, %s2361_s19  ;;  %707 = vrot.lane.b32.xlu1 %v2410_v2, %s2362_s20 }
  0x40   : > { %865 = vrot.lane.b32.xlu2 %v2406_v1, %s2363_s21 }
  0x47   : > { %551 = vrot.lane.b32.xlu0 %v2417_v5, %s2361_s19  ;;  %705 = vrot.lane.b32.xlu1 %v2417_v5, %s2362_s20 }
  0x48   : > { %863 = vrot.lane.b32.xlu2 %v2415_v4, %s2363_s21 }
  0x4f   : > { %549 = vrot.lane.b32.xlu0 %v2422_v6, %s2361_s19  ;;  %703 = vrot.lane.b32.xlu1 %v2422_v6, %s2362_s20 }
  0x50   : > { %861 = vrot.lane.b32.xlu2 %v2410_v2, %s2363_s21 }
  0x57   : > { %547 = vrot.lane.b32.xlu0 %v2424_v7, %s2361_s19  ;;  %701 = vrot.lane.b32.xlu1 %v2424_v7, %s2362_s20 }
  0x58   : > { %859 = vrot.lane.b32.xlu2 %v2417_v5, %s2363_s21 }
  0x5f   : > { %857 = vrot.lane.b32.xlu0 %v2422_v6, %s2363_s21  ;;  %855 = vrot.lane.b32.xlu1 %v2424_v7, %s2363_s21 }
  0x60   : > { %1177 = vrot.lane.b32.xlu2 %v2404_v0, %s2364_s22 }
  0x67   : > { %1023 = vrot.lane.b32.xlu1 %v2404_v0, %s2365_s23  ;;  %1331 = vrot.lane.b32.xlu0 %v2404_v0, %s2366_s24 }
  0x68   : > { %1175 = vrot.lane.b32.xlu2 %v2413_v3, %s2364_s22 }
  0x6a   : > { %v311_v8 = vpop.permute.xlu2 %310 }
  0x6f   : > { %1021 = vrot.lane.b32.xlu1 %v2413_v3, %s2365_s23  ;;  %1329 = vrot.lane.b32.xlu0 %v2413_v3, %s2366_s24 }
  0x70   : > { %1173 = vrot.lane.b32.xlu2 %v2406_v1, %s2364_s22 }
  0x72   : > { %v309_v9 = vpop.permute.xlu2 %308 }
  0x77   : > { %1485 = vrot.lane.b32.xlu1 %v2404_v0, %s2367_s25  ;;  %1327 = vrot.lane.b32.xlu0 %v2406_v1, %s2366_s24 }
  0x78   : > { %1019 = vrot.lane.b32.xlu2 %v2406_v1, %s2365_s23 }
  0x7a   : > { %v2472_v10 = vpop.permute.xlu2 %561 }
  0x7f   : > { %1171 = vrot.lane.b32.xlu0 %v2415_v4, %s2364_s22  ;;  %1325 = vrot.lane.b32.xlu1 %v2415_v4, %s2366_s24 }
  0x80   : > { %1483 = vrot.lane.b32.xlu2 %v2413_v3, %s2367_s25 }
  0x81   : > { %v319_v11 = vpop.permute.xlu0 %318  ;;  %v315_v12 = vpop.permute.xlu1 %314 }
  0x82   : > { %328 = vmatpush.bf16.msra.mxu0 %v319_v11  ;;  %2305 = vmatpush.bf16.msra.mxu1 %v319_v11  ;;  %v2480_v13 = vpop.permute.xlu2 %713 }
  0x83   : > { %2306 = vmatpush.bf16.msra.mxu2 %v319_v11  ;;  %2307 = vmatpush.bf16.msra.mxu3 %v319_v11 }
  0x87   : > { %1017 = vrot.lane.b32.xlu0 %v2415_v4, %s2365_s23  ;;  %1169 = vrot.lane.b32.xlu1 %v2410_v2, %s2364_s22 }
  0x88   : > { %1323 = vrot.lane.b32.xlu2 %v2410_v2, %s2366_s24 }
  0x89   : > { %v317_v14 = vpop.permute.xlu0 %316  ;;  %v313_v15 = vpop.permute.xlu1 %312 }
  0x8a   : > { %329 = vmatpush.bf16.msra.mxu0 %v317_v14  ;;  %2308 = vmatpush.bf16.msra.mxu1 %v317_v14  ;;  %v870_v16 = vpop.permute.xlu2 %869 }
  0x8b   : > { %2309 = vmatpush.bf16.msra.mxu2 %v317_v14  ;;  %2310 = vmatpush.bf16.msra.mxu3 %v317_v14 }
  0x8e   : > { %330 = vmatpush.bf16.msra.mxu0 %v315_v12  ;;  %2311 = vmatpush.bf16.msra.mxu1 %v315_v12 }
  0x8f   : > { %2312 = vmatpush.bf16.msra.mxu2 %v315_v12  ;;  %2313 = vmatpush.bf16.msra.mxu3 %v315_v12  ;;  %v2252_v12 = vld [vmem:[%s2902_s1 + $0x98] sm:$0xff] }
  0x90   : > { %1481 = vrot.lane.b32.xlu0 %v2406_v1, %s2367_s25  ;;  %1015 = vrot.lane.b32.xlu1 %v2410_v2, %s2365_s23 }
  0x91   : > { %v307_v17 = vpop.permute.xlu0 %306  ;;  %v305_v18 = vpop.permute.xlu1 %304  ;;  %1167 = vrot.lane.b32.xlu2 %v2417_v5, %s2364_s22 }
  0x92   : > { %331 = vmatpush.bf16.msra.mxu0 %v313_v15  ;;  %2314 = vmatpush.bf16.msra.mxu1 %v313_v15  ;;  %v868_v19 = vpop.permute.xlu2 %867 }
  0x93   : > { %2315 = vmatpush.bf16.msra.mxu2 %v313_v15  ;;  %2316 = vmatpush.bf16.msra.mxu3 %v313_v15 }
  0x96   : > { %332 = vmatpush.bf16.msra.mxu0 %v311_v8  ;;  %2317 = vmatpush.bf16.msra.mxu1 %v311_v8 }
  0x97   : > { %2318 = vmatpush.bf16.msra.mxu2 %v311_v8  ;;  %2319 = vmatpush.bf16.msra.mxu3 %v311_v8 }
  0x98   : > { %1479 = vrot.lane.b32.xlu1 %v2415_v4, %s2367_s25  ;;  %1321 = vrot.lane.b32.xlu0 %v2417_v5, %s2366_s24 }
  0x99   : > { %v716_v20 = vpop.permute.xlu0 %715  ;;  %v560_v21 = vpop.permute.xlu1 %559  ;;  %1013 = vrot.lane.b32.xlu2 %v2417_v5, %s2365_s23 }
  0x9a   : > { %333 = vmatpush.bf16.msra.mxu0 %v309_v9  ;;  %2320 = vmatpush.bf16.msra.mxu1 %v309_v9  ;;  %v866_v22 = vpop.permute.xlu2 %865 }
  0x9b   : > { %2321 = vmatpush.bf16.msra.mxu2 %v309_v9  ;;  %2322 = vmatpush.bf16.msra.mxu3 %v309_v9 }
  0x9e   : > { %334 = vmatpush.bf16.msra.mxu0 %v307_v17  ;;  %2323 = vmatpush.bf16.msra.mxu1 %v307_v17 }
  0x9f   : > { %2324 = vmatpush.bf16.msra.mxu2 %v307_v17  ;;  %2325 = vmatpush.bf16.msra.mxu3 %v307_v17 }
  0xa0   : > { %1165 = vrot.lane.b32.xlu0 %v2422_v6, %s2364_s22  ;;  %1319 = vrot.lane.b32.xlu1 %v2422_v6, %s2366_s24 }
  0xa1   : > { %v558_v23 = vpop.permute.xlu0 %557  ;;  %v712_v24 = vpop.permute.xlu1 %711  ;;  %1477 = vrot.lane.b32.xlu2 %v2410_v2, %s2367_s25 }
  0xa2   : > { %335 = vmatpush.bf16.msra.mxu0 %v305_v18  ;;  %2326 = vmatpush.bf16.msra.mxu1 %v305_v18  ;;  %v864_v29 = vpop.permute.xlu2 %863 }
  0xa3   : > { %2327 = vmatpush.bf16.msra.mxu2 %v305_v18  ;;  %2328 = vmatpush.bf16.msra.mxu3 %v305_v18 }
  0xa5   : > { %346 = vmatmul.bf16.vlgmr.msra.gmra.mxu1 %v2243_v25  ;;  %336 = vmatmul.bf16.vlgmr.msra.gmra.mxu0 %v2241_v28 }
  0xa6   : > { %879 = vmatpush.bf16.msrb.mxu0 %v870_v16  ;;  %433 = vmatpush.bf16.msrb.mxu1 %v2404_v0  ;;  %v2237_v16 = vld [vmem:[%s2902_s1 + $0x20] sm:$0xff] }
  0xa7   : > { %571 = vmatpush.bf16.msrb.mxu2 %v2472_v10  ;;  %725 = vmatpush.bf16.msrb.mxu3 %v716_v20  ;;  %v2267_v10 = vld [vmem:[%s2902_s1 + $0x110] sm:$0xff]  ;;  %v2268_v20 = vld [vmem:[%s2902_s1 + $0x118] sm:$0xff] }
  0xa8   : > { %356 = vmatmul.bf16.vlgmr.msra.gmra.mxu2 %v2245_v26  ;;  %366 = vmatmul.bf16.vlgmr.msra.gmra.mxu3 %v2247_v27  ;;  %v2238_v26 = vld [vmem:[%s2902_s1 + $0x28] sm:$0xff] }
  0xa9   : > { %v556_v30 = vpop.permute.xlu0 %555  ;;  %v710_v31 = vpop.permute.xlu1 %709  ;;  %1011 = vrot.lane.b32.xlu0 %v2422_v6, %s2365_s23  ;;  %1163 = vrot.lane.b32.xlu1 %v2424_v7, %s2364_s22 }
  0xaa   : > { %880 = vmatpush.bf16.msrb.mxu0 %v868_v19  ;;  %434 = vmatpush.bf16.msrb.mxu1 %v2413_v3  ;;  %v862_v32 = vpop.permute.xlu2 %861  ;;  %v2251_v3 = vld [vmem:[%s2902_s1 + $0x90] sm:$0xff] }
  0xab   : > { %572 = vmatpush.bf16.msrb.mxu2 %v560_v21  ;;  %726 = vmatpush.bf16.msrb.mxu3 %v2480_v13  ;;  %v2260_v13 = vld [vmem:[%s2902_s1 + $0xd8] sm:$0xff]  ;;  %v2253_v21 = vld [vmem:[%s2902_s1 + $0xa0] sm:$0xff] }
  0xac   : > { %1317 = vrot.lane.b32.xlu2 %v2424_v7, %s2366_s24 }
  0xae   : > { %881 = vmatpush.bf16.msrb.mxu0 %v866_v22  ;;  %435 = vmatpush.bf16.msrb.mxu1 %v2406_v1  ;;  %v2266_v1 = vld [vmem:[%s2902_s1 + $0x108] sm:$0xff]  ;;  %v2261_v22 = vld [vmem:[%s2902_s1 + $0xe0] sm:$0xff] }
  0xaf   : > { %573 = vmatpush.bf16.msrb.mxu2 %v558_v23  ;;  %727 = vmatpush.bf16.msrb.mxu3 %v712_v24 }
  0xb1   : > { %v554_v33 = vpop.permute.xlu0 %553  ;;  %v708_v34 = vpop.permute.xlu1 %707  ;;  %1475 = vrot.lane.b32.xlu0 %v2417_v5, %s2367_s25  ;;  %1009 = vrot.lane.b32.xlu1 %v2424_v7, %s2365_s23 }
  0xb2   : > { %882 = vmatpush.bf16.msrb.mxu0 %v864_v29  ;;  %436 = vmatpush.bf16.msrb.mxu1 %v2415_v4  ;;  %v860_v39 = vpop.permute.xlu2 %859  ;;  %v2259_v4 = vld [vmem:[%s2902_s1 + $0xd0] sm:$0xff]  ;;  %v2269_v29 = vld [vmem:[%s2902_s1 + $0x120] sm:$0xff] }
  0xb3   : > { %728 = vmatpush.bf16.msrb.mxu3 %v710_v31  ;;  %574 = vmatpush.bf16.msrb.mxu2 %v556_v30  ;;  %v2254_v30 = vld [vmem:[%s2902_s1 + $0xa8] sm:$0xff] }
  0xb4   : > { %1473 = vrot.lane.b32.xlu2 %v2422_v6, %s2367_s25  ;;  %v2262_v31 = vld [vmem:[%s2902_s1 + $0xe8] sm:$0xff] }
  0xb5   : > { %351 = vmatmul.bf16.gmra.mxu1 %v2244_v35  ;;  %341 = vmatmul.bf16.gmra.mxu0 %v2242_v38  ;;  %v2239_v35 = vld [vmem:[%s2902_s1 + $0x30] sm:$0xff] }
  0xb6   : > { %883 = vmatpush.bf16.msrb.mxu0 %v862_v32  ;;  %437 = vmatpush.bf16.msrb.mxu1 %v2410_v2 }
  0xb7   : > { %729 = vmatpush.bf16.msrb.mxu3 %v708_v34  ;;  %575 = vmatpush.bf16.msrb.mxu2 %v554_v33 }
  0xb8   : > { %361 = vmatmul.bf16.gmra.mxu2 %v2246_v36  ;;  %371 = vmatmul.bf16.gmra.mxu3 %v2248_v37 }
  0xb9   : > { %v552_v40 = vpop.permute.xlu0 %551  ;;  %v706_v41 = vpop.permute.xlu1 %705  ;;  %1471 = vrot.lane.b32.xlu0 %v2424_v7, %s2367_s25 }
  0xba   : > { %884 = vmatpush.bf16.msrb.mxu0 %v860_v39  ;;  %438 = vmatpush.bf16.msrb.mxu1 %v2417_v5  ;;  %v1178_v42 = vpop.permute.xlu2 %1177  ;;  %v2270_v39 = vld [vmem:[%s2902_s1 + $0x128] sm:$0xff] }
  0xbb   : > { %730 = vmatpush.bf16.msrb.mxu3 %v706_v41  ;;  %576 = vmatpush.bf16.msrb.mxu2 %v552_v40  ;;  %v2255_v41 = vld [vmem:[%s2902_s1 + $0xb0] sm:$0xff] }
  0xbe   : > { %439 = vmatpush.bf16.msrb.mxu1 %v2422_v6 }
  0xc1   : > { %v550_v43 = vpop.permute.xlu0 %549  ;;  %v704_v44 = vpop.permute.xlu1 %703 }
  0xc2   : > { %440 = vmatpush.bf16.msrb.mxu1 %v2424_v7  ;;  %731 = vmatpush.bf16.msrb.mxu3 %v704_v44  ;;  %v1176_v46 = vpop.permute.xlu2 %1175  ;;  %v2236_v7 = vld [vmem:[%s2902_s1 + $0x18] sm:$0xff] }
  0xc3   : > { %577 = vmatpush.bf16.msrb.mxu2 %v550_v43 }
  0xc5   : > { %441 = vmatmul.bf16.vlgmr.msrb.gmra.mxu1 %v2233_v45 }
  0xc9   : > { %v548_v47 = vpop.permute.xlu0 %547  ;;  %v702_v48 = vpop.permute.xlu1 %701 }
  0xca   : > { %578 = vmatpush.bf16.msrb.mxu2 %v548_v47  ;;  %732 = vmatpush.bf16.msrb.mxu3 %v702_v48  ;;  %v1174_v51 = vpop.permute.xlu2 %1173  ;;  %v2240_v47 = vld [vmem:[%s2902_s1 + $0x38] sm:$0xff] }
  0xcd   : > { %579 = vmatmul.bf16.vlgmr.msrb.gmra.mxu2 %v2249_v49  ;;  %733 = vmatmul.bf16.vlgmr.msrb.gmra.mxu3 %v2257_v50 }
  0xce   : > { %1187 = vmatpush.bf16.msra.mxu2 %v1178_v42  ;;  %v2263_v42 = vld [vmem:[%s2902_s1 + $0xf0] sm:$0xff] }
  0xd1   : > { %v858_v52 = vpop.permute.xlu0 %857  ;;  %v856_v53 = vpop.permute.xlu1 %855 }
  0xd2   : > { %1188 = vmatpush.bf16.msra.mxu2 %v1176_v46  ;;  %885 = vmatpush.bf16.msrb.mxu0 %v858_v52  ;;  %v1020_v56 = vpop.permute.xlu2 %1019  ;;  %v2271_v52 = vld [vmem:[%s2902_s1 + $0x130] sm:$0xff] }
  0xd5   : > { %446 = vmatmul.bf16.gmra.mxu1 %v2234_v54  ;;  %v2264_v54 = vld [vmem:[%s2902_s1 + $0xf8] sm:$0xff] }
  0xd6   : > { %1189 = vmatpush.bf16.msra.mxu2 %v1174_v51  ;;  %886 = vmatpush.bf16.msrb.mxu0 %v856_v53  ;;  %v2256_v53 = vld [vmem:[%s2902_s1 + $0xb8] sm:$0xff] }
  0xd9   : > { %887 = vmatmul.bf16.vlgmr.msrb.gmra.mxu0 %v2265_v55  ;;  %v1024_v57 = vpop.permute.xlu1 %1023  ;;  %v1332_v60 = vpop.permute.xlu0 %1331 }
  0xda   : > { %1033 = vmatpush.bf16.msra.mxu1 %v1024_v57  ;;  %1341 = vmatpush.bf16.msra.mxu3 %v1332_v60  ;;  %v1484_v0 = vpop.permute.xlu2 %1483 }
  0xdd   : > { %584 = vmatmul.bf16.gmra.mxu2 %v2250_v58  ;;  %738 = vmatmul.bf16.gmra.mxu3 %v2258_v59  ;;  %v2273_v59 = vld [vmem:[%s2902_s1 + $0x140] sm:$0xff] }
  0xe1   : > { %v1022_v61 = vpop.permute.xlu1 %1021  ;;  %v1330_v63 = vpop.permute.xlu0 %1329 }
  0xe2   : > { %1034 = vmatpush.bf16.msra.mxu1 %v1022_v61  ;;  %1342 = vmatpush.bf16.msra.mxu3 %v1330_v63  ;;  %v1324_v6 = vpop.permute.xlu2 %1323  ;;  %v2368_v63 = vmov 0  }
  0xe3   : > { %2347 = vset.pattern.permute.xlu1 %v2368_v63  ;;  %2349 = vset.pattern.permute.xlu0 %v2368_v63 }
  0xe4   : > { %2348 = vset.pattern.permute.xlu2 %v2368_v63 }
  0xe5   : > { %451 = vmatmul.bf16.gmra.mxu1 %v2235_v62 }
  0xe6   : > { %1035 = vmatpush.bf16.msra.mxu1 %v1020_v56 }
  0xe9   : > { %892 = vmatmul.bf16.gmra.mxu0 %v2266_v1  ;;  %v1486_v2 = vpop.permute.xlu1 %1485  ;;  %v1328_v5 = vpop.permute.xlu0 %1327  ;;  %v1560_v1 = vld [vmem:[%s2903_s2] sm:$0xff] }
  0xea   : > { %1495 = vmatpush.bf16.msra.mxu0 %v1486_v2  ;;  %1343 = vmatpush.bf16.msra.mxu3 %v1328_v5  ;;  %v2289_v5 = vld [vmem:[%s2902_s1 + $0x1c0] sm:$0xff] }
  0xeb   : > { %v1168_v11 = vpop.permute.xlu2 %1167  ;;  %1578 = vperm.xlu1 %2347, %v1560_v1   ;;  %v2276_v1 = vld [vmem:[%s2902_s1 + $0x158] sm:$0xff] }
  0xed   : > { %589 = vmatmul.bf16.gmra.mxu2 %v2251_v3  ;;  %743 = vmatmul.bf16.gmra.mxu3 %v2259_v4  ;;  %v2281_v4 = vld [vmem:[%s2902_s1 + $0x180] sm:$0xff] }
  0xee   : > { %1496 = vmatpush.bf16.msra.mxu0 %v1484_v0  ;;  %v2272_v0 = vld [vmem:[%s2902_s1 + $0x138] sm:$0xff] }
  0xf1   : > { %v1172_v8 = vpop.permute.xlu0 %1171  ;;  %v1326_v9 = vpop.permute.xlu1 %1325 }
  0xf2   : > { %1190 = vmatpush.bf16.msra.mxu2 %v1172_v8  ;;  %1344 = vmatpush.bf16.msra.mxu3 %v1326_v9 }
  0xf3   : > { %v1014_v17 = vpop.permute.xlu2 %1013 }
  0xf5   : > { %456 = vmatmul.bf16.gmra.mxu1 %v2236_v7 }
  0xf6   : > { %1345 = vmatpush.bf16.msra.mxu3 %v1324_v6 }
  0xf9   : > { %897 = vmatmul.bf16.gmra.mxu0 %v2267_v10  ;;  %v1018_v14 = vpop.permute.xlu0 %1017  ;;  %v1170_v15 = vpop.permute.xlu1 %1169 }
  0xfa   : > { %1036 = vmatpush.bf16.msra.mxu1 %v1018_v14  ;;  %1191 = vmatpush.bf16.msra.mxu2 %v1170_v15  ;;  %v2297_v15 = vld [vmem:[%s2902_s1 + $0x200] sm:$0xff] }
  0xfb   : > { %v1478_v25 = vpop.permute.xlu2 %1477 }
  0xfd   : > { %594 = vmatmul.bf16.gmra.mxu2 %v2252_v12  ;;  %748 = vmatmul.bf16.gmra.mxu3 %v2260_v13 }
  0xfe   : > { %1192 = vmatpush.bf16.msra.mxu2 %v1168_v11  ;;  %v2274_v11 = vld [vmem:[%s2902_s1 + $0x148] sm:$0xff] }
 0x102   : > { %v1482_v18 = vpop.permute.xlu0 %1481  ;;  %v1016_v19 = vpop.permute.xlu1 %1015 }
 0x103   : > { %1497 = vmatpush.bf16.msra.mxu0 %v1482_v18  ;;  %1037 = vmatpush.bf16.msra.mxu1 %v1016_v19 }
 0x105   : > { %461 = vmatmul.bf16.gmra.mxu1 %v2237_v16  ;;  %v1562_v16 = vld [vmem:[%s2903_s2 + $0x10] sm:$0xff] }
 0x106   : > { %v1318_v34 = vpop.permute.xlu2 %1317  ;;  %1588 = vperm.xlu0 %2349, %v1562_v16   ;;  %v1564_v16 = vld [vmem:[%s2903_s2 + $0x20] sm:$0xff] }
 0x107   : > { %1038 = vmatpush.bf16.msra.mxu1 %v1014_v17 }
 0x109   : > { %902 = vmatmul.bf16.gmra.mxu0 %v2268_v20 }
 0x10a   : > { %v1480_v23 = vpop.permute.xlu1 %1479  ;;  %v1322_v24 = vpop.permute.xlu0 %1321 }
 0x10b   : > { %1498 = vmatpush.bf16.msra.mxu0 %v1480_v23  ;;  %1346 = vmatpush.bf16.msra.mxu3 %v1322_v24  ;;  %v2282_v23 = vld [vmem:[%s2902_s1 + $0x188] sm:$0xff] }
 0x10c   : > { %v2290_v24 = vld [vmem:[%s2902_s1 + $0x1c8] sm:$0xff] }
 0x10d   : > { %599 = vmatmul.bf16.gmra.mxu2 %v2253_v21  ;;  %753 = vmatmul.bf16.gmra.mxu3 %v2261_v22 }
 0x10e   : > { %v1474_v40 = vpop.permute.xlu2 %1473 }
 0x10f   : > { %1499 = vmatpush.bf16.msra.mxu0 %v1478_v25 }
 0x112   : > { %v1166_v27 = vpop.permute.xlu0 %1165  ;;  %v1320_v28 = vpop.permute.xlu1 %1319 }
 0x113   : > { %1193 = vmatpush.bf16.msra.mxu2 %v1166_v27  ;;  %1347 = vmatpush.bf16.msra.mxu3 %v1320_v28  ;;  %v1563_v28 = vld [vmem:[%s2903_s2 + $0x18] sm:$0xff] }
 0x114   : > { %1593 = vperm.xlu1 %2347, %v1563_v28  }
 0x115   : > { %466 = vmatmul.bf16.gmra.mxu1 %v2238_v26 }
 0x117   : > { %1348 = vmatpush.bf16.msra.mxu3 %v1318_v34  ;;  %v2275_v34 = vld [vmem:[%s2902_s1 + $0x150] sm:$0xff] }
 0x119   : > { %907 = vmatmul.bf16.gmra.mxu0 %v2269_v29 }
 0x11b   : > { %v1012_v32 = vpop.permute.xlu0 %1011  ;;  %v1164_v33 = vpop.permute.xlu1 %1163 }
 0x11c   : > { %1039 = vmatpush.bf16.msra.mxu1 %v1012_v32  ;;  %1194 = vmatpush.bf16.msra.mxu2 %v1164_v33 }
 0x11d   : > { %604 = vmatmul.bf16.gmra.mxu2 %v2254_v30  ;;  %758 = vmatmul.bf16.gmra.mxu3 %v2262_v31 }
 0x122   : > { %v2626_v36 = vpop.f32.mrf.mxu1  ;;  %v337_v46 = vpop.f32.mrf.mxu0 }
 0x123   : > { %v1476_v37 = vpop.permute.xlu0 %1475  ;;  %v1010_v38 = vpop.permute.xlu1 %1009 }
 0x124   : > { %1500 = vmatpush.bf16.msra.mxu0 %v1476_v37  ;;  %1040 = vmatpush.bf16.msra.mxu1 %v1010_v38 }
 0x125   : > { %471 = vmatmul.bf16.gmra.mxu1 %v2239_v35 }
 0x128   : > { %1501 = vmatpush.bf16.msra.mxu0 %v1474_v40  ;;  %v1561_v40 = vld [vmem:[%s2903_s2 + $0x8] sm:$0xff] }
 0x129   : > { %912 = vmatmul.bf16.gmra.mxu0 %v2270_v39  ;;  %v2298_v39 = vld [vmem:[%s2902_s1 + $0x208] sm:$0xff]  ;;  %1583 = vperm.xlu2 %2348, %v1561_v40   ;;  %v1566_v40 = vld [vmem:[%s2903_s2 + $0x30] sm:$0xff] }
 0x12a   : > { %v2639_v44 = vpop.f32.mrf.mxu1  ;;  %v339_v56 = vpop.f32.mrf.mxu0 }
 0x12b   : > { %v2637_v43 = vpop.f32.mrf.mxu2  ;;  %v2641_v45 = vpop.f32.mrf.mxu3 }
 0x12c   : > { %v1472_v49 = vpop.permute.xlu0 %1471 }
 0x12d   : > { %609 = vmatmul.bf16.gmra.mxu2 %v2255_v41  ;;  %763 = vmatmul.bf16.gmra.mxu3 %v2263_v42 }
 0x12e   : > { %1502 = vmatpush.bf16.msra.mxu0 %v1472_v49 }
 0x131   : > { %1598 = vperm.xlu2 %2348, %v1564_v16  }
 0x132   : > { %v2646_v48 = vpop.f32.mrf.mxu1  ;;  %v342_v62 = vpop.f32.mrf.mxu0 }
 0x133   : > { %v2648_v50 = vpop.f32.mrf.mxu2  ;;  %v2650_v51 = vpop.f32.mrf.mxu3 }
 0x135   : > { %476 = vmatmul.bf16.gmra.mxu1 %v2240_v47 }
 0x139   : > { %917 = vmatmul.bf16.gmra.mxu0 %v2271_v52  ;;  %v2291_v52 = vld [vmem:[%s2902_s1 + $0x1d0] sm:$0xff]  ;;  %1608 = vperm.xlu2 %2348, %v1566_v40   ;;  %v2280_v40 = vld [vmem:[%s2902_s1 + $0x178] sm:$0xff] }
 0x13a   : > { %v2661_v55 = vpop.f32.mrf.mxu1  ;;  %v344_v7 = vpop.f32.mrf.mxu0 }
 0x13b   : > { %v2663_v57 = vpop.f32.mrf.mxu2  ;;  %v2665_v58 = vpop.f32.mrf.mxu3 }
 0x13d   : > { %614 = vmatmul.bf16.gmra.mxu2 %v2256_v53  ;;  %768 = vmatmul.bf16.gmra.mxu3 %v2264_v54 }
 0x142   : > { %v442_v60 = vpop.f32.mrf.mxu1 }
 0x143   : > { %v443_v61 = vadd.f32 %v442_v60, %v337_v46  ;;  %v2676_v2 = vpop.f32.mrf.mxu2  ;;  %v2678_v3 = vpop.f32.mrf.mxu3 }
 0x145   : > { %1041 = vmatmul.bf16.vlgmr.msra.gmra.mxu1 %v2273_v59  ;;  %v1565_v59 = vld [vmem:[%s2903_s2 + $0x28] sm:$0xff] }
 0x146   : > { %1603 = vperm.xlu1 %2347, %v1565_v59   ;;  %v1574_v59 = vld [vmem:[%s2903_s2 + $0x70] sm:$0xff] }
 0x149   : > { %922 = vmatmul.bf16.gmra.mxu0 %v2272_v0 }
 0x14a   : > { %v444_v6 = vpop.f32.mrf.mxu1 }
 0x14b   : > { %v445_v18 = vadd.f32 %v444_v6, %v339_v56  ;;  %v2299_v6 = vld [vmem:[%s2902_s1 + $0x210] sm:$0xff] }
 0x14d   : > { %1195 = vmatmul.bf16.vlgmr.msra.gmra.mxu2 %v2281_v4  ;;  %1349 = vmatmul.bf16.vlgmr.msra.gmra.mxu3 %v2289_v5 }
 0x150   : > { %v580_v8 = vpop.f32.mrf.mxu2  ;;  %v734_v9 = vpop.f32.mrf.mxu3 }
 0x151   : > { %v620_v10 = vadd.f32 %v580_v8, %v443_v61 }
 0x152   : > { %v447_v12 = vpop.f32.mrf.mxu1 }
 0x153   : > { %v448_v13 = vadd.f32 %v447_v12, %v342_v62  ;;  %v774_v14 = vadd.f32 %v734_v9, %v620_v10  ;;  %v2284_v12 = vld [vmem:[%s2902_s1 + $0x198] sm:$0xff] }
 0x155   : > { %1046 = vmatmul.bf16.gmra.mxu1 %v2274_v11 }
 0x156   : > { %v888_v17 = vpop.f32.mrf.mxu0 }
 0x157   : > { %v2695_v19 = vadd.f32 %v888_v17, %v774_v14  ;;  %v1567_v17 = vld [vmem:[%s2903_s2 + $0x38] sm:$0xff] }
 0x158   : > { %v582_v20 = vpop.f32.mrf.mxu2  ;;  %v736_v21 = vpop.f32.mrf.mxu3  ;;  %1613 = vperm.xlu0 %2349, %v1567_v17   ;;  %v1573_v17 = vld [vmem:[%s2903_s2 + $0x68] sm:$0xff] }
 0x159   : > { %v621_v22 = vadd.f32 %v582_v20, %v445_v18  ;;  %1503 = vmatmul.bf16.vlgmr.msra.gmra.mxu0 %v2297_v15 }
 0x15a   : > { %v449_v25 = vpop.f32.mrf.mxu1 }
 0x15b   : > { %v450_v26 = vadd.f32 %v449_v25, %v344_v7  ;;  %v775_v27 = vadd.f32 %v736_v21, %v621_v22 }
 0x15d   : > { %1200 = vmatmul.bf16.gmra.mxu2 %v2282_v23  ;;  %1354 = vmatmul.bf16.gmra.mxu3 %v2290_v24 }
 0x15e   : > { %v890_v29 = vpop.f32.mrf.mxu0 }
 0x15f   : > { %v2706_v30 = vadd.f32 %v890_v29, %v775_v27  ;;  %v2300_v27 = vld [vmem:[%s2902_s1 + $0x218] sm:$0xff] }
 0x160   : > { %v585_v31 = vpop.f32.mrf.mxu2  ;;  %v739_v32 = vpop.f32.mrf.mxu3 }
 0x161   : > { %v622_v33 = vadd.f32 %v585_v31, %v448_v13 }
 0x162   : > { %v452_v35 = vpop.f32.mrf.mxu1 }
 0x163   : > { %v453_v37 = vadd.f32 %v452_v35, %v2626_v36  ;;  %v776_v38 = vadd.f32 %v739_v32, %v622_v33  ;;  %v2283_v36 = vld [vmem:[%s2902_s1 + $0x190] sm:$0xff]  ;;  %v2293_v35 = vld [vmem:[%s2902_s1 + $0x1e0] sm:$0xff] }
 0x165   : > { %1051 = vmatmul.bf16.gmra.mxu1 %v2275_v34  ;;  %v2285_v34 = vld [vmem:[%s2902_s1 + $0x1a0] sm:$0xff] }
 0x166   : > { %v893_v41 = vpop.f32.mrf.mxu0 }
 0x167   : > { %v2718_v42 = vadd.f32 %v893_v41, %v776_v38 }
 0x168   : > { %v587_v46 = vpop.f32.mrf.mxu2  ;;  %v741_v47 = vpop.f32.mrf.mxu3 }
 0x169   : > { %v623_v49 = vadd.f32 %v587_v46, %v450_v26  ;;  %1508 = vmatmul.bf16.gmra.mxu0 %v2298_v39  ;;  %v1568_v26 = vld [vmem:[%s2903_s2 + $0x40] sm:$0xff]  ;;  %v1571_v39 = vld [vmem:[%s2903_s2 + $0x58] sm:$0xff] }
 0x16a   : > { %v454_v53 = vpop.f32.mrf.mxu1  ;;  %1618 = vperm.xlu1 %2347, %v1568_v26  }
 0x16b   : > { %v455_v54 = vadd.f32 %v454_v53, %v2639_v44  ;;  %v777_v56 = vadd.f32 %v741_v47, %v623_v49  ;;  %v2278_v53 = vld [vmem:[%s2902_s1 + $0x168] sm:$0xff] }
 0x16d   : > { %1205 = vmatmul.bf16.gmra.mxu2 %v2283_v36  ;;  %1359 = vmatmul.bf16.gmra.mxu3 %v2291_v52 }
 0x16e   : > { %v895_v60 = vpop.f32.mrf.mxu0 }
 0x16f   : > { %v2730_v61 = vadd.f32 %v895_v60, %v777_v56  ;;  %v1570_v60 = vld [vmem:[%s2903_s2 + $0x50] sm:$0xff] }
 0x170   : > { %v590_v62 = vpop.f32.mrf.mxu2  ;;  %v744_v63 = vpop.f32.mrf.mxu3  ;;  %1628 = vperm.xlu0 %2349, %v1570_v60  }
 0x171   : > { %v624_v0 = vadd.f32 %v590_v62, %v453_v37 }
 0x172   : > { %v457_v4 = vpop.f32.mrf.mxu1  ;;  %1633 = vperm.xlu1 %2347, %v1571_v39  }
 0x173   : > { %v458_v44 = vadd.f32 %v457_v4, %v2646_v48  ;;  %v778_v5 = vadd.f32 %v744_v63, %v624_v0  ;;  %v2292_v48 = vld [vmem:[%s2902_s1 + $0x1d8] sm:$0xff] }
 0x175   : > { %1056 = vmatmul.bf16.gmra.mxu1 %v2276_v1 }
 0x176   : > { %v898_v7 = vpop.f32.mrf.mxu0 }
 0x177   : > { %v2739_v8 = vadd.f32 %v898_v7, %v778_v5  ;;  %v2286_v5 = vld [vmem:[%s2902_s1 + $0x1a8] sm:$0xff] }
 0x178   : > { %v592_v9 = vpop.f32.mrf.mxu2  ;;  %v746_v10 = vpop.f32.mrf.mxu3  ;;  %1643 = vperm.xlu0 %2349, %v1573_v17  }
 0x179   : > { %v625_v11 = vadd.f32 %v592_v9, %v455_v54  ;;  %1513 = vmatmul.bf16.gmra.mxu0 %v2299_v6  ;;  %v2294_v6 = vld [vmem:[%s2902_s1 + $0x1e8] sm:$0xff] }
 0x17a   : > { %v459_v13 = vpop.f32.mrf.mxu1  ;;  %1648 = vperm.xlu1 %2347, %v1574_v59   ;;  %v2288_v59 = vld [vmem:[%s2902_s1 + $0x1b8] sm:$0xff] }
 0x17b   : > { %v460_v14 = vadd.f32 %v459_v13, %v2661_v55  ;;  %v779_v15 = vadd.f32 %v746_v10, %v625_v11  ;;  %v2277_v55 = vld [vmem:[%s2902_s1 + $0x160] sm:$0xff] }
 0x17d   : > { %1210 = vmatmul.bf16.gmra.mxu2 %v2284_v12  ;;  %1364 = vmatmul.bf16.gmra.mxu3 %v2292_v48 }
 0x17e   : > { %v900_v18 = vpop.f32.mrf.mxu0 }
 0x17f   : > { %v2754_v20 = vadd.f32 %v900_v18, %v779_v15  ;;  %v2279_v15 = vld [vmem:[%s2902_s1 + $0x170] sm:$0xff] }
 0x180   : > { %v595_v21 = vpop.f32.mrf.mxu2  ;;  %v749_v22 = vpop.f32.mrf.mxu3 }
 0x181   : > { %v626_v23 = vadd.f32 %v595_v21, %v458_v44 }
 0x182   : > { %v462_v24 = vpop.f32.mrf.mxu1 }
 0x183   : > { %v780_v25 = vadd.f32 %v749_v22, %v626_v23  ;;  %v463_v46 = vadd.f32 %v462_v24, %v2637_v43  ;;  %v2301_v43 = vld [vmem:[%s2902_s1 + $0x220] sm:$0xff] }
 0x184   : > { %v1572_v22 = vld [vmem:[%s2903_s2 + $0x60] sm:$0xff] }
 0x185   : > { %1061 = vmatmul.bf16.gmra.mxu1 %v2277_v55 }
 0x186   : > { %v903_v28 = vpop.f32.mrf.mxu0 }
 0x187   : > { %v2765_v29 = vadd.f32 %v903_v28, %v780_v25  ;;  %v2295_v28 = vld [vmem:[%s2902_s1 + $0x1f0] sm:$0xff] }
 0x188   : > { %v597_v31 = vpop.f32.mrf.mxu2  ;;  %v751_v32 = vpop.f32.mrf.mxu3 }
 0x189   : > { %v627_v33 = vadd.f32 %v597_v31, %v460_v14  ;;  %1518 = vmatmul.bf16.gmra.mxu0 %v2300_v27  ;;  %v2287_v27 = vld [vmem:[%s2902_s1 + $0x1b0] sm:$0xff] }
 0x18a   : > { %v464_v37 = vpop.f32.mrf.mxu1 }
 0x18b   : > { %v781_v38 = vadd.f32 %v751_v32, %v627_v33  ;;  %v465_v63 = vadd.f32 %v464_v37, %v2648_v50  ;;  %v1569_v50 = vld [vmem:[%s2903_s2 + $0x48] sm:$0xff]  ;;  %v1575_v33 = vld [vmem:[%s2903_s2 + $0x78] sm:$0xff] }
 0x18c   : > { %1623 = vperm.xlu2 %2348, %v1569_v50  }
 0x18d   : > { %1215 = vmatmul.bf16.gmra.mxu2 %v2285_v34  ;;  %1369 = vmatmul.bf16.gmra.mxu3 %v2293_v35 }
 0x18e   : > { %v905_v41 = vpop.f32.mrf.mxu0 }
 0x18f   : > { %v2780_v47 = vadd.f32 %v905_v41, %v781_v38 }
 0x190   : > { %v600_v49 = vpop.f32.mrf.mxu2  ;;  %v754_v36 = vpop.f32.mrf.mxu3 }
 0x191   : > { %v628_v52 = vadd.f32 %v600_v49, %v463_v46  ;;  %v2303_v49 = vld [vmem:[%s2902_s1 + $0x230] sm:$0xff] }
 0x192   : > { %v467_v54 = vpop.f32.mrf.mxu1 }
 0x193   : > { %v782_v56 = vadd.f32 %v754_v36, %v628_v52  ;;  %v468_v11 = vadd.f32 %v467_v54, %v2663_v57  ;;  %v2302_v57 = vld [vmem:[%s2902_s1 + $0x228] sm:$0xff] }
 0x194   : > { %1638 = vperm.xlu2 %2348, %v1572_v22  }
 0x195   : > { %1066 = vmatmul.bf16.gmra.mxu1 %v2278_v53 }
 0x196   : > { %v908_v62 = vpop.f32.mrf.mxu0 }
 0x197   : > { %v2795_v0 = vadd.f32 %v908_v62, %v782_v56 }
 0x198   : > { %v602_v1 = vpop.f32.mrf.mxu2  ;;  %v756_v4 = vpop.f32.mrf.mxu3 }
 0x199   : > { %v629_v44 = vadd.f32 %v602_v1, %v465_v63  ;;  %1523 = vmatmul.bf16.gmra.mxu0 %v2301_v43  ;;  %v2296_v43 = vld [vmem:[%s2902_s1 + $0x1f8] sm:$0xff] }
 0x19a   : > { %v469_v7 = vpop.f32.mrf.mxu1 }
 0x19b   : > { %v783_v9 = vadd.f32 %v756_v4, %v629_v44  ;;  %v470_v23 = vadd.f32 %v469_v7, %v2676_v2 }
 0x19c   : > { %1653 = vperm.xlu2 %2348, %v1575_v33  }
 0x19d   : > { %1220 = vmatmul.bf16.gmra.mxu2 %v2286_v5  ;;  %1374 = vmatmul.bf16.gmra.mxu3 %v2294_v6 }
 0x19e   : > { %v910_v10 = vpop.f32.mrf.mxu0 }
 0x19f   : > { %v2807_v12 = vadd.f32 %v910_v10, %v783_v9  ;;  %v2304_v10 = vld [vmem:[%s2902_s1 + $0x238] sm:$0xff] }
 0x1a0   : > { %v605_v48 = vpop.f32.mrf.mxu2  ;;  %v759_v13 = vpop.f32.mrf.mxu3 }
 0x1a1   : > { %v630_v14 = vadd.f32 %v605_v48, %v468_v11 }
 0x1a2   : > { %v472_v16 = vpop.f32.mrf.mxu1 }
 0x1a3   : > { %v784_v18 = vadd.f32 %v759_v13, %v630_v14  ;;  %v473_v34 = vadd.f32 %v472_v16, %v2641_v45 }
 0x1a5   : > { %1071 = vmatmul.bf16.gmra.mxu1 %v2279_v15 }
 0x1a6   : > { %v913_v21 = vpop.f32.mrf.mxu0 }
 0x1a7   : > { %v2822_v55 = vadd.f32 %v913_v21, %v784_v18 }
 0x1a8   : > { %v607_v24 = vpop.f32.mrf.mxu2  ;;  %v761_v25 = vpop.f32.mrf.mxu3 }
 0x1a9   : > { %v631_v26 = vadd.f32 %v607_v24, %v470_v23  ;;  %1528 = vmatmul.bf16.gmra.mxu0 %v2302_v57 }
 0x1aa   : > { %v474_v31 = vpop.f32.mrf.mxu1 }
 0x1ab   : > { %v785_v32 = vadd.f32 %v761_v25, %v631_v26  ;;  %v475_v45 = vadd.f32 %v474_v31, %v2650_v51 }
 0x1ad   : > { %1225 = vmatmul.bf16.gmra.mxu2 %v2287_v27  ;;  %1379 = vmatmul.bf16.gmra.mxu3 %v2295_v28 }
 0x1ae   : > { %v915_v2 = vpop.f32.mrf.mxu0 }
 0x1af   : > { %v2834_v35 = vadd.f32 %v915_v2, %v785_v32 }
 0x1b0   : > { %v610_v37 = vpop.f32.mrf.mxu2  ;;  %v764_v38 = vpop.f32.mrf.mxu3 }
 0x1b1   : > { %v632_v39 = vadd.f32 %v610_v37, %v473_v34  ;;  %v1584_v37 = vpop.permute.xlu2 %1583 }
 0x1b2   : > { %v477_v41 = vpop.f32.mrf.mxu1 }
 0x1b3   : > { %v786_v46 = vadd.f32 %v764_v38, %v632_v39  ;;  %v478_v51 = vadd.f32 %v477_v41, %v2665_v58 }
 0x1b5   : > { %1076 = vmatmul.bf16.gmra.mxu1 %v2280_v40 }
 0x1b6   : > { %v918_v36 = vpop.f32.mrf.mxu0 }
 0x1b7   : > { %v2843_v52 = vadd.f32 %v918_v36, %v786_v46 }
 0x1b8   : > { %v612_v53 = vpop.f32.mrf.mxu2  ;;  %v766_v54 = vpop.f32.mrf.mxu3 }
 0x1b9   : > { %v633_v56 = vadd.f32 %v612_v53, %v475_v45  ;;  %1533 = vmatmul.bf16.gmra.mxu0 %v2303_v49 }
 0x1ba   : > { %v479_v60 = vpop.f32.mrf.mxu1 }
 0x1bb   : > { %v787_v62 = vadd.f32 %v766_v54, %v633_v56  ;;  %v480_v11 = vadd.f32 %v479_v60, %v2678_v3 }
 0x1bd   : > { %1230 = vmatmul.bf16.gmra.mxu2 %v2288_v59  ;;  %1384 = vmatmul.bf16.gmra.mxu3 %v2296_v43  ;;  %v1589_v59 = vpop.permute.xlu0 %1588 }
 0x1be   : > { %v920_v63 = vpop.f32.mrf.mxu0 }
 0x1bf   : > { %v2852_v1 = vadd.f32 %v920_v63, %v787_v62 }
 0x1c0   : > { %v615_v4 = vpop.f32.mrf.mxu2  ;;  %v769_v44 = vpop.f32.mrf.mxu3 }
 0x1c1   : > { %v634_v5 = vadd.f32 %v615_v4, %v478_v51 }
 0x1c2   : > { %v1042_v6 = vpop.f32.mrf.mxu1 }
 0x1c3   : > { %v788_v7 = vadd.f32 %v769_v44, %v634_v5  ;;  %v1082_v9 = vadd.f32 %v1042_v6, %v2695_v19 }
 0x1c6   : > { %v923_v50 = vpop.f32.mrf.mxu0 }
 0x1c7   : > { %v2859_v48 = vadd.f32 %v923_v50, %v788_v7 }
 0x1c8   : > { %v617_v13 = vpop.f32.mrf.mxu2  ;;  %v771_v58 = vpop.f32.mrf.mxu3 }
 0x1c9   : > { %v635_v14 = vadd.f32 %v617_v13, %v480_v11  ;;  %1538 = vmatmul.bf16.gmra.mxu0 %v2304_v10 }
 0x1ca   : > { %v1044_v15 = vpop.f32.mrf.mxu1 }
 0x1cb   : > { %v789_v16 = vadd.f32 %v771_v58, %v635_v14  ;;  %v1083_v17 = vadd.f32 %v1044_v15, %v2706_v30  ;;  %v1579_v30 = vpop.permute.xlu1 %1578 }
 0x1ce   : > { %v925_v18 = vpop.f32.mrf.mxu0 }
 0x1cf   : > { %v2862_v57 = vadd.f32 %v925_v18, %v789_v16  ;;  %v1599_v18 = vpop.permute.xlu2 %1598 }
 0x1d0   : > { %v1196_v19 = vpop.f32.mrf.mxu2  ;;  %v1350_v21 = vpop.f32.mrf.mxu3 }
 0x1d1   : > { %v1236_v22 = vadd.f32 %v1196_v19, %v1082_v9 }
 0x1d2   : > { %v1047_v23 = vpop.f32.mrf.mxu1 }
 0x1d3   : > { %v1084_v24 = vadd.f32 %v1047_v23, %v2718_v42  ;;  %v1390_v3 = vadd.f32 %v1350_v21, %v1236_v22  ;;  %v1594_v9 = vpop.permute.xlu1 %1593 }
 0x1d6   : > { %v1504_v25 = vpop.f32.mrf.mxu0 }
 0x1d7   : > { %v1544_v26 = vadd.f32 %v1504_v25, %v1390_v3 }
 0x1d8   : > { %v1198_v27 = vpop.f32.mrf.mxu2  ;;  %v1352_v28 = vpop.f32.mrf.mxu3 }
 0x1d9   : > { %v1237_v31 = vadd.f32 %v1198_v27, %v1083_v17  ;;  %v1656_v38 = vadd.f32 %v1579_v30, %v1544_v26 }
 0x1da   : > { %v1049_v32 = vpop.f32.mrf.mxu1 }
 0x1db   : > { %v1085_v2 = vadd.f32 %v1049_v32, %v2730_v61  ;;  %v1391_v33 = vadd.f32 %v1352_v28, %v1237_v31  ;;  %v1673_v36 = vsel %vm1672_vm0, %v1656_v38, 0.0  ;;  %v1604_v32 = vpop.permute.xlu1 %1603 }
 0x1de   : > { %v1506_v34 = vpop.f32.mrf.mxu0 }
 0x1df   : > { %v1545_v39 = vadd.f32 %v1506_v34, %v1391_v33 }
 0x1e0   : > { %v1201_v40 = vpop.f32.mrf.mxu2  ;;  %v1355_v41 = vpop.f32.mrf.mxu3 }
 0x1e1   : > { %v1657_v46 = vadd.f32 %v1584_v37, %v1545_v39  ;;  %v1238_v42 = vadd.f32 %v1201_v40, %v1084_v24 }
 0x1e2   : > { %v1052_v49 = vpop.f32.mrf.mxu1 }
 0x1e3   : > { %v1674_v45 = vsel %vm1672_vm0, %v1657_v46, 0.0  ;;  %v1086_v53 = vadd.f32 %v1052_v49, %v2739_v8  ;;  %v1392_v54 = vadd.f32 %v1355_v41, %v1238_v42  ;;  %v1609_v42 = vpop.permute.xlu2 %1608 }
 0x1e4   : > { %v1675_v61 = vadd.f32 %v1674_v45, %v1673_v36 }
 0x1e6   : > { %v1509_v56 = vpop.f32.mrf.mxu0 }
 0x1e7   : > { %v1546_v43 = vadd.f32 %v1509_v56, %v1392_v54 }
 0x1e8   : > { %v1203_v60 = vpop.f32.mrf.mxu2  ;;  %v1357_v62 = vpop.f32.mrf.mxu3 }
 0x1e9   : > { %v1658_v63 = vadd.f32 %v1589_v59, %v1546_v43  ;;  %v1239_v51 = vadd.f32 %v1203_v60, %v1085_v2 }
 0x1ea   : > { %v1054_v4 = vpop.f32.mrf.mxu1 }
 0x1eb   : > { %v1676_v44 = vsel %vm1672_vm0, %v1658_v63, 0.0  ;;  %v1393_v5 = vadd.f32 %v1357_v62, %v1239_v51  ;;  %v1087_v19 = vadd.f32 %v1054_v4, %v2754_v20  ;;  %v1614_v62 = vpop.permute.xlu0 %1613 }
 0x1ec   : > { %v1677_v6 = vadd.f32 %v1676_v44, %v1675_v61 }
 0x1ee   : > { %v1511_v7 = vpop.f32.mrf.mxu0 }
 0x1ef   : > { %v1547_v10 = vadd.f32 %v1511_v7, %v1393_v5 }
 0x1f0   : > { %v1206_v50 = vpop.f32.mrf.mxu2  ;;  %v1360_v11 = vpop.f32.mrf.mxu3 }
 0x1f1   : > { %v1240_v8 = vadd.f32 %v1206_v50, %v1086_v53  ;;  %v1659_v13 = vadd.f32 %v1594_v9, %v1547_v10 }
 0x1f2   : > { %v1057_v58 = vpop.f32.mrf.mxu1 }
 0x1f3   : > { %v1678_v14 = vsel %vm1672_vm0, %v1659_v13, 0.0  ;;  %v1394_v15 = vadd.f32 %v1360_v11, %v1240_v8  ;;  %v1088_v2 = vadd.f32 %v1057_v58, %v2765_v29  ;;  %v1619_v13 = vpop.permute.xlu1 %1618 }
 0x1f4   : > { %v1679_v16 = vadd.f32 %v1678_v14, %v1677_v6 }
 0x1f6   : > { %v1514_v17 = vpop.f32.mrf.mxu0 }
 0x1f7   : > { %v1548_v21 = vadd.f32 %v1514_v17, %v1394_v15 }
 0x1f8   : > { %v1208_v22 = vpop.f32.mrf.mxu2  ;;  %v1362_v23 = vpop.f32.mrf.mxu3 }
 0x1f9   : > { %v1660_v24 = vadd.f32 %v1599_v18, %v1548_v21  ;;  %v1241_v3 = vadd.f32 %v1208_v22, %v1087_v19 }
 0x1fa   : > { %v1059_v25 = vpop.f32.mrf.mxu1 }
 0x1fb   : > { %v1680_v26 = vsel %vm1672_vm0, %v1660_v24, 0.0  ;;  %v1395_v28 = vadd.f32 %v1362_v23, %v1241_v3  ;;  %v1089_v49 = vadd.f32 %v1059_v25, %v2780_v47  ;;  %v1624_v24 = vpop.permute.xlu2 %1623 }
 0x1fc   : > { %v1681_v27 = vadd.f32 %v1680_v26, %v1679_v16 }
 0x1fe   : > { %v1516_v31 = vpop.f32.mrf.mxu0 }
 0x1ff   : > { %v1549_v33 = vadd.f32 %v1516_v31, %v1395_v28 }
 0x200   : > { %v1211_v30 = vpop.f32.mrf.mxu2  ;;  %v1365_v34 = vpop.f32.mrf.mxu3 }
 0x201   : > { %v1242_v37 = vadd.f32 %v1211_v30, %v1088_v2  ;;  %v1661_v38 = vadd.f32 %v1604_v32, %v1549_v33  ;;  %v1629_v33 = vpop.permute.xlu0 %1628 }
 0x202   : > { %v1062_v20 = vpop.f32.mrf.mxu1 }
 0x203   : > { %v1682_v39 = vsel %vm1672_vm0, %v1661_v38, 0.0  ;;  %v1396_v41 = vadd.f32 %v1365_v34, %v1242_v37  ;;  %v1090_v63 = vadd.f32 %v1062_v20, %v2795_v0 }
 0x204   : > { %v1683_v40 = vadd.f32 %v1682_v39, %v1681_v27 }
 0x206   : > { %v1519_v46 = vpop.f32.mrf.mxu0 }
 0x207   : > { %v1550_v36 = vadd.f32 %v1519_v46, %v1396_v41 }
 0x208   : > { %v1213_v45 = vpop.f32.mrf.mxu2  ;;  %v1367_v53 = vpop.f32.mrf.mxu3 }
 0x209   : > { %v1662_v54 = vadd.f32 %v1609_v42, %v1550_v36  ;;  %v1243_v61 = vadd.f32 %v1213_v45, %v1089_v49  ;;  %v1634_v45 = vpop.permute.xlu1 %1633 }
 0x20a   : > { %v1064_v29 = vpop.f32.mrf.mxu1 }
 0x20b   : > { %v1684_v56 = vsel %vm1672_vm0, %v1662_v54, 0.0  ;;  %v1397_v43 = vadd.f32 %v1367_v53, %v1243_v61  ;;  %v1091_v11 = vadd.f32 %v1064_v29, %v2807_v12 }
 0x20c   : > { %v1685_v59 = vadd.f32 %v1684_v56, %v1683_v40 }
 0x20e   : > { %v1521_v60 = vpop.f32.mrf.mxu0 }
 0x20f   : > { %v1551_v51 = vadd.f32 %v1521_v60, %v1397_v43 }
 0x210   : > { %v1216_v4 = vpop.f32.mrf.mxu2  ;;  %v1370_v44 = vpop.f32.mrf.mxu3 }
 0x211   : > { %v1663_v5 = vadd.f32 %v1614_v62, %v1551_v51  ;;  %v1244_v6 = vadd.f32 %v1216_v4, %v1090_v63  ;;  %v1639_v62 = vpop.permute.xlu2 %1638 }
 0x212   : > { %v1067_v47 = vpop.f32.mrf.mxu1 }
 0x213   : > { %v1686_v7 = vsel %vm1672_vm0, %v1663_v5, 0.0  ;;  %v1398_v10 = vadd.f32 %v1370_v44, %v1244_v6  ;;  %v1092_v22 = vadd.f32 %v1067_v47, %v2822_v55 }
 0x214   : > { %v1687_v9 = vadd.f32 %v1686_v7, %v1685_v59 }
 0x216   : > { %v1524_v50 = vpop.f32.mrf.mxu0 }
 0x217   : > { %v1552_v8 = vadd.f32 %v1524_v50, %v1398_v10 }
 0x218   : > { %v1218_v58 = vpop.f32.mrf.mxu2  ;;  %v1372_v14 = vpop.f32.mrf.mxu3 }
 0x219   : > { %v1245_v15 = vadd.f32 %v1218_v58, %v1091_v11  ;;  %v1664_v16 = vadd.f32 %v1619_v13, %v1552_v8  ;;  %v1644_v11 = vpop.permute.xlu0 %1643 }
 0x21a   : > { %v1069_v17 = vpop.f32.mrf.mxu1 }
 0x21b   : > { %v1688_v0 = vsel %vm1672_vm0, %v1664_v16, 0.0  ;;  %v1399_v19 = vadd.f32 %v1372_v14, %v1245_v15  ;;  %v1093_v30 = vadd.f32 %v1069_v17, %v2834_v35 }
 0x21c   : > { %v1689_v18 = vadd.f32 %v1688_v0, %v1687_v9 }
 0x21e   : > { %v1526_v21 = vpop.f32.mrf.mxu0 }
 0x21f   : > { %v1553_v23 = vadd.f32 %v1526_v21, %v1399_v19 }
 0x220   : > { %v1221_v3 = vpop.f32.mrf.mxu2  ;;  %v1375_v25 = vpop.f32.mrf.mxu3 }
 0x221   : > { %v1665_v26 = vadd.f32 %v1624_v24, %v1553_v23  ;;  %v1246_v12 = vadd.f32 %v1221_v3, %v1092_v22  ;;  %v1649_v22 = vpop.permute.xlu1 %1648 }
 0x222   : > { %v1072_v31 = vpop.f32.mrf.mxu1 }
 0x223   : > { %v1690_v27 = vsel %vm1672_vm0, %v1665_v26, 0.0  ;;  %v1400_v32 = vadd.f32 %v1375_v25, %v1246_v12  ;;  %v1094_v42 = vadd.f32 %v1072_v31, %v2843_v52 }
 0x224   : > { %v1691_v28 = vadd.f32 %v1690_v27, %v1689_v18  ;;  %v2369_v18 = vmov 128.0  }
 0x225   : > { %2350 = vrcp.f32 %v2369_v18 }
 0x226   : > { %v1529_v2 = vpop.f32.mrf.mxu0 }
 0x227   : > { %v1554_v34 = vadd.f32 %v1529_v2, %v1400_v32  ;;  %v1654_v2 = vpop.permute.xlu2 %1653 }
 0x228   : > { %v1223_v37 = vpop.f32.mrf.mxu2  ;;  %v1377_v38 = vpop.f32.mrf.mxu3 }
 0x229   : > { %v1666_v20 = vadd.f32 %v1629_v33, %v1554_v34  ;;  %v1247_v55 = vadd.f32 %v1223_v37, %v1093_v30 }
 0x22a   : > { %v1074_v49 = vpop.f32.mrf.mxu1 }
 0x22b   : > { %v1692_v39 = vsel %vm1672_vm0, %v1666_v20, 0.0  ;;  %v1401_v41 = vadd.f32 %v1377_v38, %v1247_v55  ;;  %v1095_v60 = vadd.f32 %v1074_v49, %v2852_v1  ;;  %v2351_v25 = vpop.eup %2350 }
 0x22c   : > { %v1693_v40 = vadd.f32 %v1692_v39, %v1691_v28  ;;  %v1711_v32 = vmul.f32 128.0, %v2351_v25  ;;  %vm1715_vm1 = vweird.f32 %v2351_v25 }
 0x22e   : > { %v1531_v46 = vpop.f32.mrf.mxu0 }
 0x22f   : > { %v1555_v36 = vadd.f32 %v1531_v46, %v1401_v41 }
 0x230   : > { %v1226_v53 = vpop.f32.mrf.mxu2  ;;  %v1380_v54 = vpop.f32.mrf.mxu3 }
 0x231   : > { %v1667_v61 = vadd.f32 %v1634_v45, %v1555_v36  ;;  %v1248_v29 = vadd.f32 %v1226_v53, %v1094_v42 }
 0x232   : > { %v1077_v5 = vpop.f32.mrf.mxu1 }
 0x233   : > { %v1694_v35 = vsel %vm1672_vm0, %v1667_v61, 0.0  ;;  %v1402_v59 = vadd.f32 %v1380_v54, %v1248_v29  ;;  %v1096_v10 = vadd.f32 %v1077_v5, %v2859_v48 }
 0x234   : > { %v1695_v56 = vadd.f32 %v1694_v35, %v1693_v40 }
 0x236   : > { %v1534_v43 = vpop.f32.mrf.mxu0 }
 0x237   : > { %v1556_v63 = vadd.f32 %v1534_v43, %v1402_v59 }
 0x238   : > { %v1228_v51 = vpop.f32.mrf.mxu2  ;;  %v1382_v4 = vpop.f32.mrf.mxu3 }
 0x239   : > { %v1668_v44 = vadd.f32 %v1639_v62, %v1556_v63  ;;  %v1249_v52 = vadd.f32 %v1228_v51, %v1095_v60 }
 0x23a   : > { %v1079_v15 = vpop.f32.mrf.mxu1 }
 0x23b   : > { %v1696_v6 = vsel %vm1672_vm0, %v1668_v44, 0.0  ;;  %v1403_v7 = vadd.f32 %v1382_v4, %v1249_v52  ;;  %v1097_v19 = vadd.f32 %v1079_v15, %v2862_v57  ;;  %v1712_v57 = vsub.f32 1.0, %v1711_v32 }
 0x23c   : > { %v1697_v47 = vadd.f32 %v1696_v6, %v1695_v56 }
 0x23d   : > { %v1713_v38 = vmul.f32 %v2351_v25, %v1712_v57 }
 0x23e   : > { %v1536_v9 = vpop.f32.mrf.mxu0 }
 0x23f   : > { %v1557_v50 = vadd.f32 %v1536_v9, %v1403_v7  ;;  %v1714_v39 = vadd.f32 %v2351_v25, %v1713_v38 }
 0x240   : > { %v1231_v8 = vpop.f32.mrf.mxu2  ;;  %v1385_v1 = vpop.f32.mrf.mxu3 }
 0x241   : > { %v1669_v13 = vadd.f32 %v1644_v11, %v1557_v50  ;;  %v1250_v58 = vadd.f32 %v1231_v8, %v1096_v10  ;;  %v1716_v46 = vsel %vm1715_vm1, %v2351_v25, %v1714_v39 }
 0x243   : > { %v1698_v14 = vsel %vm1672_vm0, %v1669_v13, 0.0  ;;  %v1404_v0 = vadd.f32 %v1385_v1, %v1250_v58 }
 0x244   : > { %v1699_v16 = vadd.f32 %v1698_v14, %v1697_v47 }
 0x246   : > { %v1539_v17 = vpop.f32.mrf.mxu0 }
 0x247   : > { %v1558_v21 = vadd.f32 %v1539_v17, %v1404_v0 }
 0x248   : > { %v1233_v23 = vpop.f32.mrf.mxu2  ;;  %v1387_v12 = vpop.f32.mrf.mxu3 }
 0x249   : > { %v1670_v48 = vadd.f32 %v1649_v22, %v1558_v21  ;;  %v1251_v24 = vadd.f32 %v1233_v23, %v1097_v19 }
 0x24b   : > { %v1700_v3 = vsel %vm1672_vm0, %v1670_v48, 0.0  ;;  %v1405_v27 = vadd.f32 %v1387_v12, %v1251_v24 }
 0x24c   : > { %v1701_v26 = vadd.f32 %v1700_v3, %v1699_v16 }
 0x24e   : > { %v1541_v28 = vpop.f32.mrf.mxu0 }
 0x24f   : > { %v1559_v31 = vadd.f32 %v1541_v28, %v1405_v27 }
 0x251   : > { %v1671_v33 = vadd.f32 %v1654_v2, %v1559_v31 }
 0x253   : > { %v1702_v30 = vsel %vm1672_vm0, %v1671_v33, 0.0 }
 0x254   : > { %v1703_v34 = vadd.f32 %v1702_v30, %v1701_v26 }
 0x256   : > { %v1704_v37 = vrot.slane %v1703_v34, 4 }
 0x258   : > { %v1705_v20 = vadd.f32 %v1704_v37, %v1703_v34 }
 0x25a   : > { %v1706_v55 = vrot.slane %v1705_v20, 2 }
 0x25c   : > { %v1707_v40 = vadd.f32 %v1706_v55, %v1705_v20 }
 0x25e   : > { %v1708_v41 = vrot.slane %v1707_v40, 1 }
 0x260   : > { %v1709_v42 = vadd.f32 %v1708_v41, %v1707_v40 }
 0x262   : > { %v1717_v49 = vmul.f32 %v1716_v46, %v1709_v42 }
 0x264   : > { %1719 = vst.msk [vmem:[%s166_s29] sm:$0x1] %vm1718_vm2, %v1717_v49 }
 0x265 PF: > { %s13_s12 = sadd.s32 1, %s2358_s12  }
 0x266   : > { %p10_p4 = scmp.ge.s32.totalorder %s13_s12, 4  }
 0x268   :  { %12 = sbr.rel (!%p10_p4) target bundleno = 1 (0x1), region = 70 }

</bundles_post_ra>
